<compile_context>
chip_gen: v5e
topology: v5e:2x2
jax: 0.10.0
libtpu: 0.0.40
codegen_flags: <defaults>
</compile_context>

<pallas_src>
import functools

import jax
import jax.numpy as jnp
from jax import lax
from jax.experimental import pallas as pl
from jax.experimental.pallas import tpu as pltpu

NEG_SLOPE = 0.05

_CPARAMS = pltpu.CompilerParams(dimension_semantics=("parallel",))


# ----------------------------------------------------------------------------- #
# In-kernel helpers (operate on VMEM-resident values; padded-flat layout (C, L))
# ----------------------------------------------------------------------------- #
def _lrelu(x):
    return jnp.where(x >= 0, x, x * NEG_SLOPE)


def _conv1x1_multi(xs, w, b):
    """1x1 conv over the channel-concat of `xs` (concat fused as split matmuls).

    xs: list of (Cin_i, L) values, w: (Cout, sum Cin_i), b: (Cout, 1).
    """
    acc = None
    off = 0
    for x in xs:
        c = x.shape[0]
        part = jnp.dot(w[:, off:off + c], x, preferred_element_type=jnp.float32)
        acc = part if acc is None else acc + part
        off += c
    return acc + b


def _conv3x3(x, w, b, Wp):
    """'same' 3x3 conv in padded-flat layout.

    x: (Cin, L) with L = Hp*Wp and a ZERO ring (that is the padding), w: (Cout, 9*Cin)
    with K ordered (kh, kw, cin), b: (Cout, 1).  Taps are contiguous lane slices of a
    halo-extended flat buffer, so no (H, W) reshapes are needed inside the kernel.
    """
    Cin, L = x.shape
    halo = Wp + 1
    z = jnp.zeros((Cin, halo), dtype=x.dtype)
    xe = jnp.concatenate([z, x, z], axis=1)                      # (Cin, L + 2*halo)
    offs = [halo + (kh - 1) * Wp + (kw - 1) for kh in range(3) for kw in range(3)]
    if Cin % 8 == 0:
        # im2col: one lane-dense matmul with K = 9*Cin (sublane-aligned concat).
        patches = jnp.concatenate([xe[:, o:o + L] for o in offs], axis=0)
        y = jnp.dot(w, patches, preferred_element_type=jnp.float32)
    else:
        # Small-channel fallback (avoids ragged sublane concat): 9 accumulated matmuls.
        y = jnp.dot(w[:, 0:Cin], xe[:, offs[0]:offs[0] + L],
                    preferred_element_type=jnp.float32)
        for t in range(1, 9):
            o = offs[t]
            y = y + jnp.dot(w[:, t * Cin:(t + 1) * Cin], xe[:, o:o + L],
                            preferred_element_type=jnp.float32)
    return y + b


# ----------------------------------------------------------------------------- #
# Fused kernel bodies
# ----------------------------------------------------------------------------- #
def _head_kernel(x_ref, m_ref, w_ref, b_ref, o_ref, *, Wp):
    y = _conv3x3(x_ref[0], w_ref[...], b_ref[...], Wp) * m_ref[...]
    o_ref[...] = y[None]


def _rfdb_body_kernel(x_ref, m_ref,
                      wd_ref, bd_ref, wr_ref, br_ref, w4_ref, b4_ref, w5_ref, b5_ref,
                      we1_ref, be1_ref, wef_ref, bef_ref, we2_ref, be2_ref,
                      blk_ref, cf_ref, e2_ref, *, Wp):
    """RFDB1 body + ESA head: d1, r1, r4, c5-fuse, e1, ef and the e2 3x3 conv."""
    x = x_ref[0]
    m = m_ref[...]
    d1 = _lrelu(_conv1x1_multi([x], wd_ref[...], bd_ref[...])) * m
    r1 = _lrelu(_conv3x3(x, wr_ref[...], br_ref[...], Wp) + x) * m
    r4 = _lrelu(_conv3x3(r1, w4_ref[...], b4_ref[...], Wp)) * m
    blk = _conv1x1_multi([d1, r4], w5_ref[...], b5_ref[...]) * m      # fused concat
    c1_ = _conv1x1_multi([blk], we1_ref[...], be1_ref[...]) * m
    cf = _conv1x1_multi([c1_], wef_ref[...], bef_ref[...]) * m
    e2s = _conv3x3(c1_, we2_ref[...], be2_ref[...], Wp) * m
    blk_ref[...] = blk[None]
    cf_ref[...] = cf[None]
    e2_ref[...] = e2s[None]


def _esa_mid_kernel(v_ref, m_ref, wm_ref, bm_ref, w3_ref, b3_ref, w3b_ref, b3b_ref,
                    o_ref, *, Wp):
    """ESA convs on the tiny pooled map: relu(conv), relu(conv), conv."""
    m = m_ref[...]
    t = jnp.maximum(_conv3x3(v_ref[0], wm_ref[...], bm_ref[...], Wp), 0.0) * m
    t = jnp.maximum(_conv3x3(t, w3_ref[...], b3_ref[...], Wp), 0.0) * m
    t = _conv3x3(t, w3b_ref[...], b3b_ref[...], Wp) * m
    o_ref[...] = t[None]


def _esa_post_kernel(blk_ref, cf_ref, c3_ref, m_ref, we4_ref, be4_ref, o_ref):
    """ESA tail: sigmoid(e4(c3 + cf)) gating multiply, fused."""
    g = jax.nn.sigmoid(_conv1x1_multi([c3_ref[0] + cf_ref[0]],
                                      we4_ref[...], be4_ref[...]))
    o_ref[...] = (blk_ref[0] * g * m_ref[...])[None]


def _tail_kernel(b1_ref, b2_ref, b3_ref, b4_ref, fea_ref, m_ref,
                 wc_ref, bc_ref, wlr_ref, blr_ref, wup_ref, bup_ref, o_ref, *, Wp):
    """c(1x1 over B1..B4, fused concat) + lrelu, LR_conv(3x3) + fea, upsampler conv."""
    m = m_ref[...]
    ob = _lrelu(_conv1x1_multi([b1_ref[0], b2_ref[0], b3_ref[0], b4_ref[0]],
                               wc_ref[...], bc_ref[...])) * m
    olr = (_conv3x3(ob, wlr_ref[...], blr_ref[...], Wp) + fea_ref[0]) * m
    o_ref[...] = (_conv3x3(olr, wup_ref[...], bup_ref[...], Wp) * m)[None]


# ----------------------------------------------------------------------------- #
# pallas_call plumbing
# ----------------------------------------------------------------------------- #
def _feat_spec(c, l):
    return pl.BlockSpec((1, c, l), lambda n: (n, 0, 0))


def _whole_spec(shape):
    nd = len(shape)
    return pl.BlockSpec(shape, lambda n: (0,) * nd)


def _run(kernel_fn, feat_args, const_args, out_channels, **static):
    """feat_args: (N, C, L) per-sample tensors (tiled over N); const_args: mask /
    weights / biases passed whole; out_channels: channel counts of the (N, C, L)
    outputs (same L as feat_args[0])."""
    N, _, L = feat_args[0].shape
    in_specs = [_feat_spec(a.shape[1], a.shape[2]) for a in feat_args] + \
               [_whole_spec(a.shape) for a in const_args]
    out_specs = tuple(_feat_spec(c, L) for c in out_channels)
    out_shape = tuple(jax.ShapeDtypeStruct((N, c, L), jnp.float32) for c in out_channels)
    if len(out_channels) == 1:
        out_specs, out_shape = out_specs[0], out_shape[0]
    fn = functools.partial(kernel_fn, **static) if static else kernel_fn
    return pl.pallas_call(
        fn, grid=(N,), in_specs=in_specs, out_specs=out_specs, out_shape=out_shape,
        compiler_params=_CPARAMS,
    )(*feat_args, *const_args)


# ----------------------------------------------------------------------------- #
# Plain-JAX glue (layout conversion + tiny data-movement ops)
# ----------------------------------------------------------------------------- #
def _to_pf(x):
    """(N, C, H, W) -> padded-flat (N, C, (H+2)*(W+2)) with a zero ring."""
    n, c, h, w = x.shape
    xp = jnp.pad(x, ((0, 0), (0, 0), (1, 1), (1, 1)))
    return xp.reshape(n, c, (h + 2) * (w + 2))


def _from_pf(x_pf, h, w):
    n, c, _ = x_pf.shape
    return x_pf.reshape(n, c, h + 2, w + 2)[:, :, 1:h + 1, 1:w + 1]


def _ring_mask(h, w):
    m = jnp.zeros((h + 2, w + 2), jnp.float32).at[1:h + 1, 1:w + 1].set(1.0)
    return m.reshape(1, (h + 2) * (w + 2))


def _bilinear_resize_nchw(x, out_h, out_w):
    """Matches F.interpolate(mode='bilinear', align_corners=False) upscaling, NCHW."""
    n, c, h, w = x.shape

    def idx(out_size, in_size):
        coord = (jnp.arange(out_size, dtype=jnp.float32) + 0.5) * (in_size / out_size) - 0.5
        coord = jnp.clip(coord, 0.0, float(in_size - 1))
        lo = jnp.floor(coord).astype(jnp.int32)
        hi = jnp.minimum(lo + 1, in_size - 1)
        return lo, hi, coord - lo.astype(jnp.float32)

    h0, h1, hf = idx(out_h, h)
    w0, w1, wf = idx(out_w, w)
    wf_ = wf[None, None, None, :]
    hf_ = hf[None, None, :, None]
    r0 = x[:, :, h0, :]
    r1 = x[:, :, h1, :]
    top = r0[:, :, :, w0] * (1.0 - wf_) + r0[:, :, :, w1] * wf_
    bot = r1[:, :, :, w0] * (1.0 - wf_) + r1[:, :, :, w1] * wf_
    return top * (1.0 - hf_) + bot * hf_


def _pixel_shuffle_nchw(x, r):
    n, cr2, h, w = x.shape
    c = cr2 // (r * r)
    x = x.reshape(n, c, r, r, h, w)
    x = jnp.transpose(x, (0, 1, 4, 2, 5, 3))
    return x.reshape(n, c, h * r, w * r)


# ----------------------------------------------------------------------------- #
# Network
# ----------------------------------------------------------------------------- #
def _esa_tail(blk_pf, cf_pf, e2s_pf, mask, p, H, W):
    N, f, _ = cf_pf.shape
    Hp, Wp = H + 2, W + 2
    # e2 is computed in-kernel as a stride-1 valid conv; subsample + maxpool here.
    # TODO(synk): move the stride-2 subsample in-kernel (strided pl.ds) to skip the
    #             full-resolution e2 writeback (f-channel branch only, so tiny).
    e2 = e2s_pf.reshape(N, f, Hp, Wp)[:, :, 2:H, 2:W][:, :, ::2, ::2]
    vmax = lax.reduce_window(e2, -jnp.inf, lax.max,
                             (1, 1, 7, 7), (1, 1, 3, 3), "VALID")
    sh, sw = vmax.shape[2], vmax.shape[3]
    mask_s = _ring_mask(sh, sw)
    c3_pf = _run(_esa_mid_kernel, [_to_pf(vmax)],
                 [mask_s, *p["emax"], *p["e3"], *p["e3_"]], [f], Wp=sw + 2)
    c3 = _from_pf(c3_pf, sh, sw)
    c3r = _bilinear_resize_nchw(c3, H, W)
    return _run(_esa_post_kernel, [blk_pf, cf_pf, _to_pf(c3r)],
                [mask, *p["e4"]], [blk_pf.shape[1]])


def _rfdb1(x_pf, mask, p, H, W):
    nf = x_pf.shape[1]
    f = p["e1"][0].shape[0]
    blk, cf, e2s = _run(_rfdb_body_kernel, [x_pf],
                        [mask,
                         *p["c1_d"], *p["c1_r"], *p["c4"], *p["c5"],
                         *p["e1"], *p["ef"], *p["e2"]],
                        [nf, f, f], Wp=W + 2)
    return _esa_tail(blk, cf, e2s, mask, p, H, W)


def rfdn1_forward(x_nchw, params, upscale):
    N, _, H, W = x_nchw.shape
    Wp = W + 2
    mask = _ring_mask(H, W)
    x_pf = _to_pf(x_nchw)
    nf = params["fea"][0].shape[0]
    fea = _run(_head_kernel, [x_pf], [mask, *params["fea"]], [nf], Wp=Wp)
    b = fea
    blocks = []
    for i in range(1, 5):                      # module always builds B1..B4
        b = _rfdb1(b, mask, params[f"B{i}"], H, W)
        blocks.append(b)
    out_c = params["up"][0].shape[0]
    up_pf = _run(_tail_kernel, [*blocks, fea],
                 [mask, *params["c"], *params["lr"], *params["up"]],
                 [out_c], Wp=Wp)
    up = _from_pf(up_pf, H, W)
    return _pixel_shuffle_nchw(up, upscale)


# ----------------------------------------------------------------------------- #
# Deterministic synthetic parameters, already in kernel-ready layout
#   weight: (Cout, KH*KW*Cin), K ordered (kh, kw, cin);  bias: (Cout, 1)
# ----------------------------------------------------------------------------- #
def _conv_params(key, kh, kw, cin, cout):
    kw_key, kb_key = jax.random.split(key)
    fan_in = kh * kw * cin
    w = jax.random.normal(kw_key, (kh, kw, cin, cout), jnp.float32) / jnp.sqrt(float(fan_in))
    b = 0.01 * jax.random.normal(kb_key, (cout,), jnp.float32)
    w2 = jnp.transpose(w, (3, 0, 1, 2)).reshape(cout, kh * kw * cin)
    return w2, b.reshape(cout, 1)


def _init_rfdb1(key, nf):
    dc, f = nf // 2, max(nf // 4, 1)
    ks = jax.random.split(key, 11)
    return {
        "c1_d": _conv_params(ks[0], 1, 1, nf, dc),
        "c1_r": _conv_params(ks[1], 3, 3, nf, nf),
        "c4":   _conv_params(ks[2], 3, 3, nf, dc),
        "c5":   _conv_params(ks[3], 1, 1, 2 * dc, nf),
        "e1":   _conv_params(ks[4], 1, 1, nf, f),
        "ef":   _conv_params(ks[5], 1, 1, f, f),
        "e2":   _conv_params(ks[6], 3, 3, f, f),
        "emax": _conv_params(ks[7], 3, 3, f, f),
        "e3":   _conv_params(ks[8], 3, 3, f, f),
        "e3_":  _conv_params(ks[9], 3, 3, f, f),
        "e4":   _conv_params(ks[10], 1, 1, f, nf),
    }


def init_params(key, in_nc, nf, num_modules, out_nc, upscale):
    ks = jax.random.split(key, num_modules + 4)
    params = {"fea": _conv_params(ks[0], 3, 3, in_nc, nf)}
    for i in range(num_modules):
        params[f"B{i + 1}"] = _init_rfdb1(ks[1 + i], nf)
    params["c"] = _conv_params(ks[num_modules + 1], 1, 1, nf * num_modules, nf)
    params["lr"] = _conv_params(ks[num_modules + 2], 3, 3, nf, nf)
    params["up"] = _conv_params(ks[num_modules + 3], 3, 3, nf, out_nc * upscale * upscale)
    return params


# ----------------------------------------------------------------------------- #
if __name__ == "__main__":
    IN_NC, NF, NUM_MODULES, OUT_NC, UPSCALE = 3, 16, 4, 3, 4
    N, H, W = 2, 16, 16

    key = jax.random.PRNGKey(0)
    pkey, xkey = jax.random.split(key)
    params = init_params(pkey, IN_NC, NF, NUM_MODULES, OUT_NC, UPSCALE)
    x = jax.random.normal(xkey, (N, IN_NC, H, W), jnp.float32)        # NCHW input

    fwd = jax.jit(functools.partial(rfdn1_forward, upscale=UPSCALE))
    out = jax.block_until_ready(fwd(x, params))

    expected = (N, OUT_NC, H * UPSCALE, W * UPSCALE)
    assert out.shape == expected, (out.shape, expected)
    assert bool(jnp.all(jnp.isfinite(out)))
    print("KERNEL_OK")
</pallas_src>

<mosaic_0001>
module attributes {stable_mosaic.version = 11 : i64} {
  func.func @_head_kernel(%arg0: i32, %arg1: memref<1x3x324xf32, #tpu.memory_space<vmem>>, %arg2: memref<1x324xf32, #tpu.memory_space<vmem>>, %arg3: memref<16x27xf32, #tpu.memory_space<vmem>>, %arg4: memref<16x1xf32, #tpu.memory_space<vmem>>, %arg5: memref<1x16x324xf32, #tpu.memory_space<vmem>>) attributes {dimension_semantics = [#tpu.dimension_semantics<parallel>], iteration_bounds = array<i64: 2>, scalar_prefetch = 0 : i64, scratch_operands = 0 : i64, tpu.core_type = #tpu.core_type<tc>, window_params = [{transform_indices = @transform_0, window_bounds = array<i64: 1, 3, 324>}, {pipeline_mode = #tpu.pipeline_mode<synchronous>, transform_indices = @transform_1, window_bounds = array<i64: 1, 324>}, {pipeline_mode = #tpu.pipeline_mode<synchronous>, transform_indices = @transform_2, window_bounds = array<i64: 16, 27>}, {pipeline_mode = #tpu.pipeline_mode<synchronous>, transform_indices = @transform_3, window_bounds = array<i64: 16, 1>}, {transform_indices = @transform_4, window_bounds = array<i64: 1, 16, 324>}]} {
    %c0 = arith.constant 0 : index
    %c0_0 = arith.constant 0 : index
    %c0_1 = arith.constant 0 : index
    %0 = vector.load %arg1[%c0, %c0_0, %c0_1] : memref<1x3x324xf32, #tpu.memory_space<vmem>>, vector<1x3x324xf32>
    %1 = vector.shape_cast %0 : vector<1x3x324xf32> to vector<3x324xf32>
    %c0_2 = arith.constant 0 : index
    %c0_3 = arith.constant 0 : index
    %2 = vector.load %arg3[%c0_2, %c0_3] : memref<16x27xf32, #tpu.memory_space<vmem>>, vector<16x27xf32>
    %c0_4 = arith.constant 0 : index
    %c0_5 = arith.constant 0 : index
    %3 = vector.load %arg4[%c0_4, %c0_5] : memref<16x1xf32, #tpu.memory_space<vmem>>, vector<16x1xf32>
    %cst = arith.constant 0.000000e+00 : f32
    %4 = vector.broadcast %cst : f32 to vector<3x19xf32>
    %5 = tpu.concatenate %4, %1, %4 in 1 : vector<3x19xf32>, vector<3x324xf32>, vector<3x19xf32> -> vector<3x362xf32>
    %6 = vector.extract_strided_slice %2 {offsets = [0, 0], sizes = [16, 3], strides = [1, 1]} : vector<16x27xf32> to vector<16x3xf32>
    %7 = vector.extract_strided_slice %5 {offsets = [0, 0], sizes = [3, 324], strides = [1, 1]} : vector<3x362xf32> to vector<3x324xf32>
    %cst_6 = arith.constant dense<0.000000e+00> : vector<16x324xf32>
    %8 = tpu.matmul %6, %7, %cst_6 {dimension_numbers = #tpu.dot_dimension_numbers<[1], [0], [0], [1], [0, 0, 1, 1], [], []>} : vector<16x3xf32>, vector<3x324xf32>, vector<16x324xf32> -> vector<16x324xf32>
    %9 = vector.extract_strided_slice %2 {offsets = [0, 3], sizes = [16, 3], strides = [1, 1]} : vector<16x27xf32> to vector<16x3xf32>
    %10 = vector.extract_strided_slice %5 {offsets = [0, 1], sizes = [3, 324], strides = [1, 1]} : vector<3x362xf32> to vector<3x324xf32>
    %cst_7 = arith.constant dense<0.000000e+00> : vector<16x324xf32>
    %11 = tpu.matmul %9, %10, %cst_7 {dimension_numbers = #tpu.dot_dimension_numbers<[1], [0], [0], [1], [0, 0, 1, 1], [], []>} : vector<16x3xf32>, vector<3x324xf32>, vector<16x324xf32> -> vector<16x324xf32>
    %12 = arith.addf %8, %11 : vector<16x324xf32>
    %13 = vector.extract_strided_slice %2 {offsets = [0, 6], sizes = [16, 3], strides = [1, 1]} : vector<16x27xf32> to vector<16x3xf32>
    %14 = vector.extract_strided_slice %5 {offsets = [0, 2], sizes = [3, 324], strides = [1, 1]} : vector<3x362xf32> to vector<3x324xf32>
    %cst_8 = arith.constant dense<0.000000e+00> : vector<16x324xf32>
    %15 = tpu.matmul %13, %14, %cst_8 {dimension_numbers = #tpu.dot_dimension_numbers<[1], [0], [0], [1], [0, 0, 1, 1], [], []>} : vector<16x3xf32>, vector<3x324xf32>, vector<16x324xf32> -> vector<16x324xf32>
    %16 = arith.addf %12, %15 : vector<16x324xf32>
    %17 = vector.extract_strided_slice %2 {offsets = [0, 9], sizes = [16, 3], strides = [1, 1]} : vector<16x27xf32> to vector<16x3xf32>
    %18 = vector.extract_strided_slice %5 {offsets = [0, 18], sizes = [3, 324], strides = [1, 1]} : vector<3x362xf32> to vector<3x324xf32>
    %cst_9 = arith.constant dense<0.000000e+00> : vector<16x324xf32>
    %19 = tpu.matmul %17, %18, %cst_9 {dimension_numbers = #tpu.dot_dimension_numbers<[1], [0], [0], [1], [0, 0, 1, 1], [], []>} : vector<16x3xf32>, vector<3x324xf32>, vector<16x324xf32> -> vector<16x324xf32>
    %20 = arith.addf %16, %19 : vector<16x324xf32>
    %21 = vector.extract_strided_slice %2 {offsets = [0, 12], sizes = [16, 3], strides = [1, 1]} : vector<16x27xf32> to vector<16x3xf32>
    %22 = vector.extract_strided_slice %5 {offsets = [0, 19], sizes = [3, 324], strides = [1, 1]} : vector<3x362xf32> to vector<3x324xf32>
    %cst_10 = arith.constant dense<0.000000e+00> : vector<16x324xf32>
    %23 = tpu.matmul %21, %22, %cst_10 {dimension_numbers = #tpu.dot_dimension_numbers<[1], [0], [0], [1], [0, 0, 1, 1], [], []>} : vector<16x3xf32>, vector<3x324xf32>, vector<16x324xf32> -> vector<16x324xf32>
    %24 = arith.addf %20, %23 : vector<16x324xf32>
    %25 = vector.extract_strided_slice %2 {offsets = [0, 15], sizes = [16, 3], strides = [1, 1]} : vector<16x27xf32> to vector<16x3xf32>
    %26 = vector.extract_strided_slice %5 {offsets = [0, 20], sizes = [3, 324], strides = [1, 1]} : vector<3x362xf32> to vector<3x324xf32>
    %cst_11 = arith.constant dense<0.000000e+00> : vector<16x324xf32>
    %27 = tpu.matmul %25, %26, %cst_11 {dimension_numbers = #tpu.dot_dimension_numbers<[1], [0], [0], [1], [0, 0, 1, 1], [], []>} : vector<16x3xf32>, vector<3x324xf32>, vector<16x324xf32> -> vector<16x324xf32>
    %28 = arith.addf %24, %27 : vector<16x324xf32>
    %29 = vector.extract_strided_slice %2 {offsets = [0, 18], sizes = [16, 3], strides = [1, 1]} : vector<16x27xf32> to vector<16x3xf32>
    %30 = vector.extract_strided_slice %5 {offsets = [0, 36], sizes = [3, 324], strides = [1, 1]} : vector<3x362xf32> to vector<3x324xf32>
    %cst_12 = arith.constant dense<0.000000e+00> : vector<16x324xf32>
    %31 = tpu.matmul %29, %30, %cst_12 {dimension_numbers = #tpu.dot_dimension_numbers<[1], [0], [0], [1], [0, 0, 1, 1], [], []>} : vector<16x3xf32>, vector<3x324xf32>, vector<16x324xf32> -> vector<16x324xf32>
    %32 = arith.addf %28, %31 : vector<16x324xf32>
    %33 = vector.extract_strided_slice %2 {offsets = [0, 21], sizes = [16, 3], strides = [1, 1]} : vector<16x27xf32> to vector<16x3xf32>
    %34 = vector.extract_strided_slice %5 {offsets = [0, 37], sizes = [3, 324], strides = [1, 1]} : vector<3x362xf32> to vector<3x324xf32>
    %cst_13 = arith.constant dense<0.000000e+00> : vector<16x324xf32>
    %35 = tpu.matmul %33, %34, %cst_13 {dimension_numbers = #tpu.dot_dimension_numbers<[1], [0], [0], [1], [0, 0, 1, 1], [], []>} : vector<16x3xf32>, vector<3x324xf32>, vector<16x324xf32> -> vector<16x324xf32>
    %36 = arith.addf %32, %35 : vector<16x324xf32>
    %37 = vector.extract_strided_slice %2 {offsets = [0, 24], sizes = [16, 3], strides = [1, 1]} : vector<16x27xf32> to vector<16x3xf32>
    %38 = vector.extract_strided_slice %5 {offsets = [0, 38], sizes = [3, 324], strides = [1, 1]} : vector<3x362xf32> to vector<3x324xf32>
    %cst_14 = arith.constant dense<0.000000e+00> : vector<16x324xf32>
    %39 = tpu.matmul %37, %38, %cst_14 {dimension_numbers = #tpu.dot_dimension_numbers<[1], [0], [0], [1], [0, 0, 1, 1], [], []>} : vector<16x3xf32>, vector<3x324xf32>, vector<16x324xf32> -> vector<16x324xf32>
    %40 = arith.addf %36, %39 : vector<16x324xf32>
    %41 = vector.broadcast %3 : vector<16x1xf32> to vector<16x324xf32>
    %42 = arith.addf %40, %41 : vector<16x324xf32>
    %c0_15 = arith.constant 0 : index
    %c0_16 = arith.constant 0 : index
    %43 = vector.load %arg2[%c0_15, %c0_16] : memref<1x324xf32, #tpu.memory_space<vmem>>, vector<1x324xf32>
    %44 = vector.broadcast %43 : vector<1x324xf32> to vector<16x324xf32>
    %45 = arith.mulf %42, %44 : vector<16x324xf32>
    %46 = vector.shape_cast %45 : vector<16x324xf32> to vector<1x16x324xf32>
    %c0_17 = arith.constant 0 : index
    %c0_18 = arith.constant 0 : index
    %c0_19 = arith.constant 0 : index
    %47 = vector.load %arg5[%c0_17, %c0_18, %c0_19] : memref<1x16x324xf32, #tpu.memory_space<vmem>>, vector<1x16x324xf32>
    tpu.vector_store %arg5[%c0_17, %c0_18, %c0_19], %46 {strides = array<i32>} : memref<1x16x324xf32, #tpu.memory_space<vmem>>, vector<1x16x324xf32>,
    return
  }
  func.func @transform_0(%arg0: i32) -> (i32, i32, i32) {
    %c0_i32 = arith.constant 0 : i32
    %c0_i32_0 = arith.constant 0 : i32
    %c0_i32_1 = arith.constant 0 : i32
    return %arg0, %c0_i32, %c0_i32_0 : i32, i32, i32
  }
  func.func @transform_1(%arg0: i32) -> (i32, i32) {
    %c0_i32 = arith.constant 0 : i32
    %c0_i32_0 = arith.constant 0 : i32
    %c0_i32_1 = arith.constant 0 : i32
    return %c0_i32, %c0_i32_0 : i32, i32
  }
  func.func @transform_2(%arg0: i32) -> (i32, i32) {
    %c0_i32 = arith.constant 0 : i32
    %c0_i32_0 = arith.constant 0 : i32
    %c0_i32_1 = arith.constant 0 : i32
    return %c0_i32, %c0_i32_0 : i32, i32
  }
  func.func @transform_3(%arg0: i32) -> (i32, i32) {
    %c0_i32 = arith.constant 0 : i32
    %c0_i32_0 = arith.constant 0 : i32
    %c0_i32_1 = arith.constant 0 : i32
    return %c0_i32, %c0_i32_0 : i32, i32
  }
  func.func @transform_4(%arg0: i32) -> (i32, i32, i32) {
    %c0_i32 = arith.constant 0 : i32
    %c0_i32_0 = arith.constant 0 : i32
    %c0_i32_1 = arith.constant 0 : i32
    return %arg0, %c0_i32, %c0_i32_0 : i32, i32, i32
  }
}

module attributes {stable_mosaic.version = 11 : i64} {
  func.func @_rfdb_body_kernel(%arg0: i32, %arg1: memref<1x16x324xf32, #tpu.memory_space<vmem>>, %arg2: memref<1x324xf32, #tpu.memory_space<vmem>>, %arg3: memref<8x16xf32, #tpu.memory_space<vmem>>, %arg4: memref<8x1xf32, #tpu.memory_space<vmem>>, %arg5: memref<16x144xf32, #tpu.memory_space<vmem>>, %arg6: memref<16x1xf32, #tpu.memory_space<vmem>>, %arg7: memref<8x144xf32, #tpu.memory_space<vmem>>, %arg8: memref<8x1xf32, #tpu.memory_space<vmem>>, %arg9: memref<16x16xf32, #tpu.memory_space<vmem>>, %arg10: memref<16x1xf32, #tpu.memory_space<vmem>>, %arg11: memref<4x16xf32, #tpu.memory_space<vmem>>, %arg12: memref<4x1xf32, #tpu.memory_space<vmem>>, %arg13: memref<4x4xf32, #tpu.memory_space<vmem>>, %arg14: memref<4x1xf32, #tpu.memory_space<vmem>>, %arg15: memref<4x36xf32, #tpu.memory_space<vmem>>, %arg16: memref<4x1xf32, #tpu.memory_space<vmem>>, %arg17: memref<1x16x324xf32, #tpu.memory_space<vmem>>, %arg18: memref<1x4x324xf32, #tpu.memory_space<vmem>>, %arg19: memref<1x4x324xf32, #tpu.memory_space<vmem>>) attributes {dimension_semantics = [#tpu.dimension_semantics<parallel>], iteration_bounds = array<i64: 2>, scalar_prefetch = 0 : i64, scratch_operands = 0 : i64, tpu.core_type = #tpu.core_type<tc>, window_params = [{transform_indices = @transform_0, window_bounds = array<i64: 1, 16, 324>}, {pipeline_mode = #tpu.pipeline_mode<synchronous>, transform_indices = @transform_1, window_bounds = array<i64: 1, 324>}, {pipeline_mode = #tpu.pipeline_mode<synchronous>, transform_indices = @transform_2, window_bounds = array<i64: 8, 16>}, {pipeline_mode = #tpu.pipeline_mode<synchronous>, transform_indices = @transform_3, window_bounds = array<i64: 8, 1>}, {pipeline_mode = #tpu.pipeline_mode<synchronous>, transform_indices = @transform_4, window_bounds = array<i64: 16, 144>}, {pipeline_mode = #tpu.pipeline_mode<synchronous>, transform_indices = @transform_5, window_bounds = array<i64: 16, 1>}, {pipeline_mode = #tpu.pipeline_mode<synchronous>, transform_indices = @transform_6, window_bounds = array<i64: 8, 144>}, {pipeline_mode = #tpu.pipeline_mode<synchronous>, transform_indices = @transform_7, window_bounds = array<i64: 8, 1>}, {pipeline_mode = #tpu.pipeline_mode<synchronous>, transform_indices = @transform_8, window_bounds = array<i64: 16, 16>}, {pipeline_mode = #tpu.pipeline_mode<synchronous>, transform_indices = @transform_9, window_bounds = array<i64: 16, 1>}, {pipeline_mode = #tpu.pipeline_mode<synchronous>, transform_indices = @transform_10, window_bounds = array<i64: 4, 16>}, {pipeline_mode = #tpu.pipeline_mode<synchronous>, transform_indices = @transform_11, window_bounds = array<i64: 4, 1>}, {pipeline_mode = #tpu.pipeline_mode<synchronous>, transform_indices = @transform_12, window_bounds = array<i64: 4, 4>}, {pipeline_mode = #tpu.pipeline_mode<synchronous>, transform_indices = @transform_13, window_bounds = array<i64: 4, 1>}, {pipeline_mode = #tpu.pipeline_mode<synchronous>, transform_indices = @transform_14, window_bounds = array<i64: 4, 36>}, {pipeline_mode = #tpu.pipeline_mode<synchronous>, transform_indices = @transform_15, window_bounds = array<i64: 4, 1>}, {transform_indices = @transform_16, window_bounds = array<i64: 1, 16, 324>}, {transform_indices = @transform_17, window_bounds = array<i64: 1, 4, 324>}, {transform_indices = @transform_18, window_bounds = array<i64: 1, 4, 324>}]} {
    %c0 = arith.constant 0 : index
    %c0_0 = arith.constant 0 : index
    %c0_1 = arith.constant 0 : index
    %0 = vector.load %arg1[%c0, %c0_0, %c0_1] : memref<1x16x324xf32, #tpu.memory_space<vmem>>, vector<1x16x324xf32>
    %1 = vector.shape_cast %0 : vector<1x16x324xf32> to vector<16x324xf32>
    %c0_2 = arith.constant 0 : index
    %c0_3 = arith.constant 0 : index
    %2 = vector.load %arg2[%c0_2, %c0_3] : memref<1x324xf32, #tpu.memory_space<vmem>>, vector<1x324xf32>
    %c0_4 = arith.constant 0 : index
    %c0_5 = arith.constant 0 : index
    %3 = vector.load %arg3[%c0_4, %c0_5] : memref<8x16xf32, #tpu.memory_space<vmem>>, vector<8x16xf32>
    %c0_6 = arith.constant 0 : index
    %c0_7 = arith.constant 0 : index
    %4 = vector.load %arg4[%c0_6, %c0_7] : memref<8x1xf32, #tpu.memory_space<vmem>>, vector<8x1xf32>
    %cst = arith.constant dense<0.000000e+00> : vector<8x324xf32>
    %5 = tpu.matmul %3, %1, %cst {dimension_numbers = #tpu.dot_dimension_numbers<[1], [0], [0], [1], [0, 0, 1, 1], [], []>} : vector<8x16xf32>, vector<16x324xf32>, vector<8x324xf32> -> vector<8x324xf32>
    %6 = vector.broadcast %4 : vector<8x1xf32> to vector<8x324xf32>
    %7 = arith.addf %5, %6 : vector<8x324xf32>
    %cst_8 = arith.constant 0.000000e+00 : f32
    %8 = vector.broadcast %cst_8 : f32 to vector<8x324xf32>
    %9 = arith.cmpf oge, %7, %8 : vector<8x324xf32>
    %cst_9 = arith.constant 5.000000e-02 : f32
    %10 = vector.broadcast %cst_9 : f32 to vector<8x324xf32>
    %11 = arith.mulf %7, %10 : vector<8x324xf32>
    %12 = arith.select %9, %7, %11 : vector<8x324xi1>, vector<8x324xf32>
    %13 = vector.broadcast %2 : vector<1x324xf32> to vector<8x324xf32>
    %14 = arith.mulf %12, %13 : vector<8x324xf32>
    %c0_10 = arith.constant 0 : index
    %c0_11 = arith.constant 0 : index
    %15 = vector.load %arg5[%c0_10, %c0_11] : memref<16x144xf32, #tpu.memory_space<vmem>>, vector<16x144xf32>
    %c0_12 = arith.constant 0 : index
    %c0_13 = arith.constant 0 : index
    %16 = vector.load %arg6[%c0_12, %c0_13] : memref<16x1xf32, #tpu.memory_space<vmem>>, vector<16x1xf32>
    %cst_14 = arith.constant 0.000000e+00 : f32
    %17 = vector.broadcast %cst_14 : f32 to vector<16x19xf32>
    %18 = tpu.concatenate %17, %1, %17 in 1 : vector<16x19xf32>, vector<16x324xf32>, vector<16x19xf32> -> vector<16x362xf32>
    %19 = vector.extract_strided_slice %18 {offsets = [0, 0], sizes = [16, 324], strides = [1, 1]} : vector<16x362xf32> to vector<16x324xf32>
    %20 = vector.extract_strided_slice %18 {offsets = [0, 1], sizes = [16, 324], strides = [1, 1]} : vector<16x362xf32> to vector<16x324xf32>
    %21 = vector.extract_strided_slice %18 {offsets = [0, 2], sizes = [16, 324], strides = [1, 1]} : vector<16x362xf32> to vector<16x324xf32>
    %22 = vector.extract_strided_slice %18 {offsets = [0, 18], sizes = [16, 324], strides = [1, 1]} : vector<16x362xf32> to vector<16x324xf32>
    %23 = vector.extract_strided_slice %18 {offsets = [0, 19], sizes = [16, 324], strides = [1, 1]} : vector<16x362xf32> to vector<16x324xf32>
    %24 = vector.extract_strided_slice %18 {offsets = [0, 20], sizes = [16, 324], strides = [1, 1]} : vector<16x362xf32> to vector<16x324xf32>
    %25 = vector.extract_strided_slice %18 {offsets = [0, 36], sizes = [16, 324], strides = [1, 1]} : vector<16x362xf32> to vector<16x324xf32>
    %26 = vector.extract_strided_slice %18 {offsets = [0, 37], sizes = [16, 324], strides = [1, 1]} : vector<16x362xf32> to vector<16x324xf32>
    %27 = vector.extract_strided_slice %18 {offsets = [0, 38], sizes = [16, 324], strides = [1, 1]} : vector<16x362xf32> to vector<16x324xf32>
    %28 = tpu.concatenate %19, %20, %21, %22, %23, %24, %25, %26, %27 in 0 : vector<16x324xf32>, vector<16x324xf32>, vector<16x324xf32>, vector<16x324xf32>, vector<16x324xf32>, vector<16x324xf32>, vector<16x324xf32>, vector<16x324xf32>, vector<16x324xf32> -> vector<144x324xf32>
    %cst_15 = arith.constant dense<0.000000e+00> : vector<16x324xf32>
    %29 = tpu.matmul %15, %28, %cst_15 {dimension_numbers = #tpu.dot_dimension_numbers<[1], [0], [0], [1], [0, 0, 1, 1], [], []>} : vector<16x144xf32>, vector<144x324xf32>, vector<16x324xf32> -> vector<16x324xf32>
    %30 = vector.broadcast %16 : vector<16x1xf32> to vector<16x324xf32>
    %31 = arith.addf %29, %30 : vector<16x324xf32>
    %32 = arith.addf %31, %1 : vector<16x324xf32>
    %cst_16 = arith.constant 0.000000e+00 : f32
    %33 = vector.broadcast %cst_16 : f32 to vector<16x324xf32>
    %34 = arith.cmpf oge, %32, %33 : vector<16x324xf32>
    %cst_17 = arith.constant 5.000000e-02 : f32
    %35 = vector.broadcast %cst_17 : f32 to vector<16x324xf32>
    %36 = arith.mulf %32, %35 : vector<16x324xf32>
    %37 = arith.select %34, %32, %36 : vector<16x324xi1>, vector<16x324xf32>
    %38 = vector.broadcast %2 : vector<1x324xf32> to vector<16x324xf32>
    %39 = arith.mulf %37, %38 : vector<16x324xf32>
    %c0_18 = arith.constant 0 : index
    %c0_19 = arith.constant 0 : index
    %40 = vector.load %arg7[%c0_18, %c0_19] : memref<8x144xf32, #tpu.memory_space<vmem>>, vector<8x144xf32>
    %c0_20 = arith.constant 0 : index
    %c0_21 = arith.constant 0 : index
    %41 = vector.load %arg8[%c0_20, %c0_21] : memref<8x1xf32, #tpu.memory_space<vmem>>, vector<8x1xf32>
    %cst_22 = arith.constant 0.000000e+00 : f32
    %42 = vector.broadcast %cst_22 : f32 to vector<16x19xf32>
    %43 = tpu.concatenate %42, %39, %42 in 1 : vector<16x19xf32>, vector<16x324xf32>, vector<16x19xf32> -> vector<16x362xf32>
    %44 = vector.extract_strided_slice %43 {offsets = [0, 0], sizes = [16, 324], strides = [1, 1]} : vector<16x362xf32> to vector<16x324xf32>
    %45 = vector.extract_strided_slice %43 {offsets = [0, 1], sizes = [16, 324], strides = [1, 1]} : vector<16x362xf32> to vector<16x324xf32>
    %46 = vector.extract_strided_slice %43 {offsets = [0, 2], sizes = [16, 324], strides = [1, 1]} : vector<16x362xf32> to vector<16x324xf32>
    %47 = vector.extract_strided_slice %43 {offsets = [0, 18], sizes = [16, 324], strides = [1, 1]} : vector<16x362xf32> to vector<16x324xf32>
    %48 = vector.extract_strided_slice %43 {offsets = [0, 19], sizes = [16, 324], strides = [1, 1]} : vector<16x362xf32> to vector<16x324xf32>
    %49 = vector.extract_strided_slice %43 {offsets = [0, 20], sizes = [16, 324], strides = [1, 1]} : vector<16x362xf32> to vector<16x324xf32>
    %50 = vector.extract_strided_slice %43 {offsets = [0, 36], sizes = [16, 324], strides = [1, 1]} : vector<16x362xf32> to vector<16x324xf32>
    %51 = vector.extract_strided_slice %43 {offsets = [0, 37], sizes = [16, 324], strides = [1, 1]} : vector<16x362xf32> to vector<16x324xf32>
    %52 = vector.extract_strided_slice %43 {offsets = [0, 38], sizes = [16, 324], strides = [1, 1]} : vector<16x362xf32> to vector<16x324xf32>
    %53 = tpu.concatenate %44, %45, %46, %47, %48, %49, %50, %51, %52 in 0 : vector<16x324xf32>, vector<16x324xf32>, vector<16x324xf32>, vector<16x324xf32>, vector<16x324xf32>, vector<16x324xf32>, vector<16x324xf32>, vector<16x324xf32>, vector<16x324xf32> -> vector<144x324xf32>
    %cst_23 = arith.constant dense<0.000000e+00> : vector<8x324xf32>
    %54 = tpu.matmul %40, %53, %cst_23 {dimension_numbers = #tpu.dot_dimension_numbers<[1], [0], [0], [1], [0, 0, 1, 1], [], []>} : vector<8x144xf32>, vector<144x324xf32>, vector<8x324xf32> -> vector<8x324xf32>
    %55 = vector.broadcast %41 : vector<8x1xf32> to vector<8x324xf32>
    %56 = arith.addf %54, %55 : vector<8x324xf32>
    %cst_24 = arith.constant 0.000000e+00 : f32
    %57 = vector.broadcast %cst_24 : f32 to vector<8x324xf32>
    %58 = arith.cmpf oge, %56, %57 : vector<8x324xf32>
    %cst_25 = arith.constant 5.000000e-02 : f32
    %59 = vector.broadcast %cst_25 : f32 to vector<8x324xf32>
    %60 = arith.mulf %56, %59 : vector<8x324xf32>
    %61 = arith.select %58, %56, %60 : vector<8x324xi1>, vector<8x324xf32>
    %62 = vector.broadcast %2 : vector<1x324xf32> to vector<8x324xf32>
    %63 = arith.mulf %61, %62 : vector<8x324xf32>
    %c0_26 = arith.constant 0 : index
    %c0_27 = arith.constant 0 : index
    %64 = vector.load %arg9[%c0_26, %c0_27] : memref<16x16xf32, #tpu.memory_space<vmem>>, vector<16x16xf32>
    %c0_28 = arith.constant 0 : index
    %c0_29 = arith.constant 0 : index
    %65 = vector.load %arg10[%c0_28, %c0_29] : memref<16x1xf32, #tpu.memory_space<vmem>>, vector<16x1xf32>
    %66 = vector.extract_strided_slice %64 {offsets = [0, 0], sizes = [16, 8], strides = [1, 1]} : vector<16x16xf32> to vector<16x8xf32>
    %cst_30 = arith.constant dense<0.000000e+00> : vector<16x324xf32>
    %67 = tpu.matmul %66, %14, %cst_30 {dimension_numbers = #tpu.dot_dimension_numbers<[1], [0], [0], [1], [0, 0, 1, 1], [], []>} : vector<16x8xf32>, vector<8x324xf32>, vector<16x324xf32> -> vector<16x324xf32>
    %68 = vector.extract_strided_slice %64 {offsets = [0, 8], sizes = [16, 8], strides = [1, 1]} : vector<16x16xf32> to vector<16x8xf32>
    %cst_31 = arith.constant dense<0.000000e+00> : vector<16x324xf32>
    %69 = tpu.matmul %68, %63, %cst_31 {dimension_numbers = #tpu.dot_dimension_numbers<[1], [0], [0], [1], [0, 0, 1, 1], [], []>} : vector<16x8xf32>, vector<8x324xf32>, vector<16x324xf32> -> vector<16x324xf32>
    %70 = arith.addf %67, %69 : vector<16x324xf32>
    %71 = vector.broadcast %65 : vector<16x1xf32> to vector<16x324xf32>
    %72 = arith.addf %70, %71 : vector<16x324xf32>
    %73 = vector.broadcast %2 : vector<1x324xf32> to vector<16x324xf32>
    %74 = arith.mulf %72, %73 : vector<16x324xf32>
    %c0_32 = arith.constant 0 : index
    %c0_33 = arith.constant 0 : index
    %75 = vector.load %arg11[%c0_32, %c0_33] : memref<4x16xf32, #tpu.memory_space<vmem>>, vector<4x16xf32>
    %c0_34 = arith.constant 0 : index
    %c0_35 = arith.constant 0 : index
    %76 = vector.load %arg12[%c0_34, %c0_35] : memref<4x1xf32, #tpu.memory_space<vmem>>, vector<4x1xf32>
    %cst_36 = arith.constant dense<0.000000e+00> : vector<4x324xf32>
    %77 = tpu.matmul %75, %74, %cst_36 {dimension_numbers = #tpu.dot_dimension_numbers<[1], [0], [0], [1], [0, 0, 1, 1], [], []>} : vector<4x16xf32>, vector<16x324xf32>, vector<4x324xf32> -> vector<4x324xf32>
    %78 = vector.broadcast %76 : vector<4x1xf32> to vector<4x324xf32>
    %79 = arith.addf %77, %78 : vector<4x324xf32>
    %80 = vector.broadcast %2 : vector<1x324xf32> to vector<4x324xf32>
    %81 = arith.mulf %79, %80 : vector<4x324xf32>
    %c0_37 = arith.constant 0 : index
    %c0_38 = arith.constant 0 : index
    %82 = vector.load %arg13[%c0_37, %c0_38] : memref<4x4xf32, #tpu.memory_space<vmem>>, vector<4x4xf32>
    %c0_39 = arith.constant 0 : index
    %c0_40 = arith.constant 0 : index
    %83 = vector.load %arg14[%c0_39, %c0_40] : memref<4x1xf32, #tpu.memory_space<vmem>>, vector<4x1xf32>
    %cst_41 = arith.constant dense<0.000000e+00> : vector<4x324xf32>
    %84 = tpu.matmul %82, %81, %cst_41 {dimension_numbers = #tpu.dot_dimension_numbers<[1], [0], [0], [1], [0, 0, 1, 1], [], []>} : vector<4x4xf32>, vector<4x324xf32>, vector<4x324xf32> -> vector<4x324xf32>
    %85 = vector.broadcast %83 : vector<4x1xf32> to vector<4x324xf32>
    %86 = arith.addf %84, %85 : vector<4x324xf32>
    %87 = vector.broadcast %2 : vector<1x324xf32> to vector<4x324xf32>
    %88 = arith.mulf %86, %87 : vector<4x324xf32>
    %c0_42 = arith.constant 0 : index
    %c0_43 = arith.constant 0 : index
    %89 = vector.load %arg15[%c0_42, %c0_43] : memref<4x36xf32, #tpu.memory_space<vmem>>, vector<4x36xf32>
    %c0_44 = arith.constant 0 : index
    %c0_45 = arith.constant 0 : index
    %90 = vector.load %arg16[%c0_44, %c0_45] : memref<4x1xf32, #tpu.memory_space<vmem>>, vector<4x1xf32>
    %cst_46 = arith.constant 0.000000e+00 : f32
    %91 = vector.broadcast %cst_46 : f32 to vector<4x19xf32>
    %92 = tpu.concatenate %91, %81, %91 in 1 : vector<4x19xf32>, vector<4x324xf32>, vector<4x19xf32> -> vector<4x362xf32>
    %93 = vector.extract_strided_slice %89 {offsets = [0, 0], sizes = [4, 4], strides = [1, 1]} : vector<4x36xf32> to vector<4x4xf32>
    %94 = vector.extract_strided_slice %92 {offsets = [0, 0], sizes = [4, 324], strides = [1, 1]} : vector<4x362xf32> to vector<4x324xf32>
    %cst_47 = arith.constant dense<0.000000e+00> : vector<4x324xf32>
    %95 = tpu.matmul %93, %94, %cst_47 {dimension_numbers = #tpu.dot_dimension_numbers<[1], [0], [0], [1], [0, 0, 1, 1], [], []>} : vector<4x4xf32>, vector<4x324xf32>, vector<4x324xf32> -> vector<4x324xf32>
    %96 = vector.extract_strided_slice %89 {offsets = [0, 4], sizes = [4, 4], strides = [1, 1]} : vector<4x36xf32> to vector<4x4xf32>
    %97 = vector.extract_strided_slice %92 {offsets = [0, 1], sizes = [4, 324], strides = [1, 1]} : vector<4x362xf32> to vector<4x324xf32>
    %cst_48 = arith.constant dense<0.000000e+00> : vector<4x324xf32>
    %98 = tpu.matmul %96, %97, %cst_48 {dimension_numbers = #tpu.dot_dimension_numbers<[1], [0], [0], [1], [0, 0, 1, 1], [], []>} : vector<4x4xf32>, vector<4x324xf32>, vector<4x324xf32> -> vector<4x324xf32>
    %99 = arith.addf %95, %98 : vector<4x324xf32>
    %100 = vector.extract_strided_slice %89 {offsets = [0, 8], sizes = [4, 4], strides = [1, 1]} : vector<4x36xf32> to vector<4x4xf32>
    %101 = vector.extract_strided_slice %92 {offsets = [0, 2], sizes = [4, 324], strides = [1, 1]} : vector<4x362xf32> to vector<4x324xf32>
    %cst_49 = arith.constant dense<0.000000e+00> : vector<4x324xf32>
    %102 = tpu.matmul %100, %101, %cst_49 {dimension_numbers = #tpu.dot_dimension_numbers<[1], [0], [0], [1], [0, 0, 1, 1], [], []>} : vector<4x4xf32>, vector<4x324xf32>, vector<4x324xf32> -> vector<4x324xf32>
    %103 = arith.addf %99, %102 : vector<4x324xf32>
    %104 = vector.extract_strided_slice %89 {offsets = [0, 12], sizes = [4, 4], strides = [1, 1]} : vector<4x36xf32> to vector<4x4xf32>
    %105 = vector.extract_strided_slice %92 {offsets = [0, 18], sizes = [4, 324], strides = [1, 1]} : vector<4x362xf32> to vector<4x324xf32>
    %cst_50 = arith.constant dense<0.000000e+00> : vector<4x324xf32>
    %106 = tpu.matmul %104, %105, %cst_50 {dimension_numbers = #tpu.dot_dimension_numbers<[1], [0], [0], [1], [0, 0, 1, 1], [], []>} : vector<4x4xf32>, vector<4x324xf32>, vector<4x324xf32> -> vector<4x324xf32>
    %107 = arith.addf %103, %106 : vector<4x324xf32>
    %108 = vector.extract_strided_slice %89 {offsets = [0, 16], sizes = [4, 4], strides = [1, 1]} : vector<4x36xf32> to vector<4x4xf32>
    %109 = vector.extract_strided_slice %92 {offsets = [0, 19], sizes = [4, 324], strides = [1, 1]} : vector<4x362xf32> to vector<4x324xf32>
    %cst_51 = arith.constant dense<0.000000e+00> : vector<4x324xf32>
    %110 = tpu.matmul %108, %109, %cst_51 {dimension_numbers = #tpu.dot_dimension_numbers<[1], [0], [0], [1], [0, 0, 1, 1], [], []>} : vector<4x4xf32>, vector<4x324xf32>, vector<4x324xf32> -> vector<4x324xf32>
    %111 = arith.addf %107, %110 : vector<4x324xf32>
    %112 = vector.extract_strided_slice %89 {offsets = [0, 20], sizes = [4, 4], strides = [1, 1]} : vector<4x36xf32> to vector<4x4xf32>
    %113 = vector.extract_strided_slice %92 {offsets = [0, 20], sizes = [4, 324], strides = [1, 1]} : vector<4x362xf32> to vector<4x324xf32>
    %cst_52 = arith.constant dense<0.000000e+00> : vector<4x324xf32>
    %114 = tpu.matmul %112, %113, %cst_52 {dimension_numbers = #tpu.dot_dimension_numbers<[1], [0], [0], [1], [0, 0, 1, 1], [], []>} : vector<4x4xf32>, vector<4x324xf32>, vector<4x324xf32> -> vector<4x324xf32>
    %115 = arith.addf %111, %114 : vector<4x324xf32>
    %116 = vector.extract_strided_slice %89 {offsets = [0, 24], sizes = [4, 4], strides = [1, 1]} : vector<4x36xf32> to vector<4x4xf32>
    %117 = vector.extract_strided_slice %92 {offsets = [0, 36], sizes = [4, 324], strides = [1, 1]} : vector<4x362xf32> to vector<4x324xf32>
    %cst_53 = arith.constant dense<0.000000e+00> : vector<4x324xf32>
    %118 = tpu.matmul %116, %117, %cst_53 {dimension_numbers = #tpu.dot_dimension_numbers<[1], [0], [0], [1], [0, 0, 1, 1], [], []>} : vector<4x4xf32>, vector<4x324xf32>, vector<4x324xf32> -> vector<4x324xf32>
    %119 = arith.addf %115, %118 : vector<4x324xf32>
    %120 = vector.extract_strided_slice %89 {offsets = [0, 28], sizes = [4, 4], strides = [1, 1]} : vector<4x36xf32> to vector<4x4xf32>
    %121 = vector.extract_strided_slice %92 {offsets = [0, 37], sizes = [4, 324], strides = [1, 1]} : vector<4x362xf32> to vector<4x324xf32>
    %cst_54 = arith.constant dense<0.000000e+00> : vector<4x324xf32>
    %122 = tpu.matmul %120, %121, %cst_54 {dimension_numbers = #tpu.dot_dimension_numbers<[1], [0], [0], [1], [0, 0, 1, 1], [], []>} : vector<4x4xf32>, vector<4x324xf32>, vector<4x324xf32> -> vector<4x324xf32>
    %123 = arith.addf %119, %122 : vector<4x324xf32>
    %124 = vector.extract_strided_slice %89 {offsets = [0, 32], sizes = [4, 4], strides = [1, 1]} : vector<4x36xf32> to vector<4x4xf32>
    %125 = vector.extract_strided_slice %92 {offsets = [0, 38], sizes = [4, 324], strides = [1, 1]} : vector<4x362xf32> to vector<4x324xf32>
    %cst_55 = arith.constant dense<0.000000e+00> : vector<4x324xf32>
    %126 = tpu.matmul %124, %125, %cst_55 {dimension_numbers = #tpu.dot_dimension_numbers<[1], [0], [0], [1], [0, 0, 1, 1], [], []>} : vector<4x4xf32>, vector<4x324xf32>, vector<4x324xf32> -> vector<4x324xf32>
    %127 = arith.addf %123, %126 : vector<4x324xf32>
    %128 = vector.broadcast %90 : vector<4x1xf32> to vector<4x324xf32>
    %129 = arith.addf %127, %128 : vector<4x324xf32>
    %130 = vector.broadcast %2 : vector<1x324xf32> to vector<4x324xf32>
    %131 = arith.mulf %129, %130 : vector<4x324xf32>
    %132 = vector.shape_cast %74 : vector<16x324xf32> to vector<1x16x324xf32>
    %c0_56 = arith.constant 0 : index
    %c0_57 = arith.constant 0 : index
    %c0_58 = arith.constant 0 : index
    %133 = vector.load %arg17[%c0_56, %c0_57, %c0_58] : memref<1x16x324xf32, #tpu.memory_space<vmem>>, vector<1x16x324xf32>
    tpu.vector_store %arg17[%c0_56, %c0_57, %c0_58], %132 {strides = array<i32>} : memref<1x16x324xf32, #tpu.memory_space<vmem>>, vector<1x16x324xf32>,
    %134 = vector.shape_cast %88 : vector<4x324xf32> to vector<1x4x324xf32>
    %c0_59 = arith.constant 0 : index
    %c0_60 = arith.constant 0 : index
    %c0_61 = arith.constant 0 : index
    %135 = vector.load %arg18[%c0_59, %c0_60, %c0_61] : memref<1x4x324xf32, #tpu.memory_space<vmem>>, vector<1x4x324xf32>
    tpu.vector_store %arg18[%c0_59, %c0_60, %c0_61], %134 {strides = array<i32>} : memref<1x4x324xf32, #tpu.memory_space<vmem>>, vector<1x4x324xf32>,
    %136 = vector.shape_cast %131 : vector<4x324xf32> to vector<1x4x324xf32>
    %c0_62 = arith.constant 0 : index
    %c0_63 = arith.constant 0 : index
    %c0_64 = arith.constant 0 : index
    %137 = vector.load %arg19[%c0_62, %c0_63, %c0_64] : memref<1x4x324xf32, #tpu.memory_space<vmem>>, vector<1x4x324xf32>
    tpu.vector_store %arg19[%c0_62, %c0_63, %c0_64], %136 {strides = array<i32>} : memref<1x4x324xf32, #tpu.memory_space<vmem>>, vector<1x4x324xf32>,
    return
  }
  func.func @transform_0(%arg0: i32) -> (i32, i32, i32) {
    %c0_i32 = arith.constant 0 : i32
    %c0_i32_0 = arith.constant 0 : i32
    %c0_i32_1 = arith.constant 0 : i32
    return %arg0, %c0_i32, %c0_i32_0 : i32, i32, i32
  }
  func.func @transform_1(%arg0: i32) -> (i32, i32) {
    %c0_i32 = arith.constant 0 : i32
    %c0_i32_0 = arith.constant 0 : i32
    %c0_i32_1 = arith.constant 0 : i32
    return %c0_i32, %c0_i32_0 : i32, i32
  }
  func.func @transform_2(%arg0: i32) -> (i32, i32) {
    %c0_i32 = arith.constant 0 : i32
    %c0_i32_0 = arith.constant 0 : i32
    %c0_i32_1 = arith.constant 0 : i32
    return %c0_i32, %c0_i32_0 : i32, i32
  }
  func.func @transform_3(%arg0: i32) -> (i32, i32) {
    %c0_i32 = arith.constant 0 : i32
    %c0_i32_0 = arith.constant 0 : i32
    %c0_i32_1 = arith.constant 0 : i32
    return %c0_i32, %c0_i32_0 : i32, i32
  }
  func.func @transform_4(%arg0: i32) -> (i32, i32) {
    %c0_i32 = arith.constant 0 : i32
    %c0_i32_0 = arith.constant 0 : i32
    %c0_i32_1 = arith.constant 0 : i32
    return %c0_i32, %c0_i32_0 : i32, i32
  }
  func.func @transform_5(%arg0: i32) -> (i32, i32) {
    %c0_i32 = arith.constant 0 : i32
    %c0_i32_0 = arith.constant 0 : i32
    %c0_i32_1 = arith.constant 0 : i32
    return %c0_i32, %c0_i32_0 : i32, i32
  }
  func.func @transform_6(%arg0: i32) -> (i32, i32) {
    %c0_i32 = arith.constant 0 : i32
    %c0_i32_0 = arith.constant 0 : i32
    %c0_i32_1 = arith.constant 0 : i32
    return %c0_i32, %c0_i32_0 : i32, i32
  }
  func.func @transform_7(%arg0: i32) -> (i32, i32) {
    %c0_i32 = arith.constant 0 : i32
    %c0_i32_0 = arith.constant 0 : i32
    %c0_i32_1 = arith.constant 0 : i32
    return %c0_i32, %c0_i32_0 : i32, i32
  }
  func.func @transform_8(%arg0: i32) -> (i32, i32) {
    %c0_i32 = arith.constant 0 : i32
    %c0_i32_0 = arith.constant 0 : i32
    %c0_i32_1 = arith.constant 0 : i32
    return %c0_i32, %c0_i32_0 : i32, i32
  }
  func.func @transform_9(%arg0: i32) -> (i32, i32) {
    %c0_i32 = arith.constant 0 : i32
    %c0_i32_0 = arith.constant 0 : i32
    %c0_i32_1 = arith.constant 0 : i32
    return %c0_i32, %c0_i32_0 : i32, i32
  }
  func.func @transform_10(%arg0: i32) -> (i32, i32) {
    %c0_i32 = arith.constant 0 : i32
    %c0_i32_0 = arith.constant 0 : i32
    %c0_i32_1 = arith.constant 0 : i32
    return %c0_i32, %c0_i32_0 : i32, i32
  }
  func.func @transform_11(%arg0: i32) -> (i32, i32) {
    %c0_i32 = arith.constant 0 : i32
    %c0_i32_0 = arith.constant 0 : i32
    %c0_i32_1 = arith.constant 0 : i32
    return %c0_i32, %c0_i32_0 : i32, i32
  }
  func.func @transform_12(%arg0: i32) -> (i32, i32) {
    %c0_i32 = arith.constant 0 : i32
    %c0_i32_0 = arith.constant 0 : i32
    %c0_i32_1 = arith.constant 0 : i32
    return %c0_i32, %c0_i32_0 : i32, i32
  }
  func.func @transform_13(%arg0: i32) -> (i32, i32) {
    %c0_i32 = arith.constant 0 : i32
    %c0_i32_0 = arith.constant 0 : i32
    %c0_i32_1 = arith.constant 0 : i32
    return %c0_i32, %c0_i32_0 : i32, i32
  }
  func.func @transform_14(%arg0: i32) -> (i32, i32) {
    %c0_i32 = arith.constant 0 : i32
    %c0_i32_0 = arith.constant 0 : i32
    %c0_i32_1 = arith.constant 0 : i32
    return %c0_i32, %c0_i32_0 : i32, i32
  }
  func.func @transform_15(%arg0: i32) -> (i32, i32) {
    %c0_i32 = arith.constant 0 : i32
    %c0_i32_0 = arith.constant 0 : i32
    %c0_i32_1 = arith.constant 0 : i32
    return %c0_i32, %c0_i32_0 : i32, i32
  }
  func.func @transform_16(%arg0: i32) -> (i32, i32, i32) {
    %c0_i32 = arith.constant 0 : i32
    %c0_i32_0 = arith.constant 0 : i32
    %c0_i32_1 = arith.constant 0 : i32
    return %arg0, %c0_i32, %c0_i32_0 : i32, i32, i32
  }
  func.func @transform_17(%arg0: i32) -> (i32, i32, i32) {
    %c0_i32 = arith.constant 0 : i32
    %c0_i32_0 = arith.constant 0 : i32
    %c0_i32_1 = arith.constant 0 : i32
    return %arg0, %c0_i32, %c0_i32_0 : i32, i32, i32
  }
  func.func @transform_18(%arg0: i32) -> (i32, i32, i32) {
    %c0_i32 = arith.constant 0 : i32
    %c0_i32_0 = arith.constant 0 : i32
    %c0_i32_1 = arith.constant 0 : i32
    return %arg0, %c0_i32, %c0_i32_0 : i32, i32, i32
  }
}

module attributes {stable_mosaic.version = 11 : i64} {
  func.func @_esa_mid_kernel(%arg0: i32, %arg1: memref<1x4x9xf32, #tpu.memory_space<vmem>>, %arg2: memref<1x9xf32, #tpu.memory_space<vmem>>, %arg3: memref<4x36xf32, #tpu.memory_space<vmem>>, %arg4: memref<4x1xf32, #tpu.memory_space<vmem>>, %arg5: memref<4x36xf32, #tpu.memory_space<vmem>>, %arg6: memref<4x1xf32, #tpu.memory_space<vmem>>, %arg7: memref<4x36xf32, #tpu.memory_space<vmem>>, %arg8: memref<4x1xf32, #tpu.memory_space<vmem>>, %arg9: memref<1x4x9xf32, #tpu.memory_space<vmem>>) attributes {dimension_semantics = [#tpu.dimension_semantics<parallel>], iteration_bounds = array<i64: 2>, scalar_prefetch = 0 : i64, scratch_operands = 0 : i64, tpu.core_type = #tpu.core_type<tc>, window_params = [{transform_indices = @transform_0, window_bounds = array<i64: 1, 4, 9>}, {pipeline_mode = #tpu.pipeline_mode<synchronous>, transform_indices = @transform_1, window_bounds = array<i64: 1, 9>}, {pipeline_mode = #tpu.pipeline_mode<synchronous>, transform_indices = @transform_2, window_bounds = array<i64: 4, 36>}, {pipeline_mode = #tpu.pipeline_mode<synchronous>, transform_indices = @transform_3, window_bounds = array<i64: 4, 1>}, {pipeline_mode = #tpu.pipeline_mode<synchronous>, transform_indices = @transform_4, window_bounds = array<i64: 4, 36>}, {pipeline_mode = #tpu.pipeline_mode<synchronous>, transform_indices = @transform_5, window_bounds = array<i64: 4, 1>}, {pipeline_mode = #tpu.pipeline_mode<synchronous>, transform_indices = @transform_6, window_bounds = array<i64: 4, 36>}, {pipeline_mode = #tpu.pipeline_mode<synchronous>, transform_indices = @transform_7, window_bounds = array<i64: 4, 1>}, {transform_indices = @transform_8, window_bounds = array<i64: 1, 4, 9>}]} {
    %c0 = arith.constant 0 : index
    %c0_0 = arith.constant 0 : index
    %0 = vector.load %arg2[%c0, %c0_0] : memref<1x9xf32, #tpu.memory_space<vmem>>, vector<1x9xf32>
    %c0_1 = arith.constant 0 : index
    %c0_2 = arith.constant 0 : index
    %c0_3 = arith.constant 0 : index
    %1 = vector.load %arg1[%c0_1, %c0_2, %c0_3] : memref<1x4x9xf32, #tpu.memory_space<vmem>>, vector<1x4x9xf32>
    %2 = vector.shape_cast %1 : vector<1x4x9xf32> to vector<4x9xf32>
    %c0_4 = arith.constant 0 : index
    %c0_5 = arith.constant 0 : index
    %3 = vector.load %arg3[%c0_4, %c0_5] : memref<4x36xf32, #tpu.memory_space<vmem>>, vector<4x36xf32>
    %c0_6 = arith.constant 0 : index
    %c0_7 = arith.constant 0 : index
    %4 = vector.load %arg4[%c0_6, %c0_7] : memref<4x1xf32, #tpu.memory_space<vmem>>, vector<4x1xf32>
    %cst = arith.constant 0.000000e+00 : f32
    %5 = vector.broadcast %cst : f32 to vector<4x4xf32>
    %6 = tpu.concatenate %5, %2, %5 in 1 : vector<4x4xf32>, vector<4x9xf32>, vector<4x4xf32> -> vector<4x17xf32>
    %7 = vector.extract_strided_slice %3 {offsets = [0, 0], sizes = [4, 4], strides = [1, 1]} : vector<4x36xf32> to vector<4x4xf32>
    %8 = vector.extract_strided_slice %6 {offsets = [0, 0], sizes = [4, 9], strides = [1, 1]} : vector<4x17xf32> to vector<4x9xf32>
    %cst_8 = arith.constant dense<0.000000e+00> : vector<4x9xf32>
    %9 = tpu.matmul %7, %8, %cst_8 {dimension_numbers = #tpu.dot_dimension_numbers<[1], [0], [0], [1], [0, 0, 1, 1], [], []>} : vector<4x4xf32>, vector<4x9xf32>, vector<4x9xf32> -> vector<4x9xf32>
    %10 = vector.extract_strided_slice %3 {offsets = [0, 4], sizes = [4, 4], strides = [1, 1]} : vector<4x36xf32> to vector<4x4xf32>
    %11 = vector.extract_strided_slice %6 {offsets = [0, 1], sizes = [4, 9], strides = [1, 1]} : vector<4x17xf32> to vector<4x9xf32>
    %cst_9 = arith.constant dense<0.000000e+00> : vector<4x9xf32>
    %12 = tpu.matmul %10, %11, %cst_9 {dimension_numbers = #tpu.dot_dimension_numbers<[1], [0], [0], [1], [0, 0, 1, 1], [], []>} : vector<4x4xf32>, vector<4x9xf32>, vector<4x9xf32> -> vector<4x9xf32>
    %13 = arith.addf %9, %12 : vector<4x9xf32>
    %14 = vector.extract_strided_slice %3 {offsets = [0, 8], sizes = [4, 4], strides = [1, 1]} : vector<4x36xf32> to vector<4x4xf32>
    %15 = vector.extract_strided_slice %6 {offsets = [0, 2], sizes = [4, 9], strides = [1, 1]} : vector<4x17xf32> to vector<4x9xf32>
    %cst_10 = arith.constant dense<0.000000e+00> : vector<4x9xf32>
    %16 = tpu.matmul %14, %15, %cst_10 {dimension_numbers = #tpu.dot_dimension_numbers<[1], [0], [0], [1], [0, 0, 1, 1], [], []>} : vector<4x4xf32>, vector<4x9xf32>, vector<4x9xf32> -> vector<4x9xf32>
    %17 = arith.addf %13, %16 : vector<4x9xf32>
    %18 = vector.extract_strided_slice %3 {offsets = [0, 12], sizes = [4, 4], strides = [1, 1]} : vector<4x36xf32> to vector<4x4xf32>
    %19 = vector.extract_strided_slice %6 {offsets = [0, 3], sizes = [4, 9], strides = [1, 1]} : vector<4x17xf32> to vector<4x9xf32>
    %cst_11 = arith.constant dense<0.000000e+00> : vector<4x9xf32>
    %20 = tpu.matmul %18, %19, %cst_11 {dimension_numbers = #tpu.dot_dimension_numbers<[1], [0], [0], [1], [0, 0, 1, 1], [], []>} : vector<4x4xf32>, vector<4x9xf32>, vector<4x9xf32> -> vector<4x9xf32>
    %21 = arith.addf %17, %20 : vector<4x9xf32>
    %22 = vector.extract_strided_slice %3 {offsets = [0, 16], sizes = [4, 4], strides = [1, 1]} : vector<4x36xf32> to vector<4x4xf32>
    %23 = vector.extract_strided_slice %6 {offsets = [0, 4], sizes = [4, 9], strides = [1, 1]} : vector<4x17xf32> to vector<4x9xf32>
    %cst_12 = arith.constant dense<0.000000e+00> : vector<4x9xf32>
    %24 = tpu.matmul %22, %23, %cst_12 {dimension_numbers = #tpu.dot_dimension_numbers<[1], [0], [0], [1], [0, 0, 1, 1], [], []>} : vector<4x4xf32>, vector<4x9xf32>, vector<4x9xf32> -> vector<4x9xf32>
    %25 = arith.addf %21, %24 : vector<4x9xf32>
    %26 = vector.extract_strided_slice %3 {offsets = [0, 20], sizes = [4, 4], strides = [1, 1]} : vector<4x36xf32> to vector<4x4xf32>
    %27 = vector.extract_strided_slice %6 {offsets = [0, 5], sizes = [4, 9], strides = [1, 1]} : vector<4x17xf32> to vector<4x9xf32>
    %cst_13 = arith.constant dense<0.000000e+00> : vector<4x9xf32>
    %28 = tpu.matmul %26, %27, %cst_13 {dimension_numbers = #tpu.dot_dimension_numbers<[1], [0], [0], [1], [0, 0, 1, 1], [], []>} : vector<4x4xf32>, vector<4x9xf32>, vector<4x9xf32> -> vector<4x9xf32>
    %29 = arith.addf %25, %28 : vector<4x9xf32>
    %30 = vector.extract_strided_slice %3 {offsets = [0, 24], sizes = [4, 4], strides = [1, 1]} : vector<4x36xf32> to vector<4x4xf32>
    %31 = vector.extract_strided_slice %6 {offsets = [0, 6], sizes = [4, 9], strides = [1, 1]} : vector<4x17xf32> to vector<4x9xf32>
    %cst_14 = arith.constant dense<0.000000e+00> : vector<4x9xf32>
    %32 = tpu.matmul %30, %31, %cst_14 {dimension_numbers = #tpu.dot_dimension_numbers<[1], [0], [0], [1], [0, 0, 1, 1], [], []>} : vector<4x4xf32>, vector<4x9xf32>, vector<4x9xf32> -> vector<4x9xf32>
    %33 = arith.addf %29, %32 : vector<4x9xf32>
    %34 = vector.extract_strided_slice %3 {offsets = [0, 28], sizes = [4, 4], strides = [1, 1]} : vector<4x36xf32> to vector<4x4xf32>
    %35 = vector.extract_strided_slice %6 {offsets = [0, 7], sizes = [4, 9], strides = [1, 1]} : vector<4x17xf32> to vector<4x9xf32>
    %cst_15 = arith.constant dense<0.000000e+00> : vector<4x9xf32>
    %36 = tpu.matmul %34, %35, %cst_15 {dimension_numbers = #tpu.dot_dimension_numbers<[1], [0], [0], [1], [0, 0, 1, 1], [], []>} : vector<4x4xf32>, vector<4x9xf32>, vector<4x9xf32> -> vector<4x9xf32>
    %37 = arith.addf %33, %36 : vector<4x9xf32>
    %38 = vector.extract_strided_slice %3 {offsets = [0, 32], sizes = [4, 4], strides = [1, 1]} : vector<4x36xf32> to vector<4x4xf32>
    %39 = vector.extract_strided_slice %6 {offsets = [0, 8], sizes = [4, 9], strides = [1, 1]} : vector<4x17xf32> to vector<4x9xf32>
    %cst_16 = arith.constant dense<0.000000e+00> : vector<4x9xf32>
    %40 = tpu.matmul %38, %39, %cst_16 {dimension_numbers = #tpu.dot_dimension_numbers<[1], [0], [0], [1], [0, 0, 1, 1], [], []>} : vector<4x4xf32>, vector<4x9xf32>, vector<4x9xf32> -> vector<4x9xf32>
    %41 = arith.addf %37, %40 : vector<4x9xf32>
    %42 = vector.broadcast %4 : vector<4x1xf32> to vector<4x9xf32>
    %43 = arith.addf %41, %42 : vector<4x9xf32>
    %cst_17 = arith.constant 0.000000e+00 : f32
    %44 = vector.broadcast %cst_17 : f32 to vector<4x9xf32>
    %45 = arith.maximumf %43, %44 : vector<4x9xf32>
    %46 = vector.broadcast %0 : vector<1x9xf32> to vector<4x9xf32>
    %47 = arith.mulf %45, %46 : vector<4x9xf32>
    %c0_18 = arith.constant 0 : index
    %c0_19 = arith.constant 0 : index
    %48 = vector.load %arg5[%c0_18, %c0_19] : memref<4x36xf32, #tpu.memory_space<vmem>>, vector<4x36xf32>
    %c0_20 = arith.constant 0 : index
    %c0_21 = arith.constant 0 : index
    %49 = vector.load %arg6[%c0_20, %c0_21] : memref<4x1xf32, #tpu.memory_space<vmem>>, vector<4x1xf32>
    %cst_22 = arith.constant 0.000000e+00 : f32
    %50 = vector.broadcast %cst_22 : f32 to vector<4x4xf32>
    %51 = tpu.concatenate %50, %47, %50 in 1 : vector<4x4xf32>, vector<4x9xf32>, vector<4x4xf32> -> vector<4x17xf32>
    %52 = vector.extract_strided_slice %48 {offsets = [0, 0], sizes = [4, 4], strides = [1, 1]} : vector<4x36xf32> to vector<4x4xf32>
    %53 = vector.extract_strided_slice %51 {offsets = [0, 0], sizes = [4, 9], strides = [1, 1]} : vector<4x17xf32> to vector<4x9xf32>
    %cst_23 = arith.constant dense<0.000000e+00> : vector<4x9xf32>
    %54 = tpu.matmul %52, %53, %cst_23 {dimension_numbers = #tpu.dot_dimension_numbers<[1], [0], [0], [1], [0, 0, 1, 1], [], []>} : vector<4x4xf32>, vector<4x9xf32>, vector<4x9xf32> -> vector<4x9xf32>
    %55 = vector.extract_strided_slice %48 {offsets = [0, 4], sizes = [4, 4], strides = [1, 1]} : vector<4x36xf32> to vector<4x4xf32>
    %56 = vector.extract_strided_slice %51 {offsets = [0, 1], sizes = [4, 9], strides = [1, 1]} : vector<4x17xf32> to vector<4x9xf32>
    %cst_24 = arith.constant dense<0.000000e+00> : vector<4x9xf32>
    %57 = tpu.matmul %55, %56, %cst_24 {dimension_numbers = #tpu.dot_dimension_numbers<[1], [0], [0], [1], [0, 0, 1, 1], [], []>} : vector<4x4xf32>, vector<4x9xf32>, vector<4x9xf32> -> vector<4x9xf32>
    %58 = arith.addf %54, %57 : vector<4x9xf32>
    %59 = vector.extract_strided_slice %48 {offsets = [0, 8], sizes = [4, 4], strides = [1, 1]} : vector<4x36xf32> to vector<4x4xf32>
    %60 = vector.extract_strided_slice %51 {offsets = [0, 2], sizes = [4, 9], strides = [1, 1]} : vector<4x17xf32> to vector<4x9xf32>
    %cst_25 = arith.constant dense<0.000000e+00> : vector<4x9xf32>
    %61 = tpu.matmul %59, %60, %cst_25 {dimension_numbers = #tpu.dot_dimension_numbers<[1], [0], [0], [1], [0, 0, 1, 1], [], []>} : vector<4x4xf32>, vector<4x9xf32>, vector<4x9xf32> -> vector<4x9xf32>
    %62 = arith.addf %58, %61 : vector<4x9xf32>
    %63 = vector.extract_strided_slice %48 {offsets = [0, 12], sizes = [4, 4], strides = [1, 1]} : vector<4x36xf32> to vector<4x4xf32>
    %64 = vector.extract_strided_slice %51 {offsets = [0, 3], sizes = [4, 9], strides = [1, 1]} : vector<4x17xf32> to vector<4x9xf32>
    %cst_26 = arith.constant dense<0.000000e+00> : vector<4x9xf32>
    %65 = tpu.matmul %63, %64, %cst_26 {dimension_numbers = #tpu.dot_dimension_numbers<[1], [0], [0], [1], [0, 0, 1, 1], [], []>} : vector<4x4xf32>, vector<4x9xf32>, vector<4x9xf32> -> vector<4x9xf32>
    %66 = arith.addf %62, %65 : vector<4x9xf32>
    %67 = vector.extract_strided_slice %48 {offsets = [0, 16], sizes = [4, 4], strides = [1, 1]} : vector<4x36xf32> to vector<4x4xf32>
    %68 = vector.extract_strided_slice %51 {offsets = [0, 4], sizes = [4, 9], strides = [1, 1]} : vector<4x17xf32> to vector<4x9xf32>
    %cst_27 = arith.constant dense<0.000000e+00> : vector<4x9xf32>
    %69 = tpu.matmul %67, %68, %cst_27 {dimension_numbers = #tpu.dot_dimension_numbers<[1], [0], [0], [1], [0, 0, 1, 1], [], []>} : vector<4x4xf32>, vector<4x9xf32>, vector<4x9xf32> -> vector<4x9xf32>
    %70 = arith.addf %66, %69 : vector<4x9xf32>
    %71 = vector.extract_strided_slice %48 {offsets = [0, 20], sizes = [4, 4], strides = [1, 1]} : vector<4x36xf32> to vector<4x4xf32>
    %72 = vector.extract_strided_slice %51 {offsets = [0, 5], sizes = [4, 9], strides = [1, 1]} : vector<4x17xf32> to vector<4x9xf32>
    %cst_28 = arith.constant dense<0.000000e+00> : vector<4x9xf32>
    %73 = tpu.matmul %71, %72, %cst_28 {dimension_numbers = #tpu.dot_dimension_numbers<[1], [0], [0], [1], [0, 0, 1, 1], [], []>} : vector<4x4xf32>, vector<4x9xf32>, vector<4x9xf32> -> vector<4x9xf32>
    %74 = arith.addf %70, %73 : vector<4x9xf32>
    %75 = vector.extract_strided_slice %48 {offsets = [0, 24], sizes = [4, 4], strides = [1, 1]} : vector<4x36xf32> to vector<4x4xf32>
    %76 = vector.extract_strided_slice %51 {offsets = [0, 6], sizes = [4, 9], strides = [1, 1]} : vector<4x17xf32> to vector<4x9xf32>
    %cst_29 = arith.constant dense<0.000000e+00> : vector<4x9xf32>
    %77 = tpu.matmul %75, %76, %cst_29 {dimension_numbers = #tpu.dot_dimension_numbers<[1], [0], [0], [1], [0, 0, 1, 1], [], []>} : vector<4x4xf32>, vector<4x9xf32>, vector<4x9xf32> -> vector<4x9xf32>
    %78 = arith.addf %74, %77 : vector<4x9xf32>
    %79 = vector.extract_strided_slice %48 {offsets = [0, 28], sizes = [4, 4], strides = [1, 1]} : vector<4x36xf32> to vector<4x4xf32>
    %80 = vector.extract_strided_slice %51 {offsets = [0, 7], sizes = [4, 9], strides = [1, 1]} : vector<4x17xf32> to vector<4x9xf32>
    %cst_30 = arith.constant dense<0.000000e+00> : vector<4x9xf32>
    %81 = tpu.matmul %79, %80, %cst_30 {dimension_numbers = #tpu.dot_dimension_numbers<[1], [0], [0], [1], [0, 0, 1, 1], [], []>} : vector<4x4xf32>, vector<4x9xf32>, vector<4x9xf32> -> vector<4x9xf32>
    %82 = arith.addf %78, %81 : vector<4x9xf32>
    %83 = vector.extract_strided_slice %48 {offsets = [0, 32], sizes = [4, 4], strides = [1, 1]} : vector<4x36xf32> to vector<4x4xf32>
    %84 = vector.extract_strided_slice %51 {offsets = [0, 8], sizes = [4, 9], strides = [1, 1]} : vector<4x17xf32> to vector<4x9xf32>
    %cst_31 = arith.constant dense<0.000000e+00> : vector<4x9xf32>
    %85 = tpu.matmul %83, %84, %cst_31 {dimension_numbers = #tpu.dot_dimension_numbers<[1], [0], [0], [1], [0, 0, 1, 1], [], []>} : vector<4x4xf32>, vector<4x9xf32>, vector<4x9xf32> -> vector<4x9xf32>
    %86 = arith.addf %82, %85 : vector<4x9xf32>
    %87 = vector.broadcast %49 : vector<4x1xf32> to vector<4x9xf32>
    %88 = arith.addf %86, %87 : vector<4x9xf32>
    %cst_32 = arith.constant 0.000000e+00 : f32
    %89 = vector.broadcast %cst_32 : f32 to vector<4x9xf32>
    %90 = arith.maximumf %88, %89 : vector<4x9xf32>
    %91 = vector.broadcast %0 : vector<1x9xf32> to vector<4x9xf32>
    %92 = arith.mulf %90, %91 : vector<4x9xf32>
    %c0_33 = arith.constant 0 : index
    %c0_34 = arith.constant 0 : index
    %93 = vector.load %arg7[%c0_33, %c0_34] : memref<4x36xf32, #tpu.memory_space<vmem>>, vector<4x36xf32>
    %c0_35 = arith.constant 0 : index
    %c0_36 = arith.constant 0 : index
    %94 = vector.load %arg8[%c0_35, %c0_36] : memref<4x1xf32, #tpu.memory_space<vmem>>, vector<4x1xf32>
    %cst_37 = arith.constant 0.000000e+00 : f32
    %95 = vector.broadcast %cst_37 : f32 to vector<4x4xf32>
    %96 = tpu.concatenate %95, %92, %95 in 1 : vector<4x4xf32>, vector<4x9xf32>, vector<4x4xf32> -> vector<4x17xf32>
    %97 = vector.extract_strided_slice %93 {offsets = [0, 0], sizes = [4, 4], strides = [1, 1]} : vector<4x36xf32> to vector<4x4xf32>
    %98 = vector.extract_strided_slice %96 {offsets = [0, 0], sizes = [4, 9], strides = [1, 1]} : vector<4x17xf32> to vector<4x9xf32>
    %cst_38 = arith.constant dense<0.000000e+00> : vector<4x9xf32>
    %99 = tpu.matmul %97, %98, %cst_38 {dimension_numbers = #tpu.dot_dimension_numbers<[1], [0], [0], [1], [0, 0, 1, 1], [], []>} : vector<4x4xf32>, vector<4x9xf32>, vector<4x9xf32> -> vector<4x9xf32>
    %100 = vector.extract_strided_slice %93 {offsets = [0, 4], sizes = [4, 4], strides = [1, 1]} : vector<4x36xf32> to vector<4x4xf32>
    %101 = vector.extract_strided_slice %96 {offsets = [0, 1], sizes = [4, 9], strides = [1, 1]} : vector<4x17xf32> to vector<4x9xf32>
    %cst_39 = arith.constant dense<0.000000e+00> : vector<4x9xf32>
    %102 = tpu.matmul %100, %101, %cst_39 {dimension_numbers = #tpu.dot_dimension_numbers<[1], [0], [0], [1], [0, 0, 1, 1], [], []>} : vector<4x4xf32>, vector<4x9xf32>, vector<4x9xf32> -> vector<4x9xf32>
    %103 = arith.addf %99, %102 : vector<4x9xf32>
    %104 = vector.extract_strided_slice %93 {offsets = [0, 8], sizes = [4, 4], strides = [1, 1]} : vector<4x36xf32> to vector<4x4xf32>
    %105 = vector.extract_strided_slice %96 {offsets = [0, 2], sizes = [4, 9], strides = [1, 1]} : vector<4x17xf32> to vector<4x9xf32>
    %cst_40 = arith.constant dense<0.000000e+00> : vector<4x9xf32>
    %106 = tpu.matmul %104, %105, %cst_40 {dimension_numbers = #tpu.dot_dimension_numbers<[1], [0], [0], [1], [0, 0, 1, 1], [], []>} : vector<4x4xf32>, vector<4x9xf32>, vector<4x9xf32> -> vector<4x9xf32>
    %107 = arith.addf %103, %106 : vector<4x9xf32>
    %108 = vector.extract_strided_slice %93 {offsets = [0, 12], sizes = [4, 4], strides = [1, 1]} : vector<4x36xf32> to vector<4x4xf32>
    %109 = vector.extract_strided_slice %96 {offsets = [0, 3], sizes = [4, 9], strides = [1, 1]} : vector<4x17xf32> to vector<4x9xf32>
    %cst_41 = arith.constant dense<0.000000e+00> : vector<4x9xf32>
    %110 = tpu.matmul %108, %109, %cst_41 {dimension_numbers = #tpu.dot_dimension_numbers<[1], [0], [0], [1], [0, 0, 1, 1], [], []>} : vector<4x4xf32>, vector<4x9xf32>, vector<4x9xf32> -> vector<4x9xf32>
    %111 = arith.addf %107, %110 : vector<4x9xf32>
    %112 = vector.extract_strided_slice %93 {offsets = [0, 16], sizes = [4, 4], strides = [1, 1]} : vector<4x36xf32> to vector<4x4xf32>
    %113 = vector.extract_strided_slice %96 {offsets = [0, 4], sizes = [4, 9], strides = [1, 1]} : vector<4x17xf32> to vector<4x9xf32>
    %cst_42 = arith.constant dense<0.000000e+00> : vector<4x9xf32>
    %114 = tpu.matmul %112, %113, %cst_42 {dimension_numbers = #tpu.dot_dimension_numbers<[1], [0], [0], [1], [0, 0, 1, 1], [], []>} : vector<4x4xf32>, vector<4x9xf32>, vector<4x9xf32> -> vector<4x9xf32>
    %115 = arith.addf %111, %114 : vector<4x9xf32>
    %116 = vector.extract_strided_slice %93 {offsets = [0, 20], sizes = [4, 4], strides = [1, 1]} : vector<4x36xf32> to vector<4x4xf32>
    %117 = vector.extract_strided_slice %96 {offsets = [0, 5], sizes = [4, 9], strides = [1, 1]} : vector<4x17xf32> to vector<4x9xf32>
    %cst_43 = arith.constant dense<0.000000e+00> : vector<4x9xf32>
    %118 = tpu.matmul %116, %117, %cst_43 {dimension_numbers = #tpu.dot_dimension_numbers<[1], [0], [0], [1], [0, 0, 1, 1], [], []>} : vector<4x4xf32>, vector<4x9xf32>, vector<4x9xf32> -> vector<4x9xf32>
    %119 = arith.addf %115, %118 : vector<4x9xf32>
    %120 = vector.extract_strided_slice %93 {offsets = [0, 24], sizes = [4, 4], strides = [1, 1]} : vector<4x36xf32> to vector<4x4xf32>
    %121 = vector.extract_strided_slice %96 {offsets = [0, 6], sizes = [4, 9], strides = [1, 1]} : vector<4x17xf32> to vector<4x9xf32>
    %cst_44 = arith.constant dense<0.000000e+00> : vector<4x9xf32>
    %122 = tpu.matmul %120, %121, %cst_44 {dimension_numbers = #tpu.dot_dimension_numbers<[1], [0], [0], [1], [0, 0, 1, 1], [], []>} : vector<4x4xf32>, vector<4x9xf32>, vector<4x9xf32> -> vector<4x9xf32>
    %123 = arith.addf %119, %122 : vector<4x9xf32>
    %124 = vector.extract_strided_slice %93 {offsets = [0, 28], sizes = [4, 4], strides = [1, 1]} : vector<4x36xf32> to vector<4x4xf32>
    %125 = vector.extract_strided_slice %96 {offsets = [0, 7], sizes = [4, 9], strides = [1, 1]} : vector<4x17xf32> to vector<4x9xf32>
    %cst_45 = arith.constant dense<0.000000e+00> : vector<4x9xf32>
    %126 = tpu.matmul %124, %125, %cst_45 {dimension_numbers = #tpu.dot_dimension_numbers<[1], [0], [0], [1], [0, 0, 1, 1], [], []>} : vector<4x4xf32>, vector<4x9xf32>, vector<4x9xf32> -> vector<4x9xf32>
    %127 = arith.addf %123, %126 : vector<4x9xf32>
    %128 = vector.extract_strided_slice %93 {offsets = [0, 32], sizes = [4, 4], strides = [1, 1]} : vector<4x36xf32> to vector<4x4xf32>
    %129 = vector.extract_strided_slice %96 {offsets = [0, 8], sizes = [4, 9], strides = [1, 1]} : vector<4x17xf32> to vector<4x9xf32>
    %cst_46 = arith.constant dense<0.000000e+00> : vector<4x9xf32>
    %130 = tpu.matmul %128, %129, %cst_46 {dimension_numbers = #tpu.dot_dimension_numbers<[1], [0], [0], [1], [0, 0, 1, 1], [], []>} : vector<4x4xf32>, vector<4x9xf32>, vector<4x9xf32> -> vector<4x9xf32>
    %131 = arith.addf %127, %130 : vector<4x9xf32>
    %132 = vector.broadcast %94 : vector<4x1xf32> to vector<4x9xf32>
    %133 = arith.addf %131, %132 : vector<4x9xf32>
    %134 = vector.broadcast %0 : vector<1x9xf32> to vector<4x9xf32>
    %135 = arith.mulf %133, %134 : vector<4x9xf32>
    %136 = vector.shape_cast %135 : vector<4x9xf32> to vector<1x4x9xf32>
    %c0_47 = arith.constant 0 : index
    %c0_48 = arith.constant 0 : index
    %c0_49 = arith.constant 0 : index
    %137 = vector.load %arg9[%c0_47, %c0_48, %c0_49] : memref<1x4x9xf32, #tpu.memory_space<vmem>>, vector<1x4x9xf32>
    tpu.vector_store %arg9[%c0_47, %c0_48, %c0_49], %136 {strides = array<i32>} : memref<1x4x9xf32, #tpu.memory_space<vmem>>, vector<1x4x9xf32>,
    return
  }
  func.func @transform_0(%arg0: i32) -> (i32, i32, i32) {
    %c0_i32 = arith.constant 0 : i32
    %c0_i32_0 = arith.constant 0 : i32
    %c0_i32_1 = arith.constant 0 : i32
    return %arg0, %c0_i32, %c0_i32_0 : i32, i32, i32
  }
  func.func @transform_1(%arg0: i32) -> (i32, i32) {
    %c0_i32 = arith.constant 0 : i32
    %c0_i32_0 = arith.constant 0 : i32
    %c0_i32_1 = arith.constant 0 : i32
    return %c0_i32, %c0_i32_0 : i32, i32
  }
  func.func @transform_2(%arg0: i32) -> (i32, i32) {
    %c0_i32 = arith.constant 0 : i32
    %c0_i32_0 = arith.constant 0 : i32
    %c0_i32_1 = arith.constant 0 : i32
    return %c0_i32, %c0_i32_0 : i32, i32
  }
  func.func @transform_3(%arg0: i32) -> (i32, i32) {
    %c0_i32 = arith.constant 0 : i32
    %c0_i32_0 = arith.constant 0 : i32
    %c0_i32_1 = arith.constant 0 : i32
    return %c0_i32, %c0_i32_0 : i32, i32
  }
  func.func @transform_4(%arg0: i32) -> (i32, i32) {
    %c0_i32 = arith.constant 0 : i32
    %c0_i32_0 = arith.constant 0 : i32
    %c0_i32_1 = arith.constant 0 : i32
    return %c0_i32, %c0_i32_0 : i32, i32
  }
  func.func @transform_5(%arg0: i32) -> (i32, i32) {
    %c0_i32 = arith.constant 0 : i32
    %c0_i32_0 = arith.constant 0 : i32
    %c0_i32_1 = arith.constant 0 : i32
    return %c0_i32, %c0_i32_0 : i32, i32
  }
  func.func @transform_6(%arg0: i32) -> (i32, i32) {
    %c0_i32 = arith.constant 0 : i32
    %c0_i32_0 = arith.constant 0 : i32
    %c0_i32_1 = arith.constant 0 : i32
    return %c0_i32, %c0_i32_0 : i32, i32
  }
  func.func @transform_7(%arg0: i32) -> (i32, i32) {
    %c0_i32 = arith.constant 0 : i32
    %c0_i32_0 = arith.constant 0 : i32
    %c0_i32_1 = arith.constant 0 : i32
    return %c0_i32, %c0_i32_0 : i32, i32
  }
  func.func @transform_8(%arg0: i32) -> (i32, i32, i32) {
    %c0_i32 = arith.constant 0 : i32
    %c0_i32_0 = arith.constant 0 : i32
    %c0_i32_1 = arith.constant 0 : i32
    return %arg0, %c0_i32, %c0_i32_0 : i32, i32, i32
  }
}

module attributes {stable_mosaic.version = 11 : i64} {
  func.func @_esa_post_kernel(%arg0: i32, %arg1: memref<1x16x324xf32, #tpu.memory_space<vmem>>, %arg2: memref<1x4x324xf32, #tpu.memory_space<vmem>>, %arg3: memref<1x4x324xf32, #tpu.memory_space<vmem>>, %arg4: memref<1x324xf32, #tpu.memory_space<vmem>>, %arg5: memref<16x4xf32, #tpu.memory_space<vmem>>, %arg6: memref<16x1xf32, #tpu.memory_space<vmem>>, %arg7: memref<1x16x324xf32, #tpu.memory_space<vmem>>) attributes {dimension_semantics = [#tpu.dimension_semantics<parallel>], iteration_bounds = array<i64: 2>, scalar_prefetch = 0 : i64, scratch_operands = 0 : i64, tpu.core_type = #tpu.core_type<tc>, window_params = [{transform_indices = @transform_0, window_bounds = array<i64: 1, 16, 324>}, {transform_indices = @transform_1, window_bounds = array<i64: 1, 4, 324>}, {transform_indices = @transform_2, window_bounds = array<i64: 1, 4, 324>}, {pipeline_mode = #tpu.pipeline_mode<synchronous>, transform_indices = @transform_3, window_bounds = array<i64: 1, 324>}, {pipeline_mode = #tpu.pipeline_mode<synchronous>, transform_indices = @transform_4, window_bounds = array<i64: 16, 4>}, {pipeline_mode = #tpu.pipeline_mode<synchronous>, transform_indices = @transform_5, window_bounds = array<i64: 16, 1>}, {transform_indices = @transform_6, window_bounds = array<i64: 1, 16, 324>}]} {
    %c0 = arith.constant 0 : index
    %c0_0 = arith.constant 0 : index
    %c0_1 = arith.constant 0 : index
    %0 = vector.load %arg3[%c0, %c0_0, %c0_1] : memref<1x4x324xf32, #tpu.memory_space<vmem>>, vector<1x4x324xf32>
    %1 = vector.shape_cast %0 : vector<1x4x324xf32> to vector<4x324xf32>
    %c0_2 = arith.constant 0 : index
    %c0_3 = arith.constant 0 : index
    %c0_4 = arith.constant 0 : index
    %2 = vector.load %arg2[%c0_2, %c0_3, %c0_4] : memref<1x4x324xf32, #tpu.memory_space<vmem>>, vector<1x4x324xf32>
    %3 = vector.shape_cast %2 : vector<1x4x324xf32> to vector<4x324xf32>
    %4 = arith.addf %1, %3 : vector<4x324xf32>
    %c0_5 = arith.constant 0 : index
    %c0_6 = arith.constant 0 : index
    %5 = vector.load %arg5[%c0_5, %c0_6] : memref<16x4xf32, #tpu.memory_space<vmem>>, vector<16x4xf32>
    %c0_7 = arith.constant 0 : index
    %c0_8 = arith.constant 0 : index
    %6 = vector.load %arg6[%c0_7, %c0_8] : memref<16x1xf32, #tpu.memory_space<vmem>>, vector<16x1xf32>
    %cst = arith.constant dense<0.000000e+00> : vector<16x324xf32>
    %7 = tpu.matmul %5, %4, %cst {dimension_numbers = #tpu.dot_dimension_numbers<[1], [0], [0], [1], [0, 0, 1, 1], [], []>} : vector<16x4xf32>, vector<4x324xf32>, vector<16x324xf32> -> vector<16x324xf32>
    %8 = vector.broadcast %6 : vector<16x1xf32> to vector<16x324xf32>
    %9 = arith.addf %7, %8 : vector<16x324xf32>
    %10 = arith.negf %9 : vector<16x324xf32>
    %11 = math.exp %10 : vector<16x324xf32>
    %cst_9 = arith.constant 1.000000e+00 : f32
    %12 = vector.broadcast %cst_9 : f32 to vector<16x324xf32>
    %13 = arith.addf %12, %11 : vector<16x324xf32>
    %14 = arith.divf %12, %13 : vector<16x324xf32>
    %c0_10 = arith.constant 0 : index
    %c0_11 = arith.constant 0 : index
    %c0_12 = arith.constant 0 : index
    %15 = vector.load %arg1[%c0_10, %c0_11, %c0_12] : memref<1x16x324xf32, #tpu.memory_space<vmem>>, vector<1x16x324xf32>
    %16 = vector.shape_cast %15 : vector<1x16x324xf32> to vector<16x324xf32>
    %17 = arith.mulf %16, %14 : vector<16x324xf32>
    %c0_13 = arith.constant 0 : index
    %c0_14 = arith.constant 0 : index
    %18 = vector.load %arg4[%c0_13, %c0_14] : memref<1x324xf32, #tpu.memory_space<vmem>>, vector<1x324xf32>
    %19 = vector.broadcast %18 : vector<1x324xf32> to vector<16x324xf32>
    %20 = arith.mulf %17, %19 : vector<16x324xf32>
    %21 = vector.shape_cast %20 : vector<16x324xf32> to vector<1x16x324xf32>
    %c0_15 = arith.constant 0 : index
    %c0_16 = arith.constant 0 : index
    %c0_17 = arith.constant 0 : index
    %22 = vector.load %arg7[%c0_15, %c0_16, %c0_17] : memref<1x16x324xf32, #tpu.memory_space<vmem>>, vector<1x16x324xf32>
    tpu.vector_store %arg7[%c0_15, %c0_16, %c0_17], %21 {strides = array<i32>} : memref<1x16x324xf32, #tpu.memory_space<vmem>>, vector<1x16x324xf32>,
    return
  }
  func.func @transform_0(%arg0: i32) -> (i32, i32, i32) {
    %c0_i32 = arith.constant 0 : i32
    %c0_i32_0 = arith.constant 0 : i32
    %c0_i32_1 = arith.constant 0 : i32
    return %arg0, %c0_i32, %c0_i32_0 : i32, i32, i32
  }
  func.func @transform_1(%arg0: i32) -> (i32, i32, i32) {
    %c0_i32 = arith.constant 0 : i32
    %c0_i32_0 = arith.constant 0 : i32
    %c0_i32_1 = arith.constant 0 : i32
    return %arg0, %c0_i32, %c0_i32_0 : i32, i32, i32
  }
  func.func @transform_2(%arg0: i32) -> (i32, i32, i32) {
    %c0_i32 = arith.constant 0 : i32
    %c0_i32_0 = arith.constant 0 : i32
    %c0_i32_1 = arith.constant 0 : i32
    return %arg0, %c0_i32, %c0_i32_0 : i32, i32, i32
  }
  func.func @transform_3(%arg0: i32) -> (i32, i32) {
    %c0_i32 = arith.constant 0 : i32
    %c0_i32_0 = arith.constant 0 : i32
    %c0_i32_1 = arith.constant 0 : i32
    return %c0_i32, %c0_i32_0 : i32, i32
  }
  func.func @transform_4(%arg0: i32) -> (i32, i32) {
    %c0_i32 = arith.constant 0 : i32
    %c0_i32_0 = arith.constant 0 : i32
    %c0_i32_1 = arith.constant 0 : i32
    return %c0_i32, %c0_i32_0 : i32, i32
  }
  func.func @transform_5(%arg0: i32) -> (i32, i32) {
    %c0_i32 = arith.constant 0 : i32
    %c0_i32_0 = arith.constant 0 : i32
    %c0_i32_1 = arith.constant 0 : i32
    return %c0_i32, %c0_i32_0 : i32, i32
  }
  func.func @transform_6(%arg0: i32) -> (i32, i32, i32) {
    %c0_i32 = arith.constant 0 : i32
    %c0_i32_0 = arith.constant 0 : i32
    %c0_i32_1 = arith.constant 0 : i32
    return %arg0, %c0_i32, %c0_i32_0 : i32, i32, i32
  }
}

module attributes {stable_mosaic.version = 11 : i64} {
  func.func @_esa_mid_kernel(%arg0: i32, %arg1: memref<1x4x9xf32, #tpu.memory_space<vmem>>, %arg2: memref<1x9xf32, #tpu.memory_space<vmem>>, %arg3: memref<4x36xf32, #tpu.memory_space<vmem>>, %arg4: memref<4x1xf32, #tpu.memory_space<vmem>>, %arg5: memref<4x36xf32, #tpu.memory_space<vmem>>, %arg6: memref<4x1xf32, #tpu.memory_space<vmem>>, %arg7: memref<4x36xf32, #tpu.memory_space<vmem>>, %arg8: memref<4x1xf32, #tpu.memory_space<vmem>>, %arg9: memref<1x4x9xf32, #tpu.memory_space<vmem>>) attributes {dimension_semantics = [#tpu.dimension_semantics<parallel>], iteration_bounds = array<i64: 2>, scalar_prefetch = 0 : i64, scratch_operands = 0 : i64, tpu.core_type = #tpu.core_type<tc>, window_params = [{transform_indices = @transform_0, window_bounds = array<i64: 1, 4, 9>}, {pipeline_mode = #tpu.pipeline_mode<synchronous>, transform_indices = @transform_1, window_bounds = array<i64: 1, 9>}, {pipeline_mode = #tpu.pipeline_mode<synchronous>, transform_indices = @transform_2, window_bounds = array<i64: 4, 36>}, {pipeline_mode = #tpu.pipeline_mode<synchronous>, transform_indices = @transform_3, window_bounds = array<i64: 4, 1>}, {pipeline_mode = #tpu.pipeline_mode<synchronous>, transform_indices = @transform_4, window_bounds = array<i64: 4, 36>}, {pipeline_mode = #tpu.pipeline_mode<synchronous>, transform_indices = @transform_5, window_bounds = array<i64: 4, 1>}, {pipeline_mode = #tpu.pipeline_mode<synchronous>, transform_indices = @transform_6, window_bounds = array<i64: 4, 36>}, {pipeline_mode = #tpu.pipeline_mode<synchronous>, transform_indices = @transform_7, window_bounds = array<i64: 4, 1>}, {transform_indices = @transform_8, window_bounds = array<i64: 1, 4, 9>}]} {
    %c0 = arith.constant 0 : index
    %c0_0 = arith.constant 0 : index
    %0 = vector.load %arg2[%c0, %c0_0] : memref<1x9xf32, #tpu.memory_space<vmem>>, vector<1x9xf32>
    %c0_1 = arith.constant 0 : index
    %c0_2 = arith.constant 0 : index
    %c0_3 = arith.constant 0 : index
    %1 = vector.load %arg1[%c0_1, %c0_2, %c0_3] : memref<1x4x9xf32, #tpu.memory_space<vmem>>, vector<1x4x9xf32>
    %2 = vector.shape_cast %1 : vector<1x4x9xf32> to vector<4x9xf32>
    %c0_4 = arith.constant 0 : index
    %c0_5 = arith.constant 0 : index
    %3 = vector.load %arg3[%c0_4, %c0_5] : memref<4x36xf32, #tpu.memory_space<vmem>>, vector<4x36xf32>
    %c0_6 = arith.constant 0 : index
    %c0_7 = arith.constant 0 : index
    %4 = vector.load %arg4[%c0_6, %c0_7] : memref<4x1xf32, #tpu.memory_space<vmem>>, vector<4x1xf32>
    %cst = arith.constant 0.000000e+00 : f32
    %5 = vector.broadcast %cst : f32 to vector<4x4xf32>
    %6 = tpu.concatenate %5, %2, %5 in 1 : vector<4x4xf32>, vector<4x9xf32>, vector<4x4xf32> -> vector<4x17xf32>
    %7 = vector.extract_strided_slice %3 {offsets = [0, 0], sizes = [4, 4], strides = [1, 1]} : vector<4x36xf32> to vector<4x4xf32>
    %8 = vector.extract_strided_slice %6 {offsets = [0, 0], sizes = [4, 9], strides = [1, 1]} : vector<4x17xf32> to vector<4x9xf32>
    %cst_8 = arith.constant dense<0.000000e+00> : vector<4x9xf32>
    %9 = tpu.matmul %7, %8, %cst_8 {dimension_numbers = #tpu.dot_dimension_numbers<[1], [0], [0], [1], [0, 0, 1, 1], [], []>} : vector<4x4xf32>, vector<4x9xf32>, vector<4x9xf32> -> vector<4x9xf32>
    %10 = vector.extract_strided_slice %3 {offsets = [0, 4], sizes = [4, 4], strides = [1, 1]} : vector<4x36xf32> to vector<4x4xf32>
    %11 = vector.extract_strided_slice %6 {offsets = [0, 1], sizes = [4, 9], strides = [1, 1]} : vector<4x17xf32> to vector<4x9xf32>
    %cst_9 = arith.constant dense<0.000000e+00> : vector<4x9xf32>
    %12 = tpu.matmul %10, %11, %cst_9 {dimension_numbers = #tpu.dot_dimension_numbers<[1], [0], [0], [1], [0, 0, 1, 1], [], []>} : vector<4x4xf32>, vector<4x9xf32>, vector<4x9xf32> -> vector<4x9xf32>
    %13 = arith.addf %9, %12 : vector<4x9xf32>
    %14 = vector.extract_strided_slice %3 {offsets = [0, 8], sizes = [4, 4], strides = [1, 1]} : vector<4x36xf32> to vector<4x4xf32>
    %15 = vector.extract_strided_slice %6 {offsets = [0, 2], sizes = [4, 9], strides = [1, 1]} : vector<4x17xf32> to vector<4x9xf32>
    %cst_10 = arith.constant dense<0.000000e+00> : vector<4x9xf32>
    %16 = tpu.matmul %14, %15, %cst_10 {dimension_numbers = #tpu.dot_dimension_numbers<[1], [0], [0], [1], [0, 0, 1, 1], [], []>} : vector<4x4xf32>, vector<4x9xf32>, vector<4x9xf32> -> vector<4x9xf32>
    %17 = arith.addf %13, %16 : vector<4x9xf32>
    %18 = vector.extract_strided_slice %3 {offsets = [0, 12], sizes = [4, 4], strides = [1, 1]} : vector<4x36xf32> to vector<4x4xf32>
    %19 = vector.extract_strided_slice %6 {offsets = [0, 3], sizes = [4, 9], strides = [1, 1]} : vector<4x17xf32> to vector<4x9xf32>
    %cst_11 = arith.constant dense<0.000000e+00> : vector<4x9xf32>
    %20 = tpu.matmul %18, %19, %cst_11 {dimension_numbers = #tpu.dot_dimension_numbers<[1], [0], [0], [1], [0, 0, 1, 1], [], []>} : vector<4x4xf32>, vector<4x9xf32>, vector<4x9xf32> -> vector<4x9xf32>
    %21 = arith.addf %17, %20 : vector<4x9xf32>
    %22 = vector.extract_strided_slice %3 {offsets = [0, 16], sizes = [4, 4], strides = [1, 1]} : vector<4x36xf32> to vector<4x4xf32>
    %23 = vector.extract_strided_slice %6 {offsets = [0, 4], sizes = [4, 9], strides = [1, 1]} : vector<4x17xf32> to vector<4x9xf32>
    %cst_12 = arith.constant dense<0.000000e+00> : vector<4x9xf32>
    %24 = tpu.matmul %22, %23, %cst_12 {dimension_numbers = #tpu.dot_dimension_numbers<[1], [0], [0], [1], [0, 0, 1, 1], [], []>} : vector<4x4xf32>, vector<4x9xf32>, vector<4x9xf32> -> vector<4x9xf32>
    %25 = arith.addf %21, %24 : vector<4x9xf32>
    %26 = vector.extract_strided_slice %3 {offsets = [0, 20], sizes = [4, 4], strides = [1, 1]} : vector<4x36xf32> to vector<4x4xf32>
    %27 = vector.extract_strided_slice %6 {offsets = [0, 5], sizes = [4, 9], strides = [1, 1]} : vector<4x17xf32> to vector<4x9xf32>
    %cst_13 = arith.constant dense<0.000000e+00> : vector<4x9xf32>
    %28 = tpu.matmul %26, %27, %cst_13 {dimension_numbers = #tpu.dot_dimension_numbers<[1], [0], [0], [1], [0, 0, 1, 1], [], []>} : vector<4x4xf32>, vector<4x9xf32>, vector<4x9xf32> -> vector<4x9xf32>
    %29 = arith.addf %25, %28 : vector<4x9xf32>
    %30 = vector.extract_strided_slice %3 {offsets = [0, 24], sizes = [4, 4], strides = [1, 1]} : vector<4x36xf32> to vector<4x4xf32>
    %31 = vector.extract_strided_slice %6 {offsets = [0, 6], sizes = [4, 9], strides = [1, 1]} : vector<4x17xf32> to vector<4x9xf32>
    %cst_14 = arith.constant dense<0.000000e+00> : vector<4x9xf32>
    %32 = tpu.matmul %30, %31, %cst_14 {dimension_numbers = #tpu.dot_dimension_numbers<[1], [0], [0], [1], [0, 0, 1, 1], [], []>} : vector<4x4xf32>, vector<4x9xf32>, vector<4x9xf32> -> vector<4x9xf32>
    %33 = arith.addf %29, %32 : vector<4x9xf32>
    %34 = vector.extract_strided_slice %3 {offsets = [0, 28], sizes = [4, 4], strides = [1, 1]} : vector<4x36xf32> to vector<4x4xf32>
    %35 = vector.extract_strided_slice %6 {offsets = [0, 7], sizes = [4, 9], strides = [1, 1]} : vector<4x17xf32> to vector<4x9xf32>
    %cst_15 = arith.constant dense<0.000000e+00> : vector<4x9xf32>
    %36 = tpu.matmul %34, %35, %cst_15 {dimension_numbers = #tpu.dot_dimension_numbers<[1], [0], [0], [1], [0, 0, 1, 1], [], []>} : vector<4x4xf32>, vector<4x9xf32>, vector<4x9xf32> -> vector<4x9xf32>
    %37 = arith.addf %33, %36 : vector<4x9xf32>
    %38 = vector.extract_strided_slice %3 {offsets = [0, 32], sizes = [4, 4], strides = [1, 1]} : vector<4x36xf32> to vector<4x4xf32>
    %39 = vector.extract_strided_slice %6 {offsets = [0, 8], sizes = [4, 9], strides = [1, 1]} : vector<4x17xf32> to vector<4x9xf32>
    %cst_16 = arith.constant dense<0.000000e+00> : vector<4x9xf32>
    %40 = tpu.matmul %38, %39, %cst_16 {dimension_numbers = #tpu.dot_dimension_numbers<[1], [0], [0], [1], [0, 0, 1, 1], [], []>} : vector<4x4xf32>, vector<4x9xf32>, vector<4x9xf32> -> vector<4x9xf32>
    %41 = arith.addf %37, %40 : vector<4x9xf32>
    %42 = vector.broadcast %4 : vector<4x1xf32> to vector<4x9xf32>
    %43 = arith.addf %41, %42 : vector<4x9xf32>
    %cst_17 = arith.constant 0.000000e+00 : f32
    %44 = vector.broadcast %cst_17 : f32 to vector<4x9xf32>
    %45 = arith.maximumf %43, %44 : vector<4x9xf32>
    %46 = vector.broadcast %0 : vector<1x9xf32> to vector<4x9xf32>
    %47 = arith.mulf %45, %46 : vector<4x9xf32>
    %c0_18 = arith.constant 0 : index
    %c0_19 = arith.constant 0 : index
    %48 = vector.load %arg5[%c0_18, %c0_19] : memref<4x36xf32, #tpu.memory_space<vmem>>, vector<4x36xf32>
    %c0_20 = arith.constant 0 : index
    %c0_21 = arith.constant 0 : index
    %49 = vector.load %arg6[%c0_20, %c0_21] : memref<4x1xf32, #tpu.memory_space<vmem>>, vector<4x1xf32>
    %cst_22 = arith.constant 0.000000e+00 : f32
    %50 = vector.broadcast %cst_22 : f32 to vector<4x4xf32>
    %51 = tpu.concatenate %50, %47, %50 in 1 : vector<4x4xf32>, vector<4x9xf32>, vector<4x4xf32> -> vector<4x17xf32>
    %52 = vector.extract_strided_slice %48 {offsets = [0, 0], sizes = [4, 4], strides = [1, 1]} : vector<4x36xf32> to vector<4x4xf32>
    %53 = vector.extract_strided_slice %51 {offsets = [0, 0], sizes = [4, 9], strides = [1, 1]} : vector<4x17xf32> to vector<4x9xf32>
    %cst_23 = arith.constant dense<0.000000e+00> : vector<4x9xf32>
    %54 = tpu.matmul %52, %53, %cst_23 {dimension_numbers = #tpu.dot_dimension_numbers<[1], [0], [0], [1], [0, 0, 1, 1], [], []>} : vector<4x4xf32>, vector<4x9xf32>, vector<4x9xf32> -> vector<4x9xf32>
    %55 = vector.extract_strided_slice %48 {offsets = [0, 4], sizes = [4, 4], strides = [1, 1]} : vector<4x36xf32> to vector<4x4xf32>
    %56 = vector.extract_strided_slice %51 {offsets = [0, 1], sizes = [4, 9], strides = [1, 1]} : vector<4x17xf32> to vector<4x9xf32>
    %cst_24 = arith.constant dense<0.000000e+00> : vector<4x9xf32>
    %57 = tpu.matmul %55, %56, %cst_24 {dimension_numbers = #tpu.dot_dimension_numbers<[1], [0], [0], [1], [0, 0, 1, 1], [], []>} : vector<4x4xf32>, vector<4x9xf32>, vector<4x9xf32> -> vector<4x9xf32>
    %58 = arith.addf %54, %57 : vector<4x9xf32>
    %59 = vector.extract_strided_slice %48 {offsets = [0, 8], sizes = [4, 4], strides = [1, 1]} : vector<4x36xf32> to vector<4x4xf32>
    %60 = vector.extract_strided_slice %51 {offsets = [0, 2], sizes = [4, 9], strides = [1, 1]} : vector<4x17xf32> to vector<4x9xf32>
    %cst_25 = arith.constant dense<0.000000e+00> : vector<4x9xf32>
    %61 = tpu.matmul %59, %60, %cst_25 {dimension_numbers = #tpu.dot_dimension_numbers<[1], [0], [0], [1], [0, 0, 1, 1], [], []>} : vector<4x4xf32>, vector<4x9xf32>, vector<4x9xf32> -> vector<4x9xf32>
    %62 = arith.addf %58, %61 : vector<4x9xf32>
    %63 = vector.extract_strided_slice %48 {offsets = [0, 12], sizes = [4, 4], strides = [1, 1]} : vector<4x36xf32> to vector<4x4xf32>
    %64 = vector.extract_strided_slice %51 {offsets = [0, 3], sizes = [4, 9], strides = [1, 1]} : vector<4x17xf32> to vector<4x9xf32>
    %cst_26 = arith.constant dense<0.000000e+00> : vector<4x9xf32>
    %65 = tpu.matmul %63, %64, %cst_26 {dimension_numbers = #tpu.dot_dimension_numbers<[1], [0], [0], [1], [0, 0, 1, 1], [], []>} : vector<4x4xf32>, vector<4x9xf32>, vector<4x9xf32> -> vector<4x9xf32>
    %66 = arith.addf %62, %65 : vector<4x9xf32>
    %67 = vector.extract_strided_slice %48 {offsets = [0, 16], sizes = [4, 4], strides = [1, 1]} : vector<4x36xf32> to vector<4x4xf32>
    %68 = vector.extract_strided_slice %51 {offsets = [0, 4], sizes = [4, 9], strides = [1, 1]} : vector<4x17xf32> to vector<4x9xf32>
    %cst_27 = arith.constant dense<0.000000e+00> : vector<4x9xf32>
    %69 = tpu.matmul %67, %68, %cst_27 {dimension_numbers = #tpu.dot_dimension_numbers<[1], [0], [0], [1], [0, 0, 1, 1], [], []>} : vector<4x4xf32>, vector<4x9xf32>, vector<4x9xf32> -> vector<4x9xf32>
    %70 = arith.addf %66, %69 : vector<4x9xf32>
    %71 = vector.extract_strided_slice %48 {offsets = [0, 20], sizes = [4, 4], strides = [1, 1]} : vector<4x36xf32> to vector<4x4xf32>
    %72 = vector.extract_strided_slice %51 {offsets = [0, 5], sizes = [4, 9], strides = [1, 1]} : vector<4x17xf32> to vector<4x9xf32>
    %cst_28 = arith.constant dense<0.000000e+00> : vector<4x9xf32>
    %73 = tpu.matmul %71, %72, %cst_28 {dimension_numbers = #tpu.dot_dimension_numbers<[1], [0], [0], [1], [0, 0, 1, 1], [], []>} : vector<4x4xf32>, vector<4x9xf32>, vector<4x9xf32> -> vector<4x9xf32>
    %74 = arith.addf %70, %73 : vector<4x9xf32>
    %75 = vector.extract_strided_slice %48 {offsets = [0, 24], sizes = [4, 4], strides = [1, 1]} : vector<4x36xf32> to vector<4x4xf32>
    %76 = vector.extract_strided_slice %51 {offsets = [0, 6], sizes = [4, 9], strides = [1, 1]} : vector<4x17xf32> to vector<4x9xf32>
    %cst_29 = arith.constant dense<0.000000e+00> : vector<4x9xf32>
    %77 = tpu.matmul %75, %76, %cst_29 {dimension_numbers = #tpu.dot_dimension_numbers<[1], [0], [0], [1], [0, 0, 1, 1], [], []>} : vector<4x4xf32>, vector<4x9xf32>, vector<4x9xf32> -> vector<4x9xf32>
    %78 = arith.addf %74, %77 : vector<4x9xf32>
    %79 = vector.extract_strided_slice %48 {offsets = [0, 28], sizes = [4, 4], strides = [1, 1]} : vector<4x36xf32> to vector<4x4xf32>
    %80 = vector.extract_strided_slice %51 {offsets = [0, 7], sizes = [4, 9], strides = [1, 1]} : vector<4x17xf32> to vector<4x9xf32>
    %cst_30 = arith.constant dense<0.000000e+00> : vector<4x9xf32>
    %81 = tpu.matmul %79, %80, %cst_30 {dimension_numbers = #tpu.dot_dimension_numbers<[1], [0], [0], [1], [0, 0, 1, 1], [], []>} : vector<4x4xf32>, vector<4x9xf32>, vector<4x9xf32> -> vector<4x9xf32>
    %82 = arith.addf %78, %81 : vector<4x9xf32>
    %83 = vector.extract_strided_slice %48 {offsets = [0, 32], sizes = [4, 4], strides = [1, 1]} : vector<4x36xf32> to vector<4x4xf32>
    %84 = vector.extract_strided_slice %51 {offsets = [0, 8], sizes = [4, 9], strides = [1, 1]} : vector<4x17xf32> to vector<4x9xf32>
    %cst_31 = arith.constant dense<0.000000e+00> : vector<4x9xf32>
    %85 = tpu.matmul %83, %84, %cst_31 {dimension_numbers = #tpu.dot_dimension_numbers<[1], [0], [0], [1], [0, 0, 1, 1], [], []>} : vector<4x4xf32>, vector<4x9xf32>, vector<4x9xf32> -> vector<4x9xf32>
    %86 = arith.addf %82, %85 : vector<4x9xf32>
    %87 = vector.broadcast %49 : vector<4x1xf32> to vector<4x9xf32>
    %88 = arith.addf %86, %87 : vector<4x9xf32>
    %cst_32 = arith.constant 0.000000e+00 : f32
    %89 = vector.broadcast %cst_32 : f32 to vector<4x9xf32>
    %90 = arith.maximumf %88, %89 : vector<4x9xf32>
    %91 = vector.broadcast %0 : vector<1x9xf32> to vector<4x9xf32>
    %92 = arith.mulf %90, %91 : vector<4x9xf32>
    %c0_33 = arith.constant 0 : index
    %c0_34 = arith.constant 0 : index
    %93 = vector.load %arg7[%c0_33, %c0_34] : memref<4x36xf32, #tpu.memory_space<vmem>>, vector<4x36xf32>
    %c0_35 = arith.constant 0 : index
    %c0_36 = arith.constant 0 : index
    %94 = vector.load %arg8[%c0_35, %c0_36] : memref<4x1xf32, #tpu.memory_space<vmem>>, vector<4x1xf32>
    %cst_37 = arith.constant 0.000000e+00 : f32
    %95 = vector.broadcast %cst_37 : f32 to vector<4x4xf32>
    %96 = tpu.concatenate %95, %92, %95 in 1 : vector<4x4xf32>, vector<4x9xf32>, vector<4x4xf32> -> vector<4x17xf32>
    %97 = vector.extract_strided_slice %93 {offsets = [0, 0], sizes = [4, 4], strides = [1, 1]} : vector<4x36xf32> to vector<4x4xf32>
    %98 = vector.extract_strided_slice %96 {offsets = [0, 0], sizes = [4, 9], strides = [1, 1]} : vector<4x17xf32> to vector<4x9xf32>
    %cst_38 = arith.constant dense<0.000000e+00> : vector<4x9xf32>
    %99 = tpu.matmul %97, %98, %cst_38 {dimension_numbers = #tpu.dot_dimension_numbers<[1], [0], [0], [1], [0, 0, 1, 1], [], []>} : vector<4x4xf32>, vector<4x9xf32>, vector<4x9xf32> -> vector<4x9xf32>
    %100 = vector.extract_strided_slice %93 {offsets = [0, 4], sizes = [4, 4], strides = [1, 1]} : vector<4x36xf32> to vector<4x4xf32>
    %101 = vector.extract_strided_slice %96 {offsets = [0, 1], sizes = [4, 9], strides = [1, 1]} : vector<4x17xf32> to vector<4x9xf32>
    %cst_39 = arith.constant dense<0.000000e+00> : vector<4x9xf32>
    %102 = tpu.matmul %100, %101, %cst_39 {dimension_numbers = #tpu.dot_dimension_numbers<[1], [0], [0], [1], [0, 0, 1, 1], [], []>} : vector<4x4xf32>, vector<4x9xf32>, vector<4x9xf32> -> vector<4x9xf32>
    %103 = arith.addf %99, %102 : vector<4x9xf32>
    %104 = vector.extract_strided_slice %93 {offsets = [0, 8], sizes = [4, 4], strides = [1, 1]} : vector<4x36xf32> to vector<4x4xf32>
    %105 = vector.extract_strided_slice %96 {offsets = [0, 2], sizes = [4, 9], strides = [1, 1]} : vector<4x17xf32> to vector<4x9xf32>
    %cst_40 = arith.constant dense<0.000000e+00> : vector<4x9xf32>
    %106 = tpu.matmul %104, %105, %cst_40 {dimension_numbers = #tpu.dot_dimension_numbers<[1], [0], [0], [1], [0, 0, 1, 1], [], []>} : vector<4x4xf32>, vector<4x9xf32>, vector<4x9xf32> -> vector<4x9xf32>
    %107 = arith.addf %103, %106 : vector<4x9xf32>
    %108 = vector.extract_strided_slice %93 {offsets = [0, 12], sizes = [4, 4], strides = [1, 1]} : vector<4x36xf32> to vector<4x4xf32>
    %109 = vector.extract_strided_slice %96 {offsets = [0, 3], sizes = [4, 9], strides = [1, 1]} : vector<4x17xf32> to vector<4x9xf32>
    %cst_41 = arith.constant dense<0.000000e+00> : vector<4x9xf32>
    %110 = tpu.matmul %108, %109, %cst_41 {dimension_numbers = #tpu.dot_dimension_numbers<[1], [0], [0], [1], [0, 0, 1, 1], [], []>} : vector<4x4xf32>, vector<4x9xf32>, vector<4x9xf32> -> vector<4x9xf32>
    %111 = arith.addf %107, %110 : vector<4x9xf32>
    %112 = vector.extract_strided_slice %93 {offsets = [0, 16], sizes = [4, 4], strides = [1, 1]} : vector<4x36xf32> to vector<4x4xf32>
    %113 = vector.extract_strided_slice %96 {offsets = [0, 4], sizes = [4, 9], strides = [1, 1]} : vector<4x17xf32> to vector<4x9xf32>
    %cst_42 = arith.constant dense<0.000000e+00> : vector<4x9xf32>
    %114 = tpu.matmul %112, %113, %cst_42 {dimension_numbers = #tpu.dot_dimension_numbers<[1], [0], [0], [1], [0, 0, 1, 1], [], []>} : vector<4x4xf32>, vector<4x9xf32>, vector<4x9xf32> -> vector<4x9xf32>
    %115 = arith.addf %111, %114 : vector<4x9xf32>
    %116 = vector.extract_strided_slice %93 {offsets = [0, 20], sizes = [4, 4], strides = [1, 1]} : vector<4x36xf32> to vector<4x4xf32>
    %117 = vector.extract_strided_slice %96 {offsets = [0, 5], sizes = [4, 9], strides = [1, 1]} : vector<4x17xf32> to vector<4x9xf32>
    %cst_43 = arith.constant dense<0.000000e+00> : vector<4x9xf32>
    %118 = tpu.matmul %116, %117, %cst_43 {dimension_numbers = #tpu.dot_dimension_numbers<[1], [0], [0], [1], [0, 0, 1, 1], [], []>} : vector<4x4xf32>, vector<4x9xf32>, vector<4x9xf32> -> vector<4x9xf32>
    %119 = arith.addf %115, %118 : vector<4x9xf32>
    %120 = vector.extract_strided_slice %93 {offsets = [0, 24], sizes = [4, 4], strides = [1, 1]} : vector<4x36xf32> to vector<4x4xf32>
    %121 = vector.extract_strided_slice %96 {offsets = [0, 6], sizes = [4, 9], strides = [1, 1]} : vector<4x17xf32> to vector<4x9xf32>
    %cst_44 = arith.constant dense<0.000000e+00> : vector<4x9xf32>
    %122 = tpu.matmul %120, %121, %cst_44 {dimension_numbers = #tpu.dot_dimension_numbers<[1], [0], [0], [1], [0, 0, 1, 1], [], []>} : vector<4x4xf32>, vector<4x9xf32>, vector<4x9xf32> -> vector<4x9xf32>
    %123 = arith.addf %119, %122 : vector<4x9xf32>
    %124 = vector.extract_strided_slice %93 {offsets = [0, 28], sizes = [4, 4], strides = [1, 1]} : vector<4x36xf32> to vector<4x4xf32>
    %125 = vector.extract_strided_slice %96 {offsets = [0, 7], sizes = [4, 9], strides = [1, 1]} : vector<4x17xf32> to vector<4x9xf32>
    %cst_45 = arith.constant dense<0.000000e+00> : vector<4x9xf32>
    %126 = tpu.matmul %124, %125, %cst_45 {dimension_numbers = #tpu.dot_dimension_numbers<[1], [0], [0], [1], [0, 0, 1, 1], [], []>} : vector<4x4xf32>, vector<4x9xf32>, vector<4x9xf32> -> vector<4x9xf32>
    %127 = arith.addf %123, %126 : vector<4x9xf32>
    %128 = vector.extract_strided_slice %93 {offsets = [0, 32], sizes = [4, 4], strides = [1, 1]} : vector<4x36xf32> to vector<4x4xf32>
    %129 = vector.extract_strided_slice %96 {offsets = [0, 8], sizes = [4, 9], strides = [1, 1]} : vector<4x17xf32> to vector<4x9xf32>
    %cst_46 = arith.constant dense<0.000000e+00> : vector<4x9xf32>
    %130 = tpu.matmul %128, %129, %cst_46 {dimension_numbers = #tpu.dot_dimension_numbers<[1], [0], [0], [1], [0, 0, 1, 1], [], []>} : vector<4x4xf32>, vector<4x9xf32>, vector<4x9xf32> -> vector<4x9xf32>
    %131 = arith.addf %127, %130 : vector<4x9xf32>
    %132 = vector.broadcast %94 : vector<4x1xf32> to vector<4x9xf32>
    %133 = arith.addf %131, %132 : vector<4x9xf32>
    %134 = vector.broadcast %0 : vector<1x9xf32> to vector<4x9xf32>
    %135 = arith.mulf %133, %134 : vector<4x9xf32>
    %136 = vector.shape_cast %135 : vector<4x9xf32> to vector<1x4x9xf32>
    %c0_47 = arith.constant 0 : index
    %c0_48 = arith.constant 0 : index
    %c0_49 = arith.constant 0 : index
    %137 = vector.load %arg9[%c0_47, %c0_48, %c0_49] : memref<1x4x9xf32, #tpu.memory_space<vmem>>, vector<1x4x9xf32>
    tpu.vector_store %arg9[%c0_47, %c0_48, %c0_49], %136 {strides = array<i32>} : memref<1x4x9xf32, #tpu.memory_space<vmem>>, vector<1x4x9xf32>,
    return
  }
  func.func @transform_0(%arg0: i32) -> (i32, i32, i32) {
    %c0_i32 = arith.constant 0 : i32
    %c0_i32_0 = arith.constant 0 : i32
    %c0_i32_1 = arith.constant 0 : i32
    return %arg0, %c0_i32, %c0_i32_0 : i32, i32, i32
  }
  func.func @transform_1(%arg0: i32) -> (i32, i32) {
    %c0_i32 = arith.constant 0 : i32
    %c0_i32_0 = arith.constant 0 : i32
    %c0_i32_1 = arith.constant 0 : i32
    return %c0_i32, %c0_i32_0 : i32, i32
  }
  func.func @transform_2(%arg0: i32) -> (i32, i32) {
    %c0_i32 = arith.constant 0 : i32
    %c0_i32_0 = arith.constant 0 : i32
    %c0_i32_1 = arith.constant 0 : i32
    return %c0_i32, %c0_i32_0 : i32, i32
  }
  func.func @transform_3(%arg0: i32) -> (i32, i32) {
    %c0_i32 = arith.constant 0 : i32
    %c0_i32_0 = arith.constant 0 : i32
    %c0_i32_1 = arith.constant 0 : i32
    return %c0_i32, %c0_i32_0 : i32, i32
  }
  func.func @transform_4(%arg0: i32) -> (i32, i32) {
    %c0_i32 = arith.constant 0 : i32
    %c0_i32_0 = arith.constant 0 : i32
    %c0_i32_1 = arith.constant 0 : i32
    return %c0_i32, %c0_i32_0 : i32, i32
  }
  func.func @transform_5(%arg0: i32) -> (i32, i32) {
    %c0_i32 = arith.constant 0 : i32
    %c0_i32_0 = arith.constant 0 : i32
    %c0_i32_1 = arith.constant 0 : i32
    return %c0_i32, %c0_i32_0 : i32, i32
  }
  func.func @transform_6(%arg0: i32) -> (i32, i32) {
    %c0_i32 = arith.constant 0 : i32
    %c0_i32_0 = arith.constant 0 : i32
    %c0_i32_1 = arith.constant 0 : i32
    return %c0_i32, %c0_i32_0 : i32, i32
  }
  func.func @transform_7(%arg0: i32) -> (i32, i32) {
    %c0_i32 = arith.constant 0 : i32
    %c0_i32_0 = arith.constant 0 : i32
    %c0_i32_1 = arith.constant 0 : i32
    return %c0_i32, %c0_i32_0 : i32, i32
  }
  func.func @transform_8(%arg0: i32) -> (i32, i32, i32) {
    %c0_i32 = arith.constant 0 : i32
    %c0_i32_0 = arith.constant 0 : i32
    %c0_i32_1 = arith.constant 0 : i32
    return %arg0, %c0_i32, %c0_i32_0 : i32, i32, i32
  }
}

module attributes {stable_mosaic.version = 11 : i64} {
  func.func @_tail_kernel(%arg0: i32, %arg1: memref<1x16x324xf32, #tpu.memory_space<vmem>>, %arg2: memref<1x16x324xf32, #tpu.memory_space<vmem>>, %arg3: memref<1x16x324xf32, #tpu.memory_space<vmem>>, %arg4: memref<1x16x324xf32, #tpu.memory_space<vmem>>, %arg5: memref<1x16x324xf32, #tpu.memory_space<vmem>>, %arg6: memref<1x324xf32, #tpu.memory_space<vmem>>, %arg7: memref<16x64xf32, #tpu.memory_space<vmem>>, %arg8: memref<16x1xf32, #tpu.memory_space<vmem>>, %arg9: memref<16x144xf32, #tpu.memory_space<vmem>>, %arg10: memref<16x1xf32, #tpu.memory_space<vmem>>, %arg11: memref<48x144xf32, #tpu.memory_space<vmem>>, %arg12: memref<48x1xf32, #tpu.memory_space<vmem>>, %arg13: memref<1x48x324xf32, #tpu.memory_space<vmem>>) attributes {dimension_semantics = [#tpu.dimension_semantics<parallel>], iteration_bounds = array<i64: 2>, scalar_prefetch = 0 : i64, scratch_operands = 0 : i64, tpu.core_type = #tpu.core_type<tc>, window_params = [{transform_indices = @transform_0, window_bounds = array<i64: 1, 16, 324>}, {transform_indices = @transform_1, window_bounds = array<i64: 1, 16, 324>}, {transform_indices = @transform_2, window_bounds = array<i64: 1, 16, 324>}, {transform_indices = @transform_3, window_bounds = array<i64: 1, 16, 324>}, {transform_indices = @transform_4, window_bounds = array<i64: 1, 16, 324>}, {pipeline_mode = #tpu.pipeline_mode<synchronous>, transform_indices = @transform_5, window_bounds = array<i64: 1, 324>}, {pipeline_mode = #tpu.pipeline_mode<synchronous>, transform_indices = @transform_6, window_bounds = array<i64: 16, 64>}, {pipeline_mode = #tpu.pipeline_mode<synchronous>, transform_indices = @transform_7, window_bounds = array<i64: 16, 1>}, {pipeline_mode = #tpu.pipeline_mode<synchronous>, transform_indices = @transform_8, window_bounds = array<i64: 16, 144>}, {pipeline_mode = #tpu.pipeline_mode<synchronous>, transform_indices = @transform_9, window_bounds = array<i64: 16, 1>}, {pipeline_mode = #tpu.pipeline_mode<synchronous>, transform_indices = @transform_10, window_bounds = array<i64: 48, 144>}, {pipeline_mode = #tpu.pipeline_mode<synchronous>, transform_indices = @transform_11, window_bounds = array<i64: 48, 1>}, {transform_indices = @transform_12, window_bounds = array<i64: 1, 48, 324>}]} {
    %c0 = arith.constant 0 : index
    %c0_0 = arith.constant 0 : index
    %0 = vector.load %arg6[%c0, %c0_0] : memref<1x324xf32, #tpu.memory_space<vmem>>, vector<1x324xf32>
    %c0_1 = arith.constant 0 : index
    %c0_2 = arith.constant 0 : index
    %c0_3 = arith.constant 0 : index
    %1 = vector.load %arg1[%c0_1, %c0_2, %c0_3] : memref<1x16x324xf32, #tpu.memory_space<vmem>>, vector<1x16x324xf32>
    %2 = vector.shape_cast %1 : vector<1x16x324xf32> to vector<16x324xf32>
    %c0_4 = arith.constant 0 : index
    %c0_5 = arith.constant 0 : index
    %c0_6 = arith.constant 0 : index
    %3 = vector.load %arg2[%c0_4, %c0_5, %c0_6] : memref<1x16x324xf32, #tpu.memory_space<vmem>>, vector<1x16x324xf32>
    %4 = vector.shape_cast %3 : vector<1x16x324xf32> to vector<16x324xf32>
    %c0_7 = arith.constant 0 : index
    %c0_8 = arith.constant 0 : index
    %c0_9 = arith.constant 0 : index
    %5 = vector.load %arg3[%c0_7, %c0_8, %c0_9] : memref<1x16x324xf32, #tpu.memory_space<vmem>>, vector<1x16x324xf32>
    %6 = vector.shape_cast %5 : vector<1x16x324xf32> to vector<16x324xf32>
    %c0_10 = arith.constant 0 : index
    %c0_11 = arith.constant 0 : index
    %c0_12 = arith.constant 0 : index
    %7 = vector.load %arg4[%c0_10, %c0_11, %c0_12] : memref<1x16x324xf32, #tpu.memory_space<vmem>>, vector<1x16x324xf32>
    %8 = vector.shape_cast %7 : vector<1x16x324xf32> to vector<16x324xf32>
    %c0_13 = arith.constant 0 : index
    %c0_14 = arith.constant 0 : index
    %9 = vector.load %arg7[%c0_13, %c0_14] : memref<16x64xf32, #tpu.memory_space<vmem>>, vector<16x64xf32>
    %c0_15 = arith.constant 0 : index
    %c0_16 = arith.constant 0 : index
    %10 = vector.load %arg8[%c0_15, %c0_16] : memref<16x1xf32, #tpu.memory_space<vmem>>, vector<16x1xf32>
    %11 = vector.extract_strided_slice %9 {offsets = [0, 0], sizes = [16, 16], strides = [1, 1]} : vector<16x64xf32> to vector<16x16xf32>
    %cst = arith.constant dense<0.000000e+00> : vector<16x324xf32>
    %12 = tpu.matmul %11, %2, %cst {dimension_numbers = #tpu.dot_dimension_numbers<[1], [0], [0], [1], [0, 0, 1, 1], [], []>} : vector<16x16xf32>, vector<16x324xf32>, vector<16x324xf32> -> vector<16x324xf32>
    %13 = vector.extract_strided_slice %9 {offsets = [0, 16], sizes = [16, 16], strides = [1, 1]} : vector<16x64xf32> to vector<16x16xf32>
    %cst_17 = arith.constant dense<0.000000e+00> : vector<16x324xf32>
    %14 = tpu.matmul %13, %4, %cst_17 {dimension_numbers = #tpu.dot_dimension_numbers<[1], [0], [0], [1], [0, 0, 1, 1], [], []>} : vector<16x16xf32>, vector<16x324xf32>, vector<16x324xf32> -> vector<16x324xf32>
    %15 = arith.addf %12, %14 : vector<16x324xf32>
    %16 = vector.extract_strided_slice %9 {offsets = [0, 32], sizes = [16, 16], strides = [1, 1]} : vector<16x64xf32> to vector<16x16xf32>
    %cst_18 = arith.constant dense<0.000000e+00> : vector<16x324xf32>
    %17 = tpu.matmul %16, %6, %cst_18 {dimension_numbers = #tpu.dot_dimension_numbers<[1], [0], [0], [1], [0, 0, 1, 1], [], []>} : vector<16x16xf32>, vector<16x324xf32>, vector<16x324xf32> -> vector<16x324xf32>
    %18 = arith.addf %15, %17 : vector<16x324xf32>
    %19 = vector.extract_strided_slice %9 {offsets = [0, 48], sizes = [16, 16], strides = [1, 1]} : vector<16x64xf32> to vector<16x16xf32>
    %cst_19 = arith.constant dense<0.000000e+00> : vector<16x324xf32>
    %20 = tpu.matmul %19, %8, %cst_19 {dimension_numbers = #tpu.dot_dimension_numbers<[1], [0], [0], [1], [0, 0, 1, 1], [], []>} : vector<16x16xf32>, vector<16x324xf32>, vector<16x324xf32> -> vector<16x324xf32>
    %21 = arith.addf %18, %20 : vector<16x324xf32>
    %22 = vector.broadcast %10 : vector<16x1xf32> to vector<16x324xf32>
    %23 = arith.addf %21, %22 : vector<16x324xf32>
    %cst_20 = arith.constant 0.000000e+00 : f32
    %24 = vector.broadcast %cst_20 : f32 to vector<16x324xf32>
    %25 = arith.cmpf oge, %23, %24 : vector<16x324xf32>
    %cst_21 = arith.constant 5.000000e-02 : f32
    %26 = vector.broadcast %cst_21 : f32 to vector<16x324xf32>
    %27 = arith.mulf %23, %26 : vector<16x324xf32>
    %28 = arith.select %25, %23, %27 : vector<16x324xi1>, vector<16x324xf32>
    %29 = vector.broadcast %0 : vector<1x324xf32> to vector<16x324xf32>
    %30 = arith.mulf %28, %29 : vector<16x324xf32>
    %c0_22 = arith.constant 0 : index
    %c0_23 = arith.constant 0 : index
    %31 = vector.load %arg9[%c0_22, %c0_23] : memref<16x144xf32, #tpu.memory_space<vmem>>, vector<16x144xf32>
    %c0_24 = arith.constant 0 : index
    %c0_25 = arith.constant 0 : index
    %32 = vector.load %arg10[%c0_24, %c0_25] : memref<16x1xf32, #tpu.memory_space<vmem>>, vector<16x1xf32>
    %cst_26 = arith.constant 0.000000e+00 : f32
    %33 = vector.broadcast %cst_26 : f32 to vector<16x19xf32>
    %34 = tpu.concatenate %33, %30, %33 in 1 : vector<16x19xf32>, vector<16x324xf32>, vector<16x19xf32> -> vector<16x362xf32>
    %35 = vector.extract_strided_slice %34 {offsets = [0, 0], sizes = [16, 324], strides = [1, 1]} : vector<16x362xf32> to vector<16x324xf32>
    %36 = vector.extract_strided_slice %34 {offsets = [0, 1], sizes = [16, 324], strides = [1, 1]} : vector<16x362xf32> to vector<16x324xf32>
    %37 = vector.extract_strided_slice %34 {offsets = [0, 2], sizes = [16, 324], strides = [1, 1]} : vector<16x362xf32> to vector<16x324xf32>
    %38 = vector.extract_strided_slice %34 {offsets = [0, 18], sizes = [16, 324], strides = [1, 1]} : vector<16x362xf32> to vector<16x324xf32>
    %39 = vector.extract_strided_slice %34 {offsets = [0, 19], sizes = [16, 324], strides = [1, 1]} : vector<16x362xf32> to vector<16x324xf32>
    %40 = vector.extract_strided_slice %34 {offsets = [0, 20], sizes = [16, 324], strides = [1, 1]} : vector<16x362xf32> to vector<16x324xf32>
    %41 = vector.extract_strided_slice %34 {offsets = [0, 36], sizes = [16, 324], strides = [1, 1]} : vector<16x362xf32> to vector<16x324xf32>
    %42 = vector.extract_strided_slice %34 {offsets = [0, 37], sizes = [16, 324], strides = [1, 1]} : vector<16x362xf32> to vector<16x324xf32>
    %43 = vector.extract_strided_slice %34 {offsets = [0, 38], sizes = [16, 324], strides = [1, 1]} : vector<16x362xf32> to vector<16x324xf32>
    %44 = tpu.concatenate %35, %36, %37, %38, %39, %40, %41, %42, %43 in 0 : vector<16x324xf32>, vector<16x324xf32>, vector<16x324xf32>, vector<16x324xf32>, vector<16x324xf32>, vector<16x324xf32>, vector<16x324xf32>, vector<16x324xf32>, vector<16x324xf32> -> vector<144x324xf32>
    %cst_27 = arith.constant dense<0.000000e+00> : vector<16x324xf32>
    %45 = tpu.matmul %31, %44, %cst_27 {dimension_numbers = #tpu.dot_dimension_numbers<[1], [0], [0], [1], [0, 0, 1, 1], [], []>} : vector<16x144xf32>, vector<144x324xf32>, vector<16x324xf32> -> vector<16x324xf32>
    %46 = vector.broadcast %32 : vector<16x1xf32> to vector<16x324xf32>
    %47 = arith.addf %45, %46 : vector<16x324xf32>
    %c0_28 = arith.constant 0 : index
    %c0_29 = arith.constant 0 : index
    %c0_30 = arith.constant 0 : index
    %48 = vector.load %arg5[%c0_28, %c0_29, %c0_30] : memref<1x16x324xf32, #tpu.memory_space<vmem>>, vector<1x16x324xf32>
    %49 = vector.shape_cast %48 : vector<1x16x324xf32> to vector<16x324xf32>
    %50 = arith.addf %47, %49 : vector<16x324xf32>
    %51 = vector.broadcast %0 : vector<1x324xf32> to vector<16x324xf32>
    %52 = arith.mulf %50, %51 : vector<16x324xf32>
    %c0_31 = arith.constant 0 : index
    %c0_32 = arith.constant 0 : index
    %53 = vector.load %arg11[%c0_31, %c0_32] : memref<48x144xf32, #tpu.memory_space<vmem>>, vector<48x144xf32>
    %c0_33 = arith.constant 0 : index
    %c0_34 = arith.constant 0 : index
    %54 = vector.load %arg12[%c0_33, %c0_34] : memref<48x1xf32, #tpu.memory_space<vmem>>, vector<48x1xf32>
    %cst_35 = arith.constant 0.000000e+00 : f32
    %55 = vector.broadcast %cst_35 : f32 to vector<16x19xf32>
    %56 = tpu.concatenate %55, %52, %55 in 1 : vector<16x19xf32>, vector<16x324xf32>, vector<16x19xf32> -> vector<16x362xf32>
    %57 = vector.extract_strided_slice %56 {offsets = [0, 0], sizes = [16, 324], strides = [1, 1]} : vector<16x362xf32> to vector<16x324xf32>
    %58 = vector.extract_strided_slice %56 {offsets = [0, 1], sizes = [16, 324], strides = [1, 1]} : vector<16x362xf32> to vector<16x324xf32>
    %59 = vector.extract_strided_slice %56 {offsets = [0, 2], sizes = [16, 324], strides = [1, 1]} : vector<16x362xf32> to vector<16x324xf32>
    %60 = vector.extract_strided_slice %56 {offsets = [0, 18], sizes = [16, 324], strides = [1, 1]} : vector<16x362xf32> to vector<16x324xf32>
    %61 = vector.extract_strided_slice %56 {offsets = [0, 19], sizes = [16, 324], strides = [1, 1]} : vector<16x362xf32> to vector<16x324xf32>
    %62 = vector.extract_strided_slice %56 {offsets = [0, 20], sizes = [16, 324], strides = [1, 1]} : vector<16x362xf32> to vector<16x324xf32>
    %63 = vector.extract_strided_slice %56 {offsets = [0, 36], sizes = [16, 324], strides = [1, 1]} : vector<16x362xf32> to vector<16x324xf32>
    %64 = vector.extract_strided_slice %56 {offsets = [0, 37], sizes = [16, 324], strides = [1, 1]} : vector<16x362xf32> to vector<16x324xf32>
    %65 = vector.extract_strided_slice %56 {offsets = [0, 38], sizes = [16, 324], strides = [1, 1]} : vector<16x362xf32> to vector<16x324xf32>
    %66 = tpu.concatenate %57, %58, %59, %60, %61, %62, %63, %64, %65 in 0 : vector<16x324xf32>, vector<16x324xf32>, vector<16x324xf32>, vector<16x324xf32>, vector<16x324xf32>, vector<16x324xf32>, vector<16x324xf32>, vector<16x324xf32>, vector<16x324xf32> -> vector<144x324xf32>
    %cst_36 = arith.constant dense<0.000000e+00> : vector<48x324xf32>
    %67 = tpu.matmul %53, %66, %cst_36 {dimension_numbers = #tpu.dot_dimension_numbers<[1], [0], [0], [1], [0, 0, 1, 1], [], []>} : vector<48x144xf32>, vector<144x324xf32>, vector<48x324xf32> -> vector<48x324xf32>
    %68 = vector.broadcast %54 : vector<48x1xf32> to vector<48x324xf32>
    %69 = arith.addf %67, %68 : vector<48x324xf32>
    %70 = vector.broadcast %0 : vector<1x324xf32> to vector<48x324xf32>
    %71 = arith.mulf %69, %70 : vector<48x324xf32>
    %72 = vector.shape_cast %71 : vector<48x324xf32> to vector<1x48x324xf32>
    %c0_37 = arith.constant 0 : index
    %c0_38 = arith.constant 0 : index
    %c0_39 = arith.constant 0 : index
    %73 = vector.load %arg13[%c0_37, %c0_38, %c0_39] : memref<1x48x324xf32, #tpu.memory_space<vmem>>, vector<1x48x324xf32>
    tpu.vector_store %arg13[%c0_37, %c0_38, %c0_39], %72 {strides = array<i32>} : memref<1x48x324xf32, #tpu.memory_space<vmem>>, vector<1x48x324xf32>,
    return
  }
  func.func @transform_0(%arg0: i32) -> (i32, i32, i32) {
    %c0_i32 = arith.constant 0 : i32
    %c0_i32_0 = arith.constant 0 : i32
    %c0_i32_1 = arith.constant 0 : i32
    return %arg0, %c0_i32, %c0_i32_0 : i32, i32, i32
  }
  func.func @transform_1(%arg0: i32) -> (i32, i32, i32) {
    %c0_i32 = arith.constant 0 : i32
    %c0_i32_0 = arith.constant 0 : i32
    %c0_i32_1 = arith.constant 0 : i32
    return %arg0, %c0_i32, %c0_i32_0 : i32, i32, i32
  }
  func.func @transform_2(%arg0: i32) -> (i32, i32, i32) {
    %c0_i32 = arith.constant 0 : i32
    %c0_i32_0 = arith.constant 0 : i32
    %c0_i32_1 = arith.constant 0 : i32
    return %arg0, %c0_i32, %c0_i32_0 : i32, i32, i32
  }
  func.func @transform_3(%arg0: i32) -> (i32, i32, i32) {
    %c0_i32 = arith.constant 0 : i32
    %c0_i32_0 = arith.constant 0 : i32
    %c0_i32_1 = arith.constant 0 : i32
    return %arg0, %c0_i32, %c0_i32_0 : i32, i32, i32
  }
  func.func @transform_4(%arg0: i32) -> (i32, i32, i32) {
    %c0_i32 = arith.constant 0 : i32
    %c0_i32_0 = arith.constant 0 : i32
    %c0_i32_1 = arith.constant 0 : i32
    return %arg0, %c0_i32, %c0_i32_0 : i32, i32, i32
  }
  func.func @transform_5(%arg0: i32) -> (i32, i32) {
    %c0_i32 = arith.constant 0 : i32
    %c0_i32_0 = arith.constant 0 : i32
    %c0_i32_1 = arith.constant 0 : i32
    return %c0_i32, %c0_i32_0 : i32, i32
  }
  func.func @transform_6(%arg0: i32) -> (i32, i32) {
    %c0_i32 = arith.constant 0 : i32
    %c0_i32_0 = arith.constant 0 : i32
    %c0_i32_1 = arith.constant 0 : i32
    return %c0_i32, %c0_i32_0 : i32, i32
  }
  func.func @transform_7(%arg0: i32) -> (i32, i32) {
    %c0_i32 = arith.constant 0 : i32
    %c0_i32_0 = arith.constant 0 : i32
    %c0_i32_1 = arith.constant 0 : i32
    return %c0_i32, %c0_i32_0 : i32, i32
  }
  func.func @transform_8(%arg0: i32) -> (i32, i32) {
    %c0_i32 = arith.constant 0 : i32
    %c0_i32_0 = arith.constant 0 : i32
    %c0_i32_1 = arith.constant 0 : i32
    return %c0_i32, %c0_i32_0 : i32, i32
  }
  func.func @transform_9(%arg0: i32) -> (i32, i32) {
    %c0_i32 = arith.constant 0 : i32
    %c0_i32_0 = arith.constant 0 : i32
    %c0_i32_1 = arith.constant 0 : i32
    return %c0_i32, %c0_i32_0 : i32, i32
  }
  func.func @transform_10(%arg0: i32) -> (i32, i32) {
    %c0_i32 = arith.constant 0 : i32
    %c0_i32_0 = arith.constant 0 : i32
    %c0_i32_1 = arith.constant 0 : i32
    return %c0_i32, %c0_i32_0 : i32, i32
  }
  func.func @transform_11(%arg0: i32) -> (i32, i32) {
    %c0_i32 = arith.constant 0 : i32
    %c0_i32_0 = arith.constant 0 : i32
    %c0_i32_1 = arith.constant 0 : i32
    return %c0_i32, %c0_i32_0 : i32, i32
  }
  func.func @transform_12(%arg0: i32) -> (i32, i32, i32) {
    %c0_i32 = arith.constant 0 : i32
    %c0_i32_0 = arith.constant 0 : i32
    %c0_i32_1 = arith.constant 0 : i32
    return %arg0, %c0_i32, %c0_i32_0 : i32, i32, i32
  }
}

</mosaic_0001>

<bundles_post_ra>
// kernel: rfdn1_forward.14
= control target key start
LH: loop header
LB: loop body
LE: loop exit
PB: predicated region body
PF: predicated region fallthrough
CT: control target
= control target key end

     0   :  { %9 = vsyncpa [#allocation3], 0  ;;  %s1433_s15 = smov 0   ;;  %s1652_s0 = inlined_call_operand.vmem [shape: f32[2,3,324], index: 0, kind: input, shape index: {}]   ;;  %s1653_s1 = inlined_call_operand.vmem [shape: f32[1,324], index: 1, kind: input, shape index: {}]   ;;  %s1654_s2 = inlined_call_operand.hbm [shape: f32[16,27], index: 2, kind: input, shape index: {}]   ;;  %s1655_s3 = inlined_call_operand.vmem [shape: f32[16,1], index: 3, kind: input, shape index: {}]   ;;  %s1656_s4 = inlined_call_operand.vmem [shape: f32[2,16,324], index: 4, kind: output, shape index: {}]  }
   0x1 LB: > { %s149_s18 = sshll.u32 %s1654_s2, 4  ;;  %s1210_s19 = sadd.s32 4294967295, %s1386_s15   ;;  %s1386_s15 = sphi %s1433_s15, %s15_s15   ;;  %s150_s18 = int_to_ptr.hbm [resolvable:$true] %s149_s18 }
   0x2   : > { %p1212_p0 = scmp.ge.s32.totalorder %s1386_s15, 1  ;;  %p135_p1 = scmp.lt.s32.totalorder %s1386_s15, 3 }
   0x3   : > { %p1313_p2 = scmp.eq.s32.totalorder %s1210_s19, 0  ;;  %s1388_s20 = smov [#allocation2]  }
   0x4   : > { %p136_p3 = pnand %p1212_p0, %p135_p1  ;;  %s151_s21 = sshll.u32 %s1388_s20, 4  ;;  %s152_s21 = int_to_ptr.vmem [resolvable:$true] %s151_s21 }
   0x5   : > { %s1389_s22 = smov 128   ;;  %s1390_s23 = smov 8  }
   0x6   : > { %p1309_p4 = pneg %p136_p3  ;;  %178 = sbr.rel (%p136_p3) target bundleno = 512 (0x200), region = 36 }
   0x8   : > { %p1310_p5 = pnand %p1313_p2, %p1309_p4 }
   0xa   : > { %1312 = dma.hbm_to_vmem [thread:$0]  (!%p1310_p5), %s150_s18, 256, %s152_s21, [#allocation3], %s1389_s22, %s1389_s22, %s1390_s23  }
   0xb   : > { %1381 = dma.done.wait (%p1313_p2), [#allocation3], 256  }
   0xc   : > { %1383 = vsyncadd (%p1313_p2), [#allocation3], 4294967040  ;;  %p205_p6 = scmp.lt.s32.totalorder %s1210_s19, 1  ;;  %v1450_v2 = vld [vmem:[#allocation2] sm:$0xff]  ;;  %s1391_s28 = smov 125   ;;  %vm235_vm0 = vcmask 154624  }
   0xd   : > { %245 = vrot.lane.b32.xlu2 %v1450_v2, %s1391_s28  ;;  %s1392_s29 = smov 19   ;;  %s1393_s30 = smov 127   ;;  %vm241_vm1 = vcmask 711680   ;;  %v1465_v13 = vld [vmem:[#allocation2 + $0x8] sm:$0xff]  ;;  %vm257_vm2 = vcmask 1039360   ;;  %vm265_vm3 = vcmask 1042432  }
   0xe   : > { %s1658_s19 = smov (!%p205_p6, %s1210_s19), 1  ;;  %s1394_s5 = smov 126   ;;  %vm260_vm4 = vcmask 23552   ;;  %vm430_vm5 = vcmask 1031168   ;;  %vm626_vm6 = vcmask 891904   ;;  %vm528_vm7 = vcmask 900096  }
   0xf   : > { %s1303_s24 = smul.u32 12, %s1658_s19  ;;  %s1395_s6 = smov 122   ;;  %vm724_vm8 = vcmask 883712   ;;  %vm822_vm9 = vcmask 752640   ;;  %vm920_vm10 = vcmask 744448   ;;  %vm1018_vm11 = vcmask 736256  }
  0x10   : > { %s1396_s7 = smov 119   ;;  %s1397_s8 = smov 110   ;;  %v219_v63 = vld [vmem:[%s1655_s3] sm:$0xff]  ;;  %vm1138_vm12 = vcmask 556032  }
  0x11   : > { %s209_s27 = scalar_lea.vmem %s1652_s0, %s1303_s24  ;;  %s1398_s9 = smov 109  }
  0x12   : > { %v215_v0 = vld [vmem:[%s209_s27] sm:$0x77]  ;;  %v216_v1 = vld [vmem:[%s209_s27 + $0x8] sm:$0x7]  ;;  %s1399_s10 = smov 108   ;;  %s1400_s11 = smov 116  }
  0x13   : > { %223 = vst [vmem:[#allocation1] ss:$2 sm:$0xff] %v215_v0  ;;  %s1401_s12 = smov 92   ;;  %s1402_s13 = smov 113   ;;  %v1407_v0 = vmov 0  }
  0x14   : > { %225 = vst [vmem:[#allocation1 + $0x10] ss:$2 sm:$0xff] %v216_v1  ;;  %s1403_s14 = smov 91   ;;  %s1404_s16 = smov 107   ;;  %1343 = vset.pattern.permute.xlu1 %v1407_v0  ;;  %1344 = vset.pattern.permute.xlu2 %v1407_v0 }
  0x15   : > { %s1405_s17 = smov 90   ;;  %s1406_s18 = smov 104   ;;  %1345 = vset.pattern.permute.xlu0 %v1407_v0 }
  0x16   : > { %s1304_s26 = smul.u32 48, %s1658_s19 }
  0x1a   : > { %v227_v3 = vld.sshfl [vmem:[#allocation1 + $0x8] sm:$0xff pattern:$0x75316420]  ;;  %v226_v4 = vld.sshfl [vmem:[#allocation1] sm:$0xff pattern:$0x75316420] }
  0x1b   : > { %231 = vrot.lane.b32.xlu0 %v227_v3, %s1392_s29  ;;  %229 = vrot.lane.b32.xlu1 %v226_v4, %s1392_s29  ;;  %v228_v5 = vld.sshfl [vmem:[#allocation1 + $0x10] sm:$0xff pattern:$0x75316420] }
  0x23   : > { %233 = vrot.lane.b32.xlu0 %v228_v5, %s1392_s29  ;;  %s1637_s29 = scalar_lea.vmem %s1656_s4, %s1304_s26 }
  0x67   : > { %v246_v14 = vpop.permute.xlu2 %245 }
  0x8d   : > { %v232_v6 = vpop.permute.xlu0 %231  ;;  %v230_v7 = vpop.permute.xlu1 %229 }
  0x8e   : > { %v1454_v8 = vsel %vm235_vm0, %v230_v7, %v232_v6  ;;  %v1456_v9 = vsel %vm235_vm0, 0.0, %v230_v7 }
  0x8f   : > { %251 = vrot.lane.b32.xlu2 %v1456_v9, %s1393_s30  ;;  %253 = vrot.lane.b32.xlu0 %v1454_v8, %s1393_s30 }
  0x95   : > { %v234_v10 = vpop.permute.xlu0 %233 }
  0x96   : > { %v237_v11 = vsel %vm235_vm0, %v232_v6, %v234_v10 }
  0x97   : > { %v1460_v12 = vsel %vm241_vm1, %v237_v11, 0.0  ;;  %424 = vrot.lane.b32.xlu2 %v1456_v9, %s1394_s5  ;;  %426 = vrot.lane.b32.xlu0 %v1454_v8, %s1394_s5 }
  0x98   : > { %255 = vrot.lane.b32.xlu1 %v1460_v12, %s1393_s30 }
  0x9f   : > { %422 = vrot.lane.b32.xlu2 %v1465_v13, %s1395_s6  ;;  %518 = vrot.lane.b32.xlu0 %v1450_v2, %s1396_s7 }
  0xa0   : > { %247 = vrot.lane.b32.xlu1 %v1465_v13, %s1391_s28 }
  0xa7   : > { %526 = vrot.lane.b32.xlu2 %v1460_v12, %s1397_s8  ;;  %428 = vrot.lane.b32.xlu0 %v1460_v12, %s1394_s5 }
  0xa8   : > { %420 = vrot.lane.b32.xlu1 %v1450_v2, %s1395_s6 }
  0xaf   : > { %520 = vrot.lane.b32.xlu2 %v1465_v13, %s1396_s7  ;;  %622 = vrot.lane.b32.xlu0 %v1454_v8, %s1398_s9 }
  0xb0   : > { %524 = vrot.lane.b32.xlu1 %v1454_v8, %s1397_s8 }
  0xb7   : > { %620 = vrot.lane.b32.xlu2 %v1456_v9, %s1398_s9  ;;  %624 = vrot.lane.b32.xlu0 %v1460_v12, %s1398_s9 }
  0xb8   : > { %522 = vrot.lane.b32.xlu1 %v1456_v9, %s1397_s8 }
  0xbf   : > { %718 = vrot.lane.b32.xlu2 %v1456_v9, %s1399_s10  ;;  %720 = vrot.lane.b32.xlu0 %v1454_v8, %s1399_s10 }
  0xc0   : > { %616 = vrot.lane.b32.xlu1 %v1450_v2, %s1400_s11 }
  0xc7   : > { %816 = vrot.lane.b32.xlu2 %v1456_v9, %s1401_s12  ;;  %818 = vrot.lane.b32.xlu0 %v1454_v8, %s1401_s12 }
  0xc8   : > { %618 = vrot.lane.b32.xlu1 %v1465_v13, %s1400_s11 }
  0xcf   : > { %722 = vrot.lane.b32.xlu2 %v1460_v12, %s1399_s10  ;;  %716 = vrot.lane.b32.xlu0 %v1465_v13, %s1402_s13 }
  0xd0   : > { %714 = vrot.lane.b32.xlu1 %v1450_v2, %s1402_s13 }
  0xd7   : > { %820 = vrot.lane.b32.xlu2 %v1460_v12, %s1401_s12  ;;  %916 = vrot.lane.b32.xlu0 %v1454_v8, %s1403_s14 }
  0xd8   : > { %812 = vrot.lane.b32.xlu1 %v1450_v2, %s1397_s8 }
  0xdf   : > { %910 = vrot.lane.b32.xlu2 %v1450_v2, %s1404_s16  ;;  %914 = vrot.lane.b32.xlu0 %v1456_v9, %s1403_s14 }
  0xe0   : > { %814 = vrot.lane.b32.xlu1 %v1465_v13, %s1397_s8 }
  0xe7   : > { %1016 = vrot.lane.b32.xlu2 %v1460_v12, %s1405_s17  ;;  %1008 = vrot.lane.b32.xlu0 %v1450_v2, %s1406_s18 }
  0xe8   : > { %918 = vrot.lane.b32.xlu1 %v1460_v12, %s1403_s14 }
  0xe9   : > { %v252_v15 = vpop.permute.xlu2 %251 }
  0xef   : > { %1014 = vrot.lane.b32.xlu2 %v1454_v8, %s1405_s17  ;;  %1010 = vrot.lane.b32.xlu0 %v1465_v13, %s1406_s18 }
  0xf0   : > { %912 = vrot.lane.b32.xlu1 %v1465_v13, %s1404_s16 }
  0xf1   : > { %v425_v16 = vpop.permute.xlu2 %424 }
  0xf8   : > { %1012 = vrot.lane.b32.xlu1 %v1456_v9, %s1405_s17 }
  0xf9   : > { %v1507_v17 = vpop.permute.xlu2 %422 }
 0x100   : > { %1108 = vperm.xlu1 %1343, %v219_v63  }
 0x101   : > { %v527_v18 = vpop.permute.xlu2 %526  ;;  %v254_v19 = vpop.permute.xlu0 %253 }
 0x102   : > { %v258_v20 = vsel %vm257_vm2, %v252_v15, %v254_v19 }
 0x103   : > { %1219 = vmatpush.msk.msra.mxu0 %vm265_vm3, %v258_v20  ;;  %1302 = vmatpush.msk.msra.mxu3 %vm265_vm3, %v258_v20 }
 0x104   : > { %1220 = vmatmul.msk.f32.vlgmr.msra.gmra.mxu0 %vm260_vm4, %v246_v14 }
 0x105   : > { %1228 = vmatpush.msk.msrb.mxu3 %vm265_vm3, %v1456_v9  ;;  %1231 = vmatpush.msk.msrb.mxu0 %vm265_vm3, %v1454_v8  ;;  %v220_v8 = vld [vmem:[%s1655_s3 + $0x8] sm:$0xff] }
 0x106   : > { %1113 = vperm.xlu2 %1344, %v220_v8  }
 0x109   : > { %v1517_v21 = vpop.permute.xlu2 %520  ;;  %v427_v22 = vpop.permute.xlu0 %426 }
 0x10a   : > { %v256_v23 = vpop.permute.xlu1 %255  ;;  %v431_v24 = vsel %vm430_vm5, %v425_v16, %v427_v22 }
 0x10b   : > { %1225 = vmatpush.msk.msra.mxu2 %vm265_vm3, %v256_v23  ;;  %v259_v25 = vsel %vm257_vm2, %v254_v19, %v256_v23 }
 0x10c   : > { %1222 = vmatpush.msk.msra.mxu1 %vm265_vm3, %v259_v25  ;;  %1226 = vmatmul.msk.f32.vlgmr.msra.gmra.mxu2 %vm260_vm4, %v246_v14 }
 0x10d   : > { %1232 = vmatmul.msk.f32.vlgmr.msrb.gmra.mxu0 %vm260_vm4, %v1450_v2  ;;  %1237 = vmatpush.msk.msrb.mxu2 %vm265_vm3, %v431_v24 }
 0x10e   : > { %1223 = vmatmul.msk.f32.vlgmr.msra.gmra.mxu1 %vm260_vm4, %v246_v14 }
 0x10f   : > { %1234 = vmatpush.msk.msrb.mxu1 %vm265_vm3, %v1460_v12 }
 0x111   : > { %v621_v26 = vpop.permute.xlu2 %620  ;;  %v519_v27 = vpop.permute.xlu0 %518 }
 0x112   : > { %v248_v28 = vpop.permute.xlu1 %247 }
 0x113   : > { %1221 = vmatmul.msk.f32.vlgmr.msra.gmra.mxu3 %vm260_vm4, %v248_v28 }
 0x114   : > { %1227 = vmatmul.msk.f32.gmra.mxu2 %vm260_vm4, %v248_v28 }
 0x115   : > { %1233 = vmatmul.msk.f32.gmra.mxu0 %vm260_vm4, %v1465_v13 }
 0x116   : > { %1224 = vmatmul.msk.f32.gmra.mxu1 %vm260_vm4, %v248_v28 }
 0x119   : > { %v719_v29 = vpop.permute.xlu2 %718  ;;  %v429_v30 = vpop.permute.xlu0 %428 }
 0x11a   : > { %v432_v31 = vsel %vm430_vm5, %v427_v22, %v429_v30  ;;  %1243 = vmatpush.msk.msra.mxu0 %vm265_vm3, %v429_v30  ;;  %v421_v32 = vpop.permute.xlu1 %420 }
 0x11b   : > { %1229 = vmatmul.msk.f32.vlgmr.msrb.gmra.mxu3 %vm260_vm4, %v1450_v2 }
 0x11c   : > { %1240 = vmatpush.msk.msra.mxu3 %vm265_vm3, %v432_v31  ;;  %1238 = vmatmul.msk.f32.vlgmr.msrb.gmra.mxu2 %vm260_vm4, %v421_v32 }
 0x11d   : > { %1244 = vmatmul.msk.f32.vlgmr.msra.gmra.mxu0 %vm260_vm4, %v421_v32 }
 0x11e   : > { %1252 = vmatpush.msk.msrb.mxu3 %vm265_vm3, %v527_v18  ;;  %1235 = vmatmul.msk.f32.vlgmr.msrb.gmra.mxu1 %vm260_vm4, %v1450_v2 }
 0x121   : > { %v817_v33 = vpop.permute.xlu2 %816  ;;  %v623_v34 = vpop.permute.xlu0 %622 }
 0x122   : > { %v627_v35 = vsel %vm626_vm6, %v621_v26, %v623_v34  ;;  %v525_v36 = vpop.permute.xlu1 %524 }
 0x123   : > { %v530_v37 = vsel %vm528_vm7, %v525_v36, %v527_v18  ;;  %1230 = vmatmul.msk.f32.gmra.mxu3 %vm260_vm4, %v1465_v13  ;;  %1255 = vmatpush.msk.msrb.mxu0 %vm265_vm3, %v627_v35 }
 0x124   : > { %1239 = vmatmul.msk.f32.gmra.mxu2 %vm260_vm4, %v1507_v17 }
 0x125   : > { %1245 = vmatmul.msk.f32.gmra.mxu0 %vm260_vm4, %v1507_v17  ;;  %1249 = vmatpush.msk.msra.mxu2 %vm265_vm3, %v530_v37 }
 0x126   : > { %1236 = vmatmul.msk.f32.gmra.mxu1 %vm260_vm4, %v1465_v13 }
 0x129   : > { %v723_v38 = vpop.permute.xlu2 %722  ;;  %v625_v39 = vpop.permute.xlu0 %624 }
 0x12a   : > { %1261 = vmatpush.msk.msrb.mxu2 %vm265_vm3, %v625_v39  ;;  %v523_v40 = vpop.permute.xlu1 %522  ;;  %v628_v42 = vsel %vm626_vm6, %v623_v34, %v625_v39 }
 0x12b   : > { %v529_v41 = vsel %vm528_vm7, %v523_v40, %v525_v36  ;;  %1241 = vmatmul.msk.f32.vlgmr.msra.gmra.mxu3 %vm260_vm4, %v421_v32 }
 0x12c   : > { %1246 = vmatpush.msk.msra.mxu1 %vm265_vm3, %v529_v41  ;;  %1250 = vmatmul.msk.f32.vlgmr.msra.gmra.mxu2 %vm260_vm4, %v519_v27 }
 0x12e   : > { %1258 = vmatpush.msk.msrb.mxu1 %vm265_vm3, %v628_v42 }
 0x12f   : > { %1247 = vmatmul.msk.f32.vlgmr.msra.gmra.mxu1 %vm260_vm4, %v519_v27 }
 0x130   : > { %1270 = vmatpush.msk.msra.mxu1 %vm265_vm3, %v723_v38 }
 0x131   : > { %v721_v43 = vpop.permute.xlu0 %720  ;;  %v821_v47 = vpop.permute.xlu2 %820 }
 0x132   : > { %v725_v44 = vsel %vm724_vm8, %v719_v29, %v721_v43  ;;  %v726_v45 = vsel %vm724_vm8, %v721_v43, %v723_v38  ;;  %v617_v46 = vpop.permute.xlu1 %616 }
 0x133   : > { %1242 = vmatmul.msk.f32.gmra.mxu3 %vm260_vm4, %v1507_v17  ;;  %1256 = vmatmul.msk.f32.vlgmr.msrb.gmra.mxu0 %vm260_vm4, %v617_v46 }
 0x134   : > { %1264 = vmatpush.msk.msra.mxu3 %vm265_vm3, %v725_v44  ;;  %1267 = vmatpush.msk.msra.mxu0 %vm265_vm3, %v726_v45 }
 0x135   : > { %1251 = vmatmul.msk.f32.gmra.mxu2 %vm260_vm4, %v1517_v21 }
 0x136   : > { %1279 = vmatpush.msk.msrb.mxu0 %vm265_vm3, %v821_v47 }
 0x137   : > { %1248 = vmatmul.msk.f32.gmra.mxu1 %vm260_vm4, %v1517_v21 }
 0x139   : > { %v819_v48 = vpop.permute.xlu0 %818  ;;  %v911_v52 = vpop.permute.xlu2 %910 }
 0x13a   : > { %v823_v49 = vsel %vm822_vm9, %v817_v33, %v819_v48  ;;  %v824_v50 = vsel %vm822_vm9, %v819_v48, %v821_v47  ;;  %v619_v51 = vpop.permute.xlu1 %618 }
 0x13b   : > { %1253 = vmatmul.msk.f32.vlgmr.msrb.gmra.mxu3 %vm260_vm4, %v519_v27  ;;  %1257 = vmatmul.msk.f32.gmra.mxu0 %vm260_vm4, %v619_v51 }
 0x13c   : > { %1273 = vmatpush.msk.msra.mxu2 %vm265_vm3, %v823_v49  ;;  %1276 = vmatpush.msk.msrb.mxu3 %vm265_vm3, %v824_v50 }
 0x13d   : > { %1262 = vmatmul.msk.f32.vlgmr.msrb.gmra.mxu2 %vm260_vm4, %v617_v46 }
 0x13f   : > { %1259 = vmatmul.msk.f32.vlgmr.msrb.gmra.mxu1 %vm260_vm4, %v617_v46 }
 0x141   : > { %v717_v53 = vpop.permute.xlu0 %716  ;;  %v1017_v55 = vpop.permute.xlu2 %1016 }
 0x142   : > { %v715_v54 = vpop.permute.xlu1 %714 }
 0x143   : > { %1254 = vmatmul.msk.f32.gmra.mxu3 %vm260_vm4, %v1517_v21  ;;  %1268 = vmatmul.msk.f32.vlgmr.msra.gmra.mxu0 %vm260_vm4, %v715_v54 }
 0x145   : > { %1263 = vmatmul.msk.f32.gmra.mxu2 %vm260_vm4, %v619_v51 }
 0x147   : > { %1260 = vmatmul.msk.f32.gmra.mxu1 %vm260_vm4, %v619_v51 }
 0x149   : > { %v917_v56 = vpop.permute.xlu0 %916  ;;  %v1015_v58 = vpop.permute.xlu2 %1014 }
 0x14a   : > { %v813_v57 = vpop.permute.xlu1 %812  ;;  %v1020_v62 = vsel %vm1018_vm11, %v1015_v58, %v1017_v55 }
 0x14b   : > { %1265 = vmatmul.msk.f32.vlgmr.msra.gmra.mxu3 %vm260_vm4, %v715_v54  ;;  %1269 = vmatmul.msk.f32.gmra.mxu0 %vm260_vm4, %v717_v53 }
 0x14d   : > { %1274 = vmatmul.msk.f32.vlgmr.msra.gmra.mxu2 %vm260_vm4, %v813_v57 }
 0x14f   : > { %1271 = vmatmul.msk.f32.vlgmr.msra.gmra.mxu1 %vm260_vm4, %v715_v54 }
 0x151   : > { %v915_v59 = vpop.permute.xlu0 %914 }
 0x152   : > { %v921_v60 = vsel %vm920_vm10, %v915_v59, %v917_v56  ;;  %v815_v61 = vpop.permute.xlu1 %814 }
 0x153   : > { %1266 = vmatmul.msk.f32.gmra.mxu3 %vm260_vm4, %v717_v53  ;;  %1280 = vmatmul.msk.f32.vlgmr.msrb.gmra.mxu0 %vm260_vm4, %v813_v57 }
 0x154   : > { %1282 = vmatpush.msk.msrb.mxu1 %vm265_vm3, %v921_v60 }
 0x155   : > { %1275 = vmatmul.msk.f32.gmra.mxu2 %vm260_vm4, %v815_v61 }
 0x156   : > { %1294 = vmatpush.msk.msra.mxu1 %vm265_vm3, %v1020_v62 }
 0x157   : > { %1272 = vmatmul.msk.f32.gmra.mxu1 %vm260_vm4, %v717_v53 }
 0x159   : > { %v1009_v4 = vpop.permute.xlu0 %1008 }
 0x15a   : > { %v919_v1 = vpop.permute.xlu1 %918 }
 0x15b   : > { %v922_v2 = vsel %vm920_vm10, %v917_v56, %v919_v1  ;;  %1277 = vmatmul.msk.f32.vlgmr.msrb.gmra.mxu3 %vm260_vm4, %v813_v57  ;;  %1281 = vmatmul.msk.f32.gmra.mxu0 %vm260_vm4, %v815_v61 }
 0x15c   : > { %1288 = vmatpush.msk.msra.mxu3 %vm265_vm3, %v919_v1  ;;  %1285 = vmatpush.msk.msrb.mxu2 %vm265_vm3, %v922_v2 }
 0x15d   : > { %1286 = vmatmul.msk.f32.vlgmr.msrb.gmra.mxu2 %vm260_vm4, %v911_v52 }
 0x15e   : > { %1297 = vmatpush.msk.msra.mxu2 %vm265_vm3, %v1017_v55 }
 0x15f   : > { %1283 = vmatmul.msk.f32.vlgmr.msrb.gmra.mxu1 %vm260_vm4, %v911_v52 }
 0x161   : > { %v1011_v7 = vpop.permute.xlu0 %1010 }
 0x162   : > { %v913_v3 = vpop.permute.xlu1 %912 }
 0x163   : > { %1278 = vmatmul.msk.f32.gmra.mxu3 %vm260_vm4, %v815_v61 }
 0x165   : > { %1287 = vmatmul.msk.f32.gmra.mxu2 %vm260_vm4, %v913_v3 }
 0x167   : > { %1284 = vmatmul.msk.f32.gmra.mxu1 %vm260_vm4, %v913_v3 }
 0x16a   : > { %v1013_v5 = vpop.permute.xlu1 %1012 }
 0x16b   : > { %v1019_v6 = vsel %vm1018_vm11, %v1013_v5, %v1015_v58  ;;  %1289 = vmatmul.msk.f32.vlgmr.msra.gmra.mxu3 %vm260_vm4, %v911_v52 }
 0x16c   : > { %1291 = vmatpush.msk.msra.mxu0 %vm265_vm3, %v1019_v6 }
 0x16d   : > { %1292 = vmatmul.msk.f32.vlgmr.msra.gmra.mxu0 %vm260_vm4, %v1009_v4  ;;  %1298 = vmatmul.msk.f32.vlgmr.msra.gmra.mxu2 %vm260_vm4, %v1009_v4 }
 0x16f   : > { %1295 = vmatmul.msk.f32.vlgmr.msra.gmra.mxu1 %vm260_vm4, %v1009_v4 }
 0x173   : > { %1290 = vmatmul.msk.f32.gmra.mxu3 %vm260_vm4, %v913_v3 }
 0x175   : > { %1293 = vmatmul.msk.f32.gmra.mxu0 %vm260_vm4, %v1011_v7  ;;  %1299 = vmatmul.msk.f32.gmra.mxu2 %vm260_vm4, %v1011_v7 }
 0x177   : > { %1296 = vmatmul.msk.f32.gmra.mxu1 %vm260_vm4, %v1011_v7 }
 0x181   : > { %v289_v9 = vpop.f32.mrf.mxu0 }
 0x18a   : > { %v391_v10 = vpop.f32.mrf.mxu0 }
 0x18b   : > { %v312_v11 = vpop.f32.mrf.mxu1 }
 0x18c   : > { %v392_v12 = vadd.f32 %v391_v10, %v312_v11 }
 0x18f   : > { %v335_v13 = vpop.f32.mrf.mxu2 }
 0x192   : > { %v394_v14 = vpop.f32.mrf.mxu0 }
 0x193   : > { %v315_v15 = vpop.f32.mrf.mxu1 }
 0x194   : > { %v395_v16 = vadd.f32 %v394_v14, %v315_v15 }
 0x196   : > { %v292_v17 = vpop.f32.mrf.mxu3 }
 0x197   : > { %v338_v18 = vpop.f32.mrf.mxu2 }
 0x19a   : > { %v506_v21 = vpop.f32.mrf.mxu0 }
 0x19b   : > { %v414_v19 = vpop.f32.mrf.mxu1 }
 0x19c   : > { %v415_v20 = vadd.f32 %v414_v19, %v335_v13  ;;  %v1122_v13 = vld [vmem:[%s1653_s1] sm:$0x7] }
 0x19e   : > { %v368_v22 = vpop.f32.mrf.mxu3  ;;  %v514_v0 = vadd.f32 %v506_v21, %v415_v20  ;;  %v1109_v21 = vpop.permute.xlu1 %1108 }
 0x19f   : > { %v460_v23 = vpop.f32.mrf.mxu2  ;;  %v369_v52 = vadd.f32 %v368_v22, %v289_v9 }
 0x1a1   : > { %v512_v55 = vadd.f32 %v460_v23, %v369_v52 }
 0x1a2   : > { %v509_v28 = vpop.f32.mrf.mxu0 }
 0x1a3   : > { %v417_v24 = vpop.f32.mrf.mxu1 }
 0x1a4   : > { %v418_v25 = vadd.f32 %v417_v24, %v338_v18 }
 0x1a6   : > { %v371_v26 = vpop.f32.mrf.mxu3  ;;  %v517_v19 = vadd.f32 %v509_v28, %v418_v25 }
 0x1a7   : > { %v463_v27 = vpop.f32.mrf.mxu2  ;;  %v372_v60 = vadd.f32 %v371_v26, %v292_v17 }
 0x1a9   : > { %v515_v5 = vadd.f32 %v463_v27, %v372_v60  ;;  %v1124_v27 = vperm.slane %v1122_v13, 0 }
 0x1ac   : > { %v558_v29 = vpop.f32.mrf.mxu1 }
 0x1ad   : > { %v610_v57 = vadd.f32 %v558_v29, %v512_v55 }
 0x1ae   : > { %v483_v30 = vpop.f32.mrf.mxu3 }
 0x1af   : > { %v581_v31 = vpop.f32.mrf.mxu2  ;;  %v513_v54 = vadd.f32 %v483_v30, %v392_v12 }
 0x1b0   : > { %v656_v32 = vpop.f32.mrf.mxu0 }
 0x1b1   : > { %v611_v58 = vadd.f32 %v581_v31, %v513_v54  ;;  %v708_v61 = vadd.f32 %v656_v32, %v610_v57  ;;  %v1125_v31 = vperm.slane %v1122_v13, 1 }
 0x1b4   : > { %v561_v33 = vpop.f32.mrf.mxu1 }
 0x1b5   : > { %v613_v9 = vadd.f32 %v561_v33, %v515_v5 }
 0x1b6   : > { %v486_v34 = vpop.f32.mrf.mxu3 }
 0x1b7   : > { %v516_v3 = vadd.f32 %v486_v34, %v395_v16 }
 0x1b8   : > { %v584_v35 = vpop.f32.mrf.mxu2  ;;  %v659_v36 = vpop.f32.mrf.mxu0 }
 0x1b9   : > { %v614_v11 = vadd.f32 %v584_v35, %v516_v3  ;;  %v711_v14 = vadd.f32 %v659_v36, %v613_v9 }
 0x1bc   : > { %v679_v37 = vpop.f32.mrf.mxu1 }
 0x1bd   : > { %v709_v62 = vadd.f32 %v679_v37, %v611_v58 }
 0x1be   : > { %v604_v38 = vpop.f32.mrf.mxu3 }
 0x1bf   : > { %v612_v6 = vadd.f32 %v604_v38, %v514_v0 }
 0x1c0   : > { %v702_v39 = vpop.f32.mrf.mxu2  ;;  %v777_v41 = vpop.f32.mrf.mxu0 }
 0x1c1   : > { %v807_v4 = vadd.f32 %v777_v41, %v709_v62  ;;  %v710_v15 = vadd.f32 %v702_v39, %v612_v6 }
 0x1c4   : > { %v682_v40 = vpop.f32.mrf.mxu1 }
 0x1c5   : > { %v712_v18 = vadd.f32 %v682_v40, %v614_v11 }
 0x1c6   : > { %v607_v42 = vpop.f32.mrf.mxu3 }
 0x1c7   : > { %v615_v32 = vadd.f32 %v607_v42, %v517_v19 }
 0x1c8   : > { %v1626_v43 = vpop.f32.mrf.mxu2  ;;  %v780_v45 = vpop.f32.mrf.mxu0 }
 0x1c9   : > { %v810_v29 = vadd.f32 %v780_v45, %v712_v18  ;;  %v713_v41 = vadd.f32 %v1626_v43, %v615_v32  ;;  %v1126_v45 = vperm.slane %v1122_v13, 2 }
 0x1cc   : > { %v800_v44 = vpop.f32.mrf.mxu1 }
 0x1cd   : > { %v808_v22 = vadd.f32 %v800_v44, %v710_v15 }
 0x1ce   : > { %v754_v46 = vpop.f32.mrf.mxu3 }
 0x1cf   : > { %v806_v1 = vadd.f32 %v754_v46, %v708_v61 }
 0x1d0   : > { %v852_v47 = vpop.f32.mrf.mxu2  ;;  %v898_v50 = vpop.f32.mrf.mxu0 }
 0x1d1   : > { %v904_v10 = vadd.f32 %v852_v47, %v806_v1  ;;  %v906_v33 = vadd.f32 %v898_v50, %v808_v22 }
 0x1d4   : > { %v1628_v48 = vpop.f32.mrf.mxu1 }
 0x1d5   : > { %v811_v50 = vadd.f32 %v1628_v48, %v713_v41 }
 0x1d6   : > { %v757_v49 = vpop.f32.mrf.mxu3 }
 0x1d7   : > { %v809_v23 = vadd.f32 %v757_v49, %v711_v14  ;;  %v1114_v49 = vpop.permute.xlu2 %1113 }
 0x1d8   : > { %v855_v51 = vpop.f32.mrf.mxu2  ;;  %v901_v63 = vpop.f32.mrf.mxu0 }
 0x1d9   : > { %v907_v36 = vadd.f32 %v855_v51, %v809_v23  ;;  %v909_v43 = vadd.f32 %v901_v63, %v811_v50 }
 0x1dc   : > { %v950_v53 = vpop.f32.mrf.mxu1 }
 0x1dd   : > { %v1002_v17 = vadd.f32 %v950_v53, %v904_v10 }
 0x1de   : > { %v875_v56 = vpop.f32.mrf.mxu3 }
 0x1df   : > { %v905_v7 = vadd.f32 %v875_v56, %v807_v4 }
 0x1e0   : > { %v973_v59 = vpop.f32.mrf.mxu2 }
 0x1e1   : > { %v1003_v16 = vadd.f32 %v973_v59, %v905_v7 }
 0x1e4   : > { %v953_v2 = vpop.f32.mrf.mxu1 }
 0x1e5   : > { %v1005_v42 = vadd.f32 %v953_v2, %v907_v36 }
 0x1e6   : > { %v878_v8 = vpop.f32.mrf.mxu3 }
 0x1e7   : > { %v908_v35 = vadd.f32 %v878_v8, %v810_v29 }
 0x1e8   : > { %v976_v12 = vpop.f32.mrf.mxu2 }
 0x1e9   : > { %v1006_v46 = vadd.f32 %v976_v12, %v908_v35 }
 0x1ea   : > { %v1048_v20 = vpop.f32.mrf.mxu0 }
 0x1eb   : > { %v1100_v24 = vadd.f32 %v1048_v20, %v1002_v17 }
 0x1ec   : > { %v1071_v26 = vpop.f32.mrf.mxu1 }
 0x1ed   : > { %v1101_v30 = vadd.f32 %v1071_v26, %v1003_v16  ;;  %v1116_v34 = vadd.f32 %v1109_v21, %v1100_v24 }
 0x1ee   : > { %v996_v28 = vpop.f32.mrf.mxu3 }
 0x1ef   : > { %v1117_v25 = vadd.f32 %v1109_v21, %v1101_v30  ;;  %v1130_v37 = vmul.f32 %v1124_v27, %v1116_v34  ;;  %v1004_v38 = vadd.f32 %v996_v28, %v906_v33 }
 0x1f0   : > { %v1094_v40 = vpop.f32.mrf.mxu2 }
 0x1f1   : > { %v1131_v39 = vmul.f32 %v1125_v31, %v1117_v25  ;;  %1136 = vst [vmem:[%s1637_s29] sm:$0xff] %v1130_v37  ;;  %v1102_v44 = vadd.f32 %v1094_v40, %v1004_v38 }
 0x1f2   : > { %v1051_v47 = vpop.f32.mrf.mxu0 }
 0x1f3   : > { %1137 = vst [vmem:[%s1637_s29 + $0x8] sm:$0xff] %v1131_v39  ;;  %v1118_v52 = vadd.f32 %v1109_v21, %v1102_v44  ;;  %v1103_v51 = vadd.f32 %v1051_v47, %v1005_v42 }
 0x1f4   : > { %v1074_v53 = vpop.f32.mrf.mxu1 }
 0x1f5   : > { %v1104_v54 = vadd.f32 %v1074_v53, %v1006_v46  ;;  %v1132_v55 = vmul.f32 %v1126_v45, %v1118_v52  ;;  %v1119_v56 = vadd.f32 %v1114_v49, %v1103_v51 }
 0x1f6   : > { %v999_v58 = vpop.f32.mrf.mxu3 }
 0x1f7   : > { %v1120_v57 = vadd.f32 %v1114_v49, %v1104_v54  ;;  %1139 = vst.msk [vmem:[%s1637_s29 + $0x10] sm:$0xff] %vm1138_vm12, %v1132_v55  ;;  %v1133_v59 = vmul.f32 %v1124_v27, %v1119_v56  ;;  %v1007_v60 = vadd.f32 %v999_v58, %v909_v43 }
 0x1f8   : > { %v1097_v62 = vpop.f32.mrf.mxu2 }
 0x1f9   : > { %v1134_v61 = vmul.f32 %v1125_v31, %v1120_v57  ;;  %1140 = vst [vmem:[%s1637_s29 + $0x18] sm:$0xff] %v1133_v59  ;;  %v1105_v48 = vadd.f32 %v1097_v62, %v1007_v60 }
 0x1fb   : > { %1141 = vst [vmem:[%s1637_s29 + $0x20] sm:$0xff] %v1134_v61  ;;  %v1121_v0 = vadd.f32 %v1114_v49, %v1105_v48 }
 0x1fd   : > { %v1135_v1 = vmul.f32 %v1126_v45, %v1121_v0 }
 0x1ff   : > { %1142 = vst.msk [vmem:[%s1637_s29 + $0x28] sm:$0xff] %vm1138_vm12, %v1135_v1 }
 0x200 PF: > { %s15_s15 = sadd.s32 1, %s1386_s15  }
 0x201   : > { %p12_p7 = scmp.ge.s32.totalorder %s15_s15, 4  }
 0x203   :  { %14 = sbr.rel (!%p12_p7) target bundleno = 1 (0x1), region = 72 }
 0x208   :  { %1164 = vsyncpa [#allocation3], 1 }
 0x209   :  { %1166 = vsyncpa [#allocation3 + $0x1], 1 }

// kernel: rfdn1_forward.16
= control target key start
LH: loop header
LB: loop body
LE: loop exit
PB: predicated region body
PF: predicated region fallthrough
CT: control target
= control target key end

     0   :  { %13 = vsyncpa [#allocation3], 0  ;;  %s1826_s0 = inlined_call_operand.vmem [shape: f32[2,4,9], index: 0, kind: input, shape index: {}]   ;;  %s1827_s1 = inlined_call_operand.hbm [shape: f32[1,9], index: 1, kind: input, shape index: {}]   ;;  %s1828_s2 = inlined_call_operand.hbm [shape: f32[4,36], index: 2, kind: input, shape index: {}]   ;;  %s1829_s3 = inlined_call_operand.vmem [shape: f32[4,1], index: 3, kind: input, shape index: {}]   ;;  %s1830_s4 = inlined_call_operand.hbm [shape: f32[4,36], index: 4, kind: input, shape index: {}]   ;;  %s1831_s5 = inlined_call_operand.vmem [shape: f32[4,1], index: 5, kind: input, shape index: {}]   ;;  %s1832_s6 = inlined_call_operand.hbm [shape: f32[4,36], index: 6, kind: input, shape index: {}]   ;;  %s1833_s7 = inlined_call_operand.vmem [shape: f32[4,1], index: 7, kind: input, shape index: {}]   ;;  %s1834_s8 = inlined_call_operand.vmem [shape: f32[2,4,9], index: 8, kind: output, shape index: {}]  }
   0x1   :  { %14 = vsyncpa [#allocation5], 0 }
   0x2   :  { %15 = vsyncpa [#allocation8], 0  ;;  %s1626_s27 = smov 0  }
   0x3 LB: > { %s249_s30 = sshll.u32 %s1828_s2, 4  ;;  %s1635_s9 = sadd.s32 4294967295, %s1559_s27   ;;  %s1559_s27 = sphi %s1626_s27, %s21_s27   ;;  %s250_s30 = int_to_ptr.hbm [resolvable:$true] %s249_s30 }
   0x4   : > { %p1284_p0 = scmp.ge.s32.totalorder %s1559_s27, 1  ;;  %p225_p1 = scmp.lt.s32.totalorder %s1559_s27, 3 }
   0x5   : > { %p1382_p2 = scmp.eq.s32.totalorder %s1635_s9, 0  ;;  %s1561_s11 = smov [#allocation4]  }
   0x6   : > { %p1640_p3 = pnand %p1284_p0, %p225_p1  ;;  %s251_s12 = sshll.u32 %s1561_s11, 4  ;;  %s252_s12 = int_to_ptr.vmem [resolvable:$true] %s251_s12 }
   0x7   : > { %s237_s15 = sshll.u32 %s1827_s1, 4  ;;  %s264_s18 = sshll.u32 %s1830_s4, 4  ;;  %s238_s15 = int_to_ptr.hbm [resolvable:$true] %s237_s15  ;;  %s265_s18 = int_to_ptr.hbm [resolvable:$true] %s264_s18 }
   0x8   : > { %p1369_p4 = pneg %p1640_p3  ;;  %s1562_s20 = smov [#allocation2]  }
   0x9   : > { %s239_s21 = sshll.u32 %s1562_s20, 4  ;;  %s1563_s22 = smov [#allocation6]   ;;  %s240_s21 = int_to_ptr.vmem [resolvable:$true] %s239_s21 }
   0xa   : > { %p1654_p5 = pnand %p1382_p2, %p1369_p4  ;;  %s266_s23 = sshll.u32 %s1563_s22, 4  ;;  %s267_s23 = int_to_ptr.vmem [resolvable:$true] %s266_s23 }
   0xb   : > { %s279_s26 = sshll.u32 %s1832_s6, 4  ;;  %s1564_s28 = smov [#allocation7]   ;;  %s280_s26 = int_to_ptr.hbm [resolvable:$true] %s279_s26 }
   0xc   : > { %1375 = dma.hbm_to_vmem [thread:$0]  (!%p1654_p5), %s250_s30, 64, %s252_s12, [#allocation5]  }
   0xd   : > { %1372 = dma.hbm_to_vmem [thread:$0]  (!%p1654_p5), %s238_s15, 16, %s240_s21, [#allocation3]  }
   0xe   : > { %1378 = dma.hbm_to_vmem [thread:$0]  (!%p1654_p5), %s265_s18, 64, %s267_s23, [#allocation5]  }
   0xf   : > { %s281_s29 = sshll.u32 %s1564_s28, 4  ;;  %304 = sbr.rel (%p1640_p3) target bundleno = 1212 (0x4bc), region = 52  ;;  %s282_s29 = int_to_ptr.vmem [resolvable:$true] %s281_s29 }
  0x10   : > { %1381 = dma.hbm_to_vmem [thread:$0]  (!%p1654_p5), %s280_s26, 64, %s282_s29, [#allocation8]  }
  0x14   : > { %1546 = dma.done.wait (%p1382_p2), [#allocation3], 16  }
  0x15   : > { %1548 = vsyncadd (%p1382_p2), [#allocation3], 4294967280 }
  0x16   : > { %1550 = dma.done.wait (%p1382_p2), [#allocation5], 128  }
  0x17   : > { %1552 = vsyncadd (%p1382_p2), [#allocation5], 4294967168 }
  0x18   : > { %1554 = dma.done.wait (%p1382_p2), [#allocation8], 64  }
  0x19   : > { %1556 = vsyncadd (%p1382_p2), [#allocation8], 4294967232  ;;  %p352_p6 = scmp.lt.s32.totalorder %s1635_s9, 1  ;;  %v362_v1 = vld [vmem:[#allocation4] sm:$0xf]  ;;  %s1565_s13 = smov 4  }
  0x1a   : > { %s1566_s14 = smov 124   ;;  %s1567_s15 = smov 120   ;;  %vm368_vm0 = vcmask 31744   ;;  %vm370_vm1 = vcmask 105472   ;;  %vm380_vm2 = vcmask 1043456   ;;  %v1580_v13 = vmov 0  }
  0x1b   : > { %s1838_s9 = smov (!%p352_p6, %s1635_s9), 1  ;;  %373 = vrot.lane.b32.xlu2 %v362_v1, %s1566_s14  ;;  %427 = vrot.lane.b32.xlu1 %v362_v1, %s1567_s15  ;;  %s1568_s16 = smov 104   ;;  %v363_v12 = vld [vmem:[%s1829_s3] sm:$0xf]  ;;  %v641_v23 = vld [vmem:[#allocation6] sm:$0xf] }
  0x1c   : > { %s1295_s30 = sshll.u32 %s1838_s9, 2  ;;  %s1569_s17 = smov 116   ;;  %1418 = vset.pattern.permute.xlu2 %v1580_v13  ;;  %1419 = vset.pattern.permute.xlu0 %v1580_v13  ;;  %v1736_v43 = vld [vmem:[#allocation2] ss:$0 sm:$0xff]  ;;  %vm1186_vm3 = vcmask 68608  }
  0x1d   : > { %s355_s12 = scalar_lea.vmem %s1826_s0, %s1295_s30  ;;  %s1570_s18 = smov 125   ;;  %v642_v49 = vld [vmem:[%s1831_s5] sm:$0xf] }
  0x1e   : > { %v361_v0 = vld [vmem:[%s355_s12] sm:$0xf]  ;;  %s1571_s19 = smov 127   ;;  %s1572_s20 = smov 126  }
  0x1f   : > { %365 = vrot.lane.b32.xlu0 %v361_v0, %s1565_s13  ;;  %s1573_s21 = smov 122   ;;  %s1574_s22 = smov 112  }
  0x20   : > { %s1575_s23 = smov 100   ;;  %s1576_s24 = smov 121  }
  0x21   : > { %s1577_s25 = smov 108   ;;  %s1578_s26 = smov 123  }
  0x22   : > { %s1579_s28 = smov 96  }
  0x23   : > { %543 = vrot.lane.b32.xlu2 %v362_v1, %s1568_s16 }
  0x27   : > { %456 = vrot.lane.b32.xlu0 %v362_v1, %s1569_s17 }
  0x75   : > { %v374_v5 = vpop.permute.xlu2 %373 }
  0x7d   : > { %v544_v6 = vpop.permute.xlu2 %543 }
  0x8d   : > { %v428_v9 = vpop.permute.xlu1 %427 }
  0x91   : > { %v366_v2 = vpop.permute.xlu0 %365 }
  0x92   : > { %v369_v3 = vsel %vm368_vm0, 0.0, %v366_v2 }
  0x93   : > { %v371_v4 = vsel %vm370_vm1, %v369_v3, 0.0  ;;  %v914_v3 = vld [vmem:[#allocation7] sm:$0xf] }
  0x94   : > { %458 = vrot.lane.b32.xlu2 %v371_v4, %s1570_s18  ;;  %376 = vrot.lane.b32.xlu1 %v371_v4, %s1571_s19 }
  0x95   : > { %429 = vrot.lane.b32.xlu0 %v371_v4, %s1572_s20  ;;  %1299 = vmatpush.msk.msra.mxu1 %vm380_vm2, %v371_v4 }
  0x96   : > { %1300 = vmatmul.msk.f32.vlgmr.msra.gmra.mxu1 %vm368_vm0, %v362_v1 }
  0x99   : > { %v457_v8 = vpop.permute.xlu0 %456 }
  0x9c   : > { %545 = vrot.lane.b32.xlu1 %v371_v4, %s1573_s21  ;;  %485 = vrot.lane.b32.xlu2 %v362_v1, %s1574_s22 }
  0x9d   : > { %572 = vrot.lane.b32.xlu0 %v362_v1, %s1575_s23 }
  0xa4   : > { %574 = vrot.lane.b32.xlu1 %v371_v4, %s1576_s24  ;;  %514 = vrot.lane.b32.xlu2 %v362_v1, %s1577_s25 }
  0xa5   : > { %487 = vrot.lane.b32.xlu0 %v371_v4, %s1566_s14 }
  0xac   : > { %516 = vrot.lane.b32.xlu1 %v371_v4, %s1578_s26  ;;  %632 = vperm.xlu2 %1418, %v363_v12  }
  0xad   : > { %603 = vrot.lane.b32.xlu0 %v371_v4, %s1567_s15 }
  0xb4   : > { %601 = vrot.lane.b32.xlu1 %v362_v1, %s1579_s28  ;;  %703 = vrot.lane.b32.xlu2 %v641_v23, %s1567_s15 }
  0xbc   : > { %650 = vrot.lane.b32.xlu1 %v641_v23, %s1566_s14 }
  0xc4   : > { %819 = vrot.lane.b32.xlu1 %v641_v23, %s1568_s16 }
  0xee   : > { %v459_v7 = vpop.permute.xlu2 %458 }
  0xef   : > { %1303 = vmatpush.msk.msra.mxu3 %vm380_vm2, %v459_v7 }
  0xf0   : > { %1304 = vmatmul.msk.f32.vlgmr.msra.gmra.mxu3 %vm368_vm0, %v457_v8 }
  0xf6   : > { %v486_v16 = vpop.permute.xlu2 %485 }
  0xfe   : > { %v515_v19 = vpop.permute.xlu2 %514 }
 0x106   : > { %v377_v10 = vpop.permute.xlu1 %376  ;;  %v633_v40 = vpop.permute.xlu2 %632 }
 0x107   : > { %v430_v11 = vpop.permute.xlu0 %429  ;;  %1297 = vmatpush.msk.msra.mxu0 %vm380_vm2, %v377_v10 }
 0x108   : > { %1301 = vmatpush.msk.msra.mxu2 %vm380_vm2, %v430_v11  ;;  %1298 = vmatmul.msk.f32.vlgmr.msra.gmra.mxu0 %vm368_vm0, %v374_v5 }
 0x109   : > { %1302 = vmatmul.msk.f32.vlgmr.msra.gmra.mxu2 %vm368_vm0, %v428_v9 }
 0x10e   : > { %v546_v14 = vpop.permute.xlu1 %545  ;;  %v704_v50 = vpop.permute.xlu2 %703 }
 0x10f   : > { %v573_v15 = vpop.permute.xlu0 %572  ;;  %1309 = vmatpush.msk.msrb.mxu2 %vm380_vm2, %v546_v14 }
 0x111   : > { %1310 = vmatmul.msk.f32.vlgmr.msrb.gmra.mxu2 %vm368_vm0, %v544_v6 }
 0x113   : > { %v424_v25 = vpop.f32.mrf.mxu1 }
 0x116   : > { %v575_v17 = vpop.permute.xlu1 %574 }
 0x117   : > { %v488_v18 = vpop.permute.xlu0 %487  ;;  %1311 = vmatpush.msk.msrb.mxu3 %vm380_vm2, %v575_v17 }
 0x118   : > { %1305 = vmatpush.msk.msrb.mxu0 %vm380_vm2, %v488_v18  ;;  %1312 = vmatmul.msk.f32.vlgmr.msrb.gmra.mxu3 %vm368_vm0, %v573_v15 }
 0x119   : > { %1306 = vmatmul.msk.f32.vlgmr.msrb.gmra.mxu0 %vm368_vm0, %v486_v16 }
 0x11e   : > { %v517_v20 = vpop.permute.xlu1 %516 }
 0x11f   : > { %v604_v21 = vpop.permute.xlu0 %603  ;;  %1307 = vmatpush.msk.msrb.mxu1 %vm380_vm2, %v517_v20 }
 0x120   : > { %1313 = vmatpush.msk.msra.mxu0 %vm380_vm2, %v604_v21  ;;  %1308 = vmatmul.msk.f32.vlgmr.msrb.gmra.mxu1 %vm368_vm0, %v515_v19 }
 0x126   : > { %v602_v22 = vpop.permute.xlu1 %601 }
 0x127   : > { %1314 = vmatmul.msk.f32.vlgmr.msra.gmra.mxu0 %vm368_vm0, %v602_v22 }
 0x12e   : > { %v651_v53 = vpop.permute.xlu1 %650 }
 0x136   : > { %v820_v55 = vpop.permute.xlu1 %819 }
 0x173   : > { %v481_v29 = vpop.f32.mrf.mxu3 }
 0x185   : > { %v400_v24 = vpop.f32.mrf.mxu0 }
 0x186   : > { %v425_v27 = vadd.f32 %v424_v25, %v400_v24 }
 0x18c   : > { %v452_v26 = vpop.f32.mrf.mxu2 }
 0x18d   : > { %v455_v28 = vadd.f32 %v452_v26, %v425_v27  ;;  %v915_v27 = vld [vmem:[%s1833_s7] sm:$0xf] }
 0x18f   : > { %v484_v31 = vadd.f32 %v481_v29, %v455_v28 }
 0x194   : > { %v568_v35 = vpop.f32.mrf.mxu2 }
 0x196   : > { %v510_v30 = vpop.f32.mrf.mxu0 }
 0x197   : > { %v513_v32 = vadd.f32 %v510_v30, %v484_v31 }
 0x19b   : > { %v597_v37 = vpop.f32.mrf.mxu3 }
 0x19d   : > { %v539_v33 = vpop.f32.mrf.mxu1 }
 0x19e   : > { %v542_v34 = vadd.f32 %v539_v33, %v513_v32 }
 0x1a0   : > { %v571_v36 = vadd.f32 %v568_v35, %v542_v34 }
 0x1a2   : > { %v600_v38 = vadd.f32 %v597_v37, %v571_v36 }
 0x1a4   : > { %v626_v39 = vpop.f32.mrf.mxu0 }
 0x1a5   : > { %v629_v41 = vadd.f32 %v626_v39, %v600_v38 }
 0x1a7   : > { %v635_v42 = vadd.f32 %v633_v40, %v629_v41 }
 0x1a9   : > { %v636_v44 = vmax.f32 %v635_v42, 0.0 }
 0x1ab   : > { %v640_v45 = vmul.f32 %v1736_v43, %v636_v44 }
 0x1ad   : > { %644 = vrot.lane.b32.xlu0 %v640_v45, %s1565_s13 }
 0x1b5   : > { %790 = vrot.lane.b32.xlu0 %v641_v23, %s1577_s25 }
 0x1bd   : > { %732 = vrot.lane.b32.xlu0 %v641_v23, %s1569_s17 }
 0x21f   : > { %v645_v46 = vpop.permute.xlu0 %644 }
 0x220   : > { %v647_v47 = vsel %vm368_vm0, 0.0, %v645_v46 }
 0x221   : > { %v648_v48 = vsel %vm370_vm1, %v647_v47, 0.0 }
 0x222   : > { %792 = vrot.lane.b32.xlu2 %v648_v48, %s1578_s26  ;;  %653 = vrot.lane.b32.xlu0 %v648_v48, %s1571_s19 }
 0x223   : > { %705 = vrot.lane.b32.xlu1 %v648_v48, %s1572_s20  ;;  %1317 = vmatpush.msk.msra.mxu2 %vm380_vm2, %v648_v48 }
 0x224   : > { %1318 = vmatmul.msk.f32.vlgmr.msra.gmra.mxu2 %vm368_vm0, %v641_v23 }
 0x227   : > { %v791_v52 = vpop.permute.xlu0 %790 }
 0x22a   : > { %821 = vrot.lane.b32.xlu2 %v648_v48, %s1573_s21  ;;  %761 = vrot.lane.b32.xlu0 %v641_v23, %s1574_s22 }
 0x22b   : > { %734 = vrot.lane.b32.xlu1 %v648_v48, %s1570_s18 }
 0x22f   : > { %v733_v54 = vpop.permute.xlu0 %732 }
 0x232   : > { %763 = vrot.lane.b32.xlu2 %v648_v48, %s1566_s14  ;;  %879 = vrot.lane.b32.xlu0 %v648_v48, %s1567_s15 }
 0x233   : > { %850 = vrot.lane.b32.xlu1 %v648_v48, %s1576_s24 }
 0x23a   : > { %848 = vrot.lane.b32.xlu2 %v641_v23, %s1575_s23 }
 0x23b   : > { %877 = vrot.lane.b32.xlu1 %v641_v23, %s1579_s28 }
 0x242   : > { %908 = vperm.xlu2 %1418, %v642_v49  }
 0x243   : > { %1034 = vrot.lane.b32.xlu1 %v914_v3, %s1574_s22 }
 0x24a   : > { %923 = vrot.lane.b32.xlu2 %v914_v3, %s1566_s14 }
 0x24b   : > { %976 = vrot.lane.b32.xlu1 %v914_v3, %s1567_s15 }
 0x252   : > { %1063 = vrot.lane.b32.xlu2 %v914_v3, %s1577_s25 }
 0x27c   : > { %v793_v51 = vpop.permute.xlu2 %792 }
 0x27d   : > { %1325 = vmatpush.msk.msrb.mxu2 %vm380_vm2, %v793_v51 }
 0x27e   : > { %1326 = vmatmul.msk.f32.vlgmr.msrb.gmra.mxu2 %vm368_vm0, %v791_v52 }
 0x284   : > { %v822_v56 = vpop.permute.xlu2 %821 }
 0x28c   : > { %v764_v59 = vpop.permute.xlu2 %763 }
 0x294   : > { %v654_v57 = vpop.permute.xlu0 %653  ;;  %v849_v0 = vpop.permute.xlu2 %848 }
 0x295   : > { %v706_v58 = vpop.permute.xlu1 %705  ;;  %1315 = vmatpush.msk.msra.mxu1 %vm380_vm2, %v654_v57 }
 0x296   : > { %1319 = vmatpush.msk.msra.mxu3 %vm380_vm2, %v706_v58  ;;  %1316 = vmatmul.msk.f32.vlgmr.msra.gmra.mxu1 %vm368_vm0, %v651_v53 }
 0x297   : > { %1320 = vmatmul.msk.f32.vlgmr.msra.gmra.mxu3 %vm368_vm0, %v704_v50  ;;  %1323 = vmatpush.msk.msrb.mxu1 %vm380_vm2, %v764_v59 }
 0x298   : > { %1327 = vmatpush.msk.msrb.mxu3 %vm380_vm2, %v822_v56 }
 0x29c   : > { %v762_v60 = vpop.permute.xlu0 %761  ;;  %v909_v20 = vpop.permute.xlu2 %908 }
 0x29d   : > { %v735_v61 = vpop.permute.xlu1 %734 }
 0x29e   : > { %1321 = vmatpush.msk.msrb.mxu0 %vm380_vm2, %v735_v61  ;;  %1324 = vmatmul.msk.f32.vlgmr.msrb.gmra.mxu1 %vm368_vm0, %v762_v60 }
 0x29f   : > { %1322 = vmatmul.msk.f32.vlgmr.msrb.gmra.mxu0 %vm368_vm0, %v733_v54  ;;  %1328 = vmatmul.msk.f32.vlgmr.msrb.gmra.mxu3 %vm368_vm0, %v820_v55 }
 0x2a4   : > { %v880_v62 = vpop.permute.xlu0 %879  ;;  %v924_v28 = vpop.permute.xlu2 %923 }
 0x2a5   : > { %v851_v63 = vpop.permute.xlu1 %850  ;;  %1331 = vmatpush.msk.msra.mxu1 %vm380_vm2, %v880_v62 }
 0x2a6   : > { %1329 = vmatpush.msk.msra.mxu0 %vm380_vm2, %v851_v63 }
 0x2a7   : > { %1330 = vmatmul.msk.f32.vlgmr.msra.gmra.mxu0 %vm368_vm0, %v849_v0  ;;  %v700_v4 = vpop.f32.mrf.mxu2 }
 0x2ac   : > { %v1064_v30 = vpop.permute.xlu2 %1063 }
 0x2ad   : > { %v878_v1 = vpop.permute.xlu1 %877 }
 0x2ae   : > { %1332 = vmatmul.msk.f32.vlgmr.msra.gmra.mxu1 %vm368_vm0, %v878_v1 }
 0x2b5   : > { %v1035_v29 = vpop.permute.xlu1 %1034 }
 0x2bd   : > { %v977_v31 = vpop.permute.xlu1 %976 }
 0x301   : > { %v815_v12 = vpop.f32.mrf.mxu2 }
 0x313   : > { %v676_v2 = vpop.f32.mrf.mxu1 }
 0x314   : > { %v701_v5 = vadd.f32 %v700_v4, %v676_v2 }
 0x31a   : > { %v728_v6 = vpop.f32.mrf.mxu3 }
 0x31b   : > { %v731_v7 = vadd.f32 %v728_v6, %v701_v5  ;;  %v786_v9 = vpop.f32.mrf.mxu1 }
 0x31c   : > { %v757_v8 = vpop.f32.mrf.mxu0 }
 0x31d   : > { %v760_v10 = vadd.f32 %v757_v8, %v731_v7 }
 0x31f   : > { %v789_v11 = vadd.f32 %v786_v9, %v760_v10 }
 0x321   : > { %v818_v13 = vadd.f32 %v815_v12, %v789_v11 }
 0x322   : > { %v844_v14 = vpop.f32.mrf.mxu3 }
 0x323   : > { %v847_v15 = vadd.f32 %v844_v14, %v818_v13 }
 0x324   : > { %v873_v16 = vpop.f32.mrf.mxu0 }
 0x325   : > { %v876_v17 = vadd.f32 %v873_v16, %v847_v15 }
 0x32b   : > { %v902_v18 = vpop.f32.mrf.mxu1 }
 0x32c   : > { %v905_v19 = vadd.f32 %v902_v18, %v876_v17 }
 0x32e   : > { %v911_v21 = vadd.f32 %v909_v20, %v905_v19 }
 0x330   : > { %v912_v22 = vmax.f32 %v911_v21, 0.0 }
 0x332   : > { %v913_v23 = vmul.f32 %v1736_v43, %v912_v22 }
 0x334   : > { %917 = vrot.lane.b32.xlu0 %v913_v23, %s1565_s13 }
 0x33c   : > { %1150 = vrot.lane.b32.xlu0 %v914_v3, %s1579_s28 }
 0x3a6   : > { %v918_v24 = vpop.permute.xlu0 %917 }
 0x3a7   : > { %v920_v25 = vsel %vm368_vm0, 0.0, %v918_v24 }
 0x3a8   : > { %v921_v26 = vsel %vm370_vm1, %v920_v25, 0.0 }
 0x3a9   : > { %978 = vrot.lane.b32.xlu2 %v921_v26, %s1572_s20  ;;  %1036 = vrot.lane.b32.xlu0 %v921_v26, %s1566_s14 }
 0x3aa   : > { %926 = vrot.lane.b32.xlu1 %v921_v26, %s1571_s19  ;;  %1335 = vmatpush.msk.msra.mxu3 %vm380_vm2, %v921_v26 }
 0x3ab   : > { %1336 = vmatmul.msk.f32.vlgmr.msra.gmra.mxu3 %vm368_vm0, %v914_v3 }
 0x3ae   : > { %v1151_v33 = vpop.permute.xlu0 %1150 }
 0x3b1   : > { %1152 = vrot.lane.b32.xlu2 %v921_v26, %s1567_s15  ;;  %1065 = vrot.lane.b32.xlu0 %v921_v26, %s1578_s26 }
 0x3b2   : > { %1005 = vrot.lane.b32.xlu1 %v914_v3, %s1569_s17  ;;  %s359_s17 = scalar_lea.vmem %s1834_s8, %s1295_s30 }
 0x3b9   : > { %1092 = vrot.lane.b32.xlu2 %v914_v3, %s1568_s16  ;;  %1007 = vrot.lane.b32.xlu0 %v921_v26, %s1570_s18 }
 0x3ba   : > { %1094 = vrot.lane.b32.xlu1 %v921_v26, %s1573_s21 }
 0x3c1   : > { %1181 = vperm.xlu2 %1418, %v915_v27   ;;  %1123 = vrot.lane.b32.xlu0 %v921_v26, %s1576_s24 }
 0x3c2   : > { %1121 = vrot.lane.b32.xlu1 %v914_v3, %s1575_s23 }
 0x403   : > { %v979_v32 = vpop.permute.xlu2 %978 }
 0x404   : > { %1337 = vmatpush.msk.msrb.mxu0 %vm380_vm2, %v979_v32 }
 0x405   : > { %1338 = vmatmul.msk.f32.vlgmr.msrb.gmra.mxu0 %vm368_vm0, %v977_v31 }
 0x40b   : > { %v1153_v36 = vpop.permute.xlu2 %1152 }
 0x413   : > { %v1093_v41 = vpop.permute.xlu2 %1092 }
 0x41b   : > { %v1037_v34 = vpop.permute.xlu0 %1036  ;;  %v1182_v62 = vpop.permute.xlu2 %1181 }
 0x41c   : > { %v927_v35 = vpop.permute.xlu1 %926 }
 0x41d   : > { %1333 = vmatpush.msk.msra.mxu2 %vm380_vm2, %v927_v35 }
 0x41e   : > { %1334 = vmatmul.msk.f32.vlgmr.msra.gmra.mxu2 %vm368_vm0, %v924_v28 }
 0x41f   : > { %1341 = vmatpush.msk.msrb.mxu2 %vm380_vm2, %v1037_v34 }
 0x421   : > { %1349 = vmatpush.msk.msra.mxu2 %vm380_vm2, %v1153_v36 }
 0x423   : > { %v1066_v37 = vpop.permute.xlu0 %1065 }
 0x424   : > { %v1006_v38 = vpop.permute.xlu1 %1005  ;;  %1343 = vmatpush.msk.msrb.mxu3 %vm380_vm2, %v1066_v37 }
 0x425   : > { %1344 = vmatmul.msk.f32.vlgmr.msrb.gmra.mxu3 %vm368_vm0, %v1064_v30 }
 0x426   : > { %1342 = vmatmul.msk.f32.vlgmr.msrb.gmra.mxu2 %vm368_vm0, %v1035_v29 }
 0x42b   : > { %v1008_v39 = vpop.permute.xlu0 %1007 }
 0x42c   : > { %v1095_v40 = vpop.permute.xlu1 %1094  ;;  %1339 = vmatpush.msk.msrb.mxu1 %vm380_vm2, %v1008_v39 }
 0x42d   : > { %1345 = vmatpush.msk.msra.mxu0 %vm380_vm2, %v1095_v40  ;;  %1340 = vmatmul.msk.f32.vlgmr.msrb.gmra.mxu1 %vm368_vm0, %v1006_v38 }
 0x42e   : > { %1350 = vmatmul.msk.f32.vlgmr.msra.gmra.mxu2 %vm368_vm0, %v1151_v33  ;;  %1346 = vmatmul.msk.f32.vlgmr.msra.gmra.mxu0 %vm368_vm0, %v1093_v41  ;;  %v973_v46 = vpop.f32.mrf.mxu3 }
 0x433   : > { %v1124_v42 = vpop.permute.xlu0 %1123 }
 0x434   : > { %v1122_v44 = vpop.permute.xlu1 %1121  ;;  %1347 = vmatpush.msk.msra.mxu1 %vm380_vm2, %v1124_v42 }
 0x435   : > { %1348 = vmatmul.msk.f32.vlgmr.msra.gmra.mxu1 %vm368_vm0, %v1122_v44 }
 0x482   : > { %v1001_v48 = vpop.f32.mrf.mxu0 }
 0x4a1   : > { %v949_v45 = vpop.f32.mrf.mxu2 }
 0x4a2   : > { %v974_v47 = vadd.f32 %v973_v46, %v949_v45 }
 0x4a4   : > { %v1004_v49 = vadd.f32 %v1001_v48, %v974_v47 }
 0x4a8   : > { %v1088_v54 = vpop.f32.mrf.mxu3 }
 0x4a9   : > { %v1059_v50 = vpop.f32.mrf.mxu2 }
 0x4aa   : > { %v1030_v51 = vpop.f32.mrf.mxu1 }
 0x4ab   : > { %v1033_v52 = vadd.f32 %v1030_v51, %v1004_v49  ;;  %v1117_v55 = vpop.f32.mrf.mxu0 }
 0x4ad   : > { %v1062_v53 = vadd.f32 %v1059_v50, %v1033_v52 }
 0x4af   : > { %v1091_v56 = vadd.f32 %v1088_v54, %v1062_v53 }
 0x4b1   : > { %v1120_v57 = vadd.f32 %v1117_v55, %v1091_v56  ;;  %v1175_v60 = vpop.f32.mrf.mxu2 }
 0x4b2   : > { %v1146_v58 = vpop.f32.mrf.mxu1 }
 0x4b3   : > { %v1149_v59 = vadd.f32 %v1146_v58, %v1120_v57 }
 0x4b5   : > { %v1178_v61 = vadd.f32 %v1175_v60, %v1149_v59 }
 0x4b7   : > { %v1184_v63 = vadd.f32 %v1182_v62, %v1178_v61 }
 0x4b9   : > { %v1185_v0 = vmul.f32 %v1736_v43, %v1184_v63 }
 0x4bb   : > { %1187 = vst.msk [vmem:[%s359_s17] sm:$0xf] %vm1186_vm3, %v1185_v0 }
 0x4bc PF: > { %s21_s27 = sadd.s32 1, %s1559_s27  }
 0x4bd   : > { %p18_p7 = scmp.ge.s32.totalorder %s21_s27, 4  }
 0x4bf   :  { %20 = sbr.rel (!%p18_p7) target bundleno = 3 (0x3), region = 99 }
 0x4c4   :  { %1207 = vsyncpa [#allocation3], 1 }
 0x4c5   :  { %1209 = vsyncpa [#allocation3 + $0x1], 1 }
 0x4c6   :  { %1210 = vsyncpa [#allocation5], 1 }
 0x4c7   :  { %1211 = vsyncpa [#allocation8], 1 }

// kernel: rfdn1_forward.17
= control target key start
LH: loop header
LB: loop body
LE: loop exit
PB: predicated region body
PF: predicated region fallthrough
CT: control target
= control target key end

     0   :  { %s736_s21 = smov 0   ;;  %s864_s0 = inlined_call_operand.vmem [shape: f32[2,16,324], index: 0, kind: input, shape index: {}]   ;;  %s865_s1 = inlined_call_operand.vmem [shape: f32[2,4,324], index: 1, kind: input, shape index: {}]   ;;  %s866_s2 = inlined_call_operand.vmem [shape: f32[2,4,324], index: 2, kind: input, shape index: {}]   ;;  %s867_s3 = inlined_call_operand.vmem [shape: f32[1,324], index: 3, kind: input, shape index: {}]   ;;  %s868_s4 = inlined_call_operand.vmem [shape: f32[16,4], index: 4, kind: input, shape index: {}]   ;;  %s869_s5 = inlined_call_operand.vmem [shape: f32[16,1], index: 5, kind: input, shape index: {}]   ;;  %s870_s6 = inlined_call_operand.vmem [shape: f32[2,16,324], index: 6, kind: output, shape index: {}]  }
   0x1 LB: > { %s629_s22 = sadd.s32 4294967295, %s698_s21   ;;  %p633_p0 = scmp.ge.s32.totalorder %s698_s21, 1  ;;  %s698_s21 = sphi %s736_s21, %s16_s21  }
   0x2   : > { %p232_p1 = scmp.lt.s32.totalorder %s698_s21, 3 }
   0x4   : > { %p233_p2 = pnand %p633_p0, %p232_p1 }
   0x5   : > { %p272_p3 = scmp.lt.s32.totalorder (!%p233_p2), %s629_s22, 1 }
   0x6   : > { %236 = sbr.rel (%p233_p2) target bundleno = 207 (0xcf), region = 44 }
   0xb   : > { %v700_v0 = vmov 0   ;;  %v300_v1 = vld [vmem:[%s869_s5] sm:$0xff]  ;;  %s878_s22 = smov (!%p272_p3, %s629_s22), 1  ;;  %v301_v2 = vld [vmem:[%s869_s5 + $0x8] sm:$0xff]  ;;  %vm327_vm0 = vcmask 1043456   ;;  %vm320_vm1 = vcmask 31744  }
   0xc   : > { %667 = vset.pattern.permute.xlu0 %v700_v0  ;;  %s657_s25 = smul.u32 12, %s878_s22  ;;  %v298_v9 = vld [vmem:[%s868_s4] sm:$0xff]  ;;  %v299_v10 = vld [vmem:[%s868_s4 + $0x8] sm:$0xff] }
   0xd   : > { %304 = vperm.xlu0 %667, %v300_v1   ;;  %v768_v38 = vld [vmem:[%s867_s3] sm:$0x7]  ;;  %s656_s16 = smul.u32 48, %s878_s22 }
   0xe   : > { %s281_s28 = scalar_lea.vmem %s865_s1, %s657_s25  ;;  %s286_s7 = scalar_lea.vmem %s866_s2, %s657_s25  ;;  %v531_v44 = vperm.slane %v768_v38, 0  ;;  %v532_v49 = vperm.slane %v768_v38, 1  ;;  %v533_v54 = vperm.slane %v768_v38, 2 }
   0xf   : > { %v292_v3 = vld [vmem:[%s286_s7] sm:$0xff]  ;;  %v293_v5 = vld [vmem:[%s286_s7 + $0x8] sm:$0xf]  ;;  %s792_s19 = scalar_lea.vmem %s864_s0, %s656_s16  ;;  %s824_s24 = scalar_lea.vmem %s870_s6, %s656_s16 }
  0x10   : > { %v294_v4 = vld [vmem:[%s281_s28] sm:$0xff]  ;;  %v295_v7 = vld [vmem:[%s281_s28 + $0x8] sm:$0xf] }
  0x11   : > { %v296_v6 = vadd.f32 %v294_v4, %v292_v3  ;;  %v297_v8 = vadd.f32 %v295_v7, %v293_v5 }
  0x13   : > { %314 = vst [vmem:[#allocation1] ss:$2 sm:$0xff] %v296_v6  ;;  %v517_v6 = vld [vmem:[%s792_s19] sm:$0xff] }
  0x14   : > { %316 = vst [vmem:[#allocation1 + $0x10] ss:$2 sm:$0xff] %v297_v8 }
  0x15   : > { %309 = vperm.xlu0 %667, %v301_v2  }
  0x1a   : > { %v317_v11 = vld.sshfl [vmem:[#allocation1] sm:$0xff pattern:$0x75316420]  ;;  %v318_v12 = vld.sshfl [vmem:[#allocation1 + $0x8] sm:$0xff pattern:$0x75316420] }
  0x1b   : > { %638 = vmatpush.msk.msra.mxu0 %vm327_vm0, %v317_v11  ;;  %655 = vmatpush.msk.msra.mxu3 %vm327_vm0, %v317_v11  ;;  %v319_v13 = vld.sshfl [vmem:[#allocation1 + $0x10] sm:$0xff pattern:$0x75316420]  ;;  %v518_v11 = vld [vmem:[%s792_s19 + $0x8] sm:$0xff] }
  0x1c   : > { %641 = vmatpush.msk.msra.mxu1 %vm327_vm0, %v318_v12  ;;  %644 = vmatpush.msk.msra.mxu2 %vm327_vm0, %v319_v13 }
  0x1d   : > { %639 = vmatmul.msk.f32.vlgmr.msra.gmra.mxu0 %vm320_vm1, %v298_v9  ;;  %640 = vmatmul.msk.f32.vlgmr.msra.gmra.mxu3 %vm320_vm1, %v299_v10 }
  0x1e   : > { %642 = vmatmul.msk.f32.vlgmr.msra.gmra.mxu1 %vm320_vm1, %v298_v9  ;;  %645 = vmatmul.msk.f32.vlgmr.msra.gmra.mxu2 %vm320_vm1, %v298_v9 }
  0x26   : > { %643 = vmatmul.msk.f32.gmra.mxu1 %vm320_vm1, %v299_v10  ;;  %646 = vmatmul.msk.f32.gmra.mxu2 %vm320_vm1, %v299_v10 }
  0x7f   : > { %v305_v14 = vpop.permute.xlu0 %304 }
  0x87   : > { %v310_v21 = vpop.permute.xlu0 %309 }
  0x9a   : > { %v351_v15 = vpop.f32.mrf.mxu0 }
  0x9b   : > { %v352_v16 = vadd.f32 %v351_v15, %v305_v14  ;;  %v374_v17 = vpop.f32.mrf.mxu1 }
  0x9c   : > { %v375_v18 = vadd.f32 %v374_v17, %v305_v14 }
  0x9d   : > { %v647_v19 = vmul.f32 -1.442695, %v352_v16 }
  0x9e   : > { %v648_v20 = vmul.f32 -1.442695, %v375_v18 }
  0x9f   : > { %668 = vpow2.f32 %v647_v19 }
  0xa0   : > { %670 = vpow2.f32 %v648_v20  ;;  %v354_v22 = vpop.f32.mrf.mxu3 }
  0xa1   : > { %v355_v23 = vadd.f32 %v354_v22, %v310_v21  ;;  %v397_v24 = vpop.f32.mrf.mxu2 }
  0xa2   : > { %v398_v25 = vadd.f32 %v397_v24, %v305_v14 }
  0xa3   : > { %v650_v26 = vmul.f32 -1.442695, %v355_v23  ;;  %v377_v27 = vpop.f32.mrf.mxu1 }
  0xa4   : > { %v649_v28 = vmul.f32 -1.442695, %v398_v25  ;;  %v378_v29 = vadd.f32 %v377_v27, %v310_v21 }
  0xa5   : > { %v669_v30 = vpop.eup %668  ;;  %672 = vpow2.f32 %v650_v26 }
  0xa6   : > { %v671_v31 = vpop.eup %670  ;;  %v421_v32 = vadd.f32 1.0, %v669_v30  ;;  %674 = vpow2.f32 %v649_v28  ;;  %v651_v33 = vmul.f32 -1.442695, %v378_v29 }
  0xa7   : > { %v422_v34 = vadd.f32 1.0, %v671_v31  ;;  %v520_v31 = vld [vmem:[%s792_s19 + $0x18] sm:$0xff] }
  0xa8   : > { %676 = vrcp.f32 %v421_v32  ;;  %v436_v43 = vand.u32 2147483647, %v421_v32  ;;  %v438_v48 = vand.u32 2147483648, %v421_v32  ;;  %vm432_vm2 = vweird.f32 %v421_v32 }
  0xa9   : > { %678 = vrcp.f32 %v422_v34  ;;  %v400_v35 = vpop.f32.mrf.mxu2  ;;  %v451_v52 = vand.u32 2147483647, %v422_v34  ;;  %v453_v53 = vand.u32 2147483648, %v422_v34  ;;  %vm447_vm3 = vweird.f32 %v422_v34 }
  0xaa   : > { %680 = vpow2.f32 %v651_v33  ;;  %v401_v36 = vadd.f32 %v400_v35, %v310_v21  ;;  %vm782_vm4 = vcmp.eq.f32.partialorder %v436_v43, 8.507059e+37  ;;  %v439_v61 = vor.u32 1.1754944e-38, %v438_v48 }
  0xab   : > { %v673_v37 = vpop.eup %672  ;;  %vm795_vm7 = vcmp.eq.f32.partialorder %v451_v52, 8.507059e+37  ;;  %v454_v1 = vor.u32 1.1754944e-38, %v453_v53  ;;  %v521_v52 = vld [vmem:[%s792_s19 + $0x20] sm:$0xff] }
  0xac   : > { %v675_v39 = vpop.eup %674  ;;  %v770_v40 = vadd.f32 1.0, %v673_v37  ;;  %v652_v45 = vmul.f32 -1.442695, %v401_v36  ;;  %v519_v36 = vld [vmem:[%s792_s19 + $0x10] sm:$0xff] }
  0xad   : > { %v772_v41 = vadd.f32 1.0, %v675_v39 }
  0xae   : > { %v677_v42 = vpop.eup %676  ;;  %682 = vrcp.f32 %v770_v40  ;;  %v481_v59 = vand.u32 2147483647, %v770_v40  ;;  %vm477_vm8 = vweird.f32 %v770_v40  ;;  %v483_v5 = vand.u32 2147483648, %v770_v40 }
  0xaf   : > { %v679_v46 = vpop.eup %678  ;;  %v428_v47 = vmul.f32 %v677_v42, %v421_v32  ;;  %684 = vrcp.f32 %v772_v41  ;;  %vm433_vm5 = vweird.f32 %v677_v42  ;;  %vm462_vm11 = vweird.f32 %v772_v41 }
  0xb0   : > { %v681_v50 = vpop.eup %680  ;;  %v443_v51 = vmul.f32 %v679_v46, %v422_v34  ;;  %686 = vpow2.f32 %v652_v45  ;;  %vm448_vm6 = vweird.f32 %v679_v46  ;;  %vm434_vm9 = vmor %vm432_vm2, %vm433_vm5  ;;  %vm804_vm10 = vcmp.eq.f32.partialorder %v481_v59, 8.507059e+37 }
  0xb1   : > { %v429_v55 = vsub.f32 1.0, %v428_v47  ;;  %v780_v56 = vadd.f32 1.0, %v681_v50  ;;  %vm449_vm12 = vmor %vm447_vm3, %vm448_vm6  ;;  %v466_v13 = vand.u32 2147483647, %v772_v41  ;;  %v468_v14 = vand.u32 2147483648, %v772_v41 }
  0xb2   : > { %v444_v58 = vsub.f32 1.0, %v443_v51  ;;  %v484_v29 = vor.u32 1.1754944e-38, %v483_v5 }
  0xb3   : > { %v430_v60 = vmul.f32 %v677_v42, %v429_v55  ;;  %688 = vrcp.f32 %v780_v56  ;;  %vm467_vm0 = vcmp.eq.f32.partialorder %v466_v13, 8.507059e+37  ;;  %v469_v35 = vor.u32 1.1754944e-38, %v468_v14 }
  0xb4   : > { %v683_v62 = vpop.eup %682  ;;  %v445_v63 = vmul.f32 %v679_v46, %v444_v58  ;;  %v496_v37 = vand.u32 2147483647, %v780_v56  ;;  %v498_v39 = vand.u32 2147483648, %v780_v56  ;;  %vm492_vm3 = vweird.f32 %v780_v56 }
  0xb5   : > { %v685_v2 = vpop.eup %684  ;;  %v431_v3 = vadd.f32 %v677_v42, %v430_v60  ;;  %v473_v4 = vmul.f32 %v683_v62, %v770_v40  ;;  %vm478_vm13 = vweird.f32 %v683_v62 }
  0xb6   : > { %v446_v7 = vadd.f32 %v679_v46, %v445_v63  ;;  %v458_v9 = vmul.f32 %v685_v2, %v772_v41  ;;  %v687_v15 = vpop.eup %686  ;;  %vm463_vm14 = vweird.f32 %v685_v2  ;;  %vm479_vm15 = vmor %vm477_vm8, %vm478_vm13  ;;  %v499_v51 = vor.u32 1.1754944e-38, %v498_v39 }
  0xb7   : > { %v435_v10 = vsel %vm434_vm9, %v677_v42, %v431_v3  ;;  %v474_v12 = vsub.f32 1.0, %v473_v4  ;;  %v426_v23 = vadd.f32 1.0, %v687_v15  ;;  %vm464_vm1 = vmor %vm462_vm11, %vm463_vm14  ;;  %vm497_vm6 = vcmp.eq.f32.partialorder %v496_v37, 8.507059e+37 }
  0xb8   : > { %v440_v16 = vsel %vm782_vm4, %v439_v61, %v435_v10  ;;  %v450_v17 = vsel %vm449_vm12, %v679_v46, %v446_v7  ;;  %v459_v18 = vsub.f32 1.0, %v458_v9  ;;  %vm545_vm4 = vcmask 556032  }
  0xb9   : > { %v689_v19 = vpop.eup %688  ;;  %v523_v20 = vmul.f32 %v517_v6, %v440_v16  ;;  %v455_v21 = vsel %vm795_vm7, %v454_v1, %v450_v17  ;;  %v475_v22 = vmul.f32 %v683_v62, %v474_v12  ;;  %690 = vrcp.f32 %v426_v23  ;;  %v522_v1 = vld [vmem:[%s792_s19 + $0x28] sm:$0xff] }
  0xba   : > { %v524_v24 = vmul.f32 %v518_v11, %v455_v21  ;;  %v460_v25 = vmul.f32 %v685_v2, %v459_v18  ;;  %v488_v26 = vmul.f32 %v689_v19, %v780_v56  ;;  %vm493_vm2 = vweird.f32 %v689_v19 }
  0xbb   : > { %v537_v27 = vmul.f32 %v531_v44, %v523_v20  ;;  %v476_v28 = vadd.f32 %v683_v62, %v475_v22  ;;  %vm494_vm5 = vmor %vm492_vm3, %vm493_vm2  ;;  %v513_v60 = vand.u32 2147483648, %v426_v23  ;;  %vm507_vm8 = vweird.f32 %v426_v23 }
  0xbc   : > { %v538_v30 = vmul.f32 %v532_v49, %v524_v24  ;;  %v461_v32 = vadd.f32 %v685_v2, %v460_v25  ;;  %v489_v33 = vsub.f32 1.0, %v488_v26 }
  0xbd   : > { %543 = vst [vmem:[%s824_s24] sm:$0xff] %v537_v27  ;;  %v480_v34 = vsel %vm479_vm15, %v683_v62, %v476_v28  ;;  %v511_v62 = vand.u32 2147483647, %v426_v23  ;;  %v514_v0 = vor.u32 1.1754944e-38, %v513_v60 }
  0xbe   : > { %544 = vst [vmem:[%s824_s24 + $0x8] sm:$0xff] %v538_v30  ;;  %v485_v40 = vsel %vm804_vm10, %v484_v29, %v480_v34  ;;  %v465_v42 = vsel %vm464_vm1, %v685_v2, %v461_v32  ;;  %v490_v43 = vmul.f32 %v689_v19, %v489_v33 }
  0xbf   : > { %v526_v45 = vmul.f32 %v520_v31, %v485_v40  ;;  %v470_v46 = vsel %vm467_vm0, %v469_v35, %v465_v42  ;;  %v691_v48 = vpop.eup %690  ;;  %vm512_vm10 = vcmp.eq.f32.partialorder %v511_v62, 8.507059e+37 }
  0xc0   : > { %v525_v41 = vmul.f32 %v519_v36, %v470_v46  ;;  %v491_v47 = vadd.f32 %v689_v19, %v490_v43  ;;  %v503_v57 = vmul.f32 %v691_v48, %v426_v23  ;;  %vm508_vm7 = vweird.f32 %v691_v48 }
  0xc1   : > { %v540_v50 = vmul.f32 %v531_v44, %v526_v45  ;;  %vm509_vm9 = vmor %vm507_vm8, %vm508_vm7 }
  0xc2   : > { %v539_v53 = vmul.f32 %v533_v54, %v525_v41  ;;  %v495_v55 = vsel %vm494_vm5, %v689_v19, %v491_v47  ;;  %v504_v59 = vsub.f32 1.0, %v503_v57 }
  0xc3   : > { %547 = vst [vmem:[%s824_s24 + $0x18] sm:$0xff] %v540_v50  ;;  %v500_v58 = vsel %vm497_vm6, %v499_v51, %v495_v55 }
  0xc4   : > { %546 = vst.msk [vmem:[%s824_s24 + $0x10] sm:$0xff] %vm545_vm4, %v539_v53  ;;  %v527_v56 = vmul.f32 %v521_v52, %v500_v58  ;;  %v505_v61 = vmul.f32 %v691_v48, %v504_v59 }
  0xc6   : > { %v541_v44 = vmul.f32 %v532_v49, %v527_v56  ;;  %v506_v63 = vadd.f32 %v691_v48, %v505_v61 }
  0xc8   : > { %548 = vst [vmem:[%s824_s24 + $0x20] sm:$0xff] %v541_v44  ;;  %v510_v2 = vsel %vm509_vm9, %v691_v48, %v506_v63 }
  0xc9   : > { %v515_v3 = vsel %vm512_vm10, %v514_v0, %v510_v2 }
  0xca   : > { %v528_v4 = vmul.f32 %v522_v1, %v515_v3 }
  0xcc   : > { %v542_v5 = vmul.f32 %v533_v54, %v528_v4 }
  0xce   : > { %549 = vst.msk [vmem:[%s824_s24 + $0x28] sm:$0xff] %vm545_vm4, %v542_v5 }
  0xcf PF: > { %s16_s21 = sadd.s32 1, %s698_s21  }
  0xd0   : > { %p13_p4 = scmp.ge.s32.totalorder %s16_s21, 4  }
  0xd2   :  { %15 = sbr.rel (!%p13_p4) target bundleno = 1 (0x1), region = 81 }

// kernel: rfdn1_forward.15
= control target key start
LH: loop header
LB: loop body
LE: loop exit
PB: predicated region body
PF: predicated region fallthrough
CT: control target
= control target key end

     0   :  { %s4470_s0 = inlined_call_operand.vmem [shape: f32[2,16,324], index: 0, kind: input, shape index: {}]   ;;  %s4471_s1 = inlined_call_operand.vmem [shape: f32[1,324], index: 1, kind: input, shape index: {}]   ;;  %s4472_s2 = inlined_call_operand.hbm [shape: f32[8,16], index: 2, kind: input, shape index: {}]   ;;  %s4473_s3 = inlined_call_operand.vmem [shape: f32[8,1], index: 3, kind: input, shape index: {}]   ;;  %s4474_s4 = inlined_call_operand.hbm [shape: f32[16,144], index: 4, kind: input, shape index: {}]   ;;  %s4475_s5 = inlined_call_operand.vmem [shape: f32[16,1], index: 5, kind: input, shape index: {}]   ;;  %s4476_s6 = inlined_call_operand.hbm [shape: f32[8,144], index: 6, kind: input, shape index: {}]   ;;  %s4477_s7 = inlined_call_operand.vmem [shape: f32[8,1], index: 7, kind: input, shape index: {}]   ;;  %s4478_s8 = inlined_call_operand.hbm [shape: f32[16,16], index: 8, kind: input, shape index: {}]   ;;  %s4479_s9 = inlined_call_operand.vmem [shape: f32[16,1], index: 9, kind: input, shape index: {}]   ;;  %s4480_s10 = inlined_call_operand.hbm [shape: f32[4,16], index: 10, kind: input, shape index: {}]   ;;  %s4481_s11 = inlined_call_operand.vmem [shape: f32[4,1], index: 11, kind: input, shape index: {}]   ;;  %s4482_s12 = inlined_call_operand.hbm [shape: f32[4,4], index: 12, kind: input, shape index: {}]   ;;  %s4483_s13 = inlined_call_operand.vmem [shape: f32[4,1], index: 13, kind: input, shape index: {}]   ;;  %s4484_s14 = inlined_call_operand.hbm [shape: f32[4,36], index: 14, kind: input, shape index: {}]   ;;  %s4485_s15 = inlined_call_operand.vmem [shape: f32[4,1], index: 15, kind: input, shape index: {}]   ;;  %s4486_s16 = inlined_call_operand.vmem [shape: f32[2,16,324], index: 16, kind: output, shape index: {0}]   ;;  %s4487_s17 = inlined_call_operand.vmem [shape: f32[2,4,324], index: 17, kind: output, shape index: {1}]   ;;  %s4488_s18 = inlined_call_operand.vmem [shape: f32[2,4,324], index: 18, kind: output, shape index: {2}]  }
   0x1   :  { %4490 = sst [smem:[#allocation18_spill]] %s4470_s0 }
   0x2   :  { %4491 = sst [smem:[#allocation19_spill]] %s4471_s1 }
   0x3   :  { %4492 = sst [smem:[#allocation20_spill]] %s4472_s2 }
   0x4   :  { %4493 = sst [smem:[#allocation21_spill]] %s4474_s4 }
   0x5   :  { %4494 = sst [smem:[#allocation22_spill]] %s4478_s8 }
   0x6   :  { %4495 = sst [smem:[#allocation23_spill]] %s4485_s15 }
   0x7   :  { %4496 = sst [smem:[#allocation24_spill]] %s4487_s17 }
   0x8   :  { %4497 = sst [smem:[#allocation25_spill]] %s4488_s18 }
   0x9   :  { %24 = vsyncpa [#allocation3], 0 }
   0xa   :  { %25 = vsyncpa [#allocation5], 0 }
   0xb   :  { %26 = vsyncpa [#allocation8], 0 }
   0xc   :  { %27 = vsyncpa [#allocation11], 0  ;;  %s3686_s27 = smov 0  }
   0xd LB: > { %4498 = sst [smem:[#allocation17_spill]] %s3561_s27  ;;  %s3695_s0 = sadd.s32 4294967295, %s3561_s27   ;;  %s3561_s27 = sphi %s3686_s27, %s33_s27  }
   0xe   : > { %s4499_s4 = sld [smem:[#allocation21_spill]]  ;;  %p2862_p0 = scmp.ge.s32.totalorder %s3561_s27, 1 }
   0xf   : > { %p457_p1 = scmp.lt.s32.totalorder %s3561_s27, 3  ;;  %p3036_p2 = scmp.eq.s32.totalorder %s3695_s0, 0 }
  0x10   : > { %s3563_s1 = smov [#allocation4]   ;;  %s4501_s8 = sld [smem:[#allocation22_spill]] }
  0x11   : > { %p3700_p3 = pnand %p2862_p0, %p457_p1  ;;  %s488_s20 = sshll.u32 %s3563_s1, 4  ;;  %s489_s20 = int_to_ptr.vmem [resolvable:$true] %s488_s20 }
  0x12   : > { %s3564_s24 = smov [#allocation7]   ;;  %s3565_s26 = smov 256  }
  0x13   : > { %p3014_p4 = pneg %p3700_p3  ;;  %s520_s25 = sshll.u32 %s3564_s24, 4  ;;  %s521_s25 = int_to_ptr.vmem [resolvable:$true] %s520_s25 }
  0x14   : > { %s486_s30 = sshll.u32 %s4499_s4, 4  ;;  %s3566_s28 = smov 16   ;;  %s487_s30 = int_to_ptr.hbm [resolvable:$true] %s486_s30 }
  0x15   : > { %p3711_p5 = pnand %p3036_p2, %p3014_p4  ;;  %s551_s21 = sshll.u32 %s4482_s12, 4  ;;  %s552_s21 = int_to_ptr.hbm [resolvable:$true] %s551_s21 }
  0x16   : > { %s518_s2 = sshll.u32 %s4501_s8, 4  ;;  %s3567_s22 = smov 128   ;;  %s519_s2 = int_to_ptr.hbm [resolvable:$true] %s518_s2 }
  0x17   : > { %3020 = dma.hbm_to_vmem [thread:$0]  (!%p3711_p5), %s487_s30, 512, %s489_s20, [#allocation5], %s3565_s26, %s3565_s26, %s3566_s28  }
  0x18   : > { %s3568_s4 = smov 8   ;;  %s3569_s8 = smov [#allocation10]  }
  0x19   : > { %3026 = dma.hbm_to_vmem [thread:$0]  (!%p3711_p5), %s519_s2, 256, %s521_s25, [#allocation8], %s3567_s22, %s3567_s22, %s3568_s4  }
  0x1a   : > { %s553_s27 = sshll.u32 %s3569_s8, 4  ;;  %s4503_s24 = sld [smem:[#allocation20_spill]]  ;;  %s554_s27 = int_to_ptr.vmem [resolvable:$true] %s553_s27 }
  0x1b   : > { %3032 = dma.hbm_to_vmem [thread:$0]  (!%p3711_p5), %s552_s21, 64, %s554_s27, [#allocation11]  }
  0x1c   : > { %s504_s26 = sshll.u32 %s4476_s6, 4  ;;  %s3570_s28 = smov [#allocation2]   ;;  %s505_s26 = int_to_ptr.hbm [resolvable:$true] %s504_s26 }
  0x1d   : > { %s474_s29 = sshll.u32 %s3570_s28, 4  ;;  %s3571_s4 = smov [#allocation6]   ;;  %s475_s29 = int_to_ptr.vmem [resolvable:$true] %s474_s29 }
  0x1e   : > { %s506_s8 = sshll.u32 %s3571_s4, 4  ;;  %s536_s2 = sshll.u32 %s4480_s10, 4  ;;  %s507_s8 = int_to_ptr.vmem [resolvable:$true] %s506_s8  ;;  %s537_s2 = int_to_ptr.hbm [resolvable:$true] %s536_s2 }
  0x1f   : > { %3023 = dma.hbm_to_vmem [thread:$0]  (!%p3711_p5), %s505_s26, 256, %s507_s8, [#allocation5]  }
  0x20   : > { %s472_s15 = sshll.u32 %s4503_s24, 4  ;;  %s566_s1 = sshll.u32 %s4484_s14, 4  ;;  %s473_s15 = int_to_ptr.hbm [resolvable:$true] %s472_s15  ;;  %s567_s1 = int_to_ptr.hbm [resolvable:$true] %s566_s1 }
  0x21   : > { %3017 = dma.hbm_to_vmem [thread:$0]  (!%p3711_p5), %s473_s15, 128, %s475_s29, [#allocation3]  }
  0x22   : > { %s3572_s21 = smov [#allocation9]   ;;  %s3573_s15 = smov [#allocation12]  }
  0x23   : > { %s538_s22 = sshll.u32 %s3572_s21, 4  ;;  %s568_s24 = sshll.u32 %s3573_s15, 4  ;;  %s539_s22 = int_to_ptr.vmem [resolvable:$true] %s538_s22  ;;  %s569_s24 = int_to_ptr.vmem [resolvable:$true] %s568_s24 }
  0x24   : > { %3029 = dma.hbm_to_vmem [thread:$0]  (!%p3711_p5), %s537_s2, 64, %s539_s22, [#allocation8]  }
  0x25   : > { %3035 = dma.hbm_to_vmem [thread:$0]  (!%p3711_p5), %s567_s1, 64, %s569_s24, [#allocation11]  }
  0x26   : > { %592 = sbr.rel (%p3700_p3) target bundleno = 1672 (0x688), region = 84 }
  0x2b   : > { %3544 = dma.done.wait (%p3036_p2), [#allocation3], 128  }
  0x2c   : > { %3546 = vsyncadd (%p3036_p2), [#allocation3], 4294967168 }
  0x2d   : > { %3548 = dma.done.wait (%p3036_p2), [#allocation5], 768  }
  0x2e   : > { %3550 = vsyncadd (%p3036_p2), [#allocation5], 4294966528 }
  0x2f   : > { %3552 = dma.done.wait (%p3036_p2), [#allocation8], 320  }
  0x30   : > { %3554 = vsyncadd (%p3036_p2), [#allocation8], 4294966976 }
  0x31   : > { %3556 = dma.done.wait (%p3036_p2), [#allocation11], 128  }
  0x32   : > { %3558 = vsyncadd (%p3036_p2), [#allocation11], 4294967168  ;;  %p687_p6 = scmp.lt.s32.totalorder %s3695_s0, 1  ;;  %s4504_s20 = sld [smem:[#allocation18_spill]]  ;;  %vm828_vm0 = vcmask 154624   ;;  %vm841_vm1 = vcmask 711680  }
  0x33   : > { %s3574_s28 = smov 19   ;;  %s3575_s29 = smov 91   ;;  %vm998_vm2 = vcmask 744448   ;;  %vm975_vm3 = vcmask 752640   ;;  %vm952_vm4 = vcmask 883712   ;;  %vm1021_vm5 = vcmask 736256   ;;  %vm4000_vm11 = vmneg %vm828_vm0 }
  0x34   : > { %s4513_s0 = smov (!%p687_p6, %s3695_s0), 1  ;;  %s3576_s4 = smov 92   ;;  %vm929_vm6 = vcmask 891904   ;;  %vm721_vm7 = vcmask 130048   ;;  %vm906_vm8 = vcmask 900096   ;;  %vm883_vm9 = vcmask 1031168  }
  0x35   : > { %s2984_s19 = smul.u32 48, %s4513_s0  ;;  %s3577_s8 = smov 108   ;;  %vm860_vm10 = vcmask 1039360  }
  0x36   : > { %s3578_s17 = smov 90   ;;  %s3579_s18 = smov 109  }
  0x37   : > { %s3580_s2 = smov 110   ;;  %s3581_s27 = smov 126  }
  0x38   : > { %s691_s26 = scalar_lea.vmem %s4504_s20, %s2984_s19  ;;  %s3582_s25 = smov 127  }
  0x39   : > { %v3772_v0 = vld [vmem:[%s691_s26 + $0x18] sm:$0xff]  ;;  %v3774_v1 = vld [vmem:[%s691_s26] sm:$0xff]  ;;  %v3780_v2 = vld [vmem:[%s691_s26 + $0x28] sm:$0xff]  ;;  %s4507_s30 = sld [smem:[#allocation19_spill]]  ;;  %s3584_s22 = smov 120  }
  0x3a   : > { %822 = vrot.lane.b32.xlu0 %v3772_v0, %s3574_s28  ;;  %816 = vrot.lane.b32.xlu1 %v3774_v1, %s3574_s28  ;;  %v3782_v3 = vld [vmem:[%s691_s26 + $0x20] sm:$0xff]  ;;  %v3789_v4 = vld [vmem:[%s691_s26 + $0x8] sm:$0xff]  ;;  %s4283_s15 = scalar_lea.vmem %s4486_s16, %s2984_s19  ;;  %s3585_s19 = smov 124  }
  0x3b   : > { %826 = vrot.lane.b32.xlu2 %v3780_v2, %s3574_s28  ;;  %739 = vmatpush.msra.mxu0 %v3772_v0  ;;  %v3791_v5 = vld [vmem:[%s691_s26 + $0x10] sm:$0xff]  ;;  %s3586_s24 = smov 112   ;;  %s3587_s23 = smov 116  }
  0x3c   : > { %759 = vmatpush.msra.mxu1 %v3782_v3  ;;  %779 = vmatpush.msra.mxu2 %v3780_v2  ;;  %s4509_s20 = sld [smem:[#allocation24_spill]] }
  0x3d   : > { %740 = vmatpush.msra.mxu0 %v3774_v1 }
  0x3e   : > { %760 = vmatpush.msra.mxu1 %v3789_v4  ;;  %780 = vmatpush.msra.mxu2 %v3791_v5 }
  0x42   : > { %824 = vrot.lane.b32.xlu0 %v3782_v3, %s3574_s28  ;;  %818 = vrot.lane.b32.xlu1 %v3789_v4, %s3574_s28 }
  0x43   : > { %820 = vrot.lane.b32.xlu2 %v3791_v5, %s3574_s28 }
  0x95   : > { %v827_v8 = vpop.permute.xlu2 %826 }
  0x9d   : > { %v821_v17 = vpop.permute.xlu2 %820 }
  0xac   : > { %v3802_v6 = vpop.permute.xlu0 %822  ;;  %v3804_v7 = vpop.permute.xlu1 %816 }
  0xad   : > { %v840_v11 = vsel %vm828_vm0, 0.0, %v3802_v6  ;;  %v839_v14 = vsel %vm828_vm0, 0.0, %v3804_v7 }
  0xae   : > { %v3146_v18 = vpack.i.bf16 %v839_v14, %v840_v11 }
  0xb4   : > { %v825_v9 = vpop.permute.xlu0 %824  ;;  %v819_v10 = vpop.permute.xlu1 %818 }
  0xb5   : > { %v3810_v12 = vsel %vm828_vm0, %v3802_v6, %v825_v9  ;;  %v3814_v13 = vsel %vm828_vm0, %v3804_v7, %v819_v10  ;;  %v3826_v19 = vsel %vm828_vm0, %v825_v9, %v827_v8  ;;  %v3829_v20 = vsel %vm828_vm0, %v819_v10, %v821_v17 }
  0xb6   : > { %v3086_v15 = vpack.i.bf16 %v3810_v12, %v840_v11  ;;  %v3091_v16 = vpack.i.bf16 %v3814_v13, %v839_v14  ;;  %v843_v21 = vsel %vm841_vm1, %v3826_v19, 0.0  ;;  %v842_v22 = vsel %vm841_vm1, %v3829_v20, 0.0  ;;  %v714_v11 = vld [vmem:[#allocation2] sm:$0xff] }
  0xb7   : > { %v3151_v23 = vpack.i.bf16 %v842_v22, %v843_v21  ;;  %v3171_v24 = vpack.i.bf16 %v843_v21, %v3810_v12  ;;  %v3181_v25 = vpack.i.bf16 %v842_v22, %v3814_v13  ;;  %2883 = vmatmul.msk.f32.vlgmr.msra.gmra.mxu0 %vm721_vm7, %v714_v11  ;;  %2885 = vmatmul.msk.f32.vlgmr.msra.gmra.mxu2 %vm721_vm7, %v714_v11 }
  0xb8   : > { %3087 = vrot.lane.b32.xlu0 %v3086_v15, %s3575_s29  ;;  %3097 = vrot.lane.b32.xlu2 %v3086_v15, %s3576_s4 }
  0xb9   : > { %3092 = vrot.lane.b32.xlu1 %v3091_v16, %s3575_s29  ;;  %2884 = vmatmul.msk.f32.vlgmr.msra.gmra.mxu1 %vm721_vm7, %v714_v11 }
  0xc0   : > { %3107 = vrot.lane.b32.xlu2 %v3086_v15, %s3577_s8  ;;  %3102 = vrot.lane.b32.xlu0 %v3091_v16, %s3576_s4 }
  0xc1   : > { %3147 = vrot.lane.b32.xlu1 %v3146_v18, %s3578_s17 }
  0xc8   : > { %3117 = vrot.lane.b32.xlu2 %v3086_v15, %s3579_s18  ;;  %3112 = vrot.lane.b32.xlu0 %v3091_v16, %s3577_s8 }
  0xc9   : > { %3152 = vrot.lane.b32.xlu1 %v3151_v23, %s3575_s29 }
  0xd0   : > { %3127 = vrot.lane.b32.xlu2 %v3086_v15, %s3580_s2  ;;  %3122 = vrot.lane.b32.xlu0 %v3091_v16, %s3579_s18 }
  0xd1   : > { %3157 = vrot.lane.b32.xlu1 %v3151_v23, %s3576_s4 }
  0xd8   : > { %3142 = vrot.lane.b32.xlu2 %v3091_v16, %s3581_s27  ;;  %3132 = vrot.lane.b32.xlu0 %v3091_v16, %s3580_s2 }
  0xd9   : > { %3162 = vrot.lane.b32.xlu1 %v3151_v23, %s3577_s8 }
  0xe0   : > { %3172 = vrot.lane.b32.xlu2 %v3171_v24, %s3578_s17  ;;  %3137 = vrot.lane.b32.xlu0 %v3086_v15, %s3581_s27 }
  0xe1   : > { %3167 = vrot.lane.b32.xlu1 %v3151_v23, %s3579_s18 }
  0xe8   : > { %3177 = vrot.lane.b32.xlu2 %v3086_v15, %s3582_s25  ;;  %3187 = vrot.lane.b32.xlu0 %v3151_v23, %s3580_s2 }
  0xe9   : > { %3182 = vrot.lane.b32.xlu1 %v3181_v25, %s3578_s17 }
  0xf0   : > { %3202 = vrot.lane.b32.xlu2 %v3151_v23, %s3582_s25  ;;  %3192 = vrot.lane.b32.xlu0 %v3091_v16, %s3582_s25 }
  0xf1   : > { %3197 = vrot.lane.b32.xlu1 %v3151_v23, %s3581_s27 }
 0x112   : > { %v3856_v26 = vpop.permute.xlu2 %3097 }
 0x113   : > { %v3100_v36 = vunpack.i.h.bf16 %v3856_v26  ;;  %v3099_v37 = vunpack.i.l.bf16 %v3856_v26 }
 0x115   : > { %v978_v40 = vsel %vm975_vm3, %v3099_v37, %v3100_v36 }
 0x11a   : > { %v3858_v27 = vpop.permute.xlu2 %3107 }
 0x11b   : > { %v3110_v43 = vunpack.i.h.bf16 %v3858_v27  ;;  %v3109_v44 = vunpack.i.l.bf16 %v3858_v27 }
 0x11d   : > { %v955_v49 = vsel %vm952_vm4, %v3109_v44, %v3110_v43 }
 0x122   : > { %v3860_v28 = vpop.permute.xlu2 %3117 }
 0x123   : > { %v3120_v50 = vunpack.i.h.bf16 %v3860_v28  ;;  %v3119_v51 = vunpack.i.l.bf16 %v3860_v28 }
 0x125   : > { %v932_v10 = vsel %vm929_vm6, %v3119_v51, %v3120_v50 }
 0x12a   : > { %v3088_v29 = vpop.permute.xlu0 %3087  ;;  %v3862_v30 = vpop.permute.xlu2 %3127 }
 0x12b   : > { %v3090_v31 = vunpack.i.h.bf16 %v3088_v29  ;;  %v3089_v32 = vunpack.i.l.bf16 %v3088_v29  ;;  %v3093_v33 = vpop.permute.xlu1 %3092  ;;  %v3130_v16 = vunpack.i.h.bf16 %v3862_v30  ;;  %v3129_v17 = vunpack.i.l.bf16 %v3862_v30  ;;  %v809_v30 = vld [vmem:[%s4475_s5 + $0x8] sm:$0xff] }
 0x12c   : > { %v3095_v34 = vunpack.i.h.bf16 %v3093_v33  ;;  %v3094_v35 = vunpack.i.l.bf16 %v3093_v33 }
 0x12d   : > { %v1001_v38 = vsel %vm998_vm2, %v3089_v32, %v3090_v31 }
 0x12e   : > { %1048 = vmatpush.msra.mxu3 %v1001_v38  ;;  %v999_v39 = vsel %vm998_vm2, %v3094_v35, %v3095_v34 }
 0x130   : > { %1049 = vmatpush.msra.mxu3 %v999_v39 }
 0x132   : > { %v3871_v41 = vpop.permute.xlu2 %3142  ;;  %v3103_v42 = vpop.permute.xlu0 %3102  ;;  %1050 = vmatpush.msra.mxu3 %v978_v40 }
 0x133   : > { %v3105_v45 = vunpack.i.h.bf16 %v3103_v42  ;;  %v3104_v46 = vunpack.i.l.bf16 %v3103_v42  ;;  %v3875_v47 = vpop.permute.xlu1 %3147 }
 0x134   : > { %v3149_v52 = vunpack.i.l.bf16 %v3875_v47 }
 0x135   : > { %v976_v48 = vsel %vm975_vm3, %v3104_v46, %v3105_v45  ;;  %v3144_v46 = vunpack.i.l.bf16 %v3871_v41 }
 0x136   : > { %1051 = vmatpush.msra.mxu3 %v976_v48 }
 0x138   : > { %1052 = vmatpush.msra.mxu3 %v955_v49 }
 0x13a   : > { %v3884_v53 = vpop.permute.xlu2 %3172  ;;  %v3113_v54 = vpop.permute.xlu0 %3112 }
 0x13b   : > { %v3175_v55 = vunpack.i.h.bf16 %v3884_v53  ;;  %v3174_v56 = vunpack.i.l.bf16 %v3884_v53  ;;  %v3115_v57 = vunpack.i.h.bf16 %v3113_v54  ;;  %v3114_v58 = vunpack.i.l.bf16 %v3113_v54  ;;  %v3888_v59 = vpop.permute.xlu1 %3152 }
 0x13c   : > { %v3155_v60 = vunpack.i.h.bf16 %v3888_v59  ;;  %v3154_v61 = vunpack.i.l.bf16 %v3888_v59  ;;  %v1217_v59 = vld [vmem:[#allocation6 + $0x8] sm:$0xff] }
 0x13d   : > { %v953_v62 = vsel %vm952_vm4, %v3114_v58, %v3115_v57  ;;  %v1024_v63 = vsel %vm1021_vm5, %v3149_v52, %v3174_v56  ;;  %v1025_v8 = vsel %vm1021_vm5, %v3174_v56, %v3175_v55 }
 0x13e   : > { %1053 = vmatpush.msra.mxu3 %v953_v62  ;;  %1085 = vmatpush.msrb.mxu0 %v1024_v63  ;;  %v1002_v9 = vsel %vm998_vm2, %v3090_v31, %v3154_v61  ;;  %v1000_v14 = vsel %vm998_vm2, %v3095_v34, %v3155_v60  ;;  %v909_v31 = vsel %vm906_vm8, %v3129_v17, %v3130_v16  ;;  %v808_v17 = vld [vmem:[%s4475_s5] sm:$0xff] }
 0x13f   : > { %1094 = vmatpush.msrb.mxu1 %v1002_v9  ;;  %1131 = vmatpush.msrb.mxu2 %v1025_v8  ;;  %v3583_v9 = vmov 0  }
 0x140   : > { %1054 = vmatpush.msra.mxu3 %v932_v10  ;;  %3207 = vset.pattern.permute.xlu1 %v3583_v9  ;;  %v3150_v10 = vunpack.i.h.bf16 %v3875_v47  ;;  %v805_v47 = vld [vmem:[#allocation4 + $0x8] sm:$0xff] }
 0x141   : > { %1095 = vmatpush.msrb.mxu1 %v1000_v14  ;;  %3206 = vset.pattern.permute.xlu0 %v3583_v9 }
 0x142   : > { %v3123_v15 = vpop.permute.xlu0 %3122  ;;  %v3940_v42 = vpop.permute.xlu2 %3177  ;;  %3328 = vset.pattern.permute.xlu2 %v3583_v9  ;;  %1034 = vperm.xlu1 %3207, %v808_v17  }
 0x143   : > { %v3125_v18 = vunpack.i.h.bf16 %v3123_v15  ;;  %v3124_v21 = vunpack.i.l.bf16 %v3123_v15  ;;  %v3911_v22 = vpop.permute.xlu1 %3157  ;;  %v3180_v52 = vunpack.i.h.bf16 %v3940_v42  ;;  %v3179_v54 = vunpack.i.l.bf16 %v3940_v42  ;;  %1039 = vperm.xlu0 %3206, %v809_v30  }
 0x144   : > { %v3160_v23 = vunpack.i.h.bf16 %v3911_v22  ;;  %v3159_v24 = vunpack.i.l.bf16 %v3911_v22  ;;  %v804_v22 = vld [vmem:[#allocation4] sm:$0xff] }
 0x145   : > { %v930_v25 = vsel %vm929_vm6, %v3124_v21, %v3125_v18  ;;  %v863_v63 = vsel %vm860_vm10, %v3179_v54, %v3180_v52 }
 0x146   : > { %1055 = vmatpush.msra.mxu3 %v930_v25  ;;  %v979_v29 = vsel %vm975_vm3, %v3100_v36, %v3159_v24  ;;  %v977_v32 = vsel %vm975_vm3, %v3105_v45, %v3160_v23  ;;  %v3145_v45 = vunpack.i.h.bf16 %v3871_v41 }
 0x147   : > { %1096 = vmatpush.msrb.mxu1 %v979_v29 }
 0x148   : > { %1056 = vmatpush.msra.mxu3 %v909_v31  ;;  %v884_v58 = vsel %vm883_vm9, %v3144_v46, %v3145_v45 }
 0x149   : > { %1097 = vmatpush.msrb.mxu1 %v977_v32 }
 0x14a   : > { %v3133_v33 = vpop.permute.xlu0 %3132  ;;  %v3203_v31 = vpop.permute.xlu2 %3202 }
 0x14b   : > { %v3135_v34 = vunpack.i.h.bf16 %v3133_v33  ;;  %v3134_v35 = vunpack.i.l.bf16 %v3133_v33  ;;  %v3927_v37 = vpop.permute.xlu1 %3162 }
 0x14c   : > { %v3165_v26 = vunpack.i.h.bf16 %v3927_v37  ;;  %v3164_v36 = vunpack.i.l.bf16 %v3927_v37  ;;  %v4044_v37 = vpop.f32.mrf.mxu1 }
 0x14d   : > { %v907_v38 = vsel %vm906_vm8, %v3134_v35, %v3135_v34 }
 0x14e   : > { %1057 = vmatpush.msra.mxu3 %v907_v38  ;;  %v956_v39 = vsel %vm952_vm4, %v3110_v43, %v3164_v36  ;;  %v954_v40 = vsel %vm952_vm4, %v3115_v57, %v3165_v26  ;;  %v807_v38 = vld [vmem:[#allocation4 + $0x18] sm:$0xff] }
 0x14f   : > { %1098 = vmatpush.msrb.mxu1 %v956_v39 }
 0x151   : > { %1099 = vmatpush.msrb.mxu1 %v954_v40 }
 0x152   : > { %v3942_v44 = vpop.permute.xlu0 %3137 }
 0x153   : > { %v3140_v48 = vunpack.i.h.bf16 %v3942_v44  ;;  %v3139_v27 = vunpack.i.l.bf16 %v3942_v44  ;;  %v3948_v49 = vpop.permute.xlu1 %3167 }
 0x154   : > { %v3170_v43 = vunpack.i.h.bf16 %v3948_v49  ;;  %v3169_v51 = vunpack.i.l.bf16 %v3948_v49 }
 0x155   : > { %v886_v56 = vsel %vm883_vm9, %v3139_v27, %v3140_v48 }
 0x156   : > { %1058 = vmatpush.msra.mxu3 %v886_v56  ;;  %v933_v57 = vsel %vm929_vm6, %v3120_v50, %v3169_v51  ;;  %v931_v62 = vsel %vm929_vm6, %v3125_v18, %v3170_v43 }
 0x157   : > { %1100 = vmatpush.msrb.mxu1 %v933_v57 }
 0x158   : > { %1059 = vmatpush.msra.mxu3 %v884_v58 }
 0x159   : > { %1101 = vmatpush.msrb.mxu1 %v931_v62 }
 0x15a   : > { %v3971_v8 = vpop.permute.xlu0 %3187  ;;  %1060 = vmatpush.msra.mxu3 %v863_v63 }
 0x15b   : > { %v3189_v28 = vunpack.i.l.bf16 %v3971_v8  ;;  %v3183_v50 = vpop.permute.xlu1 %3182  ;;  %v3190_v11 = vunpack.i.h.bf16 %v3971_v8 }
 0x15c   : > { %v3185_v14 = vunpack.i.h.bf16 %v3183_v50  ;;  %v3184_v15 = vunpack.i.l.bf16 %v3183_v50 }
 0x15d   : > { %v910_v18 = vsel %vm906_vm8, %v3130_v16, %v3189_v28  ;;  %v908_v29 = vsel %vm906_vm8, %v3135_v34, %v3190_v11 }
 0x15e   : > { %v1022_v21 = vsel %vm1021_vm5, %v3150_v10, %v3184_v15  ;;  %1102 = vmatpush.msrb.mxu1 %v910_v18  ;;  %v1023_v25 = vsel %vm1021_vm5, %v3184_v15, %v3185_v14 }
 0x15f   : > { %1086 = vmatpush.msrb.mxu0 %v1022_v21  ;;  %1132 = vmatpush.msrb.mxu2 %v1023_v25 }
 0x160   : > { %1103 = vmatpush.msrb.mxu1 %v908_v29  ;;  %2892 = vmatmul.msk.f32.vlgmr.msrb.gmra.mxu2 %vm721_vm7, %v805_v47 }
 0x161   : > { %1140 = vmatpush.msra.mxu0 %v3154_v61  ;;  %1177 = vmatpush.msra.mxu2 %v3175_v55 }
 0x162   : > { %v3193_v16 = vpop.permute.xlu0 %3192  ;;  %2890 = vmatmul.msk.f32.vlgmr.msrb.gmra.mxu0 %vm721_vm7, %v805_v47 }
 0x163   : > { %1141 = vmatpush.msra.mxu0 %v3155_v60  ;;  %1178 = vmatpush.msra.mxu2 %v3185_v14  ;;  %v3195_v32 = vunpack.i.h.bf16 %v3193_v16  ;;  %v3194_v61 = vunpack.i.l.bf16 %v3193_v16  ;;  %v3198_v33 = vpop.permute.xlu1 %3197  ;;  %v3204_v60 = vunpack.i.l.bf16 %v3203_v31 }
 0x164   : > { %v3200_v53 = vunpack.i.h.bf16 %v3198_v33  ;;  %v3199_v55 = vunpack.i.l.bf16 %v3198_v33 }
 0x165   : > { %1142 = vmatpush.msra.mxu0 %v3159_v24  ;;  %v861_v34 = vsel %vm860_vm10, %v3194_v61, %v3195_v32 }
 0x166   : > { %1061 = vmatpush.msra.mxu3 %v861_v34  ;;  %v887_v35 = vsel %vm883_vm9, %v3140_v48, %v3199_v55  ;;  %v885_v24 = vsel %vm883_vm9, %v3145_v45, %v3200_v53 }
 0x167   : > { %1143 = vmatpush.msra.mxu0 %v3160_v23  ;;  %1104 = vmatpush.msrb.mxu1 %v887_v35  ;;  %v3205_v23 = vunpack.i.h.bf16 %v3203_v31 }
 0x168   : > { %2887 = vmatpush.msk.msra.mxu3 %vm4000_vm11, %v3802_v6  ;;  %2893 = vmatmul.msk.f32.gmra.mxu2 %vm721_vm7, %v807_v38  ;;  %v864_v6 = vsel %vm860_vm10, %v3180_v52, %v3204_v60 }
 0x169   : > { %1144 = vmatpush.msra.mxu0 %v3164_v36  ;;  %1105 = vmatpush.msrb.mxu1 %v885_v24  ;;  %v862_v41 = vsel %vm860_vm10, %v3195_v32, %v3205_v23 }
 0x16a   : > { %2889 = vmatpush.msk.msra.mxu3 %vm4000_vm11, %v3804_v7  ;;  %2891 = vmatmul.msk.f32.gmra.mxu0 %vm721_vm7, %v807_v38  ;;  %v806_v7 = vld [vmem:[#allocation4 + $0x10] sm:$0xff] }
 0x16b   : > { %1145 = vmatpush.msra.mxu0 %v3165_v26  ;;  %1106 = vmatpush.msrb.mxu1 %v864_v6 }
 0x16c   : > { %1064 = vmatmul.f32.vlgmr.msra.gmra.mxu3 %v804_v22 }
 0x16d   : > { %1146 = vmatpush.msra.mxu0 %v3169_v51  ;;  %1107 = vmatpush.msrb.mxu1 %v862_v41 }
 0x16f   : > { %1147 = vmatpush.msra.mxu0 %v3170_v43  ;;  %1108 = vmatpush.msrb.mxu1 %v3810_v12  ;;  %v4040_v12 = vpop.f32.mrf.mxu2 }
 0x170   : > { %2896 = vmatmul.msk.f32.vlgmr.msra.gmra.mxu2 %vm721_vm7, %v805_v47 }
 0x171   : > { %1148 = vmatpush.msra.mxu0 %v3189_v28  ;;  %1109 = vmatpush.msrb.mxu1 %v3814_v13  ;;  %v4042_v13 = vpop.f32.mrf.mxu0 }
 0x172   : > { %1110 = vmatmul.f32.vlgmr.msrb.gmra.mxu1 %v804_v22 }
 0x173   : > { %1149 = vmatpush.msra.mxu0 %v3190_v11 }
 0x174   : > { %1067 = vmatmul.f32.gmra.mxu3 %v806_v7 }
 0x175   : > { %1150 = vmatpush.msra.mxu0 %v3199_v55 }
 0x177   : > { %1151 = vmatpush.msra.mxu0 %v3200_v53 }
 0x178   : > { %2897 = vmatmul.msk.f32.gmra.mxu2 %vm721_vm7, %v807_v38 }
 0x179   : > { %1152 = vmatpush.msra.mxu0 %v3204_v60 }
 0x17a   : > { %1113 = vmatmul.f32.gmra.mxu1 %v806_v7 }
 0x17b   : > { %1153 = vmatpush.msra.mxu0 %v3205_v23 }
 0x17d   : > { %2894 = vmatpush.msk.msra.mxu0 %vm841_vm1, %v3826_v19 }
 0x17f   : > { %2895 = vmatpush.msk.msra.mxu0 %vm841_vm1, %v3829_v20  ;;  %v713_v20 = vld [vmem:[%s4507_s30] sm:$0x7] }
 0x180   : > { %1156 = vmatmul.f32.vlgmr.msra.gmra.mxu0 %v804_v22  ;;  %v4051_v52 = vperm.slane %v713_v20, 0  ;;  %v4053_v56 = vperm.slane %v713_v20, 1  ;;  %v4066_v33 = vperm.slane %v713_v20, 2 }
 0x188   : > { %1159 = vmatmul.f32.gmra.mxu0 %v806_v7 }
 0x1b4   : > { %v1035_v39 = vpop.permute.xlu1 %1034 }
 0x1b5   : > { %v1040_v51 = vpop.permute.xlu0 %1039 }
 0x1df   : > { %v1088_v36 = vpop.f32.mrf.mxu0 }
 0x1e3   : > { %v1134_v26 = vpop.f32.mrf.mxu2 }
 0x1e7   : > { %v1091_v27 = vpop.f32.mrf.mxu0 }
 0x1eb   : > { %v1137_v46 = vpop.f32.mrf.mxu2 }
 0x1ef   : > { %v1065_v40 = vpop.f32.mrf.mxu3  ;;  %v1111_v44 = vpop.f32.mrf.mxu1 }
 0x1f0   : > { %v1066_v42 = vadd.f32 %v1065_v40, %v1035_v39  ;;  %v1112_v45 = vadd.f32 %v1111_v44, %v1035_v39 }
 0x1f2   : > { %v1089_v19 = vadd.f32 %v1088_v36, %v1066_v42  ;;  %v1135_v48 = vadd.f32 %v1134_v26, %v1112_v45 }
 0x1f3   : > { %v1180_v11 = vpop.f32.mrf.mxu2 }
 0x1f4   : > { %v1186_v49 = vadd.f32 %v1089_v19, %v3774_v1  ;;  %v1187_v43 = vadd.f32 %v1135_v48, %v3789_v4 }
 0x1f6   : > { %v1198_v54 = vmul.f32 0.05, %v1186_v49  ;;  %vm1192_vm12 = vcmp.ge.f32.partialorder %v1186_v49, 0.0  ;;  %v1199_v57 = vmul.f32 0.05, %v1187_v43  ;;  %vm1193_vm13 = vcmp.ge.f32.partialorder %v1187_v43, 0.0 }
 0x1f7   : > { %v1068_v58 = vpop.f32.mrf.mxu3  ;;  %v1114_v63 = vpop.f32.mrf.mxu1 }
 0x1f8   : > { %v1069_v62 = vadd.f32 %v1068_v58, %v1040_v51  ;;  %v1204_v8 = vsel %vm1192_vm12, %v1186_v49, %v1198_v54  ;;  %v1115_v28 = vadd.f32 %v1114_v63, %v1040_v51  ;;  %v1205_v50 = vsel %vm1193_vm13, %v1187_v43, %v1199_v57  ;;  %v1218_v49 = vld [vmem:[%s4477_s7] sm:$0xff]  ;;  %v1574_v57 = vld [vmem:[%s4479_s9 + $0x8] sm:$0xff] }
 0x1f9   : > { %v1210_v9 = vmul.f32 %v1204_v8, %v4051_v52  ;;  %v1211_v4 = vmul.f32 %v1205_v50, %v4053_v56  ;;  %v4130_v43 = vld [vmem:[#allocation7 + $0x8] sm:$0xff] }
 0x1fa   : > { %v1092_v1 = vadd.f32 %v1091_v27, %v1069_v62  ;;  %v1138_v10 = vadd.f32 %v1137_v46, %v1115_v28  ;;  %v715_v27 = vld [vmem:[%s4473_s3] sm:$0xff] }
 0x1fb   : > { %1225 = vrot.lane.b32.xlu2 %v1210_v9, %s3574_s28  ;;  %1227 = vrot.lane.b32.xlu0 %v1211_v4, %s3574_s28  ;;  %v1183_v61 = vpop.f32.mrf.mxu2  ;;  %v1751_v54 = vld [vmem:[%s4481_s11] sm:$0xf] }
 0x1fc   : > { %v1189_v14 = vadd.f32 %v1092_v1, %v3772_v0  ;;  %v1190_v15 = vadd.f32 %v1138_v10, %v3782_v3 }
 0x1fd   : > { %v1157_v17 = vpop.f32.mrf.mxu0 }
 0x1fe   : > { %v1201_v18 = vmul.f32 0.05, %v1189_v14  ;;  %v1158_v21 = vadd.f32 %v1157_v17, %v1035_v39  ;;  %vm1195_vm14 = vcmp.ge.f32.partialorder %v1189_v14, 0.0  ;;  %v1202_v25 = vmul.f32 0.05, %v1190_v15 }
 0x1ff   : > { %vm1196_vm15 = vcmp.ge.f32.partialorder %v1190_v15, 0.0 }
 0x200   : > { %v1181_v47 = vadd.f32 %v1180_v11, %v1158_v21  ;;  %v1207_v29 = vsel %vm1195_vm14, %v1189_v14, %v1201_v18  ;;  %v1208_v30 = vsel %vm1196_vm15, %v1190_v15, %v1202_v25  ;;  %vm1581_vm14 = vcmask 64512  }
 0x201   : > { %v1213_v16 = vmul.f32 %v1207_v29, %v4051_v52  ;;  %v1214_v32 = vmul.f32 %v1208_v30, %v4053_v56 }
 0x202   : > { %v1188_v31 = vadd.f32 %v1181_v47, %v3791_v5 }
 0x203   : > { %1231 = vrot.lane.b32.xlu2 %v1213_v16, %s3574_s28  ;;  %1233 = vrot.lane.b32.xlu1 %v1214_v32, %s3574_s28 }
 0x204   : > { %vm1194_vm12 = vcmp.ge.f32.partialorder %v1188_v31, 0.0  ;;  %v1200_v0 = vmul.f32 0.05, %v1188_v31 }
 0x205   : > { %v1160_v3 = vpop.f32.mrf.mxu0 }
 0x206   : > { %v1161_v53 = vadd.f32 %v1160_v3, %v1040_v51  ;;  %v1206_v55 = vsel %vm1194_vm12, %v1188_v31, %v1200_v0  ;;  %v4135_v51 = vld [vmem:[#allocation7] sm:$0xff] }
 0x207   : > { %v1212_v60 = vmul.f32 %v1206_v55, %v4066_v33 }
 0x208   : > { %v1184_v34 = vadd.f32 %v1183_v61, %v1161_v53 }
 0x20a   : > { %v1191_v35 = vadd.f32 %v1184_v34, %v3780_v2 }
 0x20b   : > { %1229 = vrot.lane.b32.xlu2 %v1212_v60, %s3574_s28 }
 0x20c   : > { %vm1197_vm13 = vcmp.ge.f32.partialorder %v1191_v35, 0.0  ;;  %v1203_v5 = vmul.f32 0.05, %v1191_v35 }
 0x20e   : > { %v1209_v38 = vsel %vm1197_vm13, %v1191_v35, %v1203_v5 }
 0x20f   : > { %v1215_v24 = vmul.f32 %v1209_v38, %v4066_v33 }
 0x211   : > { %1235 = vrot.lane.b32.xlu1 %v1215_v24, %s3574_s28 }
 0x255   : > { %v4073_v22 = vpop.permute.xlu2 %1225 }
 0x256   : > { %v1247_v6 = vsel %vm828_vm0, 0.0, %v4073_v22 }
 0x25d   : > { %v4085_v7 = vpop.permute.xlu2 %1231 }
 0x25e   : > { %v1248_v36 = vsel %vm828_vm0, 0.0, %v4085_v7 }
 0x265   : > { %v1230_v42 = vpop.permute.xlu2 %1229 }
 0x26d   : > { %v1228_v23 = vpop.permute.xlu0 %1227 }
 0x26e   : > { %v4079_v41 = vsel %vm828_vm0, %v4073_v22, %v1228_v23  ;;  %v4097_v44 = vsel %vm828_vm0, %v1228_v23, %v1230_v42 }
 0x26f   : > { %v3273_v2 = vpack.i.bf16 %v4079_v41, %v1247_v6  ;;  %v1249_v19 = vsel %vm841_vm1, %v4097_v44, 0.0 }
 0x271   : > { %3274 = vrot.lane.b32.xlu2 %v3273_v2, %s3582_s25  ;;  %3214 = vrot.lane.b32.xlu0 %v3273_v2, %s3576_s4 }
 0x272   : > { %3209 = vrot.lane.b32.xlu1 %v3273_v2, %s3575_s29 }
 0x275   : > { %v1234_v26 = vpop.permute.xlu1 %1233 }
 0x276   : > { %v4091_v39 = vsel %vm828_vm0, %v4085_v7, %v1234_v26 }
 0x277   : > { %v3278_v40 = vpack.i.bf16 %v4091_v39, %v1248_v36 }
 0x279   : > { %3219 = vrot.lane.b32.xlu0 %v3273_v2, %s3577_s8  ;;  %3279 = vrot.lane.b32.xlu2 %v3278_v40, %s3576_s4 }
 0x281   : > { %3224 = vrot.lane.b32.xlu0 %v3273_v2, %s3579_s18  ;;  %3284 = vrot.lane.b32.xlu2 %v3278_v40, %s3577_s8 }
 0x283   : > { %v1236_v45 = vpop.permute.xlu1 %1235 }
 0x284   : > { %v4102_v46 = vsel %vm828_vm0, %v1234_v26, %v1236_v45 }
 0x285   : > { %v1250_v20 = vsel %vm841_vm1, %v4102_v46, 0.0 }
 0x286   : > { %v3228_v48 = vpack.i.bf16 %v1249_v19, %v1250_v20 }
 0x288   : > { %3229 = vrot.lane.b32.xlu1 %v3228_v48, %s3575_s29 }
 0x289   : > { %3289 = vrot.lane.b32.xlu2 %v3278_v40, %s3579_s18  ;;  %3244 = vrot.lane.b32.xlu0 %v3278_v40, %s3575_s29 }
 0x290   : > { %3234 = vrot.lane.b32.xlu1 %v3228_v48, %s3576_s4 }
 0x291   : > { %3294 = vrot.lane.b32.xlu2 %v3278_v40, %s3580_s2  ;;  %3249 = vrot.lane.b32.xlu0 %v3273_v2, %s3580_s2 }
 0x298   : > { %3239 = vrot.lane.b32.xlu1 %v3228_v48, %s3577_s8 }
 0x299   : > { %3299 = vrot.lane.b32.xlu2 %v3278_v40, %s3581_s27  ;;  %3259 = vrot.lane.b32.xlu0 %v3273_v2, %s3581_s27 }
 0x2a0   : > { %3254 = vrot.lane.b32.xlu1 %v3228_v48, %s3579_s18 }
 0x2a1   : > { %3304 = vrot.lane.b32.xlu2 %v3278_v40, %s3578_s17  ;;  %3309 = vrot.lane.b32.xlu0 %v3278_v40, %s3582_s25 }
 0x2a8   : > { %3264 = vrot.lane.b32.xlu1 %v3228_v48, %s3580_s2 }
 0x2a9   : > { %3324 = vrot.lane.b32.xlu2 %v3228_v48, %s3578_s17  ;;  %3314 = vrot.lane.b32.xlu0 %v3228_v48, %s3581_s27 }
 0x2b0   : > { %3269 = vrot.lane.b32.xlu1 %v3273_v2, %s3578_s17 }
 0x2b1   : > { %718 = vperm.xlu2 %3328, %v715_v27   ;;  %1433 = vperm.xlu0 %3206, %v1218_v49  }
 0x2b8   : > { %3319 = vrot.lane.b32.xlu1 %v3228_v48, %s3582_s25 }
 0x2b9   : > { %1579 = vrot.lane.b32.xlu0 %v4130_v43, %s3584_s22 }
 0x2c0   : > { %1577 = vrot.lane.b32.xlu1 %v4135_v51, %s3584_s22 }
 0x2c1   : > { %1754 = vperm.xlu0 %3206, %v1751_v54  }
 0x2c8   : > { %1735 = vperm.xlu1 %3207, %v1574_v57  }
 0x2cb   : > { %v4145_v58 = vpop.permute.xlu2 %3274 }
 0x2d3   : > { %v3280_v62 = vpop.permute.xlu2 %3279 }
 0x2d4   : > { %v3282_v31 = vunpack.i.h.bf16 %v3280_v62  ;;  %v3281_v32 = vunpack.i.l.bf16 %v3280_v62 }
 0x2d6   : > { %v1379_v23 = vsel %vm975_vm3, %v3281_v32, %v3282_v31 }
 0x2db   : > { %v4147_v63 = vpop.permute.xlu2 %3284 }
 0x2dc   : > { %v3287_v5 = vunpack.i.h.bf16 %v4147_v63  ;;  %v3286_v38 = vunpack.i.l.bf16 %v4147_v63 }
 0x2de   : > { %v1357_v20 = vsel %vm952_vm4, %v3286_v38, %v3287_v5 }
 0x2e3   : > { %v3215_v8 = vpop.permute.xlu0 %3214  ;;  %v4149_v28 = vpop.permute.xlu2 %3289 }
 0x2e4   : > { %v3210_v1 = vpop.permute.xlu1 %3209  ;;  %v3217_v53 = vunpack.i.h.bf16 %v3215_v8  ;;  %v3216_v55 = vunpack.i.l.bf16 %v3215_v8  ;;  %v3292_v45 = vunpack.i.h.bf16 %v4149_v28  ;;  %v3291_v19 = vunpack.i.l.bf16 %v4149_v28 }
 0x2e5   : > { %v3212_v15 = vunpack.i.h.bf16 %v3210_v1  ;;  %v3211_v17 = vunpack.i.l.bf16 %v3210_v1 }
 0x2e6   : > { %v1377_v40 = vsel %vm975_vm3, %v3216_v55, %v3217_v53  ;;  %v1335_v28 = vsel %vm929_vm6, %v3291_v19, %v3292_v45 }
 0x2e7   : > { %v1399_v34 = vsel %vm998_vm2, %v3211_v17, %v3212_v15 }
 0x2eb   : > { %v4151_v50 = vpop.permute.xlu0 %3219  ;;  %v4153_v9 = vpop.permute.xlu2 %3294 }
 0x2ec   : > { %v3222_v26 = vunpack.i.h.bf16 %v4151_v50  ;;  %v3221_v36 = vunpack.i.l.bf16 %v4151_v50  ;;  %v3297_v62 = vunpack.i.h.bf16 %v4153_v9  ;;  %v3296_v63 = vunpack.i.l.bf16 %v4153_v9 }
 0x2ee   : > { %v1355_v54 = vsel %vm952_vm4, %v3221_v36, %v3222_v26 }
 0x2f3   : > { %v4155_v4 = vpop.permute.xlu0 %3224  ;;  %v4157_v10 = vpop.permute.xlu2 %3299 }
 0x2f4   : > { %v3227_v27 = vunpack.i.h.bf16 %v4155_v4  ;;  %v3226_v49 = vunpack.i.l.bf16 %v4155_v4  ;;  %v3302_v17 = vunpack.i.h.bf16 %v4157_v10  ;;  %v3301_v9 = vunpack.i.l.bf16 %v4157_v10 }
 0x2f6   : > { %v1291_v10 = vsel %vm883_vm9, %v3301_v9, %v3302_v17 }
 0x2fa   : > { %v3230_v11 = vpop.permute.xlu1 %3229 }
 0x2fb   : > { %v3231_v14 = vunpack.i.l.bf16 %v3230_v11  ;;  %v3232_v18 = vunpack.i.h.bf16 %v3230_v11  ;;  %v3245_v21 = vpop.permute.xlu0 %3244  ;;  %v4159_v25 = vpop.permute.xlu2 %3304 }
 0x2fc   : > { %v3247_v47 = vunpack.i.h.bf16 %v3245_v21  ;;  %v3246_v29 = vunpack.i.l.bf16 %v3245_v21  ;;  %v3307_v30 = vunpack.i.h.bf16 %v4159_v25  ;;  %v3306_v16 = vunpack.i.l.bf16 %v4159_v25 }
 0x2fd   : > { %1519 = vmatpush.msrb.mxu0 %v3231_v14  ;;  %v1400_v35 = vsel %vm998_vm2, %v3212_v15, %v3232_v18 }
 0x2fe   : > { %v1401_v0 = vsel %vm998_vm2, %v3246_v29, %v3247_v47  ;;  %v1423_v3 = vsel %vm1021_vm5, %v3306_v16, %v3307_v30  ;;  %v1402_v61 = vsel %vm998_vm2, %v3247_v47, %v3231_v14  ;;  %v1333_v14 = vsel %vm929_vm6, %v3226_v49, %v3227_v27 }
 0x2ff   : > { %1520 = vmatpush.msrb.mxu0 %v3232_v18  ;;  %1439 = vmatpush.msrb.mxu2 %v1401_v0  ;;  %v1313_v18 = vsel %vm906_vm8, %v3296_v63, %v3297_v62 }
 0x300   : > { %1473 = vmatpush.msrb.mxu3 %v1423_v3  ;;  %1479 = vmatpush.msra.mxu1 %v1402_v61  ;;  %v3277_v3 = vunpack.i.h.bf16 %v4145_v58  ;;  %v3276_v61 = vunpack.i.l.bf16 %v4145_v58 }
 0x301   : > { %1440 = vmatpush.msrb.mxu2 %v1399_v34 }
 0x302   : > { %v3235_v60 = vpop.permute.xlu1 %3234  ;;  %1480 = vmatpush.msra.mxu1 %v1400_v35 }
 0x303   : > { %v3236_v24 = vunpack.i.l.bf16 %v3235_v60  ;;  %v3237_v6 = vunpack.i.h.bf16 %v3235_v60  ;;  %v4173_v2 = vpop.permute.xlu0 %3249  ;;  %1441 = vmatpush.msrb.mxu2 %v1379_v23 }
 0x304   : > { %v3252_v11 = vunpack.i.h.bf16 %v4173_v2  ;;  %v3251_v4 = vunpack.i.l.bf16 %v4173_v2  ;;  %v3325_v2 = vpop.permute.xlu2 %3324 }
 0x305   : > { %1521 = vmatpush.msrb.mxu0 %v3236_v24  ;;  %1442 = vmatpush.msrb.mxu2 %v1377_v40  ;;  %v1380_v42 = vsel %vm975_vm3, %v3282_v31, %v3236_v24  ;;  %v1378_v48 = vsel %vm975_vm3, %v3217_v53, %v3237_v6  ;;  %v1267_v24 = vsel %vm860_vm10, %v3276_v61, %v3277_v3  ;;  %v3326_v49 = vunpack.i.l.bf16 %v3325_v2 }
 0x306   : > { %1481 = vmatpush.msra.mxu1 %v1380_v42  ;;  %v1311_v16 = vsel %vm906_vm8, %v3251_v4, %v3252_v11  ;;  %v1216_v42 = vld [vmem:[#allocation6] sm:$0xff] }
 0x307   : > { %1522 = vmatpush.msrb.mxu0 %v3237_v6  ;;  %1443 = vmatpush.msrb.mxu2 %v1357_v20  ;;  %v1573_v6 = vld [vmem:[%s4479_s9] sm:$0xff] }
 0x308   : > { %1482 = vmatpush.msra.mxu1 %v1378_v48  ;;  %1730 = vperm.xlu2 %3328, %v1573_v6  }
 0x309   : > { %1444 = vmatpush.msrb.mxu2 %v1355_v54 }
 0x30a   : > { %v3240_v57 = vpop.permute.xlu1 %3239 }
 0x30b   : > { %v3241_v8 = vunpack.i.l.bf16 %v3240_v57  ;;  %v3242_v50 = vunpack.i.h.bf16 %v3240_v57  ;;  %v4189_v1 = vpop.permute.xlu0 %3259  ;;  %1445 = vmatpush.msrb.mxu2 %v1335_v28  ;;  %v1424_v28 = vsel %vm1021_vm5, %v3307_v30, %v3326_v49 }
 0x30c   : > { %v3262_v47 = vunpack.i.h.bf16 %v4189_v1  ;;  %v3261_v29 = vunpack.i.l.bf16 %v4189_v1 }
 0x30d   : > { %1523 = vmatpush.msrb.mxu0 %v3241_v8  ;;  %1446 = vmatpush.msrb.mxu2 %v1333_v14  ;;  %v1358_v15 = vsel %vm952_vm4, %v3287_v5, %v3241_v8  ;;  %v1356_v21 = vsel %vm952_vm4, %v3222_v26, %v3242_v50  ;;  %v3327_v8 = vunpack.i.h.bf16 %v3325_v2 }
 0x30e   : > { %1483 = vmatpush.msra.mxu1 %v1358_v15  ;;  %v1289_v60 = vsel %vm883_vm9, %v3261_v29, %v3262_v47 }
 0x30f   : > { %1524 = vmatpush.msrb.mxu0 %v3242_v50  ;;  %1447 = vmatpush.msrb.mxu2 %v1313_v18 }
 0x310   : > { %1484 = vmatpush.msra.mxu1 %v1356_v21 }
 0x311   : > { %1448 = vmatpush.msrb.mxu2 %v1311_v16 }
 0x312   : > { %v3255_v31 = vpop.permute.xlu1 %3254 }
 0x313   : > { %v3257_v32 = vunpack.i.h.bf16 %v3255_v31  ;;  %v3256_v0 = vunpack.i.l.bf16 %v3255_v31  ;;  %v4205_v53 = vpop.permute.xlu0 %3309  ;;  %1449 = vmatpush.msrb.mxu2 %v1291_v10 }
 0x314   : > { %v3312_v55 = vunpack.i.h.bf16 %v4205_v53  ;;  %v3311_v34 = vunpack.i.l.bf16 %v4205_v53 }
 0x315   : > { %1525 = vmatpush.msrb.mxu0 %v3256_v0  ;;  %v1336_v35 = vsel %vm929_vm6, %v3292_v45, %v3256_v0  ;;  %1450 = vmatpush.msrb.mxu2 %v1289_v60  ;;  %v1334_v38 = vsel %vm929_vm6, %v3227_v27, %v3257_v32 }
 0x316   : > { %1485 = vmatpush.msra.mxu1 %v1336_v35  ;;  %v1269_v5 = vsel %vm860_vm10, %v3311_v34, %v3312_v55 }
 0x317   : > { %1526 = vmatpush.msrb.mxu0 %v3257_v32  ;;  %1451 = vmatpush.msrb.mxu2 %v1269_v5 }
 0x318   : > { %1486 = vmatpush.msra.mxu1 %v1334_v38 }
 0x319   : > { %1452 = vmatpush.msrb.mxu2 %v1267_v24 }
 0x31a   : > { %v3265_v23 = vpop.permute.xlu1 %3264 }
 0x31b   : > { %v3267_v26 = vunpack.i.h.bf16 %v3265_v23  ;;  %v3266_v36 = vunpack.i.l.bf16 %v3265_v23  ;;  %v3315_v40 = vpop.permute.xlu0 %3314  ;;  %2899 = vmatpush.msk.msrb.mxu2 %vm4000_vm11, %v4085_v7 }
 0x31c   : > { %v3316_v45 = vunpack.i.l.bf16 %v3315_v40  ;;  %v3317_v20 = vunpack.i.h.bf16 %v3315_v40 }
 0x31d   : > { %1527 = vmatpush.msrb.mxu0 %v3266_v36  ;;  %v1314_v19 = vsel %vm906_vm8, %v3297_v62, %v3266_v36  ;;  %2901 = vmatpush.msk.msrb.mxu2 %vm4000_vm11, %v4073_v22  ;;  %v1312_v48 = vsel %vm906_vm8, %v3252_v11, %v3267_v26  ;;  %v719_v22 = vpop.permute.xlu2 %718 }
 0x31e   : > { %1487 = vmatpush.msra.mxu1 %v1314_v19  ;;  %1455 = vmatmul.f32.vlgmr.msrb.gmra.mxu2 %v1216_v42  ;;  %v1292_v27 = vsel %vm883_vm9, %v3302_v17, %v3316_v45  ;;  %v1290_v62 = vsel %vm883_vm9, %v3262_v47, %v3317_v20  ;;  %v743_v50 = vadd.f32 %v4042_v13, %v719_v22 }
 0x31f   : > { %1528 = vmatpush.msrb.mxu0 %v3267_v26  ;;  %v783_v31 = vadd.f32 %v4040_v12, %v719_v22 }
 0x320   : > { %1488 = vmatpush.msra.mxu1 %v1312_v48  ;;  %v788_v15 = vmul.f32 0.05, %v743_v50  ;;  %vm785_vm11 = vcmp.ge.f32.partialorder %v743_v50, 0.0 }
 0x321   : > { %1529 = vmatpush.msrb.mxu0 %v3316_v45  ;;  %v790_v61 = vmul.f32 0.05, %v783_v31  ;;  %vm787_vm13 = vcmp.ge.f32.partialorder %v783_v31, 0.0 }
 0x322   : > { %v3270_v7 = vpop.permute.xlu1 %3269  ;;  %1489 = vmatpush.msra.mxu1 %v1292_v27  ;;  %v791_v30 = vsel %vm785_vm11, %v743_v50, %v788_v15 }
 0x323   : > { %v3272_v54 = vunpack.i.h.bf16 %v3270_v7  ;;  %v3271_v57 = vunpack.i.l.bf16 %v3270_v7  ;;  %1530 = vmatpush.msrb.mxu0 %v3317_v20  ;;  %v801_v17 = vmul.f32 %v4051_v52, %v791_v30  ;;  %v793_v60 = vsel %vm787_vm13, %v783_v31, %v790_v61 }
 0x324   : > { %1490 = vmatpush.msra.mxu1 %v1290_v62  ;;  %v803_v6 = vmul.f32 %v4066_v33, %v793_v60  ;;  %v1750_v62 = vld [vmem:[#allocation9] sm:$0xf] }
 0x325   : > { %v1421_v63 = vsel %vm1021_vm5, %v3271_v57, %v3272_v54  ;;  %v1422_v1 = vsel %vm1021_vm5, %v3272_v54, %v3327_v8 }
 0x326   : > { %1474 = vmatpush.msrb.mxu3 %v1421_v63 }
 0x327   : > { %2902 = vmatmul.msk.f32.vlgmr.msrb.gmra.mxu3 %vm721_vm7, %v1217_v59 }
 0x328   : > { %1513 = vmatpush.msra.mxu3 %v1424_v28 }
 0x32a   : > { %1514 = vmatpush.msra.mxu3 %v1422_v1  ;;  %v3320_v11 = vpop.permute.xlu1 %3319 }
 0x32b   : > { %v3322_v4 = vunpack.i.h.bf16 %v3320_v11  ;;  %v3321_v14 = vunpack.i.l.bf16 %v3320_v11 }
 0x32c   : > { %1553 = vmatpush.msrb.mxu3 %v3326_v49 }
 0x32d   : > { %1531 = vmatpush.msrb.mxu0 %v3321_v14  ;;  %v1270_v25 = vsel %vm860_vm10, %v3312_v55, %v3321_v14  ;;  %v1268_v13 = vsel %vm860_vm10, %v3277_v3, %v3322_v4 }
 0x32e   : > { %1554 = vmatpush.msrb.mxu3 %v3327_v8  ;;  %1491 = vmatpush.msra.mxu1 %v1270_v25 }
 0x32f   : > { %2903 = vmatmul.msk.f32.vlgmr.msra.gmra.mxu3 %vm721_vm7, %v1217_v59  ;;  %1532 = vmatpush.msrb.mxu0 %v3322_v4 }
 0x330   : > { %1492 = vmatpush.msra.mxu1 %v1268_v13 }
 0x331   : > { %2904 = vmatpush.msk.msrb.mxu0 %vm841_vm1, %v4102_v46  ;;  %v763_v46 = vadd.f32 %v4044_v37, %v719_v22 }
 0x332   : > { %1493 = vmatpush.msra.mxu1 %v4091_v39  ;;  %v1578_v32 = vpop.permute.xlu1 %1577 }
 0x333   : > { %2905 = vmatpush.msk.msrb.mxu0 %vm841_vm1, %v4097_v44  ;;  %v1434_v44 = vpop.permute.xlu0 %1433  ;;  %v789_v18 = vmul.f32 0.05, %v763_v46  ;;  %vm786_vm15 = vcmp.ge.f32.partialorder %v763_v46, 0.0 }
 0x334   : > { %1494 = vmatpush.msra.mxu1 %v4079_v41  ;;  %1535 = vmatmul.f32.vlgmr.msrb.gmra.mxu0 %v1216_v42 }
 0x335   : > { %1674 = vmatpush.msra.mxu0 %v801_v17  ;;  %1495 = vmatmul.f32.vlgmr.msra.gmra.mxu1 %v1216_v42  ;;  %v792_v47 = vsel %vm786_vm15, %v763_v46, %v789_v18 }
 0x336   : > { %v802_v37 = vmul.f32 %v4053_v56, %v792_v47  ;;  %v4303_v47 = vld [vmem:[#allocation12] sm:$0xf] }
 0x337   : > { %2906 = vmatmul.msk.f32.vlgmr.msrb.gmra.mxu3 %vm721_vm7, %v1217_v59 }
 0x33a   : > { %v1736_v7 = vpop.permute.xlu1 %1735 }
 0x33b   : > { %v1580_v12 = vpop.permute.xlu0 %1579 }
 0x33c   : > { %2913 = vmatmul.msk.f32.vlgmr.msra.gmra.mxu0 %vm1581_vm14, %v4135_v51 }
 0x344   : > { %2914 = vmatmul.msk.f32.gmra.mxu0 %vm1581_vm14, %v4130_v43 }
 0x362   : > { %v1731_v19 = vpop.permute.xlu2 %1730 }
 0x3a1   : > { %v1456_v39 = vpop.f32.mrf.mxu2 }
 0x3a2   : > { %v1457_v58 = vadd.f32 %v1456_v39, %v1434_v44 }
 0x3aa   : > { %v1476_v9 = vpop.f32.mrf.mxu3 }
 0x3ab   : > { %v1477_v41 = vadd.f32 %v1476_v9, %v1457_v58  ;;  %v1755_v9 = vpop.permute.xlu0 %1754 }
 0x3ad   : > { %vm1559_vm12 = vcmp.ge.f32.partialorder %v1477_v41, 0.0  ;;  %v1562_v21 = vmul.f32 0.05, %v1477_v41 }
 0x3af   : > { %v1565_v29 = vsel %vm1559_vm12, %v1477_v41, %v1562_v21  ;;  %vm1834_vm12 = vcmask 1043456  }
 0x3b0   : > { %v1568_v16 = vmul.f32 %v1565_v29, %v4051_v52 }
 0x3b1   : > { %v1536_v55 = vpop.f32.mrf.mxu0 }
 0x3b2   : > { %v1496_v0 = vpop.f32.mrf.mxu1  ;;  %v1516_v10 = vpop.f32.mrf.mxu3  ;;  %1601 = vmatpush.msra.mxu2 %v1568_v16  ;;  %v1537_v35 = vadd.f32 %v1536_v55, %v1434_v44  ;;  %v1823_v55 = vld [vmem:[#allocation10] sm:$0xf] }
 0x3b3   : > { %v1497_v3 = vadd.f32 %v1496_v0, %v1434_v44  ;;  %2907 = vmatmul.msk.f32.vlgmr.msra.gmra.mxu2 %vm1581_vm14, %v1578_v32 }
 0x3b4   : > { %1697 = vmatpush.msrb.mxu2 %v802_v37 }
 0x3b5   : > { %v1517_v53 = vadd.f32 %v1516_v10, %v1497_v3 }
 0x3b7   : > { %vm1560_vm11 = vcmp.ge.f32.partialorder %v1517_v53, 0.0  ;;  %v1563_v34 = vmul.f32 0.05, %v1517_v53 }
 0x3b9   : > { %v1566_v5 = vsel %vm1560_vm11, %v1517_v53, %v1563_v34  ;;  %v1676_v40 = vpop.f32.mrf.mxu0 }
 0x3ba   : > { %v1569_v38 = vmul.f32 %v1566_v5, %v4053_v56  ;;  %v1556_v24 = vpop.f32.mrf.mxu3  ;;  %v1824_v5 = vld [vmem:[%s4483_s13] sm:$0xf] }
 0x3bb   : > { %v1557_v23 = vadd.f32 %v1556_v24, %v1537_v35  ;;  %2908 = vmatmul.msk.f32.gmra.mxu2 %vm1581_vm14, %v1580_v12 }
 0x3bc   : > { %1624 = vmatpush.msra.mxu3 %v1569_v38 }
 0x3bd   : > { %vm1561_vm15 = vcmp.ge.f32.partialorder %v1557_v23, 0.0  ;;  %v1564_v2 = vmul.f32 0.05, %v1557_v23  ;;  %2909 = vmatmul.msk.f32.vlgmr.msra.gmra.mxu3 %vm1581_vm14, %v1578_v32 }
 0x3be   : > { %1720 = vmatpush.msrb.mxu3 %v803_v6 }
 0x3bf   : > { %v1567_v26 = vsel %vm1561_vm15, %v1557_v23, %v1564_v2 }
 0x3c0   : > { %v1570_v36 = vmul.f32 %v1567_v26, %v4066_v33 }
 0x3c1   : > { %v1679_v27 = vpop.f32.mrf.mxu0 }
 0x3c2   : > { %1647 = vmatpush.msrb.mxu1 %v1570_v36 }
 0x3c3   : > { %2911 = vmatmul.msk.f32.vlgmr.msrb.gmra.mxu1 %vm1581_vm14, %v1578_v32  ;;  %2915 = vmatmul.msk.f32.vlgmr.msrb.gmra.mxu2 %vm1581_vm14, %v4135_v51 }
 0x3c5   : > { %2910 = vmatmul.msk.f32.gmra.mxu3 %vm1581_vm14, %v1580_v12 }
 0x3cb   : > { %2912 = vmatmul.msk.f32.gmra.mxu1 %vm1581_vm14, %v1580_v12  ;;  %2916 = vmatmul.msk.f32.gmra.mxu2 %vm1581_vm14, %v4130_v43 }
 0x3cd   : > { %2917 = vmatmul.msk.f32.vlgmr.msrb.gmra.mxu3 %vm1581_vm14, %v4135_v51 }
 0x3d5   : > { %2918 = vmatmul.msk.f32.gmra.mxu3 %vm1581_vm14, %v4130_v43  ;;  %vm2650_vm14 = vcmask 556032  }
 0x436   : > { %v1603_v42 = vpop.f32.mrf.mxu2 }
 0x437   : > { %v1677_v45 = vadd.f32 %v1676_v40, %v1603_v42 }
 0x439   : > { %v1738_v20 = vadd.f32 %v1731_v19, %v1677_v45 }
 0x43b   : > { %v1744_v48 = vmul.f32 %v1738_v20, %v4051_v52 }
 0x43d   : > { %2648 = vst [vmem:[%s4283_s15] sm:$0xff] %v1744_v48 }
 0x43e   : > { %v1606_v51 = vpop.f32.mrf.mxu2 }
 0x43f   : > { %v1680_v43 = vadd.f32 %v1679_v27, %v1606_v51 }
 0x440   : > { %v1626_v49 = vpop.f32.mrf.mxu3  ;;  %v1649_v50 = vpop.f32.mrf.mxu1 }
 0x441   : > { %v1741_v54 = vadd.f32 %v1736_v7, %v1680_v43 }
 0x443   : > { %v1747_v57 = vmul.f32 %v1741_v54, %v4051_v52 }
 0x445   : > { %2652 = vst [vmem:[%s4283_s15 + $0x18] sm:$0xff] %v1747_v57  ;;  %1774 = vmatpush.msra.mxu1 %v1747_v57 }
 0x446   : > { %v1699_v59 = vpop.f32.mrf.mxu2 }
 0x447   : > { %v1700_v22 = vadd.f32 %v1699_v59, %v1626_v49  ;;  %1775 = vmatpush.msra.mxu1 %v1744_v48 }
 0x448   : > { %v1629_v63 = vpop.f32.mrf.mxu3  ;;  %2919 = vmatmul.msk.f32.vlgmr.msra.gmra.mxu1 %vm721_vm7, %v1750_v62  ;;  %v1652_v17 = vpop.f32.mrf.mxu1 }
 0x449   : > { %v1739_v8 = vadd.f32 %v1731_v19, %v1700_v22 }
 0x44b   : > { %v1745_v28 = vmul.f32 %v1739_v8, %v4053_v56 }
 0x44d   : > { %2649 = vst [vmem:[%s4283_s15 + $0x8] sm:$0xff] %v1745_v28 }
 0x44e   : > { %v1702_v1 = vpop.f32.mrf.mxu2 }
 0x44f   : > { %v1703_v11 = vadd.f32 %v1702_v1, %v1629_v63 }
 0x450   : > { %v1722_v4 = vpop.f32.mrf.mxu3 }
 0x451   : > { %v1742_v14 = vadd.f32 %v1736_v7, %v1703_v11  ;;  %v1723_v15 = vadd.f32 %v1722_v4, %v1649_v50 }
 0x453   : > { %v1748_v25 = vmul.f32 %v1742_v14, %v4053_v56  ;;  %v1740_v13 = vadd.f32 %v1731_v19, %v1723_v15 }
 0x455   : > { %2653 = vst [vmem:[%s4283_s15 + $0x20] sm:$0xff] %v1748_v25  ;;  %1794 = vmatpush.msrb.mxu0 %v1748_v25  ;;  %v1746_v30 = vmul.f32 %v1740_v13, %v4066_v33 }
 0x457   : > { %1795 = vmatpush.msrb.mxu0 %v1745_v28  ;;  %2651 = vst.msk [vmem:[%s4283_s15 + $0x10] sm:$0xff] %vm2650_vm14, %v1746_v30 }
 0x458   : > { %v1725_v39 = vpop.f32.mrf.mxu3  ;;  %2920 = vmatmul.msk.f32.vlgmr.msrb.gmra.mxu0 %vm721_vm7, %v1750_v62 }
 0x459   : > { %v1726_v46 = vadd.f32 %v1725_v39, %v1652_v17 }
 0x45b   : > { %v1743_v44 = vadd.f32 %v1736_v7, %v1726_v46 }
 0x45d   : > { %v1749_v58 = vmul.f32 %v1743_v44, %v4066_v33 }
 0x45f   : > { %2654 = vst.msk [vmem:[%s4283_s15 + $0x28] sm:$0xff] %vm2650_vm14, %v1749_v58  ;;  %1814 = vmatpush.msrb.mxu1 %v1749_v58  ;;  %s4510_s15 = sld [smem:[#allocation25_spill]] }
 0x461   : > { %1815 = vmatpush.msrb.mxu1 %v1746_v30 }
 0x462   : > { %2921 = vmatmul.msk.f32.vlgmr.msrb.gmra.mxu1 %vm721_vm7, %v1750_v62  ;;  %vm1830_vm7 = vcmask 31744  }
 0x4c5   : > { %v1777_v18 = vpop.f32.mrf.mxu1 }
 0x4c6   : > { %v1778_v41 = vadd.f32 %v1777_v18, %v1755_v9 }
 0x4c8   : > { %v1820_v21 = vmul.f32 %v1778_v41, %v4051_v52 }
 0x4ca   : > { %1909 = vrot.lane.b32.xlu0 %v1820_v21, %s3574_s28  ;;  %2922 = vmatpush.msk.msra.mxu2 %vm1834_vm12, %v1820_v21 }
 0x4cb   : > { %2923 = vmatmul.msk.f32.vlgmr.msra.gmra.mxu2 %vm1830_vm7, %v1823_v55 }
 0x4d2   : > { %1922 = vrot.lane.b32.xlu0 %v4303_v47, %s3585_s19 }
 0x4d5   : > { %v1797_v29 = vpop.f32.mrf.mxu0 }
 0x4d6   : > { %v1798_v16 = vadd.f32 %v1797_v29, %v1755_v9 }
 0x4d8   : > { %v1821_v31 = vmul.f32 %v1798_v16, %v4053_v56 }
 0x4da   : > { %1911 = vrot.lane.b32.xlu1 %v1821_v31, %s3574_s28  ;;  %2924 = vmatpush.msk.msra.mxu3 %vm1834_vm12, %v1821_v31 }
 0x4db   : > { %2232 = vrot.lane.b32.xlu0 %v4303_v47, %s3586_s24  ;;  %2925 = vmatmul.msk.f32.vlgmr.msra.gmra.mxu3 %vm1830_vm7, %v1823_v55 }
 0x4df   : > { %v1817_v32 = vpop.f32.mrf.mxu1 }
 0x4e0   : > { %v1818_v0 = vadd.f32 %v1817_v32, %v1755_v9 }
 0x4e2   : > { %v1822_v10 = vmul.f32 %v1818_v0, %v4066_v33  ;;  %2070 = vrot.lane.b32.xlu1 %v4303_v47, %s3584_s22  ;;  %s4508_s22 = sld [smem:[#allocation23_spill]] }
 0x4e3   : > { %2313 = vrot.lane.b32.xlu0 %v4303_v47, %s3577_s8 }
 0x4e4   : > { %1913 = vrot.lane.b32.xlu2 %v1822_v10, %s3574_s28  ;;  %2926 = vmatpush.msk.msra.mxu0 %vm1834_vm12, %v1822_v10  ;;  %s3588_s28 = smov 104  }
 0x4e5   : > { %2927 = vmatmul.msk.f32.vlgmr.msra.gmra.mxu0 %vm1830_vm7, %v1823_v55 }
 0x4e8   : > { %v1908_v12 = vld [vmem:[%s4508_s22] sm:$0xf] }
 0x4ea   : > { %2151 = vrot.lane.b32.xlu1 %v4303_v47, %s3587_s23 }
 0x53c   : > { %v1910_v37 = vpop.permute.xlu0 %1909 }
 0x53d   : > { %v1919_v3 = vsel %vm828_vm0, 0.0, %v1910_v37 }
 0x53e   : > { %2072 = vrot.lane.b32.xlu2 %v1919_v3, %s3581_s27  ;;  %1926 = vrot.lane.b32.xlu1 %v1919_v3, %s3582_s25  ;;  %v1914_v34 = vpop.permute.xlu2 %1913 }
 0x53f   : > { %2934 = vmatpush.msk.msrb.mxu0 %vm1834_vm12, %v1919_v3 }
 0x540   : > { %2935 = vmatmul.msk.f32.vlgmr.msrb.gmra.mxu0 %vm1830_vm7, %v4303_v47 }
 0x544   : > { %v1923_v23 = vpop.permute.xlu0 %1922 }
 0x546   : > { %2153 = vrot.lane.b32.xlu2 %v1919_v3, %s3580_s2 }
 0x54c   : > { %v1912_v61 = vpop.permute.xlu1 %1911 }
 0x54d   : > { %v4324_v53 = vsel %vm828_vm0, %v1910_v37, %v1912_v61  ;;  %v1916_v60 = vsel %vm828_vm0, %v1912_v61, %v1914_v34  ;;  %v2233_v26 = vpop.permute.xlu0 %2232  ;;  %vm2661_vm0 = vcmask 551936  }
 0x54e   : > { %2398 = vrot.lane.b32.xlu2 %v4324_v53, %s3576_s4  ;;  %2074 = vrot.lane.b32.xlu0 %v4324_v53, %s3581_s27  ;;  %v1920_v35 = vsel %vm841_vm1, %v1916_v60, 0.0  ;;  %v1861_v0 = vpop.f32.mrf.mxu2 }
 0x54f   : > { %1928 = vrot.lane.b32.xlu1 %v4324_v53, %s3582_s25 }
 0x554   : > { %v2071_v6 = vpop.permute.xlu1 %2070 }
 0x555   : > { %v2314_v42 = vpop.permute.xlu0 %2313 }
 0x556   : > { %1930 = vrot.lane.b32.xlu2 %v1920_v35, %s3582_s25  ;;  %2155 = vrot.lane.b32.xlu0 %v4324_v53, %s3580_s2 }
 0x557   : > { %2234 = vrot.lane.b32.xlu1 %v1919_v3, %s3579_s18 }
 0x55c   : > { %v2152_v36 = vpop.permute.xlu1 %2151 }
 0x55e   : > { %2157 = vrot.lane.b32.xlu2 %v1920_v35, %s3580_s2  ;;  %2076 = vrot.lane.b32.xlu0 %v1920_v35, %s3581_s27  ;;  %s3589_s2 = smov 100   ;;  %v1881_v31 = vpop.f32.mrf.mxu3 }
 0x55f   : > { %2396 = vrot.lane.b32.xlu1 %v1919_v3, %s3576_s4 }
 0x562   : > { %v1901_v32 = vpop.f32.mrf.mxu0 }
 0x566   : > { %2317 = vrot.lane.b32.xlu2 %v4324_v53, %s3577_s8  ;;  %2394 = vrot.lane.b32.xlu0 %v4303_v47, %s3588_s28 }
 0x567   : > { %2236 = vrot.lane.b32.xlu1 %v4324_v53, %s3579_s18 }
 0x56e   : > { %2238 = vrot.lane.b32.xlu2 %v1920_v35, %s3579_s18  ;;  %2477 = vrot.lane.b32.xlu0 %v1919_v3, %s3575_s29 }
 0x56f   : > { %2315 = vrot.lane.b32.xlu1 %v1919_v3, %s3577_s8 }
 0x576   : > { %2319 = vrot.lane.b32.xlu2 %v1920_v35, %s3577_s8  ;;  %2481 = vrot.lane.b32.xlu0 %v1920_v35, %s3575_s29  ;;  %s3590_s8 = smov 96  }
 0x577   : > { %2479 = vrot.lane.b32.xlu1 %v4324_v53, %s3575_s29 }
 0x57e   : > { %2475 = vrot.lane.b32.xlu2 %v4303_v47, %s3589_s2  ;;  %2562 = vrot.lane.b32.xlu0 %v1920_v35, %s3578_s17 }
 0x57f   : > { %2400 = vrot.lane.b32.xlu1 %v1920_v35, %s3576_s4  ;;  %s2985_s4 = smul.u32 12, %s4513_s0 }
 0x581   : > { %s701_s26 = scalar_lea.vmem %s4509_s20, %s2985_s4  ;;  %s706_s19 = scalar_lea.vmem %s4510_s15, %s2985_s4 }
 0x586   : > { %2560 = vrot.lane.b32.xlu2 %v4324_v53, %s3578_s17  ;;  %1827 = vperm.xlu0 %3206, %v1824_v5  }
 0x587   : > { %2556 = vrot.lane.b32.xlu1 %v4303_v47, %s3590_s8 }
 0x58e   : > { %2558 = vrot.lane.b32.xlu2 %v1919_v3, %s3578_s17 }
 0x58f   : > { %2639 = vperm.xlu1 %3207, %v1908_v12  }
 0x598   : > { %v2073_v38 = vpop.permute.xlu2 %2072 }
 0x5a0   : > { %v2154_v24 = vpop.permute.xlu2 %2153 }
 0x5a8   : > { %v4371_v2 = vpop.permute.xlu2 %2398 }
 0x5b0   : > { %v1931_v40 = vpop.permute.xlu2 %1930  ;;  %v1927_v19 = vpop.permute.xlu1 %1926 }
 0x5b1   : > { %2932 = vmatpush.msk.msrb.mxu3 %vm1834_vm12, %v1931_v40 }
 0x5b2   : > { %2933 = vmatmul.msk.f32.vlgmr.msrb.gmra.mxu3 %vm1830_vm7, %v1923_v23 }
 0x5b8   : > { %v2158_v45 = vpop.permute.xlu2 %2157 }
 0x5c0   : > { %v2318_v20 = vpop.permute.xlu2 %2317  ;;  %v2075_v48 = vpop.permute.xlu0 %2074 }
 0x5c1   : > { %v1929_v27 = vpop.permute.xlu1 %1928  ;;  %v2078_v51 = vsel %vm883_vm9, %v2073_v38, %v2075_v48 }
 0x5c2   : > { %v1932_v43 = vsel %vm860_vm10, %v1927_v19, %v1929_v27  ;;  %v1933_v7 = vsel %vm860_vm10, %v1929_v27, %v1931_v40  ;;  %2940 = vmatpush.msk.msra.mxu3 %vm1834_vm12, %v2078_v51 }
 0x5c3   : > { %2928 = vmatpush.msk.msra.mxu1 %vm1834_vm12, %v1932_v43  ;;  %2930 = vmatpush.msk.msrb.mxu2 %vm1834_vm12, %v1933_v7 }
 0x5c4   : > { %2929 = vmatmul.msk.f32.vlgmr.msra.gmra.mxu1 %vm1830_vm7, %v1923_v23  ;;  %2931 = vmatmul.msk.f32.vlgmr.msrb.gmra.mxu2 %vm1830_vm7, %v1923_v23 }
 0x5c5   : > { %2936 = vmatpush.msk.msrb.mxu1 %vm1834_vm12, %v4324_v53  ;;  %2938 = vmatpush.msk.msra.mxu2 %vm1834_vm12, %v1920_v35 }
 0x5c6   : > { %2941 = vmatmul.msk.f32.vlgmr.msra.gmra.mxu3 %vm1830_vm7, %v2071_v6 }
 0x5c8   : > { %v2239_v49 = vpop.permute.xlu2 %2238  ;;  %v2156_v54 = vpop.permute.xlu0 %2155 }
 0x5c9   : > { %v2235_v57 = vpop.permute.xlu1 %2234  ;;  %v2159_v62 = vsel %vm906_vm8, %v2154_v24, %v2156_v54  ;;  %v2160_v59 = vsel %vm906_vm8, %v2156_v54, %v2158_v45 }
 0x5ca   : > { %2946 = vmatpush.msk.msrb.mxu2 %vm1834_vm12, %v2159_v62  ;;  %2948 = vmatpush.msk.msrb.mxu3 %vm1834_vm12, %v2160_v59 }
 0x5cc   : > { %2956 = vmatpush.msk.msra.mxu3 %vm1834_vm12, %v2239_v49  ;;  %2937 = vmatmul.msk.f32.vlgmr.msrb.gmra.mxu1 %vm1830_vm7, %v4303_v47 }
 0x5cd   : > { %2939 = vmatmul.msk.f32.vlgmr.msra.gmra.mxu2 %vm1830_vm7, %v4303_v47 }
 0x5ce   : > { %2949 = vmatmul.msk.f32.vlgmr.msrb.gmra.mxu3 %vm1830_vm7, %v2152_v36 }
 0x5d0   : > { %v2077_v22 = vpop.permute.xlu0 %2076  ;;  %v2320_v28 = vpop.permute.xlu2 %2319 }
 0x5d1   : > { %v2397_v63 = vpop.permute.xlu1 %2396  ;;  %v2079_v8 = vsel %vm883_vm9, %v2075_v48, %v2077_v22  ;;  %2944 = vmatpush.msk.msra.mxu1 %vm1834_vm12, %v2077_v22  ;;  %v2322_v15 = vsel %vm952_vm4, %v2318_v20, %v2320_v28 }
 0x5d2   : > { %v2402_v50 = vsel %vm975_vm3, %v2397_v63, %v4371_v2  ;;  %2942 = vmatpush.msk.msra.mxu0 %vm1834_vm12, %v2079_v8 }
 0x5d3   : > { %2964 = vmatpush.msk.msrb.mxu3 %vm1834_vm12, %v2402_v50  ;;  %2943 = vmatmul.msk.f32.vlgmr.msra.gmra.mxu0 %vm1830_vm7, %v2071_v6 }
 0x5d4   : > { %2945 = vmatmul.msk.f32.vlgmr.msra.gmra.mxu1 %vm1830_vm7, %v2071_v6  ;;  %2950 = vmatpush.msk.msrb.mxu0 %vm1834_vm12, %v2158_v45  ;;  %v2027_v6 = vpop.f32.mrf.mxu0 }
 0x5d5   : > { %2947 = vmatmul.msk.f32.vlgmr.msrb.gmra.mxu2 %vm1830_vm7, %v2152_v36 }
 0x5d6   : > { %2957 = vmatmul.msk.f32.vlgmr.msra.gmra.mxu3 %vm1830_vm7, %v2233_v26 }
 0x5d8   : > { %v2395_v1 = vpop.permute.xlu0 %2394  ;;  %v2476_v25 = vpop.permute.xlu2 %2475 }
 0x5d9   : > { %v2237_v11 = vpop.permute.xlu1 %2236 }
 0x5da   : > { %v2240_v4 = vsel %vm929_vm6, %v2235_v57, %v2237_v11  ;;  %v2241_v14 = vsel %vm929_vm6, %v2237_v11, %v2239_v49 }
 0x5db   : > { %2952 = vmatpush.msk.msrb.mxu1 %vm1834_vm12, %v2240_v4  ;;  %2954 = vmatpush.msk.msra.mxu2 %vm1834_vm12, %v2241_v14 }
 0x5dc   : > { %2951 = vmatmul.msk.f32.vlgmr.msrb.gmra.mxu0 %vm1830_vm7, %v2152_v36  ;;  %2953 = vmatmul.msk.f32.vlgmr.msrb.gmra.mxu1 %vm1830_vm7, %v2233_v26 }
 0x5dd   : > { %2955 = vmatmul.msk.f32.vlgmr.msra.gmra.mxu2 %vm1830_vm7, %v2233_v26  ;;  %2960 = vmatpush.msk.msra.mxu1 %vm1834_vm12, %v2322_v15 }
 0x5de   : > { %2962 = vmatpush.msk.msrb.mxu2 %vm1834_vm12, %v2320_v28  ;;  %2965 = vmatmul.msk.f32.vlgmr.msrb.gmra.mxu3 %vm1830_vm7, %v2395_v1 }
 0x5e0   : > { %v2478_v13 = vpop.permute.xlu0 %2477  ;;  %v2561_v39 = vpop.permute.xlu2 %2560 }
 0x5e1   : > { %v2316_v30 = vpop.permute.xlu1 %2315 }
 0x5e2   : > { %v2321_v17 = vsel %vm952_vm4, %v2316_v30, %v2318_v20 }
 0x5e3   : > { %2958 = vmatpush.msk.msra.mxu0 %vm1834_vm12, %v2321_v17 }
 0x5e4   : > { %2959 = vmatmul.msk.f32.vlgmr.msra.gmra.mxu0 %vm1830_vm7, %v2314_v42  ;;  %2961 = vmatmul.msk.f32.vlgmr.msra.gmra.mxu1 %vm1830_vm7, %v2314_v42 }
 0x5e5   : > { %2963 = vmatmul.msk.f32.vlgmr.msrb.gmra.mxu2 %vm1830_vm7, %v2314_v42 }
 0x5e8   : > { %v2482_v46 = vpop.permute.xlu0 %2481  ;;  %v2559_v18 = vpop.permute.xlu2 %2558 }
 0x5e9   : > { %v2480_v44 = vpop.permute.xlu1 %2479  ;;  %v2564_v16 = vsel %vm1021_vm5, %v2559_v18, %v2561_v39 }
 0x5ea   : > { %v2483_v58 = vsel %vm998_vm2, %v2478_v13, %v2480_v44  ;;  %v2484_v9 = vsel %vm998_vm2, %v2480_v44, %v2482_v46 }
 0x5eb   : > { %2970 = vmatpush.msk.msra.mxu2 %vm1834_vm12, %v2483_v58  ;;  %2972 = vmatpush.msk.msra.mxu3 %vm1834_vm12, %v2484_v9 }
 0x5ec   : > { %2973 = vmatmul.msk.f32.vlgmr.msra.gmra.mxu3 %vm1830_vm7, %v2476_v25 }
 0x5ed   : > { %2971 = vmatmul.msk.f32.vlgmr.msra.gmra.mxu2 %vm1830_vm7, %v2476_v25 }
 0x5f0   : > { %v2563_v41 = vpop.permute.xlu0 %2562 }
 0x5f1   : > { %v2401_v21 = vpop.permute.xlu1 %2400  ;;  %v2565_v47 = vsel %vm1021_vm5, %v2561_v39, %v2563_v41  ;;  %2980 = vmatpush.msk.msrb.mxu3 %vm1834_vm12, %v2563_v41 }
 0x5f2   : > { %v2403_v29 = vsel %vm975_vm3, %v4371_v2, %v2401_v21  ;;  %2968 = vmatpush.msk.msrb.mxu1 %vm1834_vm12, %v2401_v21  ;;  %2978 = vmatpush.msk.msrb.mxu2 %vm1834_vm12, %v2565_v47 }
 0x5f3   : > { %2966 = vmatpush.msk.msrb.mxu0 %vm1834_vm12, %v2403_v29  ;;  %2969 = vmatmul.msk.f32.vlgmr.msrb.gmra.mxu1 %vm1830_vm7, %v2395_v1 }
 0x5f4   : > { %2976 = vmatpush.msk.msra.mxu1 %vm1834_vm12, %v2564_v16  ;;  %2967 = vmatmul.msk.f32.vlgmr.msrb.gmra.mxu0 %vm1830_vm7, %v2395_v1 }
 0x5f5   : > { %2974 = vmatpush.msk.msra.mxu0 %vm1834_vm12, %v2482_v46 }
 0x5f8   : > { %v1828_v10 = vpop.permute.xlu0 %1827 }
 0x5f9   : > { %v2557_v37 = vpop.permute.xlu1 %2556  ;;  %v1882_v3 = vadd.f32 %v1881_v31, %v1828_v10  ;;  %v1902_v61 = vadd.f32 %v1901_v32, %v1828_v10  ;;  %v1862_v53 = vadd.f32 %v1861_v0, %v1828_v10 }
 0x5fa   : > { %2979 = vmatmul.msk.f32.vlgmr.msrb.gmra.mxu2 %vm1830_vm7, %v2557_v37  ;;  %2981 = vmatmul.msk.f32.vlgmr.msrb.gmra.mxu3 %vm1830_vm7, %v2557_v37 }
 0x5fb   : > { %v1905_v55 = vmul.f32 %v1882_v3, %v4053_v56  ;;  %v1906_v34 = vmul.f32 %v1902_v61, %v4066_v33  ;;  %2977 = vmatmul.msk.f32.vlgmr.msra.gmra.mxu1 %vm1830_vm7, %v2557_v37  ;;  %v1904_v35 = vmul.f32 %v1862_v53, %v4051_v52 }
 0x5fc   : > { %2975 = vmatmul.msk.f32.vlgmr.msra.gmra.mxu0 %vm1830_vm7, %v2476_v25 }
 0x5fd   : > { %v2657_v60 = vrot.slane %v1905_v55, 4  ;;  %2662 = vst.msk [vmem:[%s701_s26 + $0x8] sm:$0xf] %vm2661_vm0, %v1906_v34 }
 0x5ff   : > { %v2658_v5 = vsel %vm1834_vm12, %v1904_v35, %v2657_v60 }
 0x600   : > { %2660 = vst [vmem:[%s701_s26] sm:$0xff] %v2658_v5 }
 0x601   : > { %v2640_v10 = vpop.permute.xlu1 %2639 }
 0x635   : > { %v1999_v24 = vpop.f32.mrf.mxu3 }
 0x641   : > { %v1959_v12 = vpop.f32.mrf.mxu1 }
 0x642   : > { %v2028_v7 = vadd.f32 %v2027_v6, %v1959_v12 }
 0x647   : > { %v1979_v38 = vpop.f32.mrf.mxu2 }
 0x649   : > { %v2047_v23 = vpop.f32.mrf.mxu1  ;;  %v2105_v26 = vpop.f32.mrf.mxu3 }
 0x64a   : > { %v2048_v49 = vadd.f32 %v2047_v23, %v1979_v38  ;;  %v2148_v57 = vadd.f32 %v2105_v26, %v2028_v7 }
 0x650   : > { %v2067_v2 = vpop.f32.mrf.mxu2  ;;  %v2125_v40 = vpop.f32.mrf.mxu0 }
 0x651   : > { %v2145_v36 = vpop.f32.mrf.mxu1  ;;  %v2206_v45 = vpop.f32.mrf.mxu3  ;;  %v2068_v62 = vadd.f32 %v2067_v2, %v1999_v24  ;;  %v2149_v59 = vadd.f32 %v2125_v40, %v2048_v49 }
 0x653   : > { %v2150_v8 = vadd.f32 %v2145_v36, %v2068_v62  ;;  %v2230_v28 = vadd.f32 %v2206_v45, %v2149_v59 }
 0x658   : > { %v2186_v42 = vpop.f32.mrf.mxu2 }
 0x659   : > { %v2267_v19 = vpop.f32.mrf.mxu1  ;;  %v2226_v20 = vpop.f32.mrf.mxu0  ;;  %v2229_v63 = vadd.f32 %v2186_v42, %v2148_v57 }
 0x65a   : > { %v2307_v27 = vpop.f32.mrf.mxu3  ;;  %v2231_v11 = vadd.f32 %v2226_v20, %v2150_v8 }
 0x65b   : > { %v2310_v4 = vadd.f32 %v2267_v19, %v2229_v63 }
 0x65c   : > { %v2312_v17 = vadd.f32 %v2307_v27, %v2231_v11 }
 0x660   : > { %v2287_v48 = vpop.f32.mrf.mxu2 }
 0x661   : > { %v2368_v51 = vpop.f32.mrf.mxu1  ;;  %v2348_v43 = vpop.f32.mrf.mxu0  ;;  %v2311_v14 = vadd.f32 %v2287_v48, %v2230_v28 }
 0x662   : > { %v2429_v22 = vpop.f32.mrf.mxu3  ;;  %v2391_v15 = vadd.f32 %v2348_v43, %v2310_v4 }
 0x663   : > { %v2392_v30 = vadd.f32 %v2368_v51, %v2311_v14 }
 0x664   : > { %v2472_v39 = vadd.f32 %v2429_v22, %v2391_v15 }
 0x668   : > { %v2388_v54 = vpop.f32.mrf.mxu2 }
 0x669   : > { %v2393_v46 = vadd.f32 %v2388_v54, %v2312_v17 }
 0x66f   : > { %v2530_v13 = vpop.f32.mrf.mxu3 }
 0x670   : > { %v2469_v50 = vpop.f32.mrf.mxu1  ;;  %v2510_v25 = vpop.f32.mrf.mxu2 }
 0x671   : > { %v2449_v1 = vpop.f32.mrf.mxu0  ;;  %v2553_v18 = vadd.f32 %v2510_v25, %v2472_v39  ;;  %v2474_v41 = vadd.f32 %v2469_v50, %v2393_v46 }
 0x672   : > { %v2473_v44 = vadd.f32 %v2449_v1, %v2392_v30 }
 0x674   : > { %v2554_v21 = vadd.f32 %v2530_v13, %v2473_v44 }
 0x678   : > { %v2591_v58 = vpop.f32.mrf.mxu1 }
 0x679   : > { %v2550_v9 = vpop.f32.mrf.mxu0  ;;  %v2634_v47 = vadd.f32 %v2591_v58, %v2553_v18 }
 0x67a   : > { %v2555_v29 = vadd.f32 %v2550_v9, %v2474_v41 }
 0x67b   : > { %v2642_v37 = vadd.f32 %v2640_v10, %v2634_v47 }
 0x67d   : > { %v2611_v16 = vpop.f32.mrf.mxu2  ;;  %v2631_v31 = vpop.f32.mrf.mxu3  ;;  %v2645_v34 = vmul.f32 %v2642_v37, %v4051_v52 }
 0x67e   : > { %v2635_v32 = vadd.f32 %v2611_v16, %v2554_v21  ;;  %v2636_v0 = vadd.f32 %v2631_v31, %v2555_v29 }
 0x680   : > { %v2643_v3 = vadd.f32 %v2640_v10, %v2635_v32  ;;  %v2644_v61 = vadd.f32 %v2640_v10, %v2636_v0 }
 0x682   : > { %v2646_v53 = vmul.f32 %v2643_v3, %v4053_v56  ;;  %v2647_v55 = vmul.f32 %v2644_v61, %v4066_v33 }
 0x684   : > { %v2665_v60 = vrot.slane %v2646_v53, 4  ;;  %2669 = vst.msk [vmem:[%s706_s19 + $0x8] sm:$0xf] %vm2661_vm0, %v2647_v55 }
 0x686   : > { %v2666_v35 = vsel %vm1834_vm12, %v2645_v34, %v2665_v60 }
 0x687   : > { %2668 = vst [vmem:[%s706_s19] sm:$0xff] %v2666_v35 }
 0x688 PF: > { %s4511_s24 = sld [smem:[#allocation17_spill]] }
 0x68e   : > { %s33_s27 = sadd.s32 1, %s4511_s24  }
 0x68f   : > { %p30_p7 = scmp.ge.s32.totalorder %s33_s27, 4  }
 0x691   :  { %32 = sbr.rel (!%p30_p7) target bundleno = 13 (0xd), region = 167 }
 0x696   :  { %2723 = vsyncpa [#allocation3], 1 }
 0x697   :  { %2725 = vsyncpa [#allocation3 + $0x1], 1 }
 0x698   :  { %2726 = vsyncpa [#allocation5], 1 }
 0x699   :  { %2727 = vsyncpa [#allocation8], 1 }
 0x69a   :  { %2728 = vsyncpa [#allocation11], 1 }

// kernel: rfdn1_forward.25
= control target key start
LH: loop header
LB: loop body
LE: loop exit
PB: predicated region body
PF: predicated region fallthrough
CT: control target
= control target key end

     0   :  { %s1341_s27 = smov 0   ;;  %s1502_s0 = inlined_call_operand.vmem [shape: f32[2,4,9], index: 0, kind: input, shape index: {}]   ;;  %s1503_s1 = inlined_call_operand.vmem [shape: f32[1,9], index: 1, kind: input, shape index: {}]   ;;  %s1504_s2 = inlined_call_operand.vmem [shape: f32[4,36], index: 2, kind: input, shape index: {}]   ;;  %s1505_s3 = inlined_call_operand.vmem [shape: f32[4,1], index: 3, kind: input, shape index: {}]   ;;  %s1506_s4 = inlined_call_operand.vmem [shape: f32[4,36], index: 4, kind: input, shape index: {}]   ;;  %s1507_s5 = inlined_call_operand.vmem [shape: f32[4,1], index: 5, kind: input, shape index: {}]   ;;  %s1508_s6 = inlined_call_operand.vmem [shape: f32[4,36], index: 6, kind: input, shape index: {}]   ;;  %s1509_s7 = inlined_call_operand.vmem [shape: f32[4,1], index: 7, kind: input, shape index: {}]   ;;  %s1510_s8 = inlined_call_operand.vmem [shape: f32[2,4,9], index: 8, kind: output, shape index: {}]  }
   0x1 LB: > { %s1182_s28 = sadd.s32 4294967295, %s1278_s27   ;;  %p1186_p0 = scmp.ge.s32.totalorder %s1278_s27, 1  ;;  %s1278_s27 = sphi %s1341_s27, %s18_s27  }
   0x2   : > { %p261_p1 = scmp.lt.s32.totalorder %s1278_s27, 3 }
   0x4   : > { %p262_p2 = pnand %p1186_p0, %p261_p1 }
   0x5   : > { %p293_p3 = scmp.lt.s32.totalorder (!%p262_p2), %s1182_s28, 1  ;;  %s1280_s9 = smov (!%p262_p2), 124  }
   0x6   : > { %265 = sbr.rel (%p262_p2) target bundleno = 1196 (0x4ac), region = 52  ;;  %s1281_s11 = smov (!%p262_p2), 120  }
   0x7   : > { %s1282_s15 = smov (!%p262_p2), 4   ;;  %s1283_s16 = smov (!%p262_p2), 104  }
   0x8   : > { %s1284_s17 = smov (!%p262_p2), 116   ;;  %s1285_s18 = smov (!%p262_p2), 125  }
   0x9   : > { %s1286_s19 = smov (!%p262_p2), 127   ;;  %s1287_s20 = smov (!%p262_p2), 126  }
   0xa   : > { %s1288_s21 = smov (!%p262_p2), 122   ;;  %s1289_s22 = smov (!%p262_p2), 112  }
   0xb   : > { %v303_v0 = vld [vmem:[%s1504_s2] sm:$0xf]  ;;  %s1512_s28 = smov (!%p293_p3, %s1182_s28), 1  ;;  %vm309_vm0 = vcmask 31744   ;;  %vm311_vm1 = vcmask 105472   ;;  %vm321_vm2 = vcmask 1043456  }
   0xc   : > { %314 = vrot.lane.b32.xlu2 %v303_v0, %s1280_s9  ;;  %s1187_s10 = sshll.u32 %s1512_s28, 2  ;;  %368 = vrot.lane.b32.xlu1 %v303_v0, %s1281_s11  ;;  %s1290_s23 = smov 100   ;;  %v304_v12 = vld [vmem:[%s1505_s3] sm:$0xf]  ;;  %v1295_v13 = vmov 0   ;;  %vm1127_vm3 = vcmask 68608  }
   0xd   : > { %s296_s14 = scalar_lea.vmem %s1502_s0, %s1187_s10  ;;  %s1291_s24 = smov 121   ;;  %1269 = vset.pattern.permute.xlu2 %v1295_v13  ;;  %1270 = vset.pattern.permute.xlu0 %v1295_v13  ;;  %v582_v23 = vld [vmem:[%s1506_s4] sm:$0xf] }
   0xe   : > { %v302_v1 = vld [vmem:[%s296_s14] sm:$0xf]  ;;  %s1292_s25 = smov 108   ;;  %s1293_s26 = smov 123  }
   0xf   : > { %306 = vrot.lane.b32.xlu0 %v302_v1, %s1282_s15  ;;  %s1294_s29 = smov 96   ;;  %v1409_v42 = vld [vmem:[%s1503_s1] ss:$0 sm:$0xff] }
  0x10   : > { %v583_v49 = vld [vmem:[%s1507_s5] sm:$0xf] }
  0x14   : > { %484 = vrot.lane.b32.xlu2 %v303_v0, %s1283_s16 }
  0x17   : > { %397 = vrot.lane.b32.xlu0 %v303_v0, %s1284_s17 }
  0x66   : > { %v315_v5 = vpop.permute.xlu2 %314 }
  0x6e   : > { %v485_v6 = vpop.permute.xlu2 %484 }
  0x7e   : > { %v369_v9 = vpop.permute.xlu1 %368 }
  0x81   : > { %v307_v2 = vpop.permute.xlu0 %306 }
  0x82   : > { %v310_v3 = vsel %vm309_vm0, 0.0, %v307_v2 }
  0x83   : > { %v312_v4 = vsel %vm311_vm1, %v310_v3, 0.0  ;;  %v855_v3 = vld [vmem:[%s1508_s6] sm:$0xf] }
  0x84   : > { %399 = vrot.lane.b32.xlu2 %v312_v4, %s1285_s18  ;;  %317 = vrot.lane.b32.xlu1 %v312_v4, %s1286_s19 }
  0x85   : > { %370 = vrot.lane.b32.xlu0 %v312_v4, %s1287_s20  ;;  %1191 = vmatpush.msk.msra.mxu1 %vm321_vm2, %v312_v4 }
  0x86   : > { %1192 = vmatmul.msk.f32.vlgmr.msra.gmra.mxu1 %vm309_vm0, %v303_v0 }
  0x89   : > { %v398_v8 = vpop.permute.xlu0 %397 }
  0x8c   : > { %486 = vrot.lane.b32.xlu1 %v312_v4, %s1288_s21  ;;  %426 = vrot.lane.b32.xlu2 %v303_v0, %s1289_s22 }
  0x8d   : > { %513 = vrot.lane.b32.xlu0 %v303_v0, %s1290_s23 }
  0x94   : > { %515 = vrot.lane.b32.xlu1 %v312_v4, %s1291_s24  ;;  %455 = vrot.lane.b32.xlu2 %v303_v0, %s1292_s25 }
  0x95   : > { %428 = vrot.lane.b32.xlu0 %v312_v4, %s1280_s9 }
  0x9c   : > { %457 = vrot.lane.b32.xlu1 %v312_v4, %s1293_s26  ;;  %573 = vperm.xlu2 %1269, %v304_v12  }
  0x9d   : > { %544 = vrot.lane.b32.xlu0 %v312_v4, %s1281_s11 }
  0xa4   : > { %542 = vrot.lane.b32.xlu1 %v303_v0, %s1294_s29  ;;  %644 = vrot.lane.b32.xlu2 %v582_v23, %s1281_s11 }
  0xac   : > { %591 = vrot.lane.b32.xlu1 %v582_v23, %s1280_s9 }
  0xb4   : > { %760 = vrot.lane.b32.xlu1 %v582_v23, %s1283_s16 }
  0xde   : > { %v400_v7 = vpop.permute.xlu2 %399 }
  0xdf   : > { %1195 = vmatpush.msk.msra.mxu3 %vm321_vm2, %v400_v7 }
  0xe0   : > { %1196 = vmatmul.msk.f32.vlgmr.msra.gmra.mxu3 %vm309_vm0, %v398_v8 }
  0xe6   : > { %v427_v16 = vpop.permute.xlu2 %426 }
  0xee   : > { %v456_v19 = vpop.permute.xlu2 %455 }
  0xf6   : > { %v318_v10 = vpop.permute.xlu1 %317  ;;  %v574_v40 = vpop.permute.xlu2 %573 }
  0xf7   : > { %v371_v11 = vpop.permute.xlu0 %370  ;;  %1189 = vmatpush.msk.msra.mxu0 %vm321_vm2, %v318_v10 }
  0xf8   : > { %1193 = vmatpush.msk.msra.mxu2 %vm321_vm2, %v371_v11  ;;  %1190 = vmatmul.msk.f32.vlgmr.msra.gmra.mxu0 %vm309_vm0, %v315_v5 }
  0xf9   : > { %1194 = vmatmul.msk.f32.vlgmr.msra.gmra.mxu2 %vm309_vm0, %v369_v9 }
  0xfe   : > { %v487_v14 = vpop.permute.xlu1 %486  ;;  %v645_v50 = vpop.permute.xlu2 %644 }
  0xff   : > { %v514_v15 = vpop.permute.xlu0 %513  ;;  %1201 = vmatpush.msk.msrb.mxu2 %vm321_vm2, %v487_v14 }
 0x101   : > { %1202 = vmatmul.msk.f32.vlgmr.msrb.gmra.mxu2 %vm309_vm0, %v485_v6 }
 0x103   : > { %v365_v25 = vpop.f32.mrf.mxu1 }
 0x106   : > { %v516_v17 = vpop.permute.xlu1 %515 }
 0x107   : > { %v429_v18 = vpop.permute.xlu0 %428  ;;  %1203 = vmatpush.msk.msrb.mxu3 %vm321_vm2, %v516_v17 }
 0x108   : > { %1197 = vmatpush.msk.msrb.mxu0 %vm321_vm2, %v429_v18  ;;  %1204 = vmatmul.msk.f32.vlgmr.msrb.gmra.mxu3 %vm309_vm0, %v514_v15 }
 0x109   : > { %1198 = vmatmul.msk.f32.vlgmr.msrb.gmra.mxu0 %vm309_vm0, %v427_v16 }
 0x10e   : > { %v458_v20 = vpop.permute.xlu1 %457 }
 0x10f   : > { %v545_v21 = vpop.permute.xlu0 %544  ;;  %1199 = vmatpush.msk.msrb.mxu1 %vm321_vm2, %v458_v20 }
 0x110   : > { %1205 = vmatpush.msk.msra.mxu0 %vm321_vm2, %v545_v21  ;;  %1200 = vmatmul.msk.f32.vlgmr.msrb.gmra.mxu1 %vm309_vm0, %v456_v19 }
 0x116   : > { %v543_v22 = vpop.permute.xlu1 %542 }
 0x117   : > { %1206 = vmatmul.msk.f32.vlgmr.msra.gmra.mxu0 %vm309_vm0, %v543_v22 }
 0x11e   : > { %v592_v53 = vpop.permute.xlu1 %591 }
 0x126   : > { %v761_v55 = vpop.permute.xlu1 %760 }
 0x163   : > { %v422_v29 = vpop.f32.mrf.mxu3 }
 0x175   : > { %v341_v24 = vpop.f32.mrf.mxu0 }
 0x176   : > { %v366_v27 = vadd.f32 %v365_v25, %v341_v24 }
 0x17c   : > { %v393_v26 = vpop.f32.mrf.mxu2 }
 0x17d   : > { %v396_v28 = vadd.f32 %v393_v26, %v366_v27  ;;  %v856_v27 = vld [vmem:[%s1509_s7] sm:$0xf] }
 0x17f   : > { %v425_v31 = vadd.f32 %v422_v29, %v396_v28 }
 0x184   : > { %v509_v35 = vpop.f32.mrf.mxu2 }
 0x186   : > { %v451_v30 = vpop.f32.mrf.mxu0 }
 0x187   : > { %v454_v32 = vadd.f32 %v451_v30, %v425_v31 }
 0x18b   : > { %v538_v37 = vpop.f32.mrf.mxu3 }
 0x18d   : > { %v480_v33 = vpop.f32.mrf.mxu1 }
 0x18e   : > { %v483_v34 = vadd.f32 %v480_v33, %v454_v32 }
 0x190   : > { %v512_v36 = vadd.f32 %v509_v35, %v483_v34 }
 0x192   : > { %v541_v38 = vadd.f32 %v538_v37, %v512_v36 }
 0x194   : > { %v567_v39 = vpop.f32.mrf.mxu0 }
 0x195   : > { %v570_v41 = vadd.f32 %v567_v39, %v541_v38 }
 0x197   : > { %v576_v43 = vadd.f32 %v574_v40, %v570_v41 }
 0x199   : > { %v577_v44 = vmax.f32 %v576_v43, 0.0 }
 0x19b   : > { %v581_v45 = vmul.f32 %v1409_v42, %v577_v44 }
 0x19d   : > { %585 = vrot.lane.b32.xlu0 %v581_v45, %s1282_s15 }
 0x1a5   : > { %731 = vrot.lane.b32.xlu0 %v582_v23, %s1292_s25 }
 0x1ad   : > { %673 = vrot.lane.b32.xlu0 %v582_v23, %s1284_s17 }
 0x20f   : > { %v586_v46 = vpop.permute.xlu0 %585 }
 0x210   : > { %v588_v47 = vsel %vm309_vm0, 0.0, %v586_v46 }
 0x211   : > { %v589_v48 = vsel %vm311_vm1, %v588_v47, 0.0 }
 0x212   : > { %733 = vrot.lane.b32.xlu2 %v589_v48, %s1293_s26  ;;  %594 = vrot.lane.b32.xlu0 %v589_v48, %s1286_s19 }
 0x213   : > { %646 = vrot.lane.b32.xlu1 %v589_v48, %s1287_s20  ;;  %1209 = vmatpush.msk.msra.mxu2 %vm321_vm2, %v589_v48 }
 0x214   : > { %1210 = vmatmul.msk.f32.vlgmr.msra.gmra.mxu2 %vm309_vm0, %v582_v23 }
 0x217   : > { %v732_v52 = vpop.permute.xlu0 %731 }
 0x21a   : > { %762 = vrot.lane.b32.xlu2 %v589_v48, %s1288_s21  ;;  %702 = vrot.lane.b32.xlu0 %v582_v23, %s1289_s22 }
 0x21b   : > { %675 = vrot.lane.b32.xlu1 %v589_v48, %s1285_s18 }
 0x21f   : > { %v674_v54 = vpop.permute.xlu0 %673 }
 0x222   : > { %704 = vrot.lane.b32.xlu2 %v589_v48, %s1280_s9  ;;  %820 = vrot.lane.b32.xlu0 %v589_v48, %s1281_s11 }
 0x223   : > { %791 = vrot.lane.b32.xlu1 %v589_v48, %s1291_s24 }
 0x22a   : > { %789 = vrot.lane.b32.xlu2 %v582_v23, %s1290_s23 }
 0x22b   : > { %818 = vrot.lane.b32.xlu1 %v582_v23, %s1294_s29 }
 0x232   : > { %849 = vperm.xlu2 %1269, %v583_v49  }
 0x233   : > { %975 = vrot.lane.b32.xlu1 %v855_v3, %s1289_s22 }
 0x23a   : > { %864 = vrot.lane.b32.xlu2 %v855_v3, %s1280_s9 }
 0x23b   : > { %917 = vrot.lane.b32.xlu1 %v855_v3, %s1281_s11 }
 0x242   : > { %1004 = vrot.lane.b32.xlu2 %v855_v3, %s1292_s25 }
 0x26c   : > { %v734_v51 = vpop.permute.xlu2 %733 }
 0x26d   : > { %1217 = vmatpush.msk.msrb.mxu2 %vm321_vm2, %v734_v51 }
 0x26e   : > { %1218 = vmatmul.msk.f32.vlgmr.msrb.gmra.mxu2 %vm309_vm0, %v732_v52 }
 0x274   : > { %v763_v56 = vpop.permute.xlu2 %762 }
 0x27c   : > { %v705_v59 = vpop.permute.xlu2 %704 }
 0x284   : > { %v595_v57 = vpop.permute.xlu0 %594  ;;  %v790_v0 = vpop.permute.xlu2 %789 }
 0x285   : > { %v647_v58 = vpop.permute.xlu1 %646  ;;  %1207 = vmatpush.msk.msra.mxu1 %vm321_vm2, %v595_v57 }
 0x286   : > { %1211 = vmatpush.msk.msra.mxu3 %vm321_vm2, %v647_v58  ;;  %1208 = vmatmul.msk.f32.vlgmr.msra.gmra.mxu1 %vm309_vm0, %v592_v53 }
 0x287   : > { %1212 = vmatmul.msk.f32.vlgmr.msra.gmra.mxu3 %vm309_vm0, %v645_v50  ;;  %1215 = vmatpush.msk.msrb.mxu1 %vm321_vm2, %v705_v59 }
 0x288   : > { %1219 = vmatpush.msk.msrb.mxu3 %vm321_vm2, %v763_v56 }
 0x28c   : > { %v703_v60 = vpop.permute.xlu0 %702  ;;  %v850_v20 = vpop.permute.xlu2 %849 }
 0x28d   : > { %v676_v61 = vpop.permute.xlu1 %675 }
 0x28e   : > { %1213 = vmatpush.msk.msrb.mxu0 %vm321_vm2, %v676_v61  ;;  %1216 = vmatmul.msk.f32.vlgmr.msrb.gmra.mxu1 %vm309_vm0, %v703_v60 }
 0x28f   : > { %1214 = vmatmul.msk.f32.vlgmr.msrb.gmra.mxu0 %vm309_vm0, %v674_v54  ;;  %1220 = vmatmul.msk.f32.vlgmr.msrb.gmra.mxu3 %vm309_vm0, %v761_v55 }
 0x294   : > { %v821_v62 = vpop.permute.xlu0 %820  ;;  %v865_v28 = vpop.permute.xlu2 %864 }
 0x295   : > { %v792_v63 = vpop.permute.xlu1 %791  ;;  %1223 = vmatpush.msk.msra.mxu1 %vm321_vm2, %v821_v62 }
 0x296   : > { %1221 = vmatpush.msk.msra.mxu0 %vm321_vm2, %v792_v63 }
 0x297   : > { %1222 = vmatmul.msk.f32.vlgmr.msra.gmra.mxu0 %vm309_vm0, %v790_v0  ;;  %v641_v4 = vpop.f32.mrf.mxu2 }
 0x29c   : > { %v1005_v30 = vpop.permute.xlu2 %1004 }
 0x29d   : > { %v819_v1 = vpop.permute.xlu1 %818 }
 0x29e   : > { %1224 = vmatmul.msk.f32.vlgmr.msra.gmra.mxu1 %vm309_vm0, %v819_v1 }
 0x2a5   : > { %v976_v29 = vpop.permute.xlu1 %975 }
 0x2ad   : > { %v918_v31 = vpop.permute.xlu1 %917 }
 0x2f1   : > { %v756_v12 = vpop.f32.mrf.mxu2 }
 0x303   : > { %v617_v2 = vpop.f32.mrf.mxu1 }
 0x304   : > { %v642_v5 = vadd.f32 %v641_v4, %v617_v2 }
 0x30a   : > { %v669_v6 = vpop.f32.mrf.mxu3 }
 0x30b   : > { %v672_v7 = vadd.f32 %v669_v6, %v642_v5  ;;  %v727_v9 = vpop.f32.mrf.mxu1 }
 0x30c   : > { %v698_v8 = vpop.f32.mrf.mxu0 }
 0x30d   : > { %v701_v10 = vadd.f32 %v698_v8, %v672_v7 }
 0x30f   : > { %v730_v11 = vadd.f32 %v727_v9, %v701_v10 }
 0x311   : > { %v759_v13 = vadd.f32 %v756_v12, %v730_v11 }
 0x312   : > { %v785_v14 = vpop.f32.mrf.mxu3 }
 0x313   : > { %v788_v15 = vadd.f32 %v785_v14, %v759_v13 }
 0x314   : > { %v814_v16 = vpop.f32.mrf.mxu0 }
 0x315   : > { %v817_v17 = vadd.f32 %v814_v16, %v788_v15 }
 0x31b   : > { %v843_v18 = vpop.f32.mrf.mxu1 }
 0x31c   : > { %v846_v19 = vadd.f32 %v843_v18, %v817_v17 }
 0x31e   : > { %v852_v21 = vadd.f32 %v850_v20, %v846_v19 }
 0x320   : > { %v853_v22 = vmax.f32 %v852_v21, 0.0 }
 0x322   : > { %v854_v23 = vmul.f32 %v1409_v42, %v853_v22 }
 0x324   : > { %858 = vrot.lane.b32.xlu0 %v854_v23, %s1282_s15 }
 0x32c   : > { %1091 = vrot.lane.b32.xlu0 %v855_v3, %s1294_s29 }
 0x396   : > { %v859_v24 = vpop.permute.xlu0 %858 }
 0x397   : > { %v861_v25 = vsel %vm309_vm0, 0.0, %v859_v24 }
 0x398   : > { %v862_v26 = vsel %vm311_vm1, %v861_v25, 0.0 }
 0x399   : > { %919 = vrot.lane.b32.xlu2 %v862_v26, %s1287_s20  ;;  %977 = vrot.lane.b32.xlu0 %v862_v26, %s1280_s9 }
 0x39a   : > { %867 = vrot.lane.b32.xlu1 %v862_v26, %s1286_s19  ;;  %1227 = vmatpush.msk.msra.mxu3 %vm321_vm2, %v862_v26 }
 0x39b   : > { %1228 = vmatmul.msk.f32.vlgmr.msra.gmra.mxu3 %vm309_vm0, %v855_v3 }
 0x39e   : > { %v1092_v33 = vpop.permute.xlu0 %1091 }
 0x3a1   : > { %1093 = vrot.lane.b32.xlu2 %v862_v26, %s1281_s11  ;;  %1006 = vrot.lane.b32.xlu0 %v862_v26, %s1293_s26 }
 0x3a2   : > { %946 = vrot.lane.b32.xlu1 %v855_v3, %s1284_s17  ;;  %s300_s17 = scalar_lea.vmem %s1510_s8, %s1187_s10 }
 0x3a9   : > { %1033 = vrot.lane.b32.xlu2 %v855_v3, %s1283_s16  ;;  %948 = vrot.lane.b32.xlu0 %v862_v26, %s1285_s18 }
 0x3aa   : > { %1035 = vrot.lane.b32.xlu1 %v862_v26, %s1288_s21 }
 0x3b1   : > { %1122 = vperm.xlu2 %1269, %v856_v27   ;;  %1064 = vrot.lane.b32.xlu0 %v862_v26, %s1291_s24 }
 0x3b2   : > { %1062 = vrot.lane.b32.xlu1 %v855_v3, %s1290_s23 }
 0x3f3   : > { %v920_v32 = vpop.permute.xlu2 %919 }
 0x3f4   : > { %1229 = vmatpush.msk.msrb.mxu0 %vm321_vm2, %v920_v32 }
 0x3f5   : > { %1230 = vmatmul.msk.f32.vlgmr.msrb.gmra.mxu0 %vm309_vm0, %v918_v31 }
 0x3fb   : > { %v1094_v36 = vpop.permute.xlu2 %1093 }
 0x403   : > { %v1034_v41 = vpop.permute.xlu2 %1033 }
 0x40b   : > { %v978_v34 = vpop.permute.xlu0 %977  ;;  %v1123_v62 = vpop.permute.xlu2 %1122 }
 0x40c   : > { %v868_v35 = vpop.permute.xlu1 %867 }
 0x40d   : > { %1225 = vmatpush.msk.msra.mxu2 %vm321_vm2, %v868_v35 }
 0x40e   : > { %1226 = vmatmul.msk.f32.vlgmr.msra.gmra.mxu2 %vm309_vm0, %v865_v28 }
 0x40f   : > { %1233 = vmatpush.msk.msrb.mxu2 %vm321_vm2, %v978_v34 }
 0x411   : > { %1241 = vmatpush.msk.msra.mxu2 %vm321_vm2, %v1094_v36 }
 0x413   : > { %v1007_v37 = vpop.permute.xlu0 %1006 }
 0x414   : > { %v947_v38 = vpop.permute.xlu1 %946  ;;  %1235 = vmatpush.msk.msrb.mxu3 %vm321_vm2, %v1007_v37 }
 0x415   : > { %1236 = vmatmul.msk.f32.vlgmr.msrb.gmra.mxu3 %vm309_vm0, %v1005_v30 }
 0x416   : > { %1234 = vmatmul.msk.f32.vlgmr.msrb.gmra.mxu2 %vm309_vm0, %v976_v29 }
 0x41b   : > { %v949_v39 = vpop.permute.xlu0 %948 }
 0x41c   : > { %v1036_v40 = vpop.permute.xlu1 %1035  ;;  %1231 = vmatpush.msk.msrb.mxu1 %vm321_vm2, %v949_v39 }
 0x41d   : > { %1237 = vmatpush.msk.msra.mxu0 %vm321_vm2, %v1036_v40  ;;  %1232 = vmatmul.msk.f32.vlgmr.msrb.gmra.mxu1 %vm309_vm0, %v947_v38 }
 0x41e   : > { %1242 = vmatmul.msk.f32.vlgmr.msra.gmra.mxu2 %vm309_vm0, %v1092_v33  ;;  %1238 = vmatmul.msk.f32.vlgmr.msra.gmra.mxu0 %vm309_vm0, %v1034_v41  ;;  %v914_v46 = vpop.f32.mrf.mxu3 }
 0x423   : > { %v1065_v43 = vpop.permute.xlu0 %1064 }
 0x424   : > { %v1063_v44 = vpop.permute.xlu1 %1062  ;;  %1239 = vmatpush.msk.msra.mxu1 %vm321_vm2, %v1065_v43 }
 0x425   : > { %1240 = vmatmul.msk.f32.vlgmr.msra.gmra.mxu1 %vm309_vm0, %v1063_v44 }
 0x472   : > { %v942_v48 = vpop.f32.mrf.mxu0 }
 0x491   : > { %v890_v45 = vpop.f32.mrf.mxu2 }
 0x492   : > { %v915_v47 = vadd.f32 %v914_v46, %v890_v45 }
 0x494   : > { %v945_v49 = vadd.f32 %v942_v48, %v915_v47 }
 0x498   : > { %v1029_v54 = vpop.f32.mrf.mxu3 }
 0x499   : > { %v1000_v50 = vpop.f32.mrf.mxu2 }
 0x49a   : > { %v971_v51 = vpop.f32.mrf.mxu1 }
 0x49b   : > { %v974_v52 = vadd.f32 %v971_v51, %v945_v49  ;;  %v1058_v55 = vpop.f32.mrf.mxu0 }
 0x49d   : > { %v1003_v53 = vadd.f32 %v1000_v50, %v974_v52 }
 0x49f   : > { %v1032_v56 = vadd.f32 %v1029_v54, %v1003_v53 }
 0x4a1   : > { %v1061_v57 = vadd.f32 %v1058_v55, %v1032_v56  ;;  %v1116_v60 = vpop.f32.mrf.mxu2 }
 0x4a2   : > { %v1087_v58 = vpop.f32.mrf.mxu1 }
 0x4a3   : > { %v1090_v59 = vadd.f32 %v1087_v58, %v1061_v57 }
 0x4a5   : > { %v1119_v61 = vadd.f32 %v1116_v60, %v1090_v59 }
 0x4a7   : > { %v1125_v63 = vadd.f32 %v1123_v62, %v1119_v61 }
 0x4a9   : > { %v1126_v0 = vmul.f32 %v1409_v42, %v1125_v63 }
 0x4ab   : > { %1128 = vst.msk [vmem:[%s300_s17] sm:$0xf] %vm1127_vm3, %v1126_v0 }
 0x4ac PF: > { %s18_s27 = sadd.s32 1, %s1278_s27  }
 0x4ad   : > { %p15_p4 = scmp.ge.s32.totalorder %s18_s27, 4  }
 0x4af   :  { %17 = sbr.rel (!%p15_p4) target bundleno = 1 (0x1), region = 82 }

// kernel: rfdn1_forward.27
= control target key start
LH: loop header
LB: loop body
LE: loop exit
PB: predicated region body
PF: predicated region fallthrough
CT: control target
= control target key end

     0   :  { %s2344_s21 = smov 0   ;;  %s3133_s0 = inlined_call_operand.vmem [shape: f32[2,16,324], index: 0, kind: input, shape index: {}]   ;;  %s3134_s1 = inlined_call_operand.vmem [shape: f32[2,16,324], index: 1, kind: input, shape index: {}]   ;;  %s3135_s2 = inlined_call_operand.vmem [shape: f32[2,16,324], index: 2, kind: input, shape index: {}]   ;;  %s3136_s3 = inlined_call_operand.vmem [shape: f32[2,16,324], index: 3, kind: input, shape index: {}]   ;;  %s3137_s4 = inlined_call_operand.vmem [shape: f32[2,16,324], index: 4, kind: input, shape index: {}]   ;;  %s3138_s5 = inlined_call_operand.vmem [shape: f32[1,324], index: 5, kind: input, shape index: {}]   ;;  %s3139_s6 = inlined_call_operand.vmem [shape: f32[16,64], index: 6, kind: input, shape index: {}]   ;;  %s3140_s7 = inlined_call_operand.vmem [shape: f32[16,1], index: 7, kind: input, shape index: {}]   ;;  %s3141_s8 = inlined_call_operand.vmem [shape: f32[16,144], index: 8, kind: input, shape index: {}]   ;;  %s3142_s9 = inlined_call_operand.vmem [shape: f32[16,1], index: 9, kind: input, shape index: {}]   ;;  %s3143_s10 = inlined_call_operand.vmem [shape: f32[48,144], index: 10, kind: input, shape index: {}]   ;;  %s3144_s11 = inlined_call_operand.vmem [shape: f32[48,1], index: 11, kind: input, shape index: {}]   ;;  %s3145_s12 = inlined_call_operand.vmem [shape: f32[2,48,324], index: 12, kind: output, shape index: {}]  }
   0x1 LB: > { %s1917_s22 = sadd.s32 4294967295, %s2264_s21   ;;  %p1921_p0 = scmp.ge.s32.totalorder %s2264_s21, 1  ;;  %s2264_s21 = sphi %s2344_s21, %s22_s21  }
   0x2   : > { %p402_p1 = scmp.lt.s32.totalorder %s2264_s21, 3 }
   0x4   : > { %p403_p2 = pnand %p1921_p0, %p402_p1 }
   0x5   : > { %s2266_s25 = smov (!%p403_p2), 112   ;;  %s2267_s26 = smov (!%p403_p2), 96  }
   0x6   : > { %406 = sbr.rel (%p403_p2) target bundleno = 1262 (0x4ee), region = 68  ;;  %p464_p3 = scmp.lt.s32.totalorder (!%p403_p2), %s1917_s22, 1 }
   0x7   : > { %s2268_s27 = smov (!%p403_p2), 80   ;;  %s2270_s16 = smov (!%p403_p2), 19  }
   0x8   : > { %s2271_s17 = smov (!%p403_p2), 91   ;;  %s2273_s19 = smov (!%p403_p2), 108  }
   0x9   : > { %s2274_s20 = smov (!%p403_p2), 109   ;;  %s2276_s24 = smov (!%p403_p2), 126  }
   0xb   : > { %v2355_v0 = vld [vmem:[%s3139_s6] sm:$0xff]  ;;  %s3149_s22 = smov (!%p464_p3, %s1917_s22), 1  ;;  %v2368_v1 = vld [vmem:[%s3139_s6 + $0x8] sm:$0xff]  ;;  %vm529_vm0 = vcmask 130048   ;;  %v2269_v29 = vmov 0   ;;  %vm913_vm7 = vcmask 154624  }
   0xc   : > { %525 = vrot.lane.b32.xlu0 %v2355_v0, %s2266_s25  ;;  %676 = vrot.lane.b32.xlu1 %v2355_v0, %s2267_s26  ;;  %s2363_s28 = smul.u32 48, %s3149_s22  ;;  %v521_v28 = vld [vmem:[%s3140_s7] sm:$0xff]  ;;  %v522_v33 = vld [vmem:[%s3140_s7 + $0x8] sm:$0xff]  ;;  %vm926_vm8 = vcmask 711680   ;;  %vm1083_vm9 = vcmask 744448   ;;  %vm1060_vm10 = vcmask 752640  }
   0xd   : > { %759 = vrot.lane.b32.xlu2 %v2355_v0, %s2268_s27  ;;  %2016 = vset.pattern.permute.xlu1 %v2269_v29  ;;  %v494_v62 = vld [vmem:[%s3138_s5] sm:$0x7]  ;;  %vm1037_vm11 = vcmask 883712   ;;  %vm1014_vm12 = vcmask 891904   ;;  %vm991_vm13 = vcmask 900096   ;;  %vm968_vm14 = vcmask 1031168  }
   0xe   : > { %s473_s15 = scalar_lea.vmem %s3134_s1, %s2363_s28  ;;  %s468_s18 = scalar_lea.vmem %s3133_s0, %s2363_s28  ;;  %2015 = vset.pattern.permute.xlu0 %v2269_v29  ;;  %2257 = vset.pattern.permute.xlu2 %v2269_v29  ;;  %vm945_vm15 = vcmask 1039360  }
   0xf   : > { %v504_v2 = vld [vmem:[%s473_s15 + $0x18] sm:$0xff]  ;;  %v505_v3 = vld [vmem:[%s473_s15 + $0x20] sm:$0xff]  ;;  %v506_v4 = vld [vmem:[%s473_s15 + $0x28] sm:$0xff]  ;;  %s2385_s23 = scalar_lea.vmem %s3135_s2, %s2363_s28  ;;  %s2711_s30 = scalar_lea.vmem %s3137_s4, %s2363_s28 }
  0x10   : > { %548 = vmatpush.msra.mxu0 %v504_v2  ;;  %571 = vmatpush.msra.mxu1 %v505_v3  ;;  %v501_v5 = vld [vmem:[%s473_s15] sm:$0xff]  ;;  %v502_v6 = vld [vmem:[%s473_s15 + $0x8] sm:$0xff]  ;;  %v503_v7 = vld [vmem:[%s473_s15 + $0x10] sm:$0xff]  ;;  %v2444_v2 = vperm.slane %v494_v62, 1 }
  0x11   : > { %594 = vmatpush.msra.mxu3 %v506_v4  ;;  %v498_v8 = vld [vmem:[%s468_s18 + $0x18] sm:$0xff]  ;;  %v499_v9 = vld [vmem:[%s468_s18 + $0x20] sm:$0xff]  ;;  %v500_v10 = vld [vmem:[%s468_s18 + $0x28] sm:$0xff] }
  0x12   : > { %549 = vmatpush.msra.mxu0 %v501_v5  ;;  %572 = vmatpush.msra.mxu1 %v502_v6  ;;  %v495_v11 = vld [vmem:[%s468_s18] sm:$0xff]  ;;  %v496_v12 = vld [vmem:[%s468_s18 + $0x8] sm:$0xff]  ;;  %v497_v13 = vld [vmem:[%s468_s18 + $0x10] sm:$0xff]  ;;  %v2446_v5 = vperm.slane %v494_v62, 0  ;;  %s2272_s18 = smov 92  }
  0x13   : > { %595 = vmatpush.msra.mxu3 %v503_v7  ;;  %v510_v14 = vld [vmem:[%s2385_s23 + $0x18] sm:$0xff]  ;;  %v507_v15 = vld [vmem:[%s2385_s23] sm:$0xff]  ;;  %v512_v20 = vld [vmem:[%s2385_s23 + $0x28] sm:$0xff] }
  0x14   : > { %527 = vrot.lane.b32.xlu0 %v2368_v1, %s2266_s25  ;;  %678 = vrot.lane.b32.xlu1 %v2368_v1, %s2267_s26  ;;  %s2393_s26 = scalar_lea.vmem %s3136_s3, %s2363_s28  ;;  %v511_v19 = vld [vmem:[%s2385_s23 + $0x20] sm:$0xff]  ;;  %v508_v22 = vld [vmem:[%s2385_s23 + $0x8] sm:$0xff]  ;;  %s2277_s25 = smov 127  }
  0x15   : > { %761 = vrot.lane.b32.xlu2 %v2368_v1, %s2268_s27  ;;  %621 = vmatpush.msrb.mxu3 %v498_v8  ;;  %v517_v16 = vld [vmem:[%s2393_s26 + $0x20] sm:$0xff]  ;;  %v516_v21 = vld [vmem:[%s2393_s26 + $0x18] sm:$0xff]  ;;  %v509_v23 = vld [vmem:[%s2385_s23 + $0x10] sm:$0xff]  ;;  %s2275_s23 = smov 110  }
  0x16   : > { %644 = vmatpush.msrb.mxu0 %v499_v9  ;;  %667 = vmatpush.msrb.mxu1 %v500_v10  ;;  %v514_v24 = vld [vmem:[%s2393_s26 + $0x8] sm:$0xff]  ;;  %v513_v25 = vld [vmem:[%s2393_s26] sm:$0xff]  ;;  %v515_v32 = vld [vmem:[%s2393_s26 + $0x10] sm:$0xff] }
  0x17   : > { %622 = vmatpush.msrb.mxu3 %v495_v11  ;;  %698 = vmatpush.msra.mxu2 %v510_v14  ;;  %v518_v31 = vld [vmem:[%s2393_s26 + $0x28] sm:$0xff]  ;;  %s2278_s26 = smov 90  }
  0x18   : > { %645 = vmatpush.msrb.mxu0 %v496_v12  ;;  %668 = vmatpush.msrb.mxu1 %v497_v13 }
  0x19   : > { %699 = vmatpush.msra.mxu2 %v507_v15 }
  0x1b   : > { %804 = vmatpush.msrb.mxu2 %v517_v16 }
  0x1c   : > { %844 = vperm.xlu1 %2016, %v521_v28   ;;  %849 = vperm.xlu0 %2015, %v522_v33  }
  0x1d   : > { %805 = vmatpush.msrb.mxu2 %v514_v24 }
  0x67   : > { %v760_v30 = vpop.permute.xlu2 %759 }
  0x6f   : > { %v762_v34 = vpop.permute.xlu2 %761 }
  0x7e   : > { %v526_v17 = vpop.permute.xlu0 %525  ;;  %v677_v18 = vpop.permute.xlu1 %676 }
  0x7f   : > { %1928 = vmatmul.msk.f32.vlgmr.msra.gmra.mxu0 %vm529_vm0, %v526_v17  ;;  %1930 = vmatmul.msk.f32.vlgmr.msra.gmra.mxu1 %vm529_vm0, %v526_v17 }
  0x80   : > { %1932 = vmatmul.msk.f32.vlgmr.msra.gmra.mxu3 %vm529_vm0, %v526_v17  ;;  %1940 = vmatmul.msk.f32.vlgmr.msra.gmra.mxu2 %vm529_vm0, %v677_v18 }
  0x81   : > { %721 = vmatpush.msra.mxu3 %v511_v19  ;;  %744 = vmatpush.msra.mxu0 %v512_v20 }
  0x82   : > { %781 = vmatpush.msra.mxu1 %v516_v21 }
  0x83   : > { %722 = vmatpush.msra.mxu3 %v508_v22  ;;  %745 = vmatpush.msra.mxu0 %v509_v23 }
  0x84   : > { %782 = vmatpush.msra.mxu1 %v513_v25 }
  0x86   : > { %v528_v26 = vpop.permute.xlu0 %527  ;;  %v679_v27 = vpop.permute.xlu1 %678 }
  0x87   : > { %1929 = vmatmul.msk.f32.gmra.mxu0 %vm529_vm0, %v528_v26  ;;  %1931 = vmatmul.msk.f32.gmra.mxu1 %vm529_vm0, %v528_v26 }
  0x88   : > { %1933 = vmatmul.msk.f32.gmra.mxu3 %vm529_vm0, %v528_v26  ;;  %1941 = vmatmul.msk.f32.gmra.mxu2 %vm529_vm0, %v679_v27 }
  0x8e   : > { %v850_v57 = vpop.permute.xlu0 %849  ;;  %v845_v60 = vpop.permute.xlu1 %844 }
  0x8f   : > { %1936 = vmatmul.msk.f32.vlgmr.msrb.gmra.mxu0 %vm529_vm0, %v2355_v0  ;;  %1938 = vmatmul.msk.f32.vlgmr.msrb.gmra.mxu1 %vm529_vm0, %v2355_v0 }
  0x90   : > { %1934 = vmatmul.msk.f32.vlgmr.msrb.gmra.mxu3 %vm529_vm0, %v2355_v0  ;;  %1948 = vmatmul.msk.f32.vlgmr.msrb.gmra.mxu2 %vm529_vm0, %v760_v30 }
  0x91   : > { %827 = vmatpush.msrb.mxu3 %v518_v31 }
  0x93   : > { %828 = vmatpush.msrb.mxu3 %v515_v32 }
  0x97   : > { %1937 = vmatmul.msk.f32.gmra.mxu0 %vm529_vm0, %v2368_v1  ;;  %1939 = vmatmul.msk.f32.gmra.mxu1 %vm529_vm0, %v2368_v1 }
  0x98   : > { %1935 = vmatmul.msk.f32.gmra.mxu3 %vm529_vm0, %v2368_v1  ;;  %1949 = vmatmul.msk.f32.gmra.mxu2 %vm529_vm0, %v762_v34 }
  0x9f   : > { %1944 = vmatmul.msk.f32.vlgmr.msra.gmra.mxu0 %vm529_vm0, %v677_v18  ;;  %1946 = vmatmul.msk.f32.vlgmr.msra.gmra.mxu1 %vm529_vm0, %v760_v30 }
  0xa0   : > { %1942 = vmatmul.msk.f32.vlgmr.msra.gmra.mxu3 %vm529_vm0, %v677_v18 }
  0xa7   : > { %1945 = vmatmul.msk.f32.gmra.mxu0 %vm529_vm0, %v679_v27  ;;  %1947 = vmatmul.msk.f32.gmra.mxu1 %vm529_vm0, %v762_v34 }
  0xa8   : > { %1943 = vmatmul.msk.f32.gmra.mxu3 %vm529_vm0, %v679_v27 }
  0xb0   : > { %1950 = vmatmul.msk.f32.vlgmr.msrb.gmra.mxu3 %vm529_vm0, %v760_v30 }
  0xb8   : > { %1951 = vmatmul.msk.f32.gmra.mxu3 %vm529_vm0, %v762_v34 }
  0xfc   : > { %v574_v35 = vpop.f32.mrf.mxu1  ;;  %v551_v38 = vpop.f32.mrf.mxu0 }
 0x103   : > { %v597_v36 = vpop.f32.mrf.mxu3  ;;  %v701_v41 = vpop.f32.mrf.mxu2 }
 0x104   : > { %v577_v37 = vpop.f32.mrf.mxu1  ;;  %v554_v42 = vpop.f32.mrf.mxu0 }
 0x10b   : > { %v600_v39 = vpop.f32.mrf.mxu3  ;;  %v704_v45 = vpop.f32.mrf.mxu2 }
 0x10c   : > { %v670_v40 = vpop.f32.mrf.mxu1  ;;  %v647_v46 = vpop.f32.mrf.mxu0 }
 0x10d   : > { %v648_v51 = vadd.f32 %v647_v46, %v574_v35  ;;  %v671_v25 = vadd.f32 %v670_v40, %v597_v36 }
 0x113   : > { %v624_v43 = vpop.f32.mrf.mxu3  ;;  %v807_v50 = vpop.f32.mrf.mxu2 }
 0x114   : > { %v673_v44 = vpop.f32.mrf.mxu1  ;;  %v650_v52 = vpop.f32.mrf.mxu0  ;;  %v625_v63 = vadd.f32 %v624_v43, %v551_v38  ;;  %v2456_v38 = vperm.slane %v494_v62, 2 }
 0x115   : > { %v651_v3 = vadd.f32 %v650_v52, %v577_v37  ;;  %v674_v26 = vadd.f32 %v673_v44, %v600_v39 }
 0x116   : > { %v753_v9 = vadd.f32 %v701_v41, %v625_v63 }
 0x11b   : > { %v627_v47 = vpop.f32.mrf.mxu3  ;;  %v810_v7 = vpop.f32.mrf.mxu2 }
 0x11c   : > { %v784_v48 = vpop.f32.mrf.mxu1  ;;  %v628_v49 = vadd.f32 %v627_v47, %v554_v42  ;;  %v747_v13 = vpop.f32.mrf.mxu0 }
 0x11d   : > { %v836_v15 = vadd.f32 %v784_v48, %v753_v9  ;;  %v755_v27 = vadd.f32 %v747_v13, %v671_v25 }
 0x11e   : > { %v756_v53 = vadd.f32 %v704_v45, %v628_v49 }
 0x11f   : > { %v852_v18 = vadd.f32 %v845_v60, %v836_v15 }
 0x121   : > { %v864_v23 = vmul.f32 0.05, %v852_v18  ;;  %vm858_vm4 = vcmp.ge.f32.partialorder %v852_v18, 0.0 }
 0x123   : > { %v724_v54 = vpop.f32.mrf.mxu3  ;;  %v870_v29 = vsel %vm858_vm4, %v852_v18, %v864_v23 }
 0x124   : > { %v754_v55 = vadd.f32 %v724_v54, %v648_v51  ;;  %v787_v56 = vpop.f32.mrf.mxu1  ;;  %v750_v24 = vpop.f32.mrf.mxu0  ;;  %v883_v33 = vmul.f32 %v2446_v5, %v870_v29 }
 0x125   : > { %v839_v58 = vadd.f32 %v787_v56, %v756_v53  ;;  %v758_v28 = vadd.f32 %v750_v24, %v674_v26 }
 0x126   : > { %v837_v59 = vadd.f32 %v807_v50, %v754_v55 }
 0x127   : > { %v855_v61 = vadd.f32 %v850_v57, %v839_v58 }
 0x128   : > { %v853_v0 = vadd.f32 %v845_v60, %v837_v59 }
 0x129   : > { %v867_v1 = vmul.f32 0.05, %v855_v61  ;;  %vm861_vm1 = vcmp.ge.f32.partialorder %v855_v61, 0.0 }
 0x12a   : > { %vm859_vm2 = vcmp.ge.f32.partialorder %v853_v0, 0.0  ;;  %v865_v4 = vmul.f32 0.05, %v853_v0 }
 0x12b   : > { %v727_v6 = vpop.f32.mrf.mxu3  ;;  %v873_v8 = vsel %vm861_vm1, %v855_v61, %v867_v1  ;;  %v894_v61 = vld [vmem:[%s3142_s9 + $0x8] sm:$0xff]  ;;  %vm2641_vm1 = vmneg %vm913_vm7 }
 0x12c   : > { %v757_v10 = vadd.f32 %v727_v6, %v651_v3  ;;  %v871_v11 = vsel %vm859_vm2, %v853_v0, %v865_v4  ;;  %v886_v12 = vmul.f32 %v2446_v5, %v873_v8  ;;  %vm1106_vm2 = vcmask 736256  }
 0x12d   : > { %v884_v14 = vmul.f32 %v2444_v2, %v871_v11 }
 0x12e   : > { %v840_v16 = vadd.f32 %v810_v7, %v757_v10  ;;  %907 = vrot.lane.b32.xlu2 %v886_v12, %s2270_s16 }
 0x12f   : > { %903 = vrot.lane.b32.xlu0 %v884_v14, %s2270_s16 }
 0x130   : > { %v856_v17 = vadd.f32 %v850_v57, %v840_v16 }
 0x132   : > { %vm862_vm3 = vcmp.ge.f32.partialorder %v856_v17, 0.0  ;;  %v868_v19 = vmul.f32 0.05, %v856_v17 }
 0x133   : > { %v830_v20 = vpop.f32.mrf.mxu3 }
 0x134   : > { %v874_v21 = vsel %vm862_vm3, %v856_v17, %v868_v19  ;;  %v838_v31 = vadd.f32 %v830_v20, %v755_v27 }
 0x135   : > { %v887_v22 = vmul.f32 %v2444_v2, %v874_v21 }
 0x136   : > { %v854_v35 = vadd.f32 %v845_v60, %v838_v31  ;;  %v893_v60 = vld [vmem:[%s3142_s9] sm:$0xff] }
 0x137   : > { %909 = vrot.lane.b32.xlu2 %v887_v22, %s2270_s16 }
 0x138   : > { %v866_v39 = vmul.f32 0.05, %v854_v35  ;;  %vm860_vm6 = vcmp.ge.f32.partialorder %v854_v35, 0.0 }
 0x13a   : > { %v872_v40 = vsel %vm860_vm6, %v854_v35, %v866_v39 }
 0x13b   : > { %v833_v30 = vpop.f32.mrf.mxu3  ;;  %v885_v42 = vmul.f32 %v2456_v38, %v872_v40 }
 0x13c   : > { %v841_v32 = vadd.f32 %v833_v30, %v758_v28 }
 0x13e   : > { %v857_v34 = vadd.f32 %v850_v57, %v841_v32 }
 0x13f   : > { %901 = vrot.lane.b32.xlu2 %v883_v33, %s2270_s16 }
 0x140   : > { %vm863_vm5 = vcmp.ge.f32.partialorder %v857_v34, 0.0  ;;  %v869_v37 = vmul.f32 0.05, %v857_v34 }
 0x142   : > { %v875_v41 = vsel %vm863_vm5, %v857_v34, %v869_v37 }
 0x143   : > { %v888_v36 = vmul.f32 %v2456_v38, %v875_v41 }
 0x145   : > { %911 = vrot.lane.b32.xlu1 %v888_v36, %s2270_s16 }
 0x14d   : > { %905 = vrot.lane.b32.xlu1 %v885_v42, %s2270_s16 }
 0x188   : > { %v2462_v43 = vpop.permute.xlu2 %907 }
 0x189   : > { %v925_v46 = vsel %vm913_vm7, 0.0, %v2462_v43 }
 0x191   : > { %v910_v44 = vpop.permute.xlu2 %909 }
 0x192   : > { %v2478_v51 = vsel %vm913_vm7, %v2462_v43, %v910_v44 }
 0x199   : > { %v2464_v45 = vpop.permute.xlu2 %901 }
 0x19a   : > { %v924_v47 = vsel %vm913_vm7, 0.0, %v2464_v45 }
 0x19b   : > { %v2017_v48 = vpack.i.bf16 %v924_v47, %v925_v46 }
 0x19d   : > { %2018 = vrot.lane.b32.xlu1 %v2017_v48, %s2271_s17 }
 0x1a1   : > { %v904_v54 = vpop.permute.xlu0 %903 }
 0x1a2   : > { %v2489_v57 = vsel %vm913_vm7, %v2464_v45, %v904_v54 }
 0x1a5   : > { %2023 = vrot.lane.b32.xlu1 %v2017_v48, %s2272_s18 }
 0x1ad   : > { %2028 = vrot.lane.b32.xlu1 %v2017_v48, %s2273_s19 }
 0x1b7   : > { %v912_v49 = vpop.permute.xlu1 %911 }
 0x1b8   : > { %v2474_v50 = vsel %vm913_vm7, %v910_v44, %v912_v49 }
 0x1b9   : > { %v928_v52 = vsel %vm926_vm8, %v2474_v50, 0.0 }
 0x1ba   : > { %v2087_v53 = vpack.i.bf16 %v928_v52, %v2478_v51 }
 0x1bc   : > { %2088 = vrot.lane.b32.xlu2 %v2087_v53, %s2272_s18 }
 0x1bf   : > { %v906_v55 = vpop.permute.xlu1 %905 }
 0x1c0   : > { %v2485_v56 = vsel %vm913_vm7, %v904_v54, %v906_v55 }
 0x1c1   : > { %v927_v58 = vsel %vm926_vm8, %v2485_v56, 0.0 }
 0x1c2   : > { %v2037_v59 = vpack.i.bf16 %v927_v58, %v2489_v57 }
 0x1c4   : > { %2093 = vrot.lane.b32.xlu2 %v2087_v53, %s2273_s19  ;;  %2038 = vrot.lane.b32.xlu0 %v2037_v59, %s2272_s18 }
 0x1c5   : > { %2033 = vrot.lane.b32.xlu1 %v2037_v59, %s2271_s17 }
 0x1cc   : > { %2098 = vrot.lane.b32.xlu2 %v2087_v53, %s2274_s20  ;;  %2043 = vrot.lane.b32.xlu0 %v2037_v59, %s2273_s19 }
 0x1cd   : > { %2063 = vrot.lane.b32.xlu1 %v2017_v48, %s2274_s20 }
 0x1d4   : > { %2103 = vrot.lane.b32.xlu2 %v2087_v53, %s2275_s23  ;;  %2048 = vrot.lane.b32.xlu0 %v2037_v59, %s2274_s20 }
 0x1d5   : > { %2073 = vrot.lane.b32.xlu1 %v2017_v48, %s2275_s23 }
 0x1dc   : > { %2108 = vrot.lane.b32.xlu2 %v2087_v53, %s2276_s24  ;;  %2053 = vrot.lane.b32.xlu0 %v2087_v53, %s2271_s17 }
 0x1dd   : > { %2083 = vrot.lane.b32.xlu1 %v2017_v48, %s2276_s24 }
 0x1e4   : > { %2113 = vrot.lane.b32.xlu2 %v2087_v53, %s2277_s25  ;;  %2058 = vrot.lane.b32.xlu0 %v2037_v59, %s2275_s23 }
 0x1e5   : > { %2128 = vrot.lane.b32.xlu1 %v2037_v59, %s2278_s26 }
 0x1ec   : > { %2118 = vrot.lane.b32.xlu2 %v2017_v48, %s2277_s25  ;;  %2068 = vrot.lane.b32.xlu0 %v2037_v59, %s2276_s24 }
 0x1ed   : > { %1119 = vperm.xlu1 %2016, %v893_v60  }
 0x1f4   : > { %2133 = vrot.lane.b32.xlu2 %v2017_v48, %s2278_s26  ;;  %2078 = vrot.lane.b32.xlu0 %v2037_v59, %s2277_s25 }
 0x1fc   : > { %2123 = vrot.lane.b32.xlu0 %v2087_v53, %s2278_s26 }
 0x204   : > { %1124 = vperm.xlu0 %2015, %v894_v61  }
 0x20f   : > { %v2019_v62 = vpop.permute.xlu1 %2018 }
 0x210   : > { %v2020_v13 = vunpack.i.l.bf16 %v2019_v62  ;;  %v2021_v21 = vunpack.i.h.bf16 %v2019_v62 }
 0x216   : > { %v2520_v63 = vpop.permute.xlu2 %2088 }
 0x217   : > { %v2024_v0 = vpop.permute.xlu1 %2023  ;;  %v2091_v19 = vunpack.i.h.bf16 %v2520_v63  ;;  %v2090_v20 = vunpack.i.l.bf16 %v2520_v63 }
 0x218   : > { %v2025_v22 = vunpack.i.l.bf16 %v2024_v0  ;;  %v2026_v29 = vunpack.i.h.bf16 %v2024_v0 }
 0x219   : > { %v1064_v31 = vsel %vm1060_vm10, %v2090_v20, %v2091_v19 }
 0x21a   : > { %v1063_v35 = vsel %vm1060_vm10, %v2025_v22, %v2090_v20 }
 0x21e   : > { %v2522_v1 = vpop.permute.xlu2 %2093 }
 0x21f   : > { %v2029_v4 = vpop.permute.xlu1 %2028  ;;  %v2096_v32 = vunpack.i.h.bf16 %v2522_v1  ;;  %v2095_v33 = vunpack.i.l.bf16 %v2522_v1 }
 0x220   : > { %v2030_v34 = vunpack.i.l.bf16 %v2029_v4  ;;  %v2031_v47 = vunpack.i.h.bf16 %v2029_v4 }
 0x221   : > { %v1041_v52 = vsel %vm1037_vm11, %v2095_v33, %v2096_v32 }
 0x222   : > { %v1040_v49 = vsel %vm1037_vm11, %v2030_v34, %v2095_v33 }
 0x226   : > { %v2526_v6 = vpop.permute.xlu2 %2098 }
 0x227   : > { %v2101_v44 = vunpack.i.h.bf16 %v2526_v6  ;;  %v2100_v46 = vunpack.i.l.bf16 %v2526_v6 }
 0x229   : > { %v1018_v60 = vsel %vm1014_vm12, %v2100_v46, %v2101_v44 }
 0x22e   : > { %v2532_v9 = vpop.permute.xlu2 %2103 }
 0x22f   : > { %v2106_v59 = vunpack.i.h.bf16 %v2532_v9  ;;  %v2105_v61 = vunpack.i.l.bf16 %v2532_v9 }
 0x236   : > { %v2524_v3 = vpop.permute.xlu0 %2038  ;;  %v2538_v12 = vpop.permute.xlu2 %2108 }
 0x237   : > { %v2530_v8 = vpop.permute.xlu1 %2033  ;;  %v2041_v25 = vunpack.i.h.bf16 %v2524_v3  ;;  %v2040_v26 = vunpack.i.l.bf16 %v2524_v3  ;;  %v2111_v22 = vunpack.i.h.bf16 %v2538_v12 }
 0x238   : > { %v2036_v15 = vunpack.i.h.bf16 %v2530_v8  ;;  %v2035_v16 = vunpack.i.l.bf16 %v2530_v8 }
 0x239   : > { %v1061_v40 = vsel %vm1060_vm10, %v2026_v29, %v2040_v26  ;;  %v1062_v42 = vsel %vm1060_vm10, %v2040_v26, %v2041_v25  ;;  %v995_v29 = vsel %vm991_vm13, %v2105_v61, %v2106_v59 }
 0x23a   : > { %v1084_v27 = vsel %vm1083_vm9, %v2021_v21, %v2035_v16  ;;  %v1085_v28 = vsel %vm1083_vm9, %v2035_v16, %v2036_v15 }
 0x23e   : > { %v2528_v7 = vpop.permute.xlu0 %2043  ;;  %v2570_v39 = vpop.permute.xlu2 %2113 }
 0x23f   : > { %v2536_v11 = vpop.permute.xlu1 %2063  ;;  %v2046_v41 = vunpack.i.h.bf16 %v2528_v7  ;;  %v2045_v36 = vunpack.i.l.bf16 %v2528_v7  ;;  %v1271_v7 = vld [vmem:[%s2711_s30] sm:$0xff] }
 0x240   : > { %v2065_v48 = vunpack.i.l.bf16 %v2536_v11  ;;  %v2066_v62 = vunpack.i.h.bf16 %v2536_v11 }
 0x241   : > { %v1038_v55 = vsel %vm1037_vm11, %v2031_v47, %v2045_v36  ;;  %v1039_v58 = vsel %vm1037_vm11, %v2045_v36, %v2046_v41 }
 0x242   : > { %v1017_v4 = vsel %vm1014_vm12, %v2065_v48, %v2100_v46 }
 0x246   : > { %v2534_v10 = vpop.permute.xlu0 %2048  ;;  %v2119_v26 = vpop.permute.xlu2 %2118 }
 0x247   : > { %v2558_v30 = vpop.permute.xlu1 %2073  ;;  %v2051_v53 = vunpack.i.h.bf16 %v2534_v10  ;;  %v2050_v54 = vunpack.i.l.bf16 %v2534_v10 }
 0x248   : > { %v2075_v0 = vunpack.i.l.bf16 %v2558_v30 }
 0x249   : > { %v1015_v21 = vsel %vm1014_vm12, %v2066_v62, %v2050_v54  ;;  %v1016_v11 = vsel %vm1014_vm12, %v2050_v54, %v2051_v53 }
 0x24e   : > { %v2540_v14 = vpop.permute.xlu0 %2053  ;;  %v2134_v62 = vpop.permute.xlu2 %2133 }
 0x24f   : > { %v2056_v17 = vunpack.i.h.bf16 %v2540_v14  ;;  %v2055_v18 = vunpack.i.l.bf16 %v2540_v14 }
 0x251   : > { %v1086_v23 = vsel %vm1083_vm9, %v2020_v13, %v2055_v18  ;;  %v1087_v24 = vsel %vm1083_vm9, %v2055_v18, %v2056_v17  ;;  %v2084_v13 = vpop.permute.xlu1 %2083 }
 0x252   : > { %1133 = vmatpush.msrb.mxu0 %v1086_v23  ;;  %1179 = vmatpush.msra.mxu2 %v1087_v24  ;;  %v2110_v23 = vunpack.i.l.bf16 %v2538_v12  ;;  %v2076_v24 = vunpack.i.h.bf16 %v2558_v30  ;;  %v2086_v46 = vunpack.i.h.bf16 %v2084_v13 }
 0x254   : > { %1134 = vmatpush.msrb.mxu0 %v1084_v27  ;;  %1180 = vmatpush.msra.mxu2 %v1085_v28  ;;  %v2085_v27 = vunpack.i.l.bf16 %v2084_v13  ;;  %v994_v28 = vsel %vm991_vm13, %v2075_v0, %v2105_v61  ;;  %v972_v36 = vsel %vm968_vm14, %v2110_v23, %v2111_v22 }
 0x256   : > { %v2566_v37 = vpop.permute.xlu0 %2058  ;;  %1135 = vmatpush.msrb.mxu0 %v1063_v35  ;;  %1181 = vmatpush.msra.mxu2 %v1064_v31  ;;  %v2116_v35 = vunpack.i.h.bf16 %v2570_v39  ;;  %v971_v47 = vsel %vm968_vm14, %v2085_v27, %v2110_v23  ;;  %v889_v23 = vld [vmem:[%s3141_s8] sm:$0xff] }
 0x257   : > { %v2061_v18 = vunpack.i.h.bf16 %v2566_v37  ;;  %v2060_v20 = vunpack.i.l.bf16 %v2566_v37 }
 0x258   : > { %1136 = vmatpush.msrb.mxu0 %v1061_v40  ;;  %1182 = vmatpush.msra.mxu2 %v1062_v42  ;;  %v2115_v40 = vunpack.i.l.bf16 %v2570_v39  ;;  %v2120_v42 = vunpack.i.l.bf16 %v2119_v26 }
 0x259   : > { %v992_v34 = vsel %vm991_vm13, %v2076_v24, %v2060_v20  ;;  %v993_v30 = vsel %vm991_vm13, %v2060_v20, %v2061_v18  ;;  %v2129_v20 = vpop.permute.xlu1 %2128 }
 0x25a   : > { %1137 = vmatpush.msrb.mxu0 %v1040_v49  ;;  %1183 = vmatpush.msra.mxu2 %v1041_v52  ;;  %v949_v61 = vsel %vm945_vm15, %v2115_v40, %v2116_v35  ;;  %v2131_v24 = vunpack.i.h.bf16 %v2129_v20 }
 0x25c   : > { %1138 = vmatpush.msrb.mxu0 %v1038_v55  ;;  %1184 = vmatpush.msra.mxu2 %v1039_v58  ;;  %v2121_v58 = vunpack.i.h.bf16 %v2119_v26  ;;  %v2130_v26 = vunpack.i.l.bf16 %v2129_v20 }
 0x25e   : > { %v2597_v16 = vpop.permute.xlu0 %2068  ;;  %1139 = vmatpush.msrb.mxu0 %v1017_v4  ;;  %1185 = vmatpush.msra.mxu2 %v1018_v60  ;;  %v948_v60 = vsel %vm945_vm15, %v2120_v42, %v2115_v40 }
 0x25f   : > { %v2071_v31 = vunpack.i.h.bf16 %v2597_v16  ;;  %v2070_v33 = vunpack.i.l.bf16 %v2597_v16 }
 0x260   : > { %1140 = vmatpush.msrb.mxu0 %v1015_v21  ;;  %1186 = vmatpush.msra.mxu2 %v1016_v11  ;;  %v2135_v21 = vunpack.i.l.bf16 %v2134_v62 }
 0x261   : > { %v969_v54 = vsel %vm968_vm14, %v2086_v46, %v2070_v33  ;;  %v970_v55 = vsel %vm968_vm14, %v2070_v33, %v2071_v31  ;;  %v890_v33 = vld [vmem:[%s3141_s8 + $0x8] sm:$0xff]  ;;  %v1120_v1 = vpop.permute.xlu1 %1119 }
 0x262   : > { %1141 = vmatpush.msrb.mxu0 %v994_v28  ;;  %1187 = vmatpush.msra.mxu2 %v995_v29  ;;  %v2136_v29 = vunpack.i.h.bf16 %v2134_v62 }
 0x264   : > { %1142 = vmatpush.msrb.mxu0 %v992_v34  ;;  %1188 = vmatpush.msra.mxu2 %v993_v30  ;;  %v1107_v34 = vsel %vm1106_vm2, %v2136_v29, %v2130_v26  ;;  %v892_v30 = vld [vmem:[%s3141_s8 + $0x18] sm:$0xff] }
 0x266   : > { %v2624_v48 = vpop.permute.xlu0 %2078  ;;  %1143 = vmatpush.msrb.mxu0 %v971_v47  ;;  %1189 = vmatpush.msra.mxu2 %v972_v36 }
 0x267   : > { %v2081_v49 = vunpack.i.h.bf16 %v2624_v48  ;;  %v2080_v52 = vunpack.i.l.bf16 %v2624_v48  ;;  %v1273_v48 = vld [vmem:[%s2711_s30 + $0x10] sm:$0xff] }
 0x268   : > { %1144 = vmatpush.msrb.mxu0 %v969_v54  ;;  %1190 = vmatpush.msra.mxu2 %v970_v55 }
 0x269   : > { %v946_v0 = vsel %vm945_vm15, %v2121_v58, %v2080_v52  ;;  %v947_v4 = vsel %vm945_vm15, %v2080_v52, %v2081_v49 }
 0x26a   : > { %1145 = vmatpush.msrb.mxu0 %v948_v60  ;;  %1191 = vmatpush.msra.mxu2 %v949_v61  ;;  %v1276_v61 = vld [vmem:[%s2711_s30 + $0x28] sm:$0xff] }
 0x26c   : > { %1146 = vmatpush.msrb.mxu0 %v946_v0  ;;  %1192 = vmatpush.msra.mxu2 %v947_v4 }
 0x26e   : > { %v2124_v11 = vpop.permute.xlu0 %2123  ;;  %1953 = vmatpush.msk.msrb.mxu0 %vm2641_vm1, %v2462_v43  ;;  %1193 = vmatpush.msra.mxu2 %v2478_v51 }
 0x26f   : > { %v2126_v27 = vunpack.i.h.bf16 %v2124_v11  ;;  %v2125_v28 = vunpack.i.l.bf16 %v2124_v11 }
 0x270   : > { %1955 = vmatpush.msk.msrb.mxu0 %vm2641_vm1, %v2464_v45  ;;  %1194 = vmatpush.msra.mxu2 %v2489_v57  ;;  %v1108_v45 = vsel %vm1106_vm2, %v2130_v26, %v2131_v24  ;;  %v891_v57 = vld [vmem:[%s3141_s8 + $0x10] sm:$0xff] }
 0x271   : > { %1149 = vmatmul.f32.vlgmr.msrb.gmra.mxu0 %v889_v23  ;;  %1195 = vmatmul.f32.vlgmr.msra.gmra.mxu2 %v889_v23  ;;  %v1109_v43 = vsel %vm1106_vm2, %v2135_v21, %v2125_v28  ;;  %v1110_v51 = vsel %vm1106_vm2, %v2125_v28, %v2126_v27 }
 0x272   : > { %1170 = vmatpush.msrb.mxu1 %v1109_v43  ;;  %1216 = vmatpush.msra.mxu3 %v1110_v51 }
 0x274   : > { %1171 = vmatpush.msrb.mxu1 %v1107_v34  ;;  %1217 = vmatpush.msra.mxu3 %v1108_v45 }
 0x275   : > { %1956 = vmatmul.msk.f32.vlgmr.msrb.gmra.mxu1 %vm529_vm0, %v890_v33  ;;  %1958 = vmatmul.msk.f32.vlgmr.msra.gmra.mxu3 %vm529_vm0, %v890_v33 }
 0x276   : > { %1225 = vmatpush.msra.mxu1 %v2056_v17  ;;  %1262 = vmatpush.msrb.mxu3 %v2126_v27  ;;  %v1125_v12 = vpop.permute.xlu0 %1124 }
 0x278   : > { %1226 = vmatpush.msra.mxu1 %v2036_v15  ;;  %1263 = vmatpush.msrb.mxu3 %v2131_v24 }
 0x279   : > { %1152 = vmatmul.f32.gmra.mxu0 %v891_v57  ;;  %1198 = vmatmul.f32.gmra.mxu2 %v891_v57 }
 0x27a   : > { %1227 = vmatpush.msra.mxu1 %v2091_v19  ;;  %v1274_v19 = vld [vmem:[%s2711_s30 + $0x18] sm:$0xff] }
 0x27c   : > { %1228 = vmatpush.msra.mxu1 %v2041_v25 }
 0x27d   : > { %1957 = vmatmul.msk.f32.gmra.mxu1 %vm529_vm0, %v892_v30  ;;  %1959 = vmatmul.msk.f32.gmra.mxu3 %vm529_vm0, %v892_v30 }
 0x27e   : > { %1229 = vmatpush.msra.mxu1 %v2096_v32 }
 0x280   : > { %1230 = vmatpush.msra.mxu1 %v2046_v41 }
 0x282   : > { %1231 = vmatpush.msra.mxu1 %v2101_v44 }
 0x284   : > { %1232 = vmatpush.msra.mxu1 %v2051_v53 }
 0x285   : > { %1962 = vmatmul.msk.f32.vlgmr.msrb.gmra.mxu3 %vm529_vm0, %v890_v33 }
 0x286   : > { %1233 = vmatpush.msra.mxu1 %v2106_v59  ;;  %v1272_v59 = vld [vmem:[%s2711_s30 + $0x8] sm:$0xff] }
 0x288   : > { %1234 = vmatpush.msra.mxu1 %v2061_v18  ;;  %v1275_v18 = vld [vmem:[%s2711_s30 + $0x20] sm:$0xff] }
 0x28a   : > { %1235 = vmatpush.msra.mxu1 %v2111_v22 }
 0x28c   : > { %1236 = vmatpush.msra.mxu1 %v2071_v31 }
 0x28d   : > { %1963 = vmatmul.msk.f32.gmra.mxu3 %vm529_vm0, %v892_v30 }
 0x28e   : > { %1237 = vmatpush.msra.mxu1 %v2116_v35 }
 0x290   : > { %1238 = vmatpush.msra.mxu1 %v2081_v49 }
 0x292   : > { %1960 = vmatpush.msk.msra.mxu1 %vm926_vm8, %v2474_v50 }
 0x294   : > { %1961 = vmatpush.msk.msra.mxu1 %vm926_vm8, %v2485_v56 }
 0x295   : > { %1241 = vmatmul.f32.vlgmr.msra.gmra.mxu1 %v889_v23 }
 0x29d   : > { %1244 = vmatmul.f32.gmra.mxu1 %v891_v57 }
 0x2ee   : > { %v1150_v63 = vpop.f32.mrf.mxu0 }
 0x2ef   : > { %v1151_v3 = vadd.f32 %v1150_v63, %v1120_v1 }
 0x2f2   : > { %v1173_v6 = vpop.f32.mrf.mxu1 }
 0x2f3   : > { %v1174_v8 = vadd.f32 %v1173_v6, %v1151_v3  ;;  %v1305_v3 = vld [vmem:[%s3144_s11 + $0x20] sm:$0xff]  ;;  %v1303_v6 = vld [vmem:[%s3144_s11 + $0x10] sm:$0xff] }
 0x2f4   : > { %v1196_v9 = vpop.f32.mrf.mxu2 }
 0x2f5   : > { %v1277_v50 = vadd.f32 %v1271_v7, %v1174_v8  ;;  %v1197_v37 = vadd.f32 %v1196_v9, %v1120_v1  ;;  %v1306_v7 = vld [vmem:[%s3144_s11 + $0x28] sm:$0xff] }
 0x2f6   : > { %v1153_v10 = vpop.f32.mrf.mxu0 }
 0x2f7   : > { %v1283_v56 = vmul.f32 %v1277_v50, %v2446_v5  ;;  %v1154_v15 = vadd.f32 %v1153_v10, %v1125_v12 }
 0x2f8   : > { %v1219_v14 = vpop.f32.mrf.mxu3 }
 0x2f9   : > { %1313 = vrot.lane.b32.xlu1 %v1283_v56, %s2270_s16  ;;  %v1220_v39 = vadd.f32 %v1219_v14, %v1197_v37 }
 0x2fa   : > { %v1176_v17 = vpop.f32.mrf.mxu1 }
 0x2fb   : > { %v1177_v25 = vadd.f32 %v1176_v17, %v1154_v15  ;;  %v1278_v31 = vadd.f32 %v1272_v59, %v1220_v39  ;;  %v2829_v39 = vld [vmem:[%s3143_s10 + $0x18] sm:$0xff] }
 0x2fc   : > { %v1199_v32 = vpop.f32.mrf.mxu2 }
 0x2fd   : > { %v1280_v41 = vadd.f32 %v1274_v19, %v1177_v25  ;;  %v1200_v44 = vadd.f32 %v1199_v32, %v1125_v12  ;;  %v1284_v40 = vmul.f32 %v1278_v31, %v2444_v2  ;;  %v2816_v25 = vld [vmem:[%s3143_s10 + $0x8] sm:$0xff] }
 0x2ff   : > { %v1286_v53 = vmul.f32 %v1280_v41, %v2446_v5 }
 0x300   : > { %v1222_v16 = vpop.f32.mrf.mxu3 }
 0x301   : > { %v1223_v22 = vadd.f32 %v1222_v16, %v1200_v44  ;;  %1319 = vrot.lane.b32.xlu2 %v1286_v53, %s2270_s16 }
 0x303   : > { %v1281_v35 = vadd.f32 %v1275_v18, %v1223_v22 }
 0x305   : > { %v1287_v36 = vmul.f32 %v1281_v35, %v2444_v2 }
 0x307   : > { %1321 = vrot.lane.b32.xlu0 %v1287_v36, %s2270_s16 }
 0x308   : > { %v1265_v42 = vpop.f32.mrf.mxu3 }
 0x309   : > { %1315 = vrot.lane.b32.xlu2 %v1284_v40, %s2270_s16 }
 0x310   : > { %v1268_v58 = vpop.f32.mrf.mxu3 }
 0x312   : > { %v1242_v46 = vpop.f32.mrf.mxu1 }
 0x313   : > { %v1243_v47 = vadd.f32 %v1242_v46, %v1120_v1  ;;  %v1302_v1 = vld [vmem:[%s3144_s11 + $0x8] sm:$0xff] }
 0x315   : > { %v1266_v49 = vadd.f32 %v1265_v42, %v1243_v47 }
 0x317   : > { %v1279_v52 = vadd.f32 %v1273_v48, %v1266_v49  ;;  %v2856_v48 = vld [vmem:[%s3143_s10 + $0x28] sm:$0xff] }
 0x319   : > { %v1285_v54 = vmul.f32 %v1279_v52, %v2456_v38 }
 0x31a   : > { %v1245_v55 = vpop.f32.mrf.mxu1 }
 0x31b   : > { %v1246_v60 = vadd.f32 %v1245_v55, %v1125_v12  ;;  %1317 = vrot.lane.b32.xlu1 %v1285_v54, %s2270_s16 }
 0x31d   : > { %v1269_v62 = vadd.f32 %v1268_v58, %v1246_v60 }
 0x31f   : > { %v1282_v0 = vadd.f32 %v1276_v61, %v1269_v62 }
 0x321   : > { %v1288_v4 = vmul.f32 %v1282_v0, %v2456_v38 }
 0x323   : > { %1323 = vrot.lane.b32.xlu0 %v1288_v4, %s2270_s16 }
 0x35b   : > { %v2731_v20 = vpop.permute.xlu2 %1319 }
 0x35c   : > { %v1336_v28 = vsel %vm913_vm7, 0.0, %v2731_v20 }
 0x363   : > { %v1316_v21 = vpop.permute.xlu2 %1315 }
 0x36b   : > { %v2733_v11 = vpop.permute.xlu1 %1313 }
 0x36c   : > { %v2737_v23 = vsel %vm913_vm7, %v2733_v11, %v1316_v21  ;;  %v1335_v24 = vsel %vm913_vm7, 0.0, %v2733_v11 }
 0x36d   : > { %v2147_v26 = vpack.i.bf16 %v2737_v23, %v1335_v24 }
 0x36f   : > { %2148 = vrot.lane.b32.xlu1 %v2147_v26, %s2272_s18  ;;  %2143 = vrot.lane.b32.xlu2 %v2147_v26, %s2271_s17 }
 0x370   : > { %2138 = vrot.lane.b32.xlu0 %v2147_v26, %s2278_s26 }
 0x377   : > { %2158 = vrot.lane.b32.xlu2 %v2147_v26, %s2274_s20 }
 0x378   : > { %2153 = vrot.lane.b32.xlu0 %v2147_v26, %s2273_s19 }
 0x379   : > { %v1322_v27 = vpop.permute.xlu0 %1321 }
 0x37a   : > { %v2751_v29 = vsel %vm913_vm7, %v2731_v20, %v1322_v27 }
 0x37b   : > { %v2172_v43 = vpack.i.bf16 %v2751_v29, %v1336_v28  ;;  %v2887_v28 = vld [vmem:[%s3143_s10 + $0x38] sm:$0xff] }
 0x37d   : > { %2173 = vrot.lane.b32.xlu1 %v2172_v43, %s2271_s17 }
 0x37f   : > { %2163 = vrot.lane.b32.xlu2 %v2172_v43, %s2278_s26 }
 0x380   : > { %2178 = vrot.lane.b32.xlu0 %v2172_v43, %s2272_s18 }
 0x385   : > { %2198 = vrot.lane.b32.xlu1 %v2172_v43, %s2274_s20 }
 0x387   : > { %2168 = vrot.lane.b32.xlu2 %v2147_v26, %s2275_s23 }
 0x388   : > { %2203 = vrot.lane.b32.xlu0 %v2172_v43, %s2275_s23 }
 0x38d   : > { %v1318_v51 = vpop.permute.xlu1 %1317 }
 0x38e   : > { %v2763_v33 = vsel %vm913_vm7, %v1316_v21, %v1318_v51 }
 0x38f   : > { %2183 = vrot.lane.b32.xlu2 %v2172_v43, %s2273_s19  ;;  %v1337_v57 = vsel %vm926_vm8, %v2763_v33, 0.0 }
 0x390   : > { %2208 = vrot.lane.b32.xlu0 %v2172_v43, %s2276_s24 }
 0x395   : > { %v1324_v34 = vpop.permute.xlu0 %1323 }
 0x396   : > { %v2766_v45 = vsel %vm913_vm7, %v1322_v27, %v1324_v34 }
 0x397   : > { %v1338_v30 = vsel %vm926_vm8, %v2766_v45, 0.0  ;;  %2188 = vrot.lane.b32.xlu2 %v2147_v26, %s2276_s24 }
 0x398   : > { %2213 = vrot.lane.b32.xlu0 %v2172_v43, %s2277_s25  ;;  %v2217_v63 = vpack.i.bf16 %v1337_v57, %v1338_v30 }
 0x39a   : > { %2218 = vrot.lane.b32.xlu1 %v2217_v63, %s2271_s17 }
 0x39f   : > { %2193 = vrot.lane.b32.xlu2 %v2147_v26, %s2277_s25 }
 0x3a0   : > { %2233 = vrot.lane.b32.xlu0 %v2217_v63, %s2274_s20 }
 0x3a2   : > { %2223 = vrot.lane.b32.xlu1 %v2217_v63, %s2272_s18  ;;  %s1993_s18 = smul.u32 144, %s3149_s22 }
 0x3a7   : > { %2243 = vrot.lane.b32.xlu2 %v2217_v63, %s2275_s23  ;;  %s3076_s23 = scalar_lea.vmem %s3145_s12, %s1993_s18 }
 0x3a8   : > { %2248 = vrot.lane.b32.xlu0 %v2217_v63, %s2276_s24 }
 0x3aa   : > { %2228 = vrot.lane.b32.xlu1 %v2217_v63, %s2273_s19 }
 0x3b0   : > { %1526 = vperm.xlu0 %2015, %v1302_v1  }
 0x3b2   : > { %2238 = vrot.lane.b32.xlu1 %v2217_v63, %s2278_s26 }
 0x3b8   : > { %1541 = vperm.xlu0 %2015, %v1305_v3  }
 0x3ba   : > { %2253 = vrot.lane.b32.xlu1 %v2217_v63, %s2277_s25 }
 0x3c2   : > { %1531 = vperm.xlu1 %2016, %v1303_v6  }
 0x3c9   : > { %v2795_v8 = vpop.permute.xlu2 %2143 }
 0x3ca   : > { %1546 = vperm.xlu1 %2016, %v1306_v7   ;;  %v2146_v53 = vunpack.i.h.bf16 %v2795_v8  ;;  %v2145_v59 = vunpack.i.l.bf16 %v2795_v8 }
 0x3cc   : > { %v1487_v47 = vsel %vm1083_vm9, %v2145_v59, %v2146_v53  ;;  %v2918_v59 = vld [vmem:[%s3143_s10 + $0x48] sm:$0xff] }
 0x3d1   : > { %v2797_v9 = vpop.permute.xlu2 %2158 }
 0x3d2   : > { %v2161_v24 = vunpack.i.h.bf16 %v2797_v9  ;;  %v2160_v26 = vunpack.i.l.bf16 %v2797_v9 }
 0x3d4   : > { %v1421_v1 = vsel %vm1014_vm12, %v2160_v26, %v2161_v24 }
 0x3d9   : > { %v2799_v50 = vpop.permute.xlu2 %2163 }
 0x3da   : > { %v2166_v10 = vunpack.i.h.bf16 %v2799_v50  ;;  %v2165_v56 = vunpack.i.l.bf16 %v2799_v50  ;;  %v1295_v50 = vld [vmem:[%s3143_s10 + $0x30] sm:$0xff] }
 0x3dc   : > { %v1511_v12 = vsel %vm1106_vm2, %v2165_v56, %v2166_v10 }
 0x3dd   : > { %1616 = vmatpush.msrb.mxu2 %v1511_v12 }
 0x3e1   : > { %v2818_v32 = vpop.permute.xlu1 %2148  ;;  %v2822_v37 = vpop.permute.xlu2 %2168 }
 0x3e2   : > { %v2806_v14 = vpop.permute.xlu0 %2138  ;;  %v2151_v42 = vunpack.i.h.bf16 %v2818_v32  ;;  %v2150_v46 = vunpack.i.l.bf16 %v2818_v32  ;;  %v2171_v30 = vunpack.i.h.bf16 %v2822_v37  ;;  %v2170_v63 = vunpack.i.l.bf16 %v2822_v37 }
 0x3e3   : > { %v2141_v15 = vunpack.i.h.bf16 %v2806_v14  ;;  %v2140_v17 = vunpack.i.l.bf16 %v2806_v14 }
 0x3e4   : > { %v1465_v61 = vsel %vm1060_vm10, %v2150_v46, %v2151_v42 }
 0x3e5   : > { %v1509_v19 = vsel %vm1106_vm2, %v2140_v17, %v2141_v15 }
 0x3e6   : > { %1617 = vmatpush.msrb.mxu2 %v1509_v19  ;;  %v1399_v19 = vsel %vm991_vm13, %v2170_v63, %v2171_v30 }
 0x3e7   : > { %1968 = vmatmul.msk.f32.vlgmr.msrb.gmra.mxu2 %vm529_vm0, %v2816_v25 }
 0x3e9   : > { %v2844_v35 = vpop.permute.xlu2 %2183 }
 0x3ea   : > { %v2824_v41 = vpop.permute.xlu0 %2153  ;;  %v2186_v49 = vunpack.i.h.bf16 %v2844_v35  ;;  %v2185_v52 = vunpack.i.l.bf16 %v2844_v35 }
 0x3eb   : > { %v2156_v58 = vunpack.i.h.bf16 %v2824_v41  ;;  %v2155_v60 = vunpack.i.l.bf16 %v2824_v41 }
 0x3ec   : > { %v1445_v21 = vsel %vm1037_vm11, %v2185_v52, %v2186_v49 }
 0x3ed   : > { %v1443_v27 = vsel %vm1037_vm11, %v2155_v60, %v2156_v58 }
 0x3ef   : > { %v2831_v44 = vpop.permute.xlu1 %2173  ;;  %1969 = vmatmul.msk.f32.gmra.mxu2 %vm529_vm0, %v2829_v39 }
 0x3f0   : > { %v2176_v16 = vunpack.i.h.bf16 %v2831_v44  ;;  %v2175_v18 = vunpack.i.l.bf16 %v2831_v44  ;;  %v2959_v44 = vld [vmem:[%s3143_s10] sm:$0xff] }
 0x3f1   : > { %v2889_v43 = vpop.permute.xlu2 %2188 }
 0x3f2   : > { %v2839_v22 = vpop.permute.xlu0 %2178  ;;  %v1489_v31 = vsel %vm1083_vm9, %v2175_v18, %v2176_v16  ;;  %v2191_v12 = vunpack.i.h.bf16 %v2889_v43  ;;  %v2190_v17 = vunpack.i.l.bf16 %v2889_v43  ;;  %v1297_v43 = vld [vmem:[%s3143_s10 + $0x40] sm:$0xff] }
 0x3f3   : > { %v2181_v36 = vunpack.i.h.bf16 %v2839_v22  ;;  %v2180_v40 = vunpack.i.l.bf16 %v2839_v22  ;;  %1567 = vmatpush.msra.mxu0 %v1489_v31 }
 0x3f5   : > { %1568 = vmatpush.msra.mxu0 %v1487_v47  ;;  %v1467_v54 = vsel %vm1060_vm10, %v2180_v40, %v2181_v36  ;;  %v1377_v40 = vsel %vm968_vm14, %v2190_v17, %v2191_v12 }
 0x3f7   : > { %v2863_v55 = vpop.permute.xlu1 %2198  ;;  %1569 = vmatpush.msra.mxu0 %v1467_v54  ;;  %1970 = vmatmul.msk.f32.gmra.mxu2 %vm529_vm0, %v2856_v48 }
 0x3f8   : > { %v2201_v62 = vunpack.i.h.bf16 %v2863_v55  ;;  %v2200_v0 = vunpack.i.l.bf16 %v2863_v55 }
 0x3f9   : > { %1570 = vmatpush.msra.mxu0 %v1465_v61  ;;  %v2925_v31 = vpop.permute.xlu2 %2193 }
 0x3fa   : > { %v2874_v4 = vpop.permute.xlu0 %2203  ;;  %v1423_v57 = vsel %vm1014_vm12, %v2200_v0, %v2201_v62  ;;  %v2196_v47 = vunpack.i.h.bf16 %v2925_v31  ;;  %v2195_v52 = vunpack.i.l.bf16 %v2925_v31 }
 0x3fb   : > { %1571 = vmatpush.msra.mxu0 %v1445_v21  ;;  %v2206_v51 = vunpack.i.h.bf16 %v2874_v4  ;;  %v2205_v34 = vunpack.i.l.bf16 %v2874_v4 }
 0x3fd   : > { %1572 = vmatpush.msra.mxu0 %v1443_v27  ;;  %v1401_v6 = vsel %vm991_vm13, %v2205_v34, %v2206_v51  ;;  %v1355_v27 = vsel %vm945_vm15, %v2195_v52, %v2196_v47 }
 0x3ff   : > { %1573 = vmatpush.msra.mxu0 %v1423_v57  ;;  %1971 = vmatmul.msk.f32.gmra.mxu2 %vm529_vm0, %v2887_v28  ;;  %v2948_v57 = vld [vmem:[%s3143_s10 + $0x58] sm:$0xff] }
 0x401   : > { %1574 = vmatpush.msra.mxu0 %v1421_v1  ;;  %v1301_v1 = vld [vmem:[%s3144_s11] sm:$0xff] }
 0x402   : > { %v2903_v3 = vpop.permute.xlu0 %2208  ;;  %1521 = vperm.xlu2 %2257, %v1301_v1  }
 0x403   : > { %v2211_v7 = vunpack.i.h.bf16 %v2903_v3  ;;  %v2210_v56 = vunpack.i.l.bf16 %v2903_v3  ;;  %1575 = vmatpush.msra.mxu0 %v1401_v6  ;;  %v2979_v6 = vld [vmem:[%s3143_s10 + $0x10] sm:$0xff] }
 0x405   : > { %1576 = vmatpush.msra.mxu0 %v1399_v19  ;;  %v1379_v18 = vsel %vm968_vm14, %v2210_v56, %v2211_v7 }
 0x407   : > { %1577 = vmatpush.msra.mxu0 %v1379_v18  ;;  %1972 = vmatmul.msk.f32.gmra.mxu2 %vm529_vm0, %v2918_v59 }
 0x409   : > { %1578 = vmatpush.msra.mxu0 %v1377_v40  ;;  %v2991_v40 = vld [vmem:[%s3143_s10 + $0x20] sm:$0xff] }
 0x40a   : > { %v2930_v46 = vpop.permute.xlu0 %2213 }
 0x40b   : > { %v2216_v54 = vunpack.i.h.bf16 %v2930_v46  ;;  %v2215_v60 = vunpack.i.l.bf16 %v2930_v46 }
 0x40c   : > { %v2219_v61 = vpop.permute.xlu1 %2218 }
 0x40d   : > { %v2221_v0 = vunpack.i.h.bf16 %v2219_v61  ;;  %v2220_v21 = vunpack.i.l.bf16 %v2219_v61  ;;  %v1357_v26 = vsel %vm945_vm15, %v2215_v60, %v2216_v54 }
 0x40e   : > { %1579 = vmatpush.msra.mxu0 %v1357_v26 }
 0x40f   : > { %1707 = vmatpush.msra.mxu2 %v2220_v21  ;;  %v1490_v34 = vsel %vm1083_vm9, %v2176_v16, %v2220_v21  ;;  %v1488_v63 = vsel %vm1083_vm9, %v2146_v53, %v2221_v0 }
 0x410   : > { %1580 = vmatpush.msra.mxu0 %v1355_v27  ;;  %1637 = vmatpush.msra.mxu3 %v1490_v34 }
 0x411   : > { %1708 = vmatpush.msra.mxu2 %v2221_v0 }
 0x412   : > { %1965 = vmatpush.msk.msra.mxu0 %vm2641_vm1, %v2731_v20  ;;  %1638 = vmatpush.msra.mxu3 %v1488_v63 }
 0x413   : > { %1973 = vmatmul.msk.f32.gmra.mxu2 %vm529_vm0, %v2948_v57 }
 0x414   : > { %v2224_v16 = vpop.permute.xlu1 %2223  ;;  %1967 = vmatpush.msk.msra.mxu0 %vm2641_vm1, %v2733_v11  ;;  %v2234_v11 = vpop.permute.xlu0 %2233 }
 0x415   : > { %v2226_v8 = vunpack.i.h.bf16 %v2224_v16  ;;  %v2225_v53 = vunpack.i.l.bf16 %v2224_v16  ;;  %1583 = vmatmul.f32.vlgmr.msra.gmra.mxu0 %v2959_v44  ;;  %v2235_v17 = vunpack.i.l.bf16 %v2234_v11  ;;  %v2236_v19 = vunpack.i.h.bf16 %v2234_v11 }
 0x417   : > { %1709 = vmatpush.msra.mxu2 %v2225_v53  ;;  %v1468_v20 = vsel %vm1060_vm10, %v2181_v36, %v2225_v53  ;;  %v1466_v13 = vsel %vm1060_vm10, %v2151_v42, %v2226_v8  ;;  %v2244_v42 = vpop.permute.xlu2 %2243  ;;  %v1424_v35 = vsel %vm1014_vm12, %v2201_v62, %v2235_v17 }
 0x418   : > { %1639 = vmatpush.msra.mxu3 %v1468_v20  ;;  %v2245_v52 = vunpack.i.l.bf16 %v2244_v42  ;;  %v2246_v61 = vunpack.i.h.bf16 %v2244_v42 }
 0x419   : > { %1710 = vmatpush.msra.mxu2 %v2226_v8 }
 0x41a   : > { %1640 = vmatpush.msra.mxu3 %v1466_v13  ;;  %v1402_v55 = vsel %vm991_vm13, %v2206_v51, %v2245_v52  ;;  %v1400_v9 = vsel %vm991_vm13, %v2171_v30, %v2246_v61  ;;  %v1304_v30 = vld [vmem:[%s3144_s11 + $0x18] sm:$0xff] }
 0x41b   : > { %1536 = vperm.xlu2 %2257, %v1304_v30  }
 0x41c   : > { %v2229_v22 = vpop.permute.xlu1 %2228 }
 0x41d   : > { %v2231_v36 = vunpack.i.h.bf16 %v2229_v22  ;;  %v2230_v56 = vunpack.i.l.bf16 %v2229_v22  ;;  %1586 = vmatmul.f32.gmra.mxu0 %v2979_v6 }
 0x41f   : > { %1711 = vmatpush.msra.mxu2 %v2230_v56  ;;  %v1446_v32 = vsel %vm1037_vm11, %v2186_v49, %v2230_v56  ;;  %v1444_v18 = vsel %vm1037_vm11, %v2156_v58, %v2231_v36  ;;  %v2249_v49 = vpop.permute.xlu0 %2248  ;;  %v1422_v58 = vsel %vm1014_vm12, %v2161_v24, %v2236_v19 }
 0x420   : > { %1641 = vmatpush.msra.mxu3 %v1446_v32  ;;  %v2250_v21 = vunpack.i.l.bf16 %v2249_v49  ;;  %v2251_v26 = vunpack.i.h.bf16 %v2249_v49 }
 0x421   : > { %1712 = vmatpush.msra.mxu2 %v2231_v36 }
 0x422   : > { %1642 = vmatpush.msra.mxu3 %v1444_v18 }
 0x423   : > { %1713 = vmatpush.msra.mxu2 %v2235_v17 }
 0x424   : > { %v2239_v60 = vpop.permute.xlu1 %2238  ;;  %1643 = vmatpush.msra.mxu3 %v1424_v35 }
 0x425   : > { %v2241_v0 = vunpack.i.h.bf16 %v2239_v60  ;;  %v2240_v41 = vunpack.i.l.bf16 %v2239_v60  ;;  %1589 = vmatmul.f32.gmra.mxu0 %v2991_v40  ;;  %1714 = vmatpush.msra.mxu2 %v2236_v19 }
 0x426   : > { %1644 = vmatpush.msra.mxu3 %v1422_v58 }
 0x427   : > { %1715 = vmatpush.msra.mxu2 %v2245_v52  ;;  %1756 = vmatpush.msrb.mxu0 %v2240_v41  ;;  %v1512_v62 = vsel %vm1106_vm2, %v2166_v10, %v2240_v41  ;;  %v1510_v24 = vsel %vm1106_vm2, %v2141_v15, %v2241_v0  ;;  %v1380_v10 = vsel %vm968_vm14, %v2211_v7, %v2250_v21  ;;  %v1299_v7 = vld [vmem:[%s3143_s10 + $0x50] sm:$0xff] }
 0x428   : > { %1645 = vmatpush.msra.mxu3 %v1402_v55  ;;  %1686 = vmatpush.msrb.mxu1 %v1512_v62  ;;  %v1378_v15 = vsel %vm968_vm14, %v2191_v12, %v2251_v26  ;;  %v1527_v12 = vpop.permute.xlu0 %1526 }
 0x429   : > { %1716 = vmatpush.msra.mxu2 %v2246_v61  ;;  %1757 = vmatpush.msrb.mxu0 %v2241_v0 }
 0x42a   : > { %1646 = vmatpush.msra.mxu3 %v1400_v9  ;;  %1687 = vmatpush.msrb.mxu1 %v1510_v24 }
 0x42b   : > { %1974 = vmatmul.msk.f32.vlgmr.msrb.gmra.mxu1 %vm529_vm0, %v2816_v25  ;;  %1717 = vmatpush.msra.mxu2 %v2250_v21 }
 0x42c   : > { %1990 = vmatpush.msra.mxu1 %v2240_v41  ;;  %v2254_v37 = vpop.permute.xlu1 %2253  ;;  %1647 = vmatpush.msra.mxu3 %v1380_v10 }
 0x42d   : > { %v2256_v14 = vunpack.i.h.bf16 %v2254_v37  ;;  %v2255_v4 = vunpack.i.l.bf16 %v2254_v37  ;;  %1592 = vmatmul.f32.gmra.mxu0 %v1295_v50  ;;  %1718 = vmatpush.msra.mxu2 %v2251_v26 }
 0x42e   : > { %1991 = vmatpush.msra.mxu1 %v2241_v0  ;;  %1648 = vmatpush.msra.mxu3 %v1378_v15 }
 0x42f   : > { %1719 = vmatpush.msra.mxu2 %v2255_v4  ;;  %v1358_v51 = vsel %vm945_vm15, %v2216_v54, %v2255_v4  ;;  %v1356_v3 = vsel %vm945_vm15, %v2196_v47, %v2256_v14 }
 0x430   : > { %1649 = vmatpush.msra.mxu3 %v1358_v51  ;;  %v3086_v36 = vpop.permute.xlu0 %1541 }
 0x431   : > { %1720 = vmatpush.msra.mxu2 %v2256_v14 }
 0x432   : > { %1650 = vmatpush.msra.mxu3 %v1356_v3 }
 0x433   : > { %1975 = vmatmul.msk.f32.gmra.mxu1 %vm529_vm0, %v2829_v39  ;;  %1980 = vmatpush.msk.msra.mxu2 %vm926_vm8, %v2766_v45 }
 0x434   : > { %1651 = vmatpush.msra.mxu3 %v2751_v29  ;;  %v1532_v27 = vpop.permute.xlu1 %1531 }
 0x435   : > { %1595 = vmatmul.f32.gmra.mxu0 %v1297_v43  ;;  %1981 = vmatpush.msk.msra.mxu2 %vm926_vm8, %v2763_v33 }
 0x436   : > { %1652 = vmatpush.msra.mxu3 %v2737_v23  ;;  %1723 = vmatmul.f32.vlgmr.msra.gmra.mxu2 %v2959_v44 }
 0x437   : > { %1653 = vmatmul.f32.vlgmr.msra.gmra.mxu3 %v2959_v44 }
 0x43b   : > { %1976 = vmatmul.msk.f32.gmra.mxu1 %vm529_vm0, %v2856_v48 }
 0x43c   : > { %v3090_v18 = vpop.permute.xlu1 %1546 }
 0x43d   : > { %1598 = vmatmul.f32.gmra.mxu0 %v1299_v7 }
 0x43e   : > { %1726 = vmatmul.f32.gmra.mxu2 %v2979_v6 }
 0x43f   : > { %1656 = vmatmul.f32.gmra.mxu3 %v2979_v6 }
 0x443   : > { %1977 = vmatmul.msk.f32.gmra.mxu1 %vm529_vm0, %v2887_v28 }
 0x445   : > { %1982 = vmatmul.msk.f32.vlgmr.msrb.gmra.mxu0 %vm529_vm0, %v2816_v25 }
 0x446   : > { %1729 = vmatmul.f32.gmra.mxu2 %v2991_v40 }
 0x447   : > { %1659 = vmatmul.f32.gmra.mxu3 %v2991_v40 }
 0x44b   : > { %1978 = vmatmul.msk.f32.gmra.mxu1 %vm529_vm0, %v2918_v59 }
 0x44d   : > { %1983 = vmatmul.msk.f32.gmra.mxu0 %vm529_vm0, %v2829_v39 }
 0x44e   : > { %1732 = vmatmul.f32.gmra.mxu2 %v1295_v50 }
 0x44f   : > { %1662 = vmatmul.f32.gmra.mxu3 %v1295_v50 }
 0x453   : > { %1979 = vmatmul.msk.f32.gmra.mxu1 %vm529_vm0, %v2948_v57 }
 0x455   : > { %1984 = vmatmul.msk.f32.gmra.mxu0 %vm529_vm0, %v2856_v48 }
 0x456   : > { %1735 = vmatmul.f32.gmra.mxu2 %v1297_v43 }
 0x457   : > { %1665 = vmatmul.f32.gmra.mxu3 %v1297_v43 }
 0x45b   : > { %1985 = vmatmul.msk.f32.vlgmr.msra.gmra.mxu1 %vm529_vm0, %v2887_v28 }
 0x45c   : > { %v1522_v33 = vpop.permute.xlu2 %1521 }
 0x45e   : > { %1738 = vmatmul.f32.gmra.mxu2 %v1299_v7 }
 0x45f   : > { %1668 = vmatmul.f32.gmra.mxu3 %v1299_v7 }
 0x463   : > { %1986 = vmatmul.msk.f32.gmra.mxu1 %vm529_vm0, %v2918_v59 }
 0x46a   : > { %v1619_v23 = vpop.f32.mrf.mxu2 }
 0x46b   : > { %1987 = vmatmul.msk.f32.gmra.mxu1 %vm529_vm0, %v2948_v57  ;;  %vm1797_vm0 = vcmask 556032  }
 0x472   : > { %v1622_v29 = vpop.f32.mrf.mxu2 }
 0x475   : > { %v1537_v53 = vpop.permute.xlu2 %1536 }
 0x47a   : > { %v1625_v45 = vpop.f32.mrf.mxu2 }
 0x482   : > { %v1628_v46 = vpop.f32.mrf.mxu2 }
 0x48a   : > { %v1631_v44 = vpop.f32.mrf.mxu2 }
 0x492   : > { %v1584_v25 = vpop.f32.mrf.mxu0 }
 0x493   : > { %v1585_v39 = vadd.f32 %v1584_v25, %v1522_v33 }
 0x495   : > { %v1620_v48 = vadd.f32 %v1619_v23, %v1585_v39 }
 0x496   : > { %v1634_v11 = vpop.f32.mrf.mxu2 }
 0x497   : > { %v1777_v28 = vmul.f32 %v1620_v48, %v2446_v5 }
 0x499   : > { %1795 = vst [vmem:[%s3076_s23] sm:$0xff] %v1777_v28 }
 0x49a   : > { %v1587_v59 = vpop.f32.mrf.mxu0 }
 0x49b   : > { %v1588_v31 = vadd.f32 %v1587_v59, %v1527_v12 }
 0x49d   : > { %v1623_v47 = vadd.f32 %v1622_v29, %v1588_v31 }
 0x49f   : > { %v1780_v54 = vmul.f32 %v1623_v47, %v2446_v5 }
 0x4a1   : > { %1799 = vst [vmem:[%s3076_s23 + $0x18] sm:$0xff] %v1780_v54 }
 0x4a2   : > { %v1590_v34 = vpop.f32.mrf.mxu0 }
 0x4a3   : > { %v1591_v57 = vadd.f32 %v1590_v34, %v1532_v27 }
 0x4a5   : > { %v1626_v63 = vadd.f32 %v1625_v45, %v1591_v57 }
 0x4a7   : > { %v1783_v16 = vmul.f32 %v1626_v63, %v2446_v5 }
 0x4a8   : > { %v1689_v8 = vpop.f32.mrf.mxu1 }
 0x4a9   : > { %1802 = vst [vmem:[%s3076_s23 + $0x30] sm:$0xff] %v1783_v16 }
 0x4aa   : > { %v1593_v20 = vpop.f32.mrf.mxu0 }
 0x4ab   : > { %v1594_v1 = vadd.f32 %v1593_v20, %v1537_v53 }
 0x4ad   : > { %v1629_v13 = vadd.f32 %v1628_v46, %v1594_v1 }
 0x4af   : > { %v1786_v6 = vmul.f32 %v1629_v13, %v2446_v5 }
 0x4b0   : > { %v1692_v22 = vpop.f32.mrf.mxu1 }
 0x4b1   : > { %1805 = vst [vmem:[%s3076_s23 + $0x48] sm:$0xff] %v1786_v6 }
 0x4b2   : > { %v1596_v56 = vpop.f32.mrf.mxu0 }
 0x4b3   : > { %v1597_v17 = vadd.f32 %v1596_v56, %v3086_v36 }
 0x4b5   : > { %v1632_v32 = vadd.f32 %v1631_v44, %v1597_v17 }
 0x4b7   : > { %v1789_v42 = vmul.f32 %v1632_v32, %v2446_v5 }
 0x4b8   : > { %v1695_v19 = vpop.f32.mrf.mxu1 }
 0x4b9   : > { %1808 = vst [vmem:[%s3076_s23 + $0x60] sm:$0xff] %v1789_v42  ;;  %v1724_v40 = vpop.f32.mrf.mxu2 }
 0x4ba   : > { %v1599_v52 = vpop.f32.mrf.mxu0  ;;  %v1654_v35 = vpop.f32.mrf.mxu3  ;;  %v1725_v55 = vadd.f32 %v1724_v40, %v1522_v33 }
 0x4bb   : > { %v1600_v49 = vadd.f32 %v1599_v52, %v3090_v18  ;;  %v1655_v60 = vadd.f32 %v1654_v35, %v1522_v33 }
 0x4bd   : > { %v1635_v61 = vadd.f32 %v1634_v11, %v1600_v49  ;;  %v1690_v0 = vadd.f32 %v1689_v8, %v1655_v60 }
 0x4bf   : > { %v1792_v41 = vmul.f32 %v1635_v61, %v2446_v5  ;;  %v1778_v58 = vmul.f32 %v1690_v0, %v2444_v2 }
 0x4c0   : > { %v1698_v21 = vpop.f32.mrf.mxu1 }
 0x4c1   : > { %1811 = vst [vmem:[%s3076_s23 + $0x78] sm:$0xff] %v1792_v41  ;;  %v1727_v62 = vpop.f32.mrf.mxu2 }
 0x4c2   : > { %1796 = vst [vmem:[%s3076_s23 + $0x8] sm:$0xff] %v1778_v58  ;;  %v1657_v26 = vpop.f32.mrf.mxu3  ;;  %v1759_v9 = vpop.f32.mrf.mxu0  ;;  %v1728_v4 = vadd.f32 %v1727_v62, %v1527_v12 }
 0x4c3   : > { %v1658_v24 = vadd.f32 %v1657_v26, %v1527_v12  ;;  %v1760_v50 = vadd.f32 %v1759_v9, %v1725_v55 }
 0x4c5   : > { %v1693_v10 = vadd.f32 %v1692_v22, %v1658_v24  ;;  %v1779_v37 = vmul.f32 %v1760_v50, %v2456_v38 }
 0x4c7   : > { %v1781_v14 = vmul.f32 %v1693_v10, %v2444_v2  ;;  %1798 = vst.msk [vmem:[%s3076_s23 + $0x10] sm:$0xff] %vm1797_vm0, %v1779_v37 }
 0x4c8   : > { %v1701_v5 = vpop.f32.mrf.mxu1 }
 0x4c9   : > { %1800 = vst [vmem:[%s3076_s23 + $0x20] sm:$0xff] %v1781_v14  ;;  %v1730_v15 = vpop.f32.mrf.mxu2 }
 0x4ca   : > { %v1660_v51 = vpop.f32.mrf.mxu3  ;;  %v1762_v30 = vpop.f32.mrf.mxu0  ;;  %v1731_v45 = vadd.f32 %v1730_v15, %v1532_v27 }
 0x4cb   : > { %v1661_v3 = vadd.f32 %v1660_v51, %v1532_v27  ;;  %v1763_v43 = vadd.f32 %v1762_v30, %v1728_v4 }
 0x4cd   : > { %v1696_v7 = vadd.f32 %v1695_v19, %v1661_v3  ;;  %v1782_v23 = vmul.f32 %v1763_v43, %v2456_v38 }
 0x4cf   : > { %v1784_v29 = vmul.f32 %v1696_v7, %v2444_v2  ;;  %1801 = vst.msk [vmem:[%s3076_s23 + $0x28] sm:$0xff] %vm1797_vm0, %v1782_v23 }
 0x4d0   : > { %v1704_v33 = vpop.f32.mrf.mxu1 }
 0x4d1   : > { %1803 = vst [vmem:[%s3076_s23 + $0x38] sm:$0xff] %v1784_v29  ;;  %v1733_v25 = vpop.f32.mrf.mxu2 }
 0x4d2   : > { %v1663_v39 = vpop.f32.mrf.mxu3  ;;  %v1765_v48 = vpop.f32.mrf.mxu0  ;;  %v1734_v59 = vadd.f32 %v1733_v25, %v1537_v53 }
 0x4d3   : > { %v1664_v28 = vadd.f32 %v1663_v39, %v1537_v53  ;;  %v1766_v12 = vadd.f32 %v1765_v48, %v1731_v45 }
 0x4d5   : > { %v1699_v31 = vadd.f32 %v1698_v21, %v1664_v28  ;;  %v1785_v46 = vmul.f32 %v1766_v12, %v2456_v38 }
 0x4d7   : > { %v1787_v47 = vmul.f32 %v1699_v31, %v2444_v2  ;;  %1804 = vst.msk [vmem:[%s3076_s23 + $0x40] sm:$0xff] %vm1797_vm0, %v1785_v46 }
 0x4d8   : > { %v1768_v54 = vpop.f32.mrf.mxu1 }
 0x4d9   : > { %1806 = vst [vmem:[%s3076_s23 + $0x50] sm:$0xff] %v1787_v47  ;;  %v1769_v34 = vadd.f32 %v1768_v54, %v1734_v59  ;;  %v1736_v27 = vpop.f32.mrf.mxu2 }
 0x4da   : > { %v1666_v57 = vpop.f32.mrf.mxu3  ;;  %v1737_v8 = vadd.f32 %v1736_v27, %v3086_v36 }
 0x4db   : > { %v1788_v63 = vmul.f32 %v1769_v34, %v2456_v38  ;;  %v1667_v44 = vadd.f32 %v1666_v57, %v3086_v36 }
 0x4dd   : > { %1807 = vst.msk [vmem:[%s3076_s23 + $0x58] sm:$0xff] %vm1797_vm0, %v1788_v63  ;;  %v1702_v16 = vadd.f32 %v1701_v5, %v1667_v44 }
 0x4df   : > { %v1790_v53 = vmul.f32 %v1702_v16, %v2444_v2 }
 0x4e0   : > { %v1771_v20 = vpop.f32.mrf.mxu1 }
 0x4e1   : > { %1809 = vst [vmem:[%s3076_s23 + $0x68] sm:$0xff] %v1790_v53  ;;  %v1772_v1 = vadd.f32 %v1771_v20, %v1737_v8  ;;  %v1739_v22 = vpop.f32.mrf.mxu2 }
 0x4e2   : > { %v1669_v13 = vpop.f32.mrf.mxu3  ;;  %v1740_v17 = vadd.f32 %v1739_v22, %v3090_v18 }
 0x4e3   : > { %v1791_v11 = vmul.f32 %v1772_v1, %v2456_v38  ;;  %v1670_v6 = vadd.f32 %v1669_v13, %v3090_v18 }
 0x4e5   : > { %1810 = vst.msk [vmem:[%s3076_s23 + $0x70] sm:$0xff] %vm1797_vm0, %v1791_v11  ;;  %v1705_v56 = vadd.f32 %v1704_v33, %v1670_v6 }
 0x4e7   : > { %v1793_v32 = vmul.f32 %v1705_v56, %v2444_v2 }
 0x4e8   : > { %v1774_v36 = vpop.f32.mrf.mxu1 }
 0x4e9   : > { %1812 = vst [vmem:[%s3076_s23 + $0x80] sm:$0xff] %v1793_v32  ;;  %v1775_v42 = vadd.f32 %v1774_v36, %v1740_v17 }
 0x4eb   : > { %v1794_v19 = vmul.f32 %v1775_v42, %v2456_v38 }
 0x4ed   : > { %1813 = vst.msk [vmem:[%s3076_s23 + $0x88] sm:$0xff] %vm1797_vm0, %v1794_v19 }
 0x4ee PF: > { %s22_s21 = sadd.s32 1, %s2264_s21  }
 0x4ef   : > { %p19_p4 = scmp.ge.s32.totalorder %s22_s21, 4  }
 0x4f1   :  { %21 = sbr.rel (!%p19_p4) target bundleno = 1 (0x1), region = 110 }

</bundles_post_ra>
